<compile_context>
chip_gen: v7x
topology: tpu7x:2x2x1
jax: 0.10.0
libtpu: 0.0.40
codegen_flags: <defaults>
</compile_context>

<pallas_src>
import jax
import jax.numpy as jnp
from jax.experimental import pallas as pl
from jax.experimental.pallas import tpu as pltpu

EPS = 1e-5  # nn.BatchNorm2d default eps

_VMEM_SPEC = pl.BlockSpec(memory_space=pltpu.MemorySpace.VMEM)


# ---------------------------------------------------------------------------
# Fused kernel
# ---------------------------------------------------------------------------
def _relu_bn(y, gamma, beta):
    """ReLU -> train-mode BatchNorm (biased variance, two-pass, all f32)."""
    y = jnp.maximum(y, 0.0)
    mean = jnp.mean(y, axis=0, keepdims=True)
    yc = y - mean
    var = jnp.mean(yc * yc, axis=0, keepdims=True)
    return yc * (jax.lax.rsqrt(var + EPS) * gamma) + beta


def convnet_kernel(
    xcol_ref,                                  # (N*16*16, 9) f32: im2col of padded input
    w1_ref, b1_ref, g1_ref, be1_ref,           # conv11 / bn11
    w2_ref, b2_ref, g2_ref, be2_ref,           # conv12 / bn12 (stride 2)
    w3_ref, b3_ref, g3_ref, be3_ref,           # conv21 / bn21
    w4_ref, b4_ref, g4_ref, be4_ref,           # conv22 / bn22 (stride 2)
    s2_ref, s4_ref,                            # bf16 0/1 even-w row-selection matrices
    fcw_ref, fcb_ref,                          # fc, zero-padded to 128 classes
    out_ref,                                   # (N, 10) softmax probabilities
    x1p_ref, x2p_ref, x3p_ref,                 # f32 zero-padded activation scratches
    col2_ref, col3_ref, col4_ref,              # bf16 (M, 9*Cin) im2col scratches
):
    n = out_ref.shape[0]
    nc = out_ref.shape[1]
    h1 = x1p_ref.shape[1] - 2                  # 16
    h2 = x2p_ref.shape[1] - 2                  # 8
    h3 = h2 // 2                               # 4
    c1, c2, c3 = x1p_ref.shape[-1], x2p_ref.shape[-1], x3p_ref.shape[-1]
    c4 = w4_ref.shape[-1]

    def store_padded(dst_ref, y2d, h, c):
        """Write the interior, zero only the 1-px halo (no full zero-fill)."""
        dst_ref[:, 1:h + 1, 1:h + 1, :] = y2d.reshape(n, h, h, c)
        dst_ref[:, 0:1, :, :] = jnp.zeros((n, 1, h + 2, c), jnp.float32)
        dst_ref[:, h + 1:h + 2, :, :] = jnp.zeros((n, 1, h + 2, c), jnp.float32)
        dst_ref[:, 1:h + 1, 0:1, :] = jnp.zeros((n, h, 1, c), jnp.float32)
        dst_ref[:, 1:h + 1, h + 1:h + 2, :] = jnp.zeros((n, h, 1, c), jnp.float32)

    def im2col(src_ref, col_ref, h, c, stride):
        """col[(n, oh, w), t*c:(t+1)*c] = src[n, stride*oh + ki, w + kj, :] (bf16).

        For stride 2 only the h axis is decimated here (a free major-dim
        reshape + static index); the w axis is decimated afterwards by the
        exact 0/1 selection matmul (s2/s4).
        """
        ho = h // stride
        m = n * ho * h
        for ki in range(3):
            for kj in range(3):
                xs = src_ref[:, ki:ki + h, kj:kj + h, :]            # (N, h, h, c) f32
                if stride == 2:
                    xs = xs.reshape(n, ho, 2, h, c)[:, :, 0, :, :]  # even-h rows
                t = ki * 3 + kj
                col_ref[:, t * c:(t + 1) * c] = xs.reshape(m, c).astype(jnp.bfloat16)

    # ---- conv11 (1->32): single lane-dense (M,9)x(9,32) f32 dot ----
    y = jnp.dot(xcol_ref[...], w1_ref[...], preferred_element_type=jnp.float32)
    y = _relu_bn(y + b1_ref[...], g1_ref[...], be1_ref[...])                    # (512, 32)
    store_padded(x1p_ref, y, h1, c1)

    # ---- conv12 (32->64, stride 2): one K=288 matmul at even-h rows ----
    im2col(x1p_ref, col2_ref, h1, c1, stride=2)
    y = jnp.dot(col2_ref[...], w2_ref[...], preferred_element_type=jnp.float32)  # (256, 64)
    y = jnp.dot(s2_ref[...].astype(jnp.float32), y,
                preferred_element_type=jnp.float32)                              # even-w -> (128, 64)
    y = _relu_bn(y + b2_ref[...], g2_ref[...], be2_ref[...])
    store_padded(x2p_ref, y, h2, c2)

    # ---- conv21 (64->128, stride 1): one K=576 matmul ----
    im2col(x2p_ref, col3_ref, h2, c2, stride=1)
    y = jnp.dot(col3_ref[...], w3_ref[...], preferred_element_type=jnp.float32)  # (128, 128)
    y = _relu_bn(y + b3_ref[...], g3_ref[...], be3_ref[...])
    store_padded(x3p_ref, y, h2, c3)

    # ---- conv22 (128->128, stride 2): one K=1152 matmul at even-h rows ----
    im2col(x3p_ref, col4_ref, h2, c3, stride=2)
    y = jnp.dot(col4_ref[...], w4_ref[...], preferred_element_type=jnp.float32)  # (64, 128)
    y = jnp.dot(s4_ref[...].astype(jnp.float32), y,
                preferred_element_type=jnp.float32)                              # (32, 128)
    y = _relu_bn(y + b4_ref[...], g4_ref[...], be4_ref[...])

    # ---- fused epilogue: global average pool -> fc (lane-dense) -> softmax ----
    pooled = jnp.mean(y.reshape(n, h3 * h3, c4), axis=1)                # (N, 128)
    logits = jnp.dot(pooled, fcw_ref[...],
                     preferred_element_type=jnp.float32) + fcb_ref[...]  # (N, 128)
    logits = logits[:, :nc]                                              # (N, 10)
    mx = jnp.max(logits, axis=-1, keepdims=True)
    e = jnp.exp(logits - mx)
    out_ref[...] = e / jnp.sum(e, axis=-1, keepdims=True)


# ---------------------------------------------------------------------------
# Wrapper: weight repacking + constant matrices + pallas_call
# ---------------------------------------------------------------------------
def _pack_conv_weight(w, dtype):
    """(Cout, Cin, 3, 3) torch layout -> (9*Cin, Cout); row = (ki*3+kj)*Cin + cin."""
    cin, cout = w.shape[1], w.shape[0]
    return jnp.transpose(w, (2, 3, 1, 0)).reshape(9 * cin, cout).astype(dtype)


def _even_w_select(n, oh, w):
    """(n*oh*(w//2), n*oh*w) 0/1 bf16 matrix: out(n,oh,ow) <- in(n,oh,2*ow)."""
    ow = w // 2
    r = jnp.arange(n * oh * ow)
    src = (r // (oh * ow)) * (oh * w) + ((r % (oh * ow)) // ow) * w + (r % ow) * 2
    return (src[:, None] == jnp.arange(n * oh * w)[None, :]).astype(jnp.bfloat16)


def _input_im2col(x_nchw):
    """Raw NCHW input -> (N*H*W, 9) f32 im2col (3x3, pad 1); column t = ki*3+kj."""
    n, _, h, w = x_nchw.shape
    xp = jnp.pad(x_nchw[:, 0], ((0, 0), (1, 1), (1, 1)))
    cols = [xp[:, ki:ki + h, kj:kj + w] for ki in range(3) for kj in range(3)]
    return jnp.stack(cols, axis=-1).reshape(n * h * w, 9)


@jax.jit
def convnet_forward(x_nchw, params):
    p = params
    n, _, h, _ = x_nchw.shape                      # h == 16
    h2, h3 = h // 2, h // 4
    c1 = p["conv11_w"].shape[0]                    # 32
    c2 = p["conv12_w"].shape[0]                    # 64
    c3 = p["conv21_w"].shape[0]                    # 128
    c4 = p["conv22_w"].shape[0]                    # 128
    nc = p["fc_w"].shape[0]                        # 10
    nc_pad = max(nc, 128)

    fcw = jnp.zeros((c4, nc_pad), jnp.float32).at[:, :nc].set(jnp.transpose(p["fc_w"]))
    fcb = jnp.zeros((1, nc_pad), jnp.float32).at[0, :nc].set(p["fc_b"])

    args = (
        _input_im2col(x_nchw),
        _pack_conv_weight(p["conv11_w"], jnp.float32), p["conv11_b"].reshape(1, -1),
        p["bn11_g"].reshape(1, -1), p["bn11_b"].reshape(1, -1),
        _pack_conv_weight(p["conv12_w"], jnp.bfloat16), p["conv12_b"].reshape(1, -1),
        p["bn12_g"].reshape(1, -1), p["bn12_b"].reshape(1, -1),
        _pack_conv_weight(p["conv21_w"], jnp.bfloat16), p["conv21_b"].reshape(1, -1),
        p["bn21_g"].reshape(1, -1), p["bn21_b"].reshape(1, -1),
        _pack_conv_weight(p["conv22_w"], jnp.bfloat16), p["conv22_b"].reshape(1, -1),
        p["bn22_g"].reshape(1, -1), p["bn22_b"].reshape(1, -1),
        _even_w_select(n, h2, h),                  # (128, 256) bf16, exact
        _even_w_select(n, h3, h2),                 # (32, 64) bf16, exact
        fcw, fcb,
    )

    return pl.pallas_call(
        convnet_kernel,
        out_shape=jax.ShapeDtypeStruct((n, nc), jnp.float32),
        in_specs=[_VMEM_SPEC] * len(args),
        out_specs=_VMEM_SPEC,
        scratch_shapes=[
            pltpu.VMEM((n, h + 2, h + 2, c1), jnp.float32),       # x1p  (halo scratch)
            pltpu.VMEM((n, h2 + 2, h2 + 2, c2), jnp.float32),     # x2p
            pltpu.VMEM((n, h2 + 2, h2 + 2, c3), jnp.float32),     # x3p
            pltpu.VMEM((n * h2 * h, 9 * c1), jnp.bfloat16),       # col2 (even-h, all-w)
            pltpu.VMEM((n * h2 * h2, 9 * c2), jnp.bfloat16),      # col3
            pltpu.VMEM((n * h3 * h2, 9 * c3), jnp.bfloat16),      # col4 (even-h, all-w)
        ],
        # TODO(synk): at larger batch, add a leading batch grid axis with
        # dimension_semantics=("parallel",) so v7x's two TensorCores share work.
        compiler_params=pltpu.CompilerParams(vmem_limit_bytes=32 * 1024 * 1024),
    )(*args)


# ---------------------------------------------------------------------------
# Pure-JAX f32 reference (train-mode BN) for a tolerance check
# ---------------------------------------------------------------------------
def _reference_forward(x_nchw, p):
    hp = jax.lax.Precision.HIGHEST

    def conv(x, w, b, stride):
        y = jax.lax.conv_general_dilated(
            x, w, window_strides=(stride, stride), padding=((1, 1), (1, 1)),
            dimension_numbers=("NCHW", "OIHW", "NCHW"), precision=hp)
        return y + b.reshape(1, -1, 1, 1)

    def bn(x, g, be):
        mean = jnp.mean(x, axis=(0, 2, 3), keepdims=True)
        var = jnp.mean((x - mean) ** 2, axis=(0, 2, 3), keepdims=True)
        return (x - mean) * jax.lax.rsqrt(var + EPS) * g.reshape(1, -1, 1, 1) \
               + be.reshape(1, -1, 1, 1)

    x = bn(jax.nn.relu(conv(x_nchw, p["conv11_w"], p["conv11_b"], 1)), p["bn11_g"], p["bn11_b"])
    x = bn(jax.nn.relu(conv(x, p["conv12_w"], p["conv12_b"], 2)), p["bn12_g"], p["bn12_b"])
    x = bn(jax.nn.relu(conv(x, p["conv21_w"], p["conv21_b"], 1)), p["bn21_g"], p["bn21_b"])
    x = bn(jax.nn.relu(conv(x, p["conv22_w"], p["conv22_b"], 2)), p["bn22_g"], p["bn22_b"])
    pooled = jnp.mean(x, axis=(2, 3))
    logits = jnp.dot(pooled, p["fc_w"].T, precision=hp) + p["fc_b"]
    return jax.nn.softmax(logits, axis=-1)


# ---------------------------------------------------------------------------
# Deterministic parameter init (shapes from ConvNet.__init__)
# ---------------------------------------------------------------------------
def init_params():
    key = jax.random.PRNGKey(0)
    keys = jax.random.split(key, 10)

    def conv_p(k, cout, cin):
        kw, kb = jax.random.split(k)
        scale = 1.0 / jnp.sqrt(cin * 9.0)
        return (jax.random.normal(kw, (cout, cin, 3, 3), jnp.float32) * scale,
                jax.random.normal(kb, (cout,), jnp.float32) * 0.01)

    p = {}
    p["conv11_w"], p["conv11_b"] = conv_p(keys[0], 32, 1)
    p["conv12_w"], p["conv12_b"] = conv_p(keys[1], 64, 32)
    p["conv21_w"], p["conv21_b"] = conv_p(keys[2], 128, 64)
    p["conv22_w"], p["conv22_b"] = conv_p(keys[3], 128, 128)
    for name, c in (("bn11", 32), ("bn12", 64), ("bn21", 128), ("bn22", 128)):
        p[name + "_g"] = jnp.ones((c,), jnp.float32)
        p[name + "_b"] = jnp.zeros((c,), jnp.float32)
    p["fc_w"] = jax.random.normal(keys[4], (10, 128), jnp.float32) * (1.0 / jnp.sqrt(128.0))
    p["fc_b"] = jax.random.normal(keys[5], (10,), jnp.float32) * 0.01
    return p


if __name__ == "__main__":
    # TODO(synk): BatchNorm running_mean/running_var buffer updates (a training
    # side effect) are not emitted; forward output uses train-mode batch stats.
    params = init_params()
    x = jax.random.normal(jax.random.PRNGKey(0), (2, 1, 16, 16), jnp.float32)  # NCHW

    out = jax.block_until_ready(convnet_forward(x, params))
    ref = jax.block_until_ready(jax.jit(_reference_forward)(x, params))

    assert out.shape == (2, 10)
    assert bool(jnp.all(jnp.isfinite(out)))
    assert bool(jnp.all(jnp.abs(jnp.sum(out, axis=-1) - 1.0) < 1e-4))
    # bf16 MXU operands -> documented tolerance vs. the pure-f32 reference.
    err = float(jnp.max(jnp.abs(out - ref)))
    assert err < 3e-2, f"max |pallas - reference| = {err}"
    print("KERNEL_OK")
</pallas_src>

<mosaic_0001>
module attributes {stable_mosaic.version = 11 : i64} {
  func.func @convnet_kernel(%arg0: memref<512x9xf32, #tpu.memory_space<vmem>>, %arg1: memref<9x32xf32, #tpu.memory_space<vmem>>, %arg2: memref<1x32xf32, #tpu.memory_space<vmem>>, %arg3: memref<1x32xf32, #tpu.memory_space<vmem>>, %arg4: memref<1x32xf32, #tpu.memory_space<vmem>>, %arg5: memref<288x64xbf16, #tpu.memory_space<vmem>>, %arg6: memref<1x64xf32, #tpu.memory_space<vmem>>, %arg7: memref<1x64xf32, #tpu.memory_space<vmem>>, %arg8: memref<1x64xf32, #tpu.memory_space<vmem>>, %arg9: memref<576x128xbf16, #tpu.memory_space<vmem>>, %arg10: memref<1x128xf32, #tpu.memory_space<vmem>>, %arg11: memref<1x128xf32, #tpu.memory_space<vmem>>, %arg12: memref<1x128xf32, #tpu.memory_space<vmem>>, %arg13: memref<1152x128xbf16, #tpu.memory_space<vmem>>, %arg14: memref<1x128xf32, #tpu.memory_space<vmem>>, %arg15: memref<1x128xf32, #tpu.memory_space<vmem>>, %arg16: memref<1x128xf32, #tpu.memory_space<vmem>>, %arg17: memref<128x256xbf16, #tpu.memory_space<vmem>>, %arg18: memref<32x64xbf16, #tpu.memory_space<vmem>>, %arg19: memref<128x128xf32, #tpu.memory_space<vmem>>, %arg20: memref<1x128xf32, #tpu.memory_space<vmem>>, %arg21: memref<2x10xf32, #tpu.memory_space<vmem>>, %arg22: memref<2x18x18x32xf32, #tpu.memory_space<vmem>>, %arg23: memref<2x10x10x64xf32, #tpu.memory_space<vmem>>, %arg24: memref<2x10x10x128xf32, #tpu.memory_space<vmem>>, %arg25: memref<256x288xbf16, #tpu.memory_space<vmem>>, %arg26: memref<128x576xbf16, #tpu.memory_space<vmem>>, %arg27: memref<64x1152xbf16, #tpu.memory_space<vmem>>) attributes {dimension_semantics = [], scalar_prefetch = 0 : i64, scratch_operands = 6 : i64, tpu.core_type = #tpu.core_type<tc>} {
    %c0 = arith.constant 0 : index
    %c0_0 = arith.constant 0 : index
    %0 = vector.load %arg0[%c0, %c0_0] : memref<512x9xf32, #tpu.memory_space<vmem>>, vector<512x9xf32>
    %c0_1 = arith.constant 0 : index
    %c0_2 = arith.constant 0 : index
    %1 = vector.load %arg1[%c0_1, %c0_2] : memref<9x32xf32, #tpu.memory_space<vmem>>, vector<9x32xf32>
    %cst = arith.constant dense<0.000000e+00> : vector<512x32xf32>
    %2 = tpu.matmul %0, %1, %cst {dimension_numbers = #tpu.dot_dimension_numbers<[1], [0], [0], [1], [0, 0, 1, 1], [], []>} : vector<512x9xf32>, vector<9x32xf32>, vector<512x32xf32> -> vector<512x32xf32>
    %c0_3 = arith.constant 0 : index
    %c0_4 = arith.constant 0 : index
    %3 = vector.load %arg2[%c0_3, %c0_4] : memref<1x32xf32, #tpu.memory_space<vmem>>, vector<1x32xf32>
    %4 = vector.broadcast %3 : vector<1x32xf32> to vector<512x32xf32>
    %5 = arith.addf %2, %4 : vector<512x32xf32>
    %c0_5 = arith.constant 0 : index
    %c0_6 = arith.constant 0 : index
    %6 = vector.load %arg3[%c0_5, %c0_6] : memref<1x32xf32, #tpu.memory_space<vmem>>, vector<1x32xf32>
    %c0_7 = arith.constant 0 : index
    %c0_8 = arith.constant 0 : index
    %7 = vector.load %arg4[%c0_7, %c0_8] : memref<1x32xf32, #tpu.memory_space<vmem>>, vector<1x32xf32>
    %cst_9 = arith.constant 0.000000e+00 : f32
    %8 = vector.broadcast %cst_9 : f32 to vector<512x32xf32>
    %9 = arith.maximumf %5, %8 : vector<512x32xf32>
    %cst_10 = arith.constant dense<0.000000e+00> : vector<32xf32>
    %10 = vector.multi_reduction <add>, %9, %cst_10 [0] : vector<512x32xf32> to vector<32xf32>
    %11 = vector.shape_cast %10 : vector<32xf32> to vector<1x32xf32>
    %cst_11 = arith.constant 5.120000e+02 : f32
    %12 = vector.broadcast %cst_11 : f32 to vector<1x32xf32>
    %13 = arith.divf %11, %12 : vector<1x32xf32>
    %14 = vector.broadcast %13 : vector<1x32xf32> to vector<512x32xf32>
    %15 = arith.subf %9, %14 : vector<512x32xf32>
    %16 = arith.mulf %15, %15 : vector<512x32xf32>
    %cst_12 = arith.constant dense<0.000000e+00> : vector<32xf32>
    %17 = vector.multi_reduction <add>, %16, %cst_12 [0] : vector<512x32xf32> to vector<32xf32>
    %18 = vector.shape_cast %17 : vector<32xf32> to vector<1x32xf32>
    %cst_13 = arith.constant 5.120000e+02 : f32
    %19 = vector.broadcast %cst_13 : f32 to vector<1x32xf32>
    %20 = arith.divf %18, %19 : vector<1x32xf32>
    %cst_14 = arith.constant 9.99999974E-6 : f32
    %21 = vector.broadcast %cst_14 : f32 to vector<1x32xf32>
    %22 = arith.addf %20, %21 : vector<1x32xf32>
    %23 = math.rsqrt %22 : vector<1x32xf32>
    %24 = arith.mulf %23, %6 : vector<1x32xf32>
    %25 = vector.broadcast %24 : vector<1x32xf32> to vector<512x32xf32>
    %26 = arith.mulf %15, %25 : vector<512x32xf32>
    %27 = vector.broadcast %7 : vector<1x32xf32> to vector<512x32xf32>
    %28 = arith.addf %26, %27 : vector<512x32xf32>
    %29 = vector.shape_cast %28 : vector<512x32xf32> to vector<2x16x16x32xf32>
    %c0_15 = arith.constant 0 : index
    %c1 = arith.constant 1 : index
    %c1_16 = arith.constant 1 : index
    %c0_17 = arith.constant 0 : index
    %30 = vector.load %arg22[%c0_15, %c1, %c1_16, %c0_17] : memref<2x18x18x32xf32, #tpu.memory_space<vmem>>, vector<2x16x16x32xf32>
    tpu.vector_store %arg22[%c0_15, %c1, %c1_16, %c0_17], %29 {strides = array<i32>} : memref<2x18x18x32xf32, #tpu.memory_space<vmem>>, vector<2x16x16x32xf32>,
    %cst_18 = arith.constant 0.000000e+00 : f32
    %31 = vector.broadcast %cst_18 : f32 to vector<2x1x18x32xf32>
    %c0_19 = arith.constant 0 : index
    %c0_20 = arith.constant 0 : index
    %c0_21 = arith.constant 0 : index
    %c0_22 = arith.constant 0 : index
    %32 = vector.load %arg22[%c0_19, %c0_20, %c0_21, %c0_22] : memref<2x18x18x32xf32, #tpu.memory_space<vmem>>, vector<2x1x18x32xf32>
    tpu.vector_store %arg22[%c0_19, %c0_20, %c0_21, %c0_22], %31 {strides = array<i32>} : memref<2x18x18x32xf32, #tpu.memory_space<vmem>>, vector<2x1x18x32xf32>,
    %cst_23 = arith.constant 0.000000e+00 : f32
    %33 = vector.broadcast %cst_23 : f32 to vector<2x1x18x32xf32>
    %c0_24 = arith.constant 0 : index
    %c17 = arith.constant 17 : index
    %c0_25 = arith.constant 0 : index
    %c0_26 = arith.constant 0 : index
    %34 = vector.load %arg22[%c0_24, %c17, %c0_25, %c0_26] : memref<2x18x18x32xf32, #tpu.memory_space<vmem>>, vector<2x1x18x32xf32>
    tpu.vector_store %arg22[%c0_24, %c17, %c0_25, %c0_26], %33 {strides = array<i32>} : memref<2x18x18x32xf32, #tpu.memory_space<vmem>>, vector<2x1x18x32xf32>,
    %cst_27 = arith.constant 0.000000e+00 : f32
    %35 = vector.broadcast %cst_27 : f32 to vector<2x16x1x32xf32>
    %c0_28 = arith.constant 0 : index
    %c1_29 = arith.constant 1 : index
    %c0_30 = arith.constant 0 : index
    %c0_31 = arith.constant 0 : index
    %36 = vector.load %arg22[%c0_28, %c1_29, %c0_30, %c0_31] : memref<2x18x18x32xf32, #tpu.memory_space<vmem>>, vector<2x16x1x32xf32>
    tpu.vector_store %arg22[%c0_28, %c1_29, %c0_30, %c0_31], %35 {strides = array<i32>} : memref<2x18x18x32xf32, #tpu.memory_space<vmem>>, vector<2x16x1x32xf32>,
    %cst_32 = arith.constant 0.000000e+00 : f32
    %37 = vector.broadcast %cst_32 : f32 to vector<2x16x1x32xf32>
    %c0_33 = arith.constant 0 : index
    %c1_34 = arith.constant 1 : index
    %c17_35 = arith.constant 17 : index
    %c0_36 = arith.constant 0 : index
    %38 = vector.load %arg22[%c0_33, %c1_34, %c17_35, %c0_36] : memref<2x18x18x32xf32, #tpu.memory_space<vmem>>, vector<2x16x1x32xf32>
    tpu.vector_store %arg22[%c0_33, %c1_34, %c17_35, %c0_36], %37 {strides = array<i32>} : memref<2x18x18x32xf32, #tpu.memory_space<vmem>>, vector<2x16x1x32xf32>,
    %c0_37 = arith.constant 0 : index
    %c0_38 = arith.constant 0 : index
    %c0_39 = arith.constant 0 : index
    %c0_40 = arith.constant 0 : index
    %39 = vector.load %arg22[%c0_37, %c0_38, %c0_39, %c0_40] : memref<2x18x18x32xf32, #tpu.memory_space<vmem>>, vector<2x16x16x32xf32>
    %40 = vector.shape_cast %39 : vector<2x16x16x32xf32> to vector<2x8x2x16x32xf32>
    %41 = vector.extract_strided_slice %40 {offsets = [0, 0, 0, 0, 0], sizes = [2, 8, 1, 16, 32], strides = [1, 1, 1, 1, 1]} : vector<2x8x2x16x32xf32> to vector<2x8x1x16x32xf32>
    %42 = vector.shape_cast %41 : vector<2x8x1x16x32xf32> to vector<2x8x16x32xf32>
    %43 = vector.shape_cast %42 : vector<2x8x16x32xf32> to vector<256x32xf32>
    %44 = arith.truncf %43 : vector<256x32xf32> to vector<256x32xbf16>
    %c0_41 = arith.constant 0 : index
    %c0_42 = arith.constant 0 : index
    %45 = vector.load %arg25[%c0_41, %c0_42] : memref<256x288xbf16, #tpu.memory_space<vmem>>, vector<256x32xbf16>
    tpu.vector_store %arg25[%c0_41, %c0_42], %44 {strides = array<i32>} : memref<256x288xbf16, #tpu.memory_space<vmem>>, vector<256x32xbf16>,
    %c0_43 = arith.constant 0 : index
    %c0_44 = arith.constant 0 : index
    %c1_45 = arith.constant 1 : index
    %c0_46 = arith.constant 0 : index
    %46 = vector.load %arg22[%c0_43, %c0_44, %c1_45, %c0_46] : memref<2x18x18x32xf32, #tpu.memory_space<vmem>>, vector<2x16x16x32xf32>
    %47 = vector.shape_cast %46 : vector<2x16x16x32xf32> to vector<2x8x2x16x32xf32>
    %48 = vector.extract_strided_slice %47 {offsets = [0, 0, 0, 0, 0], sizes = [2, 8, 1, 16, 32], strides = [1, 1, 1, 1, 1]} : vector<2x8x2x16x32xf32> to vector<2x8x1x16x32xf32>
    %49 = vector.shape_cast %48 : vector<2x8x1x16x32xf32> to vector<2x8x16x32xf32>
    %50 = vector.shape_cast %49 : vector<2x8x16x32xf32> to vector<256x32xf32>
    %51 = arith.truncf %50 : vector<256x32xf32> to vector<256x32xbf16>
    %c0_47 = arith.constant 0 : index
    %c32 = arith.constant 32 : index
    %52 = vector.load %arg25[%c0_47, %c32] : memref<256x288xbf16, #tpu.memory_space<vmem>>, vector<256x32xbf16>
    tpu.vector_store %arg25[%c0_47, %c32], %51 {strides = array<i32>} : memref<256x288xbf16, #tpu.memory_space<vmem>>, vector<256x32xbf16>,
    %c0_48 = arith.constant 0 : index
    %c0_49 = arith.constant 0 : index
    %c2 = arith.constant 2 : index
    %c0_50 = arith.constant 0 : index
    %53 = vector.load %arg22[%c0_48, %c0_49, %c2, %c0_50] : memref<2x18x18x32xf32, #tpu.memory_space<vmem>>, vector<2x16x16x32xf32>
    %54 = vector.shape_cast %53 : vector<2x16x16x32xf32> to vector<2x8x2x16x32xf32>
    %55 = vector.extract_strided_slice %54 {offsets = [0, 0, 0, 0, 0], sizes = [2, 8, 1, 16, 32], strides = [1, 1, 1, 1, 1]} : vector<2x8x2x16x32xf32> to vector<2x8x1x16x32xf32>
    %56 = vector.shape_cast %55 : vector<2x8x1x16x32xf32> to vector<2x8x16x32xf32>
    %57 = vector.shape_cast %56 : vector<2x8x16x32xf32> to vector<256x32xf32>
    %58 = arith.truncf %57 : vector<256x32xf32> to vector<256x32xbf16>
    %c0_51 = arith.constant 0 : index
    %c64 = arith.constant 64 : index
    %59 = vector.load %arg25[%c0_51, %c64] : memref<256x288xbf16, #tpu.memory_space<vmem>>, vector<256x32xbf16>
    tpu.vector_store %arg25[%c0_51, %c64], %58 {strides = array<i32>} : memref<256x288xbf16, #tpu.memory_space<vmem>>, vector<256x32xbf16>,
    %c0_52 = arith.constant 0 : index
    %c1_53 = arith.constant 1 : index
    %c0_54 = arith.constant 0 : index
    %c0_55 = arith.constant 0 : index
    %60 = vector.load %arg22[%c0_52, %c1_53, %c0_54, %c0_55] : memref<2x18x18x32xf32, #tpu.memory_space<vmem>>, vector<2x16x16x32xf32>
    %61 = vector.shape_cast %60 : vector<2x16x16x32xf32> to vector<2x8x2x16x32xf32>
    %62 = vector.extract_strided_slice %61 {offsets = [0, 0, 0, 0, 0], sizes = [2, 8, 1, 16, 32], strides = [1, 1, 1, 1, 1]} : vector<2x8x2x16x32xf32> to vector<2x8x1x16x32xf32>
    %63 = vector.shape_cast %62 : vector<2x8x1x16x32xf32> to vector<2x8x16x32xf32>
    %64 = vector.shape_cast %63 : vector<2x8x16x32xf32> to vector<256x32xf32>
    %65 = arith.truncf %64 : vector<256x32xf32> to vector<256x32xbf16>
    %c0_56 = arith.constant 0 : index
    %c96 = arith.constant 96 : index
    %66 = vector.load %arg25[%c0_56, %c96] : memref<256x288xbf16, #tpu.memory_space<vmem>>, vector<256x32xbf16>
    tpu.vector_store %arg25[%c0_56, %c96], %65 {strides = array<i32>} : memref<256x288xbf16, #tpu.memory_space<vmem>>, vector<256x32xbf16>,
    %c0_57 = arith.constant 0 : index
    %c1_58 = arith.constant 1 : index
    %c1_59 = arith.constant 1 : index
    %c0_60 = arith.constant 0 : index
    %67 = vector.load %arg22[%c0_57, %c1_58, %c1_59, %c0_60] : memref<2x18x18x32xf32, #tpu.memory_space<vmem>>, vector<2x16x16x32xf32>
    %68 = vector.shape_cast %67 : vector<2x16x16x32xf32> to vector<2x8x2x16x32xf32>
    %69 = vector.extract_strided_slice %68 {offsets = [0, 0, 0, 0, 0], sizes = [2, 8, 1, 16, 32], strides = [1, 1, 1, 1, 1]} : vector<2x8x2x16x32xf32> to vector<2x8x1x16x32xf32>
    %70 = vector.shape_cast %69 : vector<2x8x1x16x32xf32> to vector<2x8x16x32xf32>
    %71 = vector.shape_cast %70 : vector<2x8x16x32xf32> to vector<256x32xf32>
    %72 = arith.truncf %71 : vector<256x32xf32> to vector<256x32xbf16>
    %c0_61 = arith.constant 0 : index
    %c128 = arith.constant 128 : index
    %73 = vector.load %arg25[%c0_61, %c128] : memref<256x288xbf16, #tpu.memory_space<vmem>>, vector<256x32xbf16>
    tpu.vector_store %arg25[%c0_61, %c128], %72 {strides = array<i32>} : memref<256x288xbf16, #tpu.memory_space<vmem>>, vector<256x32xbf16>,
    %c0_62 = arith.constant 0 : index
    %c1_63 = arith.constant 1 : index
    %c2_64 = arith.constant 2 : index
    %c0_65 = arith.constant 0 : index
    %74 = vector.load %arg22[%c0_62, %c1_63, %c2_64, %c0_65] : memref<2x18x18x32xf32, #tpu.memory_space<vmem>>, vector<2x16x16x32xf32>
    %75 = vector.shape_cast %74 : vector<2x16x16x32xf32> to vector<2x8x2x16x32xf32>
    %76 = vector.extract_strided_slice %75 {offsets = [0, 0, 0, 0, 0], sizes = [2, 8, 1, 16, 32], strides = [1, 1, 1, 1, 1]} : vector<2x8x2x16x32xf32> to vector<2x8x1x16x32xf32>
    %77 = vector.shape_cast %76 : vector<2x8x1x16x32xf32> to vector<2x8x16x32xf32>
    %78 = vector.shape_cast %77 : vector<2x8x16x32xf32> to vector<256x32xf32>
    %79 = arith.truncf %78 : vector<256x32xf32> to vector<256x32xbf16>
    %c0_66 = arith.constant 0 : index
    %c160 = arith.constant 160 : index
    %80 = vector.load %arg25[%c0_66, %c160] : memref<256x288xbf16, #tpu.memory_space<vmem>>, vector<256x32xbf16>
    tpu.vector_store %arg25[%c0_66, %c160], %79 {strides = array<i32>} : memref<256x288xbf16, #tpu.memory_space<vmem>>, vector<256x32xbf16>,
    %c0_67 = arith.constant 0 : index
    %c2_68 = arith.constant 2 : index
    %c0_69 = arith.constant 0 : index
    %c0_70 = arith.constant 0 : index
    %81 = vector.load %arg22[%c0_67, %c2_68, %c0_69, %c0_70] : memref<2x18x18x32xf32, #tpu.memory_space<vmem>>, vector<2x16x16x32xf32>
    %82 = vector.shape_cast %81 : vector<2x16x16x32xf32> to vector<2x8x2x16x32xf32>
    %83 = vector.extract_strided_slice %82 {offsets = [0, 0, 0, 0, 0], sizes = [2, 8, 1, 16, 32], strides = [1, 1, 1, 1, 1]} : vector<2x8x2x16x32xf32> to vector<2x8x1x16x32xf32>
    %84 = vector.shape_cast %83 : vector<2x8x1x16x32xf32> to vector<2x8x16x32xf32>
    %85 = vector.shape_cast %84 : vector<2x8x16x32xf32> to vector<256x32xf32>
    %86 = arith.truncf %85 : vector<256x32xf32> to vector<256x32xbf16>
    %c0_71 = arith.constant 0 : index
    %c192 = arith.constant 192 : index
    %87 = vector.load %arg25[%c0_71, %c192] : memref<256x288xbf16, #tpu.memory_space<vmem>>, vector<256x32xbf16>
    tpu.vector_store %arg25[%c0_71, %c192], %86 {strides = array<i32>} : memref<256x288xbf16, #tpu.memory_space<vmem>>, vector<256x32xbf16>,
    %c0_72 = arith.constant 0 : index
    %c2_73 = arith.constant 2 : index
    %c1_74 = arith.constant 1 : index
    %c0_75 = arith.constant 0 : index
    %88 = vector.load %arg22[%c0_72, %c2_73, %c1_74, %c0_75] : memref<2x18x18x32xf32, #tpu.memory_space<vmem>>, vector<2x16x16x32xf32>
    %89 = vector.shape_cast %88 : vector<2x16x16x32xf32> to vector<2x8x2x16x32xf32>
    %90 = vector.extract_strided_slice %89 {offsets = [0, 0, 0, 0, 0], sizes = [2, 8, 1, 16, 32], strides = [1, 1, 1, 1, 1]} : vector<2x8x2x16x32xf32> to vector<2x8x1x16x32xf32>
    %91 = vector.shape_cast %90 : vector<2x8x1x16x32xf32> to vector<2x8x16x32xf32>
    %92 = vector.shape_cast %91 : vector<2x8x16x32xf32> to vector<256x32xf32>
    %93 = arith.truncf %92 : vector<256x32xf32> to vector<256x32xbf16>
    %c0_76 = arith.constant 0 : index
    %c224 = arith.constant 224 : index
    %94 = vector.load %arg25[%c0_76, %c224] : memref<256x288xbf16, #tpu.memory_space<vmem>>, vector<256x32xbf16>
    tpu.vector_store %arg25[%c0_76, %c224], %93 {strides = array<i32>} : memref<256x288xbf16, #tpu.memory_space<vmem>>, vector<256x32xbf16>,
    %c0_77 = arith.constant 0 : index
    %c2_78 = arith.constant 2 : index
    %c2_79 = arith.constant 2 : index
    %c0_80 = arith.constant 0 : index
    %95 = vector.load %arg22[%c0_77, %c2_78, %c2_79, %c0_80] : memref<2x18x18x32xf32, #tpu.memory_space<vmem>>, vector<2x16x16x32xf32>
    %96 = vector.shape_cast %95 : vector<2x16x16x32xf32> to vector<2x8x2x16x32xf32>
    %97 = vector.extract_strided_slice %96 {offsets = [0, 0, 0, 0, 0], sizes = [2, 8, 1, 16, 32], strides = [1, 1, 1, 1, 1]} : vector<2x8x2x16x32xf32> to vector<2x8x1x16x32xf32>
    %98 = vector.shape_cast %97 : vector<2x8x1x16x32xf32> to vector<2x8x16x32xf32>
    %99 = vector.shape_cast %98 : vector<2x8x16x32xf32> to vector<256x32xf32>
    %100 = arith.truncf %99 : vector<256x32xf32> to vector<256x32xbf16>
    %c0_81 = arith.constant 0 : index
    %c256 = arith.constant 256 : index
    %101 = vector.load %arg25[%c0_81, %c256] : memref<256x288xbf16, #tpu.memory_space<vmem>>, vector<256x32xbf16>
    tpu.vector_store %arg25[%c0_81, %c256], %100 {strides = array<i32>} : memref<256x288xbf16, #tpu.memory_space<vmem>>, vector<256x32xbf16>,
    %c0_82 = arith.constant 0 : index
    %c0_83 = arith.constant 0 : index
    %102 = vector.load %arg25[%c0_82, %c0_83] : memref<256x288xbf16, #tpu.memory_space<vmem>>, vector<256x288xbf16>
    %c0_84 = arith.constant 0 : index
    %c0_85 = arith.constant 0 : index
    %103 = vector.load %arg5[%c0_84, %c0_85] : memref<288x64xbf16, #tpu.memory_space<vmem>>, vector<288x64xbf16>
    %cst_86 = arith.constant dense<0.000000e+00> : vector<256x64xf32>
    %104 = tpu.matmul %102, %103, %cst_86 {dimension_numbers = #tpu.dot_dimension_numbers<[1], [0], [0], [1], [0, 0, 1, 1], [], []>} : vector<256x288xbf16>, vector<288x64xbf16>, vector<256x64xf32> -> vector<256x64xf32>
    %c0_87 = arith.constant 0 : index
    %c0_88 = arith.constant 0 : index
    %105 = vector.load %arg17[%c0_87, %c0_88] : memref<128x256xbf16, #tpu.memory_space<vmem>>, vector<128x256xbf16>
    %106 = arith.extf %105 : vector<128x256xbf16> to vector<128x256xf32>
    %cst_89 = arith.constant dense<0.000000e+00> : vector<128x64xf32>
    %107 = tpu.matmul %106, %104, %cst_89 {dimension_numbers = #tpu.dot_dimension_numbers<[1], [0], [0], [1], [0, 0, 1, 1], [], []>} : vector<128x256xf32>, vector<256x64xf32>, vector<128x64xf32> -> vector<128x64xf32>
    %c0_90 = arith.constant 0 : index
    %c0_91 = arith.constant 0 : index
    %108 = vector.load %arg6[%c0_90, %c0_91] : memref<1x64xf32, #tpu.memory_space<vmem>>, vector<1x64xf32>
    %109 = vector.broadcast %108 : vector<1x64xf32> to vector<128x64xf32>
    %110 = arith.addf %107, %109 : vector<128x64xf32>
    %c0_92 = arith.constant 0 : index
    %c0_93 = arith.constant 0 : index
    %111 = vector.load %arg7[%c0_92, %c0_93] : memref<1x64xf32, #tpu.memory_space<vmem>>, vector<1x64xf32>
    %c0_94 = arith.constant 0 : index
    %c0_95 = arith.constant 0 : index
    %112 = vector.load %arg8[%c0_94, %c0_95] : memref<1x64xf32, #tpu.memory_space<vmem>>, vector<1x64xf32>
    %cst_96 = arith.constant 0.000000e+00 : f32
    %113 = vector.broadcast %cst_96 : f32 to vector<128x64xf32>
    %114 = arith.maximumf %110, %113 : vector<128x64xf32>
    %cst_97 = arith.constant dense<0.000000e+00> : vector<64xf32>
    %115 = vector.multi_reduction <add>, %114, %cst_97 [0] : vector<128x64xf32> to vector<64xf32>
    %116 = vector.shape_cast %115 : vector<64xf32> to vector<1x64xf32>
    %cst_98 = arith.constant 1.280000e+02 : f32
    %117 = vector.broadcast %cst_98 : f32 to vector<1x64xf32>
    %118 = arith.divf %116, %117 : vector<1x64xf32>
    %119 = vector.broadcast %118 : vector<1x64xf32> to vector<128x64xf32>
    %120 = arith.subf %114, %119 : vector<128x64xf32>
    %121 = arith.mulf %120, %120 : vector<128x64xf32>
    %cst_99 = arith.constant dense<0.000000e+00> : vector<64xf32>
    %122 = vector.multi_reduction <add>, %121, %cst_99 [0] : vector<128x64xf32> to vector<64xf32>
    %123 = vector.shape_cast %122 : vector<64xf32> to vector<1x64xf32>
    %cst_100 = arith.constant 1.280000e+02 : f32
    %124 = vector.broadcast %cst_100 : f32 to vector<1x64xf32>
    %125 = arith.divf %123, %124 : vector<1x64xf32>
    %cst_101 = arith.constant 9.99999974E-6 : f32
    %126 = vector.broadcast %cst_101 : f32 to vector<1x64xf32>
    %127 = arith.addf %125, %126 : vector<1x64xf32>
    %128 = math.rsqrt %127 : vector<1x64xf32>
    %129 = arith.mulf %128, %111 : vector<1x64xf32>
    %130 = vector.broadcast %129 : vector<1x64xf32> to vector<128x64xf32>
    %131 = arith.mulf %120, %130 : vector<128x64xf32>
    %132 = vector.broadcast %112 : vector<1x64xf32> to vector<128x64xf32>
    %133 = arith.addf %131, %132 : vector<128x64xf32>
    %134 = vector.shape_cast %133 : vector<128x64xf32> to vector<2x8x8x64xf32>
    %c0_102 = arith.constant 0 : index
    %c1_103 = arith.constant 1 : index
    %c1_104 = arith.constant 1 : index
    %c0_105 = arith.constant 0 : index
    %135 = vector.load %arg23[%c0_102, %c1_103, %c1_104, %c0_105] : memref<2x10x10x64xf32, #tpu.memory_space<vmem>>, vector<2x8x8x64xf32>
    tpu.vector_store %arg23[%c0_102, %c1_103, %c1_104, %c0_105], %134 {strides = array<i32>} : memref<2x10x10x64xf32, #tpu.memory_space<vmem>>, vector<2x8x8x64xf32>,
    %cst_106 = arith.constant 0.000000e+00 : f32
    %136 = vector.broadcast %cst_106 : f32 to vector<2x1x10x64xf32>
    %c0_107 = arith.constant 0 : index
    %c0_108 = arith.constant 0 : index
    %c0_109 = arith.constant 0 : index
    %c0_110 = arith.constant 0 : index
    %137 = vector.load %arg23[%c0_107, %c0_108, %c0_109, %c0_110] : memref<2x10x10x64xf32, #tpu.memory_space<vmem>>, vector<2x1x10x64xf32>
    tpu.vector_store %arg23[%c0_107, %c0_108, %c0_109, %c0_110], %136 {strides = array<i32>} : memref<2x10x10x64xf32, #tpu.memory_space<vmem>>, vector<2x1x10x64xf32>,
    %cst_111 = arith.constant 0.000000e+00 : f32
    %138 = vector.broadcast %cst_111 : f32 to vector<2x1x10x64xf32>
    %c0_112 = arith.constant 0 : index
    %c9 = arith.constant 9 : index
    %c0_113 = arith.constant 0 : index
    %c0_114 = arith.constant 0 : index
    %139 = vector.load %arg23[%c0_112, %c9, %c0_113, %c0_114] : memref<2x10x10x64xf32, #tpu.memory_space<vmem>>, vector<2x1x10x64xf32>
    tpu.vector_store %arg23[%c0_112, %c9, %c0_113, %c0_114], %138 {strides = array<i32>} : memref<2x10x10x64xf32, #tpu.memory_space<vmem>>, vector<2x1x10x64xf32>,
    %cst_115 = arith.constant 0.000000e+00 : f32
    %140 = vector.broadcast %cst_115 : f32 to vector<2x8x1x64xf32>
    %c0_116 = arith.constant 0 : index
    %c1_117 = arith.constant 1 : index
    %c0_118 = arith.constant 0 : index
    %c0_119 = arith.constant 0 : index
    %141 = vector.load %arg23[%c0_116, %c1_117, %c0_118, %c0_119] : memref<2x10x10x64xf32, #tpu.memory_space<vmem>>, vector<2x8x1x64xf32>
    tpu.vector_store %arg23[%c0_116, %c1_117, %c0_118, %c0_119], %140 {strides = array<i32>} : memref<2x10x10x64xf32, #tpu.memory_space<vmem>>, vector<2x8x1x64xf32>,
    %cst_120 = arith.constant 0.000000e+00 : f32
    %142 = vector.broadcast %cst_120 : f32 to vector<2x8x1x64xf32>
    %c0_121 = arith.constant 0 : index
    %c1_122 = arith.constant 1 : index
    %c9_123 = arith.constant 9 : index
    %c0_124 = arith.constant 0 : index
    %143 = vector.load %arg23[%c0_121, %c1_122, %c9_123, %c0_124] : memref<2x10x10x64xf32, #tpu.memory_space<vmem>>, vector<2x8x1x64xf32>
    tpu.vector_store %arg23[%c0_121, %c1_122, %c9_123, %c0_124], %142 {strides = array<i32>} : memref<2x10x10x64xf32, #tpu.memory_space<vmem>>, vector<2x8x1x64xf32>,
    %c0_125 = arith.constant 0 : index
    %c0_126 = arith.constant 0 : index
    %c0_127 = arith.constant 0 : index
    %c0_128 = arith.constant 0 : index
    %144 = vector.load %arg23[%c0_125, %c0_126, %c0_127, %c0_128] : memref<2x10x10x64xf32, #tpu.memory_space<vmem>>, vector<2x8x8x64xf32>
    %145 = vector.shape_cast %144 : vector<2x8x8x64xf32> to vector<128x64xf32>
    %146 = arith.truncf %145 : vector<128x64xf32> to vector<128x64xbf16>
    %c0_129 = arith.constant 0 : index
    %c0_130 = arith.constant 0 : index
    %147 = vector.load %arg26[%c0_129, %c0_130] : memref<128x576xbf16, #tpu.memory_space<vmem>>, vector<128x64xbf16>
    tpu.vector_store %arg26[%c0_129, %c0_130], %146 {strides = array<i32>} : memref<128x576xbf16, #tpu.memory_space<vmem>>, vector<128x64xbf16>,
    %c0_131 = arith.constant 0 : index
    %c0_132 = arith.constant 0 : index
    %c1_133 = arith.constant 1 : index
    %c0_134 = arith.constant 0 : index
    %148 = vector.load %arg23[%c0_131, %c0_132, %c1_133, %c0_134] : memref<2x10x10x64xf32, #tpu.memory_space<vmem>>, vector<2x8x8x64xf32>
    %149 = vector.shape_cast %148 : vector<2x8x8x64xf32> to vector<128x64xf32>
    %150 = arith.truncf %149 : vector<128x64xf32> to vector<128x64xbf16>
    %c0_135 = arith.constant 0 : index
    %c64_136 = arith.constant 64 : index
    %151 = vector.load %arg26[%c0_135, %c64_136] : memref<128x576xbf16, #tpu.memory_space<vmem>>, vector<128x64xbf16>
    tpu.vector_store %arg26[%c0_135, %c64_136], %150 {strides = array<i32>} : memref<128x576xbf16, #tpu.memory_space<vmem>>, vector<128x64xbf16>,
    %c0_137 = arith.constant 0 : index
    %c0_138 = arith.constant 0 : index
    %c2_139 = arith.constant 2 : index
    %c0_140 = arith.constant 0 : index
    %152 = vector.load %arg23[%c0_137, %c0_138, %c2_139, %c0_140] : memref<2x10x10x64xf32, #tpu.memory_space<vmem>>, vector<2x8x8x64xf32>
    %153 = vector.shape_cast %152 : vector<2x8x8x64xf32> to vector<128x64xf32>
    %154 = arith.truncf %153 : vector<128x64xf32> to vector<128x64xbf16>
    %c0_141 = arith.constant 0 : index
    %c128_142 = arith.constant 128 : index
    %155 = vector.load %arg26[%c0_141, %c128_142] : memref<128x576xbf16, #tpu.memory_space<vmem>>, vector<128x64xbf16>
    tpu.vector_store %arg26[%c0_141, %c128_142], %154 {strides = array<i32>} : memref<128x576xbf16, #tpu.memory_space<vmem>>, vector<128x64xbf16>,
    %c0_143 = arith.constant 0 : index
    %c1_144 = arith.constant 1 : index
    %c0_145 = arith.constant 0 : index
    %c0_146 = arith.constant 0 : index
    %156 = vector.load %arg23[%c0_143, %c1_144, %c0_145, %c0_146] : memref<2x10x10x64xf32, #tpu.memory_space<vmem>>, vector<2x8x8x64xf32>
    %157 = vector.shape_cast %156 : vector<2x8x8x64xf32> to vector<128x64xf32>
    %158 = arith.truncf %157 : vector<128x64xf32> to vector<128x64xbf16>
    %c0_147 = arith.constant 0 : index
    %c192_148 = arith.constant 192 : index
    %159 = vector.load %arg26[%c0_147, %c192_148] : memref<128x576xbf16, #tpu.memory_space<vmem>>, vector<128x64xbf16>
    tpu.vector_store %arg26[%c0_147, %c192_148], %158 {strides = array<i32>} : memref<128x576xbf16, #tpu.memory_space<vmem>>, vector<128x64xbf16>,
    %c0_149 = arith.constant 0 : index
    %c1_150 = arith.constant 1 : index
    %c1_151 = arith.constant 1 : index
    %c0_152 = arith.constant 0 : index
    %160 = vector.load %arg23[%c0_149, %c1_150, %c1_151, %c0_152] : memref<2x10x10x64xf32, #tpu.memory_space<vmem>>, vector<2x8x8x64xf32>
    %161 = vector.shape_cast %160 : vector<2x8x8x64xf32> to vector<128x64xf32>
    %162 = arith.truncf %161 : vector<128x64xf32> to vector<128x64xbf16>
    %c0_153 = arith.constant 0 : index
    %c256_154 = arith.constant 256 : index
    %163 = vector.load %arg26[%c0_153, %c256_154] : memref<128x576xbf16, #tpu.memory_space<vmem>>, vector<128x64xbf16>
    tpu.vector_store %arg26[%c0_153, %c256_154], %162 {strides = array<i32>} : memref<128x576xbf16, #tpu.memory_space<vmem>>, vector<128x64xbf16>,
    %c0_155 = arith.constant 0 : index
    %c1_156 = arith.constant 1 : index
    %c2_157 = arith.constant 2 : index
    %c0_158 = arith.constant 0 : index
    %164 = vector.load %arg23[%c0_155, %c1_156, %c2_157, %c0_158] : memref<2x10x10x64xf32, #tpu.memory_space<vmem>>, vector<2x8x8x64xf32>
    %165 = vector.shape_cast %164 : vector<2x8x8x64xf32> to vector<128x64xf32>
    %166 = arith.truncf %165 : vector<128x64xf32> to vector<128x64xbf16>
    %c0_159 = arith.constant 0 : index
    %c320 = arith.constant 320 : index
    %167 = vector.load %arg26[%c0_159, %c320] : memref<128x576xbf16, #tpu.memory_space<vmem>>, vector<128x64xbf16>
    tpu.vector_store %arg26[%c0_159, %c320], %166 {strides = array<i32>} : memref<128x576xbf16, #tpu.memory_space<vmem>>, vector<128x64xbf16>,
    %c0_160 = arith.constant 0 : index
    %c2_161 = arith.constant 2 : index
    %c0_162 = arith.constant 0 : index
    %c0_163 = arith.constant 0 : index
    %168 = vector.load %arg23[%c0_160, %c2_161, %c0_162, %c0_163] : memref<2x10x10x64xf32, #tpu.memory_space<vmem>>, vector<2x8x8x64xf32>
    %169 = vector.shape_cast %168 : vector<2x8x8x64xf32> to vector<128x64xf32>
    %170 = arith.truncf %169 : vector<128x64xf32> to vector<128x64xbf16>
    %c0_164 = arith.constant 0 : index
    %c384 = arith.constant 384 : index
    %171 = vector.load %arg26[%c0_164, %c384] : memref<128x576xbf16, #tpu.memory_space<vmem>>, vector<128x64xbf16>
    tpu.vector_store %arg26[%c0_164, %c384], %170 {strides = array<i32>} : memref<128x576xbf16, #tpu.memory_space<vmem>>, vector<128x64xbf16>,
    %c0_165 = arith.constant 0 : index
    %c2_166 = arith.constant 2 : index
    %c1_167 = arith.constant 1 : index
    %c0_168 = arith.constant 0 : index
    %172 = vector.load %arg23[%c0_165, %c2_166, %c1_167, %c0_168] : memref<2x10x10x64xf32, #tpu.memory_space<vmem>>, vector<2x8x8x64xf32>
    %173 = vector.shape_cast %172 : vector<2x8x8x64xf32> to vector<128x64xf32>
    %174 = arith.truncf %173 : vector<128x64xf32> to vector<128x64xbf16>
    %c0_169 = arith.constant 0 : index
    %c448 = arith.constant 448 : index
    %175 = vector.load %arg26[%c0_169, %c448] : memref<128x576xbf16, #tpu.memory_space<vmem>>, vector<128x64xbf16>
    tpu.vector_store %arg26[%c0_169, %c448], %174 {strides = array<i32>} : memref<128x576xbf16, #tpu.memory_space<vmem>>, vector<128x64xbf16>,
    %c0_170 = arith.constant 0 : index
    %c2_171 = arith.constant 2 : index
    %c2_172 = arith.constant 2 : index
    %c0_173 = arith.constant 0 : index
    %176 = vector.load %arg23[%c0_170, %c2_171, %c2_172, %c0_173] : memref<2x10x10x64xf32, #tpu.memory_space<vmem>>, vector<2x8x8x64xf32>
    %177 = vector.shape_cast %176 : vector<2x8x8x64xf32> to vector<128x64xf32>
    %178 = arith.truncf %177 : vector<128x64xf32> to vector<128x64xbf16>
    %c0_174 = arith.constant 0 : index
    %c512 = arith.constant 512 : index
    %179 = vector.load %arg26[%c0_174, %c512] : memref<128x576xbf16, #tpu.memory_space<vmem>>, vector<128x64xbf16>
    tpu.vector_store %arg26[%c0_174, %c512], %178 {strides = array<i32>} : memref<128x576xbf16, #tpu.memory_space<vmem>>, vector<128x64xbf16>,
    %c0_175 = arith.constant 0 : index
    %c0_176 = arith.constant 0 : index
    %180 = vector.load %arg26[%c0_175, %c0_176] : memref<128x576xbf16, #tpu.memory_space<vmem>>, vector<128x576xbf16>
    %c0_177 = arith.constant 0 : index
    %c0_178 = arith.constant 0 : index
    %181 = vector.load %arg9[%c0_177, %c0_178] : memref<576x128xbf16, #tpu.memory_space<vmem>>, vector<576x128xbf16>
    %cst_179 = arith.constant dense<0.000000e+00> : vector<128x128xf32>
    %182 = tpu.matmul %180, %181, %cst_179 {dimension_numbers = #tpu.dot_dimension_numbers<[1], [0], [0], [1], [0, 0, 1, 1], [], []>} : vector<128x576xbf16>, vector<576x128xbf16>, vector<128x128xf32> -> vector<128x128xf32>
    %c0_180 = arith.constant 0 : index
    %c0_181 = arith.constant 0 : index
    %183 = vector.load %arg10[%c0_180, %c0_181] : memref<1x128xf32, #tpu.memory_space<vmem>>, vector<1x128xf32>
    %184 = vector.broadcast %183 : vector<1x128xf32> to vector<128x128xf32>
    %185 = arith.addf %182, %184 : vector<128x128xf32>
    %c0_182 = arith.constant 0 : index
    %c0_183 = arith.constant 0 : index
    %186 = vector.load %arg11[%c0_182, %c0_183] : memref<1x128xf32, #tpu.memory_space<vmem>>, vector<1x128xf32>
    %c0_184 = arith.constant 0 : index
    %c0_185 = arith.constant 0 : index
    %187 = vector.load %arg12[%c0_184, %c0_185] : memref<1x128xf32, #tpu.memory_space<vmem>>, vector<1x128xf32>
    %cst_186 = arith.constant 0.000000e+00 : f32
    %188 = vector.broadcast %cst_186 : f32 to vector<128x128xf32>
    %189 = arith.maximumf %185, %188 : vector<128x128xf32>
    %cst_187 = arith.constant dense<0.000000e+00> : vector<128xf32>
    %190 = vector.multi_reduction <add>, %189, %cst_187 [0] : vector<128x128xf32> to vector<128xf32>
    %191 = vector.shape_cast %190 : vector<128xf32> to vector<1x128xf32>
    %cst_188 = arith.constant 1.280000e+02 : f32
    %192 = vector.broadcast %cst_188 : f32 to vector<1x128xf32>
    %193 = arith.divf %191, %192 : vector<1x128xf32>
    %194 = vector.broadcast %193 : vector<1x128xf32> to vector<128x128xf32>
    %195 = arith.subf %189, %194 : vector<128x128xf32>
    %196 = arith.mulf %195, %195 : vector<128x128xf32>
    %cst_189 = arith.constant dense<0.000000e+00> : vector<128xf32>
    %197 = vector.multi_reduction <add>, %196, %cst_189 [0] : vector<128x128xf32> to vector<128xf32>
    %198 = vector.shape_cast %197 : vector<128xf32> to vector<1x128xf32>
    %cst_190 = arith.constant 1.280000e+02 : f32
    %199 = vector.broadcast %cst_190 : f32 to vector<1x128xf32>
    %200 = arith.divf %198, %199 : vector<1x128xf32>
    %cst_191 = arith.constant 9.99999974E-6 : f32
    %201 = vector.broadcast %cst_191 : f32 to vector<1x128xf32>
    %202 = arith.addf %200, %201 : vector<1x128xf32>
    %203 = math.rsqrt %202 : vector<1x128xf32>
    %204 = arith.mulf %203, %186 : vector<1x128xf32>
    %205 = vector.broadcast %204 : vector<1x128xf32> to vector<128x128xf32>
    %206 = arith.mulf %195, %205 : vector<128x128xf32>
    %207 = vector.broadcast %187 : vector<1x128xf32> to vector<128x128xf32>
    %208 = arith.addf %206, %207 : vector<128x128xf32>
    %209 = vector.shape_cast %208 : vector<128x128xf32> to vector<2x8x8x128xf32>
    %c0_192 = arith.constant 0 : index
    %c1_193 = arith.constant 1 : index
    %c1_194 = arith.constant 1 : index
    %c0_195 = arith.constant 0 : index
    %210 = vector.load %arg24[%c0_192, %c1_193, %c1_194, %c0_195] : memref<2x10x10x128xf32, #tpu.memory_space<vmem>>, vector<2x8x8x128xf32>
    tpu.vector_store %arg24[%c0_192, %c1_193, %c1_194, %c0_195], %209 {strides = array<i32>} : memref<2x10x10x128xf32, #tpu.memory_space<vmem>>, vector<2x8x8x128xf32>,
    %cst_196 = arith.constant 0.000000e+00 : f32
    %211 = vector.broadcast %cst_196 : f32 to vector<2x1x10x128xf32>
    %c0_197 = arith.constant 0 : index
    %c0_198 = arith.constant 0 : index
    %c0_199 = arith.constant 0 : index
    %c0_200 = arith.constant 0 : index
    %212 = vector.load %arg24[%c0_197, %c0_198, %c0_199, %c0_200] : memref<2x10x10x128xf32, #tpu.memory_space<vmem>>, vector<2x1x10x128xf32>
    tpu.vector_store %arg24[%c0_197, %c0_198, %c0_199, %c0_200], %211 {strides = array<i32>} : memref<2x10x10x128xf32, #tpu.memory_space<vmem>>, vector<2x1x10x128xf32>,
    %cst_201 = arith.constant 0.000000e+00 : f32
    %213 = vector.broadcast %cst_201 : f32 to vector<2x1x10x128xf32>
    %c0_202 = arith.constant 0 : index
    %c9_203 = arith.constant 9 : index
    %c0_204 = arith.constant 0 : index
    %c0_205 = arith.constant 0 : index
    %214 = vector.load %arg24[%c0_202, %c9_203, %c0_204, %c0_205] : memref<2x10x10x128xf32, #tpu.memory_space<vmem>>, vector<2x1x10x128xf32>
    tpu.vector_store %arg24[%c0_202, %c9_203, %c0_204, %c0_205], %213 {strides = array<i32>} : memref<2x10x10x128xf32, #tpu.memory_space<vmem>>, vector<2x1x10x128xf32>,
    %cst_206 = arith.constant 0.000000e+00 : f32
    %215 = vector.broadcast %cst_206 : f32 to vector<2x8x1x128xf32>
    %c0_207 = arith.constant 0 : index
    %c1_208 = arith.constant 1 : index
    %c0_209 = arith.constant 0 : index
    %c0_210 = arith.constant 0 : index
    %216 = vector.load %arg24[%c0_207, %c1_208, %c0_209, %c0_210] : memref<2x10x10x128xf32, #tpu.memory_space<vmem>>, vector<2x8x1x128xf32>
    tpu.vector_store %arg24[%c0_207, %c1_208, %c0_209, %c0_210], %215 {strides = array<i32>} : memref<2x10x10x128xf32, #tpu.memory_space<vmem>>, vector<2x8x1x128xf32>,
    %cst_211 = arith.constant 0.000000e+00 : f32
    %217 = vector.broadcast %cst_211 : f32 to vector<2x8x1x128xf32>
    %c0_212 = arith.constant 0 : index
    %c1_213 = arith.constant 1 : index
    %c9_214 = arith.constant 9 : index
    %c0_215 = arith.constant 0 : index
    %218 = vector.load %arg24[%c0_212, %c1_213, %c9_214, %c0_215] : memref<2x10x10x128xf32, #tpu.memory_space<vmem>>, vector<2x8x1x128xf32>
    tpu.vector_store %arg24[%c0_212, %c1_213, %c9_214, %c0_215], %217 {strides = array<i32>} : memref<2x10x10x128xf32, #tpu.memory_space<vmem>>, vector<2x8x1x128xf32>,
    %c0_216 = arith.constant 0 : index
    %c0_217 = arith.constant 0 : index
    %c0_218 = arith.constant 0 : index
    %c0_219 = arith.constant 0 : index
    %219 = vector.load %arg24[%c0_216, %c0_217, %c0_218, %c0_219] : memref<2x10x10x128xf32, #tpu.memory_space<vmem>>, vector<2x8x8x128xf32>
    %220 = vector.shape_cast %219 : vector<2x8x8x128xf32> to vector<2x4x2x8x128xf32>
    %221 = vector.extract_strided_slice %220 {offsets = [0, 0, 0, 0, 0], sizes = [2, 4, 1, 8, 128], strides = [1, 1, 1, 1, 1]} : vector<2x4x2x8x128xf32> to vector<2x4x1x8x128xf32>
    %222 = vector.shape_cast %221 : vector<2x4x1x8x128xf32> to vector<2x4x8x128xf32>
    %223 = vector.shape_cast %222 : vector<2x4x8x128xf32> to vector<64x128xf32>
    %224 = arith.truncf %223 : vector<64x128xf32> to vector<64x128xbf16>
    %c0_220 = arith.constant 0 : index
    %c0_221 = arith.constant 0 : index
    %225 = vector.load %arg27[%c0_220, %c0_221] : memref<64x1152xbf16, #tpu.memory_space<vmem>>, vector<64x128xbf16>
    tpu.vector_store %arg27[%c0_220, %c0_221], %224 {strides = array<i32>} : memref<64x1152xbf16, #tpu.memory_space<vmem>>, vector<64x128xbf16>,
    %c0_222 = arith.constant 0 : index
    %c0_223 = arith.constant 0 : index
    %c1_224 = arith.constant 1 : index
    %c0_225 = arith.constant 0 : index
    %226 = vector.load %arg24[%c0_222, %c0_223, %c1_224, %c0_225] : memref<2x10x10x128xf32, #tpu.memory_space<vmem>>, vector<2x8x8x128xf32>
    %227 = vector.shape_cast %226 : vector<2x8x8x128xf32> to vector<2x4x2x8x128xf32>
    %228 = vector.extract_strided_slice %227 {offsets = [0, 0, 0, 0, 0], sizes = [2, 4, 1, 8, 128], strides = [1, 1, 1, 1, 1]} : vector<2x4x2x8x128xf32> to vector<2x4x1x8x128xf32>
    %229 = vector.shape_cast %228 : vector<2x4x1x8x128xf32> to vector<2x4x8x128xf32>
    %230 = vector.shape_cast %229 : vector<2x4x8x128xf32> to vector<64x128xf32>
    %231 = arith.truncf %230 : vector<64x128xf32> to vector<64x128xbf16>
    %c0_226 = arith.constant 0 : index
    %c128_227 = arith.constant 128 : index
    %232 = vector.load %arg27[%c0_226, %c128_227] : memref<64x1152xbf16, #tpu.memory_space<vmem>>, vector<64x128xbf16>
    tpu.vector_store %arg27[%c0_226, %c128_227], %231 {strides = array<i32>} : memref<64x1152xbf16, #tpu.memory_space<vmem>>, vector<64x128xbf16>,
    %c0_228 = arith.constant 0 : index
    %c0_229 = arith.constant 0 : index
    %c2_230 = arith.constant 2 : index
    %c0_231 = arith.constant 0 : index
    %233 = vector.load %arg24[%c0_228, %c0_229, %c2_230, %c0_231] : memref<2x10x10x128xf32, #tpu.memory_space<vmem>>, vector<2x8x8x128xf32>
    %234 = vector.shape_cast %233 : vector<2x8x8x128xf32> to vector<2x4x2x8x128xf32>
    %235 = vector.extract_strided_slice %234 {offsets = [0, 0, 0, 0, 0], sizes = [2, 4, 1, 8, 128], strides = [1, 1, 1, 1, 1]} : vector<2x4x2x8x128xf32> to vector<2x4x1x8x128xf32>
    %236 = vector.shape_cast %235 : vector<2x4x1x8x128xf32> to vector<2x4x8x128xf32>
    %237 = vector.shape_cast %236 : vector<2x4x8x128xf32> to vector<64x128xf32>
    %238 = arith.truncf %237 : vector<64x128xf32> to vector<64x128xbf16>
    %c0_232 = arith.constant 0 : index
    %c256_233 = arith.constant 256 : index
    %239 = vector.load %arg27[%c0_232, %c256_233] : memref<64x1152xbf16, #tpu.memory_space<vmem>>, vector<64x128xbf16>
    tpu.vector_store %arg27[%c0_232, %c256_233], %238 {strides = array<i32>} : memref<64x1152xbf16, #tpu.memory_space<vmem>>, vector<64x128xbf16>,
    %c0_234 = arith.constant 0 : index
    %c1_235 = arith.constant 1 : index
    %c0_236 = arith.constant 0 : index
    %c0_237 = arith.constant 0 : index
    %240 = vector.load %arg24[%c0_234, %c1_235, %c0_236, %c0_237] : memref<2x10x10x128xf32, #tpu.memory_space<vmem>>, vector<2x8x8x128xf32>
    %241 = vector.shape_cast %240 : vector<2x8x8x128xf32> to vector<2x4x2x8x128xf32>
    %242 = vector.extract_strided_slice %241 {offsets = [0, 0, 0, 0, 0], sizes = [2, 4, 1, 8, 128], strides = [1, 1, 1, 1, 1]} : vector<2x4x2x8x128xf32> to vector<2x4x1x8x128xf32>
    %243 = vector.shape_cast %242 : vector<2x4x1x8x128xf32> to vector<2x4x8x128xf32>
    %244 = vector.shape_cast %243 : vector<2x4x8x128xf32> to vector<64x128xf32>
    %245 = arith.truncf %244 : vector<64x128xf32> to vector<64x128xbf16>
    %c0_238 = arith.constant 0 : index
    %c384_239 = arith.constant 384 : index
    %246 = vector.load %arg27[%c0_238, %c384_239] : memref<64x1152xbf16, #tpu.memory_space<vmem>>, vector<64x128xbf16>
    tpu.vector_store %arg27[%c0_238, %c384_239], %245 {strides = array<i32>} : memref<64x1152xbf16, #tpu.memory_space<vmem>>, vector<64x128xbf16>,
    %c0_240 = arith.constant 0 : index
    %c1_241 = arith.constant 1 : index
    %c1_242 = arith.constant 1 : index
    %c0_243 = arith.constant 0 : index
    %247 = vector.load %arg24[%c0_240, %c1_241, %c1_242, %c0_243] : memref<2x10x10x128xf32, #tpu.memory_space<vmem>>, vector<2x8x8x128xf32>
    %248 = vector.shape_cast %247 : vector<2x8x8x128xf32> to vector<2x4x2x8x128xf32>
    %249 = vector.extract_strided_slice %248 {offsets = [0, 0, 0, 0, 0], sizes = [2, 4, 1, 8, 128], strides = [1, 1, 1, 1, 1]} : vector<2x4x2x8x128xf32> to vector<2x4x1x8x128xf32>
    %250 = vector.shape_cast %249 : vector<2x4x1x8x128xf32> to vector<2x4x8x128xf32>
    %251 = vector.shape_cast %250 : vector<2x4x8x128xf32> to vector<64x128xf32>
    %252 = arith.truncf %251 : vector<64x128xf32> to vector<64x128xbf16>
    %c0_244 = arith.constant 0 : index
    %c512_245 = arith.constant 512 : index
    %253 = vector.load %arg27[%c0_244, %c512_245] : memref<64x1152xbf16, #tpu.memory_space<vmem>>, vector<64x128xbf16>
    tpu.vector_store %arg27[%c0_244, %c512_245], %252 {strides = array<i32>} : memref<64x1152xbf16, #tpu.memory_space<vmem>>, vector<64x128xbf16>,
    %c0_246 = arith.constant 0 : index
    %c1_247 = arith.constant 1 : index
    %c2_248 = arith.constant 2 : index
    %c0_249 = arith.constant 0 : index
    %254 = vector.load %arg24[%c0_246, %c1_247, %c2_248, %c0_249] : memref<2x10x10x128xf32, #tpu.memory_space<vmem>>, vector<2x8x8x128xf32>
    %255 = vector.shape_cast %254 : vector<2x8x8x128xf32> to vector<2x4x2x8x128xf32>
    %256 = vector.extract_strided_slice %255 {offsets = [0, 0, 0, 0, 0], sizes = [2, 4, 1, 8, 128], strides = [1, 1, 1, 1, 1]} : vector<2x4x2x8x128xf32> to vector<2x4x1x8x128xf32>
    %257 = vector.shape_cast %256 : vector<2x4x1x8x128xf32> to vector<2x4x8x128xf32>
    %258 = vector.shape_cast %257 : vector<2x4x8x128xf32> to vector<64x128xf32>
    %259 = arith.truncf %258 : vector<64x128xf32> to vector<64x128xbf16>
    %c0_250 = arith.constant 0 : index
    %c640 = arith.constant 640 : index
    %260 = vector.load %arg27[%c0_250, %c640] : memref<64x1152xbf16, #tpu.memory_space<vmem>>, vector<64x128xbf16>
    tpu.vector_store %arg27[%c0_250, %c640], %259 {strides = array<i32>} : memref<64x1152xbf16, #tpu.memory_space<vmem>>, vector<64x128xbf16>,
    %c0_251 = arith.constant 0 : index
    %c2_252 = arith.constant 2 : index
    %c0_253 = arith.constant 0 : index
    %c0_254 = arith.constant 0 : index
    %261 = vector.load %arg24[%c0_251, %c2_252, %c0_253, %c0_254] : memref<2x10x10x128xf32, #tpu.memory_space<vmem>>, vector<2x8x8x128xf32>
    %262 = vector.shape_cast %261 : vector<2x8x8x128xf32> to vector<2x4x2x8x128xf32>
    %263 = vector.extract_strided_slice %262 {offsets = [0, 0, 0, 0, 0], sizes = [2, 4, 1, 8, 128], strides = [1, 1, 1, 1, 1]} : vector<2x4x2x8x128xf32> to vector<2x4x1x8x128xf32>
    %264 = vector.shape_cast %263 : vector<2x4x1x8x128xf32> to vector<2x4x8x128xf32>
    %265 = vector.shape_cast %264 : vector<2x4x8x128xf32> to vector<64x128xf32>
    %266 = arith.truncf %265 : vector<64x128xf32> to vector<64x128xbf16>
    %c0_255 = arith.constant 0 : index
    %c768 = arith.constant 768 : index
    %267 = vector.load %arg27[%c0_255, %c768] : memref<64x1152xbf16, #tpu.memory_space<vmem>>, vector<64x128xbf16>
    tpu.vector_store %arg27[%c0_255, %c768], %266 {strides = array<i32>} : memref<64x1152xbf16, #tpu.memory_space<vmem>>, vector<64x128xbf16>,
    %c0_256 = arith.constant 0 : index
    %c2_257 = arith.constant 2 : index
    %c1_258 = arith.constant 1 : index
    %c0_259 = arith.constant 0 : index
    %268 = vector.load %arg24[%c0_256, %c2_257, %c1_258, %c0_259] : memref<2x10x10x128xf32, #tpu.memory_space<vmem>>, vector<2x8x8x128xf32>
    %269 = vector.shape_cast %268 : vector<2x8x8x128xf32> to vector<2x4x2x8x128xf32>
    %270 = vector.extract_strided_slice %269 {offsets = [0, 0, 0, 0, 0], sizes = [2, 4, 1, 8, 128], strides = [1, 1, 1, 1, 1]} : vector<2x4x2x8x128xf32> to vector<2x4x1x8x128xf32>
    %271 = vector.shape_cast %270 : vector<2x4x1x8x128xf32> to vector<2x4x8x128xf32>
    %272 = vector.shape_cast %271 : vector<2x4x8x128xf32> to vector<64x128xf32>
    %273 = arith.truncf %272 : vector<64x128xf32> to vector<64x128xbf16>
    %c0_260 = arith.constant 0 : index
    %c896 = arith.constant 896 : index
    %274 = vector.load %arg27[%c0_260, %c896] : memref<64x1152xbf16, #tpu.memory_space<vmem>>, vector<64x128xbf16>
    tpu.vector_store %arg27[%c0_260, %c896], %273 {strides = array<i32>} : memref<64x1152xbf16, #tpu.memory_space<vmem>>, vector<64x128xbf16>,
    %c0_261 = arith.constant 0 : index
    %c2_262 = arith.constant 2 : index
    %c2_263 = arith.constant 2 : index
    %c0_264 = arith.constant 0 : index
    %275 = vector.load %arg24[%c0_261, %c2_262, %c2_263, %c0_264] : memref<2x10x10x128xf32, #tpu.memory_space<vmem>>, vector<2x8x8x128xf32>
    %276 = vector.shape_cast %275 : vector<2x8x8x128xf32> to vector<2x4x2x8x128xf32>
    %277 = vector.extract_strided_slice %276 {offsets = [0, 0, 0, 0, 0], sizes = [2, 4, 1, 8, 128], strides = [1, 1, 1, 1, 1]} : vector<2x4x2x8x128xf32> to vector<2x4x1x8x128xf32>
    %278 = vector.shape_cast %277 : vector<2x4x1x8x128xf32> to vector<2x4x8x128xf32>
    %279 = vector.shape_cast %278 : vector<2x4x8x128xf32> to vector<64x128xf32>
    %280 = arith.truncf %279 : vector<64x128xf32> to vector<64x128xbf16>
    %c0_265 = arith.constant 0 : index
    %c1024 = arith.constant 1024 : index
    %281 = vector.load %arg27[%c0_265, %c1024] : memref<64x1152xbf16, #tpu.memory_space<vmem>>, vector<64x128xbf16>
    tpu.vector_store %arg27[%c0_265, %c1024], %280 {strides = array<i32>} : memref<64x1152xbf16, #tpu.memory_space<vmem>>, vector<64x128xbf16>,
    %c0_266 = arith.constant 0 : index
    %c0_267 = arith.constant 0 : index
    %282 = vector.load %arg27[%c0_266, %c0_267] : memref<64x1152xbf16, #tpu.memory_space<vmem>>, vector<64x1152xbf16>
    %c0_268 = arith.constant 0 : index
    %c0_269 = arith.constant 0 : index
    %283 = vector.load %arg13[%c0_268, %c0_269] : memref<1152x128xbf16, #tpu.memory_space<vmem>>, vector<1152x128xbf16>
    %cst_270 = arith.constant dense<0.000000e+00> : vector<64x128xf32>
    %284 = tpu.matmul %282, %283, %cst_270 {dimension_numbers = #tpu.dot_dimension_numbers<[1], [0], [0], [1], [0, 0, 1, 1], [], []>} : vector<64x1152xbf16>, vector<1152x128xbf16>, vector<64x128xf32> -> vector<64x128xf32>
    %c0_271 = arith.constant 0 : index
    %c0_272 = arith.constant 0 : index
    %285 = vector.load %arg18[%c0_271, %c0_272] : memref<32x64xbf16, #tpu.memory_space<vmem>>, vector<32x64xbf16>
    %286 = arith.extf %285 : vector<32x64xbf16> to vector<32x64xf32>
    %cst_273 = arith.constant dense<0.000000e+00> : vector<32x128xf32>
    %287 = tpu.matmul %286, %284, %cst_273 {dimension_numbers = #tpu.dot_dimension_numbers<[1], [0], [0], [1], [0, 0, 1, 1], [], []>} : vector<32x64xf32>, vector<64x128xf32>, vector<32x128xf32> -> vector<32x128xf32>
    %c0_274 = arith.constant 0 : index
    %c0_275 = arith.constant 0 : index
    %288 = vector.load %arg14[%c0_274, %c0_275] : memref<1x128xf32, #tpu.memory_space<vmem>>, vector<1x128xf32>
    %289 = vector.broadcast %288 : vector<1x128xf32> to vector<32x128xf32>
    %290 = arith.addf %287, %289 : vector<32x128xf32>
    %c0_276 = arith.constant 0 : index
    %c0_277 = arith.constant 0 : index
    %291 = vector.load %arg15[%c0_276, %c0_277] : memref<1x128xf32, #tpu.memory_space<vmem>>, vector<1x128xf32>
    %c0_278 = arith.constant 0 : index
    %c0_279 = arith.constant 0 : index
    %292 = vector.load %arg16[%c0_278, %c0_279] : memref<1x128xf32, #tpu.memory_space<vmem>>, vector<1x128xf32>
    %cst_280 = arith.constant 0.000000e+00 : f32
    %293 = vector.broadcast %cst_280 : f32 to vector<32x128xf32>
    %294 = arith.maximumf %290, %293 : vector<32x128xf32>
    %cst_281 = arith.constant dense<0.000000e+00> : vector<128xf32>
    %295 = vector.multi_reduction <add>, %294, %cst_281 [0] : vector<32x128xf32> to vector<128xf32>
    %296 = vector.shape_cast %295 : vector<128xf32> to vector<1x128xf32>
    %cst_282 = arith.constant 3.200000e+01 : f32
    %297 = vector.broadcast %cst_282 : f32 to vector<1x128xf32>
    %298 = arith.divf %296, %297 : vector<1x128xf32>
    %299 = vector.broadcast %298 : vector<1x128xf32> to vector<32x128xf32>
    %300 = arith.subf %294, %299 : vector<32x128xf32>
    %301 = arith.mulf %300, %300 : vector<32x128xf32>
    %cst_283 = arith.constant dense<0.000000e+00> : vector<128xf32>
    %302 = vector.multi_reduction <add>, %301, %cst_283 [0] : vector<32x128xf32> to vector<128xf32>
    %303 = vector.shape_cast %302 : vector<128xf32> to vector<1x128xf32>
    %cst_284 = arith.constant 3.200000e+01 : f32
    %304 = vector.broadcast %cst_284 : f32 to vector<1x128xf32>
    %305 = arith.divf %303, %304 : vector<1x128xf32>
    %cst_285 = arith.constant 9.99999974E-6 : f32
    %306 = vector.broadcast %cst_285 : f32 to vector<1x128xf32>
    %307 = arith.addf %305, %306 : vector<1x128xf32>
    %308 = math.rsqrt %307 : vector<1x128xf32>
    %309 = arith.mulf %308, %291 : vector<1x128xf32>
    %310 = vector.broadcast %309 : vector<1x128xf32> to vector<32x128xf32>
    %311 = arith.mulf %300, %310 : vector<32x128xf32>
    %312 = vector.broadcast %292 : vector<1x128xf32> to vector<32x128xf32>
    %313 = arith.addf %311, %312 : vector<32x128xf32>
    %314 = vector.shape_cast %313 : vector<32x128xf32> to vector<2x16x128xf32>
    %cst_286 = arith.constant dense<0.000000e+00> : vector<2x128xf32>
    %315 = vector.multi_reduction <add>, %314, %cst_286 [1] : vector<2x16x128xf32> to vector<2x128xf32>
    %cst_287 = arith.constant 1.600000e+01 : f32
    %316 = vector.broadcast %cst_287 : f32 to vector<2x128xf32>
    %317 = arith.divf %315, %316 : vector<2x128xf32>
    %c0_288 = arith.constant 0 : index
    %c0_289 = arith.constant 0 : index
    %318 = vector.load %arg19[%c0_288, %c0_289] : memref<128x128xf32, #tpu.memory_space<vmem>>, vector<128x128xf32>
    %cst_290 = arith.constant dense<0.000000e+00> : vector<2x128xf32>
    %319 = tpu.matmul %317, %318, %cst_290 {dimension_numbers = #tpu.dot_dimension_numbers<[1], [0], [0], [1], [0, 0, 1, 1], [], []>} : vector<2x128xf32>, vector<128x128xf32>, vector<2x128xf32> -> vector<2x128xf32>
    %c0_291 = arith.constant 0 : index
    %c0_292 = arith.constant 0 : index
    %320 = vector.load %arg20[%c0_291, %c0_292] : memref<1x128xf32, #tpu.memory_space<vmem>>, vector<1x128xf32>
    %321 = vector.broadcast %320 : vector<1x128xf32> to vector<2x128xf32>
    %322 = arith.addf %319, %321 : vector<2x128xf32>
    %323 = vector.extract_strided_slice %322 {offsets = [0, 0], sizes = [2, 10], strides = [1, 1]} : vector<2x128xf32> to vector<2x10xf32>
    %cst_293 = arith.constant dense<0xFF800000> : vector<2xf32>
    %324 = vector.multi_reduction <maximumf>, %323, %cst_293 [1] : vector<2x10xf32> to vector<2xf32>
    %325 = vector.shape_cast %324 : vector<2xf32> to vector<2x1xf32>
    %326 = vector.broadcast %325 : vector<2x1xf32> to vector<2x10xf32>
    %327 = arith.subf %323, %326 : vector<2x10xf32>
    %328 = math.exp %327 : vector<2x10xf32>
    %cst_294 = arith.constant dense<0.000000e+00> : vector<2xf32>
    %329 = vector.multi_reduction <add>, %328, %cst_294 [1] : vector<2x10xf32> to vector<2xf32>
    %330 = vector.shape_cast %329 : vector<2xf32> to vector<2x1xf32>
    %331 = vector.broadcast %330 : vector<2x1xf32> to vector<2x10xf32>
    %332 = arith.divf %328, %331 : vector<2x10xf32>
    %c0_295 = arith.constant 0 : index
    %c0_296 = arith.constant 0 : index
    %333 = vector.load %arg21[%c0_295, %c0_296] : memref<2x10xf32, #tpu.memory_space<vmem>>, vector<2x10xf32>
    tpu.vector_store %arg21[%c0_295, %c0_296], %332 {strides = array<i32>} : memref<2x10xf32, #tpu.memory_space<vmem>>, vector<2x10xf32>,
    return
  }
}

</mosaic_0001>

<bundles_post_ra>
// kernel: convnet_forward.1
= control target key start
LH: loop header
LB: loop body
LE: loop exit
PB: predicated region body
PF: predicated region fallthrough
CT: control target
= control target key end

     0   :  { %s11218_s0 = inlined_call_operand.vmem [shape: f32[512,9], index: 0, kind: input, shape index: {}]   ;;  %s11219_s1 = inlined_call_operand.vmem [shape: f32[9,32], index: 1, kind: input, shape index: {}]   ;;  %s11220_s2 = inlined_call_operand.vmem [shape: f32[1,32], index: 2, kind: input, shape index: {}]   ;;  %s11221_s3 = inlined_call_operand.vmem [shape: f32[1,32], index: 3, kind: input, shape index: {}]   ;;  %s11222_s4 = inlined_call_operand.vmem [shape: f32[1,32], index: 4, kind: input, shape index: {}]   ;;  %s11223_s5 = inlined_call_operand.vmem [shape: bf16[288,64], index: 5, kind: input, shape index: {}]   ;;  %s11224_s6 = inlined_call_operand.vmem [shape: f32[1,64], index: 6, kind: input, shape index: {}]   ;;  %s11225_s7 = inlined_call_operand.vmem [shape: f32[1,64], index: 7, kind: input, shape index: {}]   ;;  %s11226_s8 = inlined_call_operand.vmem [shape: f32[1,64], index: 8, kind: input, shape index: {}]   ;;  %s11227_s9 = inlined_call_operand.vmem [shape: bf16[576,128], index: 9, kind: input, shape index: {}]   ;;  %s11228_s10 = inlined_call_operand.vmem [shape: f32[1,128], index: 10, kind: input, shape index: {}]   ;;  %s11229_s11 = inlined_call_operand.vmem [shape: f32[1,128], index: 11, kind: input, shape index: {}]   ;;  %s11230_s12 = inlined_call_operand.vmem [shape: f32[1,128], index: 12, kind: input, shape index: {}]   ;;  %s11231_s13 = inlined_call_operand.vmem [shape: bf16[1152,128], index: 13, kind: input, shape index: {}]   ;;  %s11232_s14 = inlined_call_operand.vmem [shape: f32[1,128], index: 14, kind: input, shape index: {}]   ;;  %s11233_s15 = inlined_call_operand.vmem [shape: f32[1,128], index: 15, kind: input, shape index: {}]   ;;  %s11234_s16 = inlined_call_operand.vmem [shape: f32[1,128], index: 16, kind: input, shape index: {}]   ;;  %s11235_s17 = inlined_call_operand.vmem [shape: bf16[128,256], index: 17, kind: input, shape index: {}]   ;;  %s11236_s18 = inlined_call_operand.vmem [shape: bf16[32,64], index: 18, kind: input, shape index: {}]   ;;  %s11237_s19 = inlined_call_operand.vmem [shape: f32[128,128], index: 19, kind: input, shape index: {}]   ;;  %s11238_s20 = inlined_call_operand.vmem [shape: f32[1,128], index: 20, kind: input, shape index: {}]   ;;  %s11239_s21 = inlined_call_operand.hbm [shape: f32[2,10], index: 21, kind: output, shape index: {}]  }
   0x1   :  { %11342 = sst [smem:[#allocation37_spill]] %s11218_s0 }
   0x2   :  { %11343 = sst [smem:[#allocation38_spill]] %s11219_s1 }
   0x3   :  { %11344 = sst [smem:[#allocation39_spill]] %s11220_s2 }
   0x4   :  { %11345 = sst [smem:[#allocation40_spill]] %s11221_s3 }
   0x5   :  { %11346 = sst [smem:[#allocation41_spill]] %s11222_s4 }
   0x6   :  { %11347 = sst [smem:[#allocation42_spill]] %s11223_s5 }
   0x7   :  { %s11348_s26 = sld [smem:[#allocation38_spill]]  ;;  %vm336_vm0 = vcmask 1040384   ;;  %s11349_s0 = sld [smem:[#allocation37_spill]]  ;;  %vm7451_vm1 = vmmov 1   ;;  %vm143_vm3 = vcmask 72704  }
   0x8   :  { %vm7186_vm2 = vmpackc.low %vm336_vm0, %vm7451_vm1 }
   0xd   :  { %v134_v0 = vld [vmem:[%s11348_s26] sm:$0xff]  ;;  %v135_v1 = vld [vmem:[%s11348_s26 + $0x8] sm:$0x1]  ;;  %v72_v5 = vld [vmem:[%s11349_s0 + $0x10] sm:$0xff] }
   0xe   :  { %v70_v2 = vld [vmem:[%s11349_s0] sm:$0xff]  ;;  %v7185_v3 = vpack.c.bf16 %v135_v1, %v134_v0  ;;  %v71_v4 = vld [vmem:[%s11349_s0 + $0x8] sm:$0xff]  ;;  %v73_v6 = vld [vmem:[%s11349_s0 + $0x18] sm:$0xff] }
   0xf   :  { %6948 = vmatprep.mubr.msk.f32.mxu0 %vm143_vm3, %v70_v2  ;;  %v74_v7 = vld [vmem:[%s11349_s0 + $0x20] sm:$0xff]  ;;  %v75_v8 = vld [vmem:[%s11349_s0 + $0x28] sm:$0xff]  ;;  %v76_v9 = vld [vmem:[%s11349_s0 + $0x30] sm:$0xff] }
  0x10   :  { %7187 = vmatprep.subr.msk.bf16.mxu0 %vm7186_vm2, %v7185_v3  ;;  %v77_v10 = vld [vmem:[%s11349_s0 + $0x38] sm:$0xff]  ;;  %v78_v11 = vld [vmem:[%s11349_s0 + $0x40] sm:$0xff]  ;;  %v79_v12 = vld [vmem:[%s11349_s0 + $0x48] sm:$0xff] }
  0x11   :  { %7190 = vmatpush3.bf16.msk.msra.mxu0 %vm7186_vm2, %v7185_v3  ;;  %v80_v13 = vld [vmem:[%s11349_s0 + $0x50] sm:$0xff]  ;;  %v81_v14 = vld [vmem:[%s11349_s0 + $0x58] sm:$0xff]  ;;  %v82_v15 = vld [vmem:[%s11349_s0 + $0x60] sm:$0xff] }
  0x12   :  { %v83_v16 = vld [vmem:[%s11349_s0 + $0x68] sm:$0xff]  ;;  %v84_v17 = vld [vmem:[%s11349_s0 + $0x70] sm:$0xff]  ;;  %v85_v18 = vld [vmem:[%s11349_s0 + $0x78] sm:$0xff] }
  0x13   :  { %v86_v19 = vld [vmem:[%s11349_s0 + $0x80] sm:$0xff]  ;;  %v87_v20 = vld [vmem:[%s11349_s0 + $0x88] sm:$0xff]  ;;  %v88_v21 = vld [vmem:[%s11349_s0 + $0x90] sm:$0xff] }
  0x14   :  { %6949 = vmatmul.mubr.msk.f32.vlgmr.msra.gmra.mrb[0].mxu0 %vm143_vm3, %v71_v4  ;;  %v89_v22 = vld [vmem:[%s11349_s0 + $0x98] sm:$0xff]  ;;  %v90_v23 = vld [vmem:[%s11349_s0 + $0xa0] sm:$0xff]  ;;  %v91_v24 = vld [vmem:[%s11349_s0 + $0xa8] sm:$0xff] }
  0x15   :  { %6951 = vmatprep.mubr.msk.f32.mxu0 %vm143_vm3, %v72_v5  ;;  %v92_v25 = vld [vmem:[%s11349_s0 + $0xb0] sm:$0xff]  ;;  %v93_v26 = vld [vmem:[%s11349_s0 + $0xb8] sm:$0xff]  ;;  %v94_v27 = vld [vmem:[%s11349_s0 + $0xc0] sm:$0xff] }
  0x16   :  { %v95_v28 = vld [vmem:[%s11349_s0 + $0xc8] sm:$0xff]  ;;  %v96_v29 = vld [vmem:[%s11349_s0 + $0xd0] sm:$0xff]  ;;  %v97_v30 = vld [vmem:[%s11349_s0 + $0xd8] sm:$0xff] }
  0x17   :  { %v98_v31 = vld [vmem:[%s11349_s0 + $0xe0] sm:$0xff]  ;;  %v99_v32 = vld [vmem:[%s11349_s0 + $0xe8] sm:$0xff]  ;;  %v100_v33 = vld [vmem:[%s11349_s0 + $0xf0] sm:$0xff] }
  0x18   :  { %6952 = vmatmul.mubr.msk.f32.gmra.mrb[2].mxu0 %vm143_vm3, %v73_v6  ;;  %v101_v34 = vld [vmem:[%s11349_s0 + $0xf8] sm:$0xff]  ;;  %v102_v35 = vld [vmem:[%s11349_s0 + $0x100] sm:$0xff]  ;;  %v103_v36 = vld [vmem:[%s11349_s0 + $0x108] sm:$0xff] }
  0x19   :  { %6954 = vmatprep.mubr.msk.f32.mxu0 %vm143_vm3, %v74_v7  ;;  %v104_v37 = vld [vmem:[%s11349_s0 + $0x110] sm:$0xff]  ;;  %v105_v38 = vld [vmem:[%s11349_s0 + $0x118] sm:$0xff]  ;;  %v106_v39 = vld [vmem:[%s11349_s0 + $0x120] sm:$0xff] }
  0x1a   :  { %v107_v40 = vld [vmem:[%s11349_s0 + $0x128] sm:$0xff]  ;;  %v108_v41 = vld [vmem:[%s11349_s0 + $0x130] sm:$0xff]  ;;  %v109_v42 = vld [vmem:[%s11349_s0 + $0x138] sm:$0xff] }
  0x1b   :  { %v110_v43 = vld [vmem:[%s11349_s0 + $0x140] sm:$0xff]  ;;  %v111_v44 = vld [vmem:[%s11349_s0 + $0x148] sm:$0xff]  ;;  %v112_v45 = vld [vmem:[%s11349_s0 + $0x150] sm:$0xff] }
  0x1c   :  { %6955 = vmatmul.mubr.msk.f32.gmra.mrb[4].mxu0 %vm143_vm3, %v75_v8  ;;  %v113_v46 = vld [vmem:[%s11349_s0 + $0x158] sm:$0xff]  ;;  %v114_v47 = vld [vmem:[%s11349_s0 + $0x160] sm:$0xff]  ;;  %v115_v48 = vld [vmem:[%s11349_s0 + $0x168] sm:$0xff] }
  0x1d   :  { %6957 = vmatprep.mubr.msk.f32.mxu0 %vm143_vm3, %v76_v9  ;;  %v116_v49 = vld [vmem:[%s11349_s0 + $0x170] sm:$0xff]  ;;  %v117_v50 = vld [vmem:[%s11349_s0 + $0x178] sm:$0xff]  ;;  %v118_v51 = vld [vmem:[%s11349_s0 + $0x180] sm:$0xff] }
  0x1e   :  { %v119_v52 = vld [vmem:[%s11349_s0 + $0x188] sm:$0xff]  ;;  %v120_v53 = vld [vmem:[%s11349_s0 + $0x190] sm:$0xff]  ;;  %v121_v54 = vld [vmem:[%s11349_s0 + $0x198] sm:$0xff] }
  0x1f   :  { %v122_v55 = vld [vmem:[%s11349_s0 + $0x1a0] sm:$0xff] }
  0x20   :  { %6958 = vmatmul.mubr.msk.f32.gmra.mrb[6].mxu0 %vm143_vm3, %v77_v10 }
  0x21   :  { %6960 = vmatprep.mubr.msk.f32.mxu0 %vm143_vm3, %v78_v11 }
  0x24   :  { %6961 = vmatmul.mubr.msk.f32.gmra.mrb[8].mxu0 %vm143_vm3, %v79_v12 }
  0x25   :  { %6963 = vmatprep.mubr.msk.f32.mxu0 %vm143_vm3, %v80_v13 }
  0x28   :  { %6964 = vmatmul.mubr.msk.f32.gmra.mrb[10].mxu0 %vm143_vm3, %v81_v14 }
  0x29   :  { %6966 = vmatprep.mubr.msk.f32.mxu0 %vm143_vm3, %v82_v15 }
  0x2c   :  { %6967 = vmatmul.mubr.msk.f32.gmra.mrb[12].mxu0 %vm143_vm3, %v83_v16 }
  0x2d   :  { %6969 = vmatprep.mubr.msk.f32.mxu0 %vm143_vm3, %v84_v17 }
  0x30   :  { %6970 = vmatmul.mubr.msk.f32.gmra.mrb[14].mxu0 %vm143_vm3, %v85_v18 }
  0x31   :  { %6972 = vmatprep.mubr.msk.f32.mxu0 %vm143_vm3, %v86_v19 }
  0x34   :  { %6973 = vmatmul.mubr.msk.f32.gmra.mrb[16].mxu0 %vm143_vm3, %v87_v20 }
  0x35   :  { %6975 = vmatprep.mubr.msk.f32.mxu0 %vm143_vm3, %v88_v21 }
  0x38   :  { %6976 = vmatmul.mubr.msk.f32.gmra.mrb[18].mxu0 %vm143_vm3, %v89_v22 }
  0x39   :  { %6978 = vmatprep.mubr.msk.f32.mxu0 %vm143_vm3, %v90_v23 }
  0x3c   :  { %6979 = vmatmul.mubr.msk.f32.gmra.mrb[20].mxu0 %vm143_vm3, %v91_v24 }
  0x3d   :  { %6981 = vmatprep.mubr.msk.f32.mxu0 %vm143_vm3, %v92_v25 }
  0x40   :  { %6982 = vmatmul.mubr.msk.f32.gmra.mrb[22].mxu0 %vm143_vm3, %v93_v26 }
  0x41   :  { %6984 = vmatprep.mubr.msk.f32.mxu0 %vm143_vm3, %v94_v27 }
  0x44   :  { %6985 = vmatmul.mubr.msk.f32.gmra.mrb[24].mxu0 %vm143_vm3, %v95_v28 }
  0x45   :  { %6987 = vmatprep.mubr.msk.f32.mxu0 %vm143_vm3, %v96_v29 }
  0x48   :  { %6988 = vmatmul.mubr.msk.f32.gmra.mrb[26].mxu0 %vm143_vm3, %v97_v30 }
  0x49   :  { %6990 = vmatprep.mubr.msk.f32.mxu0 %vm143_vm3, %v98_v31 }
  0x4c   :  { %6991 = vmatmul.mubr.msk.f32.gmra.mrb[28].mxu0 %vm143_vm3, %v99_v32 }
  0x4d   :  { %6993 = vmatprep.mubr.msk.f32.mxu0 %vm143_vm3, %v100_v33 }
  0x50   :  { %6994 = vmatmul.mubr.msk.f32.gmra.mrb[30].mxu0 %vm143_vm3, %v101_v34 }
  0x51   :  { %6996 = vmatprep.mubr.msk.f32.mxu0 %vm143_vm3, %v102_v35 }
  0x54   :  { %6997 = vmatmul.mubr.msk.f32.gmra.mrb[32].mxu0 %vm143_vm3, %v103_v36 }
  0x55   :  { %6999 = vmatprep.mubr.msk.f32.mxu0 %vm143_vm3, %v104_v37 }
  0x58   :  { %7000 = vmatmul.mubr.msk.f32.gmra.mrb[34].mxu0 %vm143_vm3, %v105_v38 }
  0x59   :  { %7002 = vmatprep.mubr.msk.f32.mxu0 %vm143_vm3, %v106_v39 }
  0x5c   :  { %7003 = vmatmul.mubr.msk.f32.gmra.mrb[36].mxu0 %vm143_vm3, %v107_v40 }
  0x5d   :  { %7005 = vmatprep.mubr.msk.f32.mxu0 %vm143_vm3, %v108_v41 }
  0x60   :  { %7006 = vmatmul.mubr.msk.f32.gmra.mrb[38].mxu0 %vm143_vm3, %v109_v42 }
  0x61   :  { %7008 = vmatprep.mubr.msk.f32.mxu0 %vm143_vm3, %v110_v43 }
  0x64   :  { %7009 = vmatmul.mubr.msk.f32.gmra.mrb[40].mxu0 %vm143_vm3, %v111_v44 }
  0x65   :  { %7011 = vmatprep.mubr.msk.f32.mxu0 %vm143_vm3, %v112_v45 }
  0x68   :  { %7012 = vmatmul.mubr.msk.f32.gmra.mrb[42].mxu0 %vm143_vm3, %v113_v46 }
  0x69   :  { %7014 = vmatprep.mubr.msk.f32.mxu0 %vm143_vm3, %v114_v47 }
  0x6c   :  { %7015 = vmatmul.mubr.msk.f32.gmra.mrb[44].mxu0 %vm143_vm3, %v115_v48 }
  0x6d   :  { %7017 = vmatprep.mubr.msk.f32.mxu0 %vm143_vm3, %v116_v49 }
  0x70   :  { %7018 = vmatmul.mubr.msk.f32.gmra.mrb[46].mxu0 %vm143_vm3, %v117_v50 }
  0x71   :  { %7020 = vmatprep.mubr.msk.f32.mxu0 %vm143_vm3, %v118_v51 }
  0x74   :  { %7021 = vmatmul.mubr.msk.f32.gmra.mrb[48].mxu0 %vm143_vm3, %v119_v52 }
  0x75   :  { %7023 = vmatprep.mubr.msk.f32.mxu0 %vm143_vm3, %v120_v53 }
  0x78   :  { %7024 = vmatmul.mubr.msk.f32.gmra.mrb[50].mxu0 %vm143_vm3, %v121_v54 }
  0x79   :  { %26 = vsyncpa [#allocation9], 0  ;;  %7026 = vmatprep.mubr.msk.f32.mxu0 %vm143_vm3, %v122_v55  ;;  %v123_v56 = vld [vmem:[%s11349_s0 + $0x1a8] sm:$0xff]  ;;  %v124_v57 = vld [vmem:[%s11349_s0 + $0x1b0] sm:$0xff]  ;;  %s11350_s5 = sld [smem:[#allocation39_spill]]  ;;  %vm791_vm4 = vcmask 261120  }
  0x7a   :  { %v125_v58 = vld [vmem:[%s11349_s0 + $0x1b8] sm:$0xff]  ;;  %v126_v59 = vld [vmem:[%s11349_s0 + $0x1c0] sm:$0xff]  ;;  %v127_v60 = vld [vmem:[%s11349_s0 + $0x1c8] sm:$0xff]  ;;  %vm1397_vm5 = vcmask 254976   ;;  %s7454_s22 = smov 64   ;;  %vm1409_vm6 = vcmask 253952  }
  0x7b   :  { %v128_v61 = vld [vmem:[%s11349_s0 + $0x1d0] sm:$0xff]  ;;  %v129_v62 = vld [vmem:[%s11349_s0 + $0x1d8] sm:$0xff]  ;;  %v130_v63 = vld [vmem:[%s11349_s0 + $0x1e0] sm:$0xff]  ;;  %s11467_s24 = sld [smem:[#allocation40_spill]]  ;;  %s11469_s26 = sld [smem:[#allocation41_spill]]  ;;  %vm1650_vm7 = vcmask 523520  }
  0x7c   :  { %7027 = vmatmul.mubr.msk.f32.gmra.mrb[52].mxu0 %vm143_vm3, %v123_v56  ;;  %v131_v0 = vld [vmem:[%s11349_s0 + $0x1e8] sm:$0xff]  ;;  %v132_v1 = vld [vmem:[%s11349_s0 + $0x1f0] sm:$0xff]  ;;  %v133_v2 = vld [vmem:[%s11349_s0 + $0x1f8] sm:$0xff]  ;;  %s7453_s0 = smov 32   ;;  %s11470_s28 = sld [smem:[#allocation42_spill]]  ;;  %vm1779_vm8 = vcmask 785920  }
  0x7d   :  { %7029 = vmatprep.mubr.msk.f32.mxu0 %vm143_vm3, %v124_v57  ;;  %vm1908_vm9 = vcmask 1048320   ;;  %vm3218_vm10 = vcmask 523264   ;;  %vm3400_vm11 = vcmask 516096   ;;  %vm3391_vm12 = vcmask 517120   ;;  %s7458_s27 = smov [#allocation8]  }
  0x7e   :  { %vm3521_vm13 = vcmask 1048064   ;;  %vm7457_vm14 = vmmov 0   ;;  %vm5990_vm15 = vcmask 1041409   ;;  %vm6063_vm0 = vcmask 74752   ;;  %s6082_s3 = sshll.u32 %s7458_s27, 4  ;;  %s6083_s3 = int_to_ptr.vmem [resolvable:$true] %s6082_s3 }
  0x7f   :  { %v7834_v3 = vld [vmem:[%s11350_s5] ss:$0 sm:$0xff]  ;;  %p7432_p1 = scmp.lt.s32.totalorder %s6083_s3, %s6083_s3 }
  0x80   :  { %7030 = vmatmul.mubr.msk.f32.gmra.mrb[54].mxu0 %vm143_vm3, %v125_v58 }
  0x81   :  { %7032 = vmatprep.mubr.msk.f32.mxu0 %vm143_vm3, %v126_v59 }
  0x84   :  { %7033 = vmatmul.mubr.msk.f32.gmra.mrb[56].mxu0 %vm143_vm3, %v127_v60 }
  0x85   :  { %7035 = vmatprep.mubr.msk.f32.mxu0 %vm143_vm3, %v128_v61 }
  0x88   :  { %7036 = vmatmul.mubr.msk.f32.gmra.mrb[58].mxu0 %vm143_vm3, %v129_v62 }
  0x89   :  { %7038 = vmatprep.mubr.msk.f32.mxu0 %vm143_vm3, %v130_v63 }
  0x8c   :  { %7039 = vmatmul.mubr.msk.f32.gmra.mrb[60].mxu0 %vm143_vm3, %v131_v0 }
  0x8d   :  { %7041 = vmatprep.mubr.msk.f32.mxu0 %vm143_vm3, %v132_v1 }
  0x90   :  { %7042 = vmatmul.mubr.msk.f32.gmra.mrb[62].mxu0 %vm143_vm3, %v133_v2 }
  0xe7   :  { %v6950_v4 = vpop.f32.mrb[0].mxu0 }
  0xe8   :  { %v7837_v5 = vadd.f32 %v6950_v4, %v7834_v3  ;;  %v406_v6 = vpop.f32.mrb[1].mxu0 }
  0xe9   :  { %v7840_v7 = vadd.f32 %v7834_v3, %v406_v6 }
  0xea   :  { %v11287_v8 = vmax.f32 %v7837_v5, 0.0 }
  0xeb   :  { %v11288_v9 = vmax.f32 %v7840_v7, 0.0  ;;  %v6953_v10 = vpop.f32.mrb[2].mxu0 }
  0xec   :  { %v7845_v11 = vadd.f32 %v6953_v10, %v7834_v3  ;;  %v416_v12 = vpop.f32.mrb[3].mxu0  ;;  %v793_v13 = vsel %vm791_vm4, %v11287_v8, 0.0 }
  0xed   :  { %v792_v14 = vsel %vm791_vm4, %v11288_v9, 0.0  ;;  %v7854_v15 = vadd.f32 %v7834_v3, %v416_v12 }
  0xee   :  { %v11283_v16 = vmax.f32 %v7845_v11, 0.0  ;;  %v794_v19 = vadd.f32 %v793_v13, %v792_v14 }
  0xef   :  { %v11284_v17 = vmax.f32 %v7854_v15, 0.0  ;;  %v6956_v18 = vpop.f32.mrb[4].mxu0 }
  0xf0   :  { %v7859_v20 = vadd.f32 %v6956_v18, %v7834_v3  ;;  %v426_v21 = vpop.f32.mrb[5].mxu0  ;;  %v797_v25 = vsel %vm791_vm4, %v11283_v16, 0.0 }
  0xf1   :  { %v795_v22 = vsel %vm791_vm4, %v11284_v17, 0.0  ;;  %v7865_v23 = vadd.f32 %v7834_v3, %v426_v21 }
  0xf2   :  { %v796_v24 = vadd.f32 %v795_v22, %v794_v19  ;;  %v11279_v26 = vmax.f32 %v7859_v20, 0.0 }
  0xf3   :  { %v11280_v27 = vmax.f32 %v7865_v23, 0.0  ;;  %v6959_v28 = vpop.f32.mrb[6].mxu0 }
  0xf4   :  { %v798_v29 = vadd.f32 %v797_v25, %v796_v24  ;;  %v7873_v30 = vadd.f32 %v6959_v28, %v7834_v3  ;;  %v436_v31 = vpop.f32.mrb[7].mxu0  ;;  %v801_v35 = vsel %vm791_vm4, %v11279_v26, 0.0 }
  0xf5   :  { %v799_v32 = vsel %vm791_vm4, %v11280_v27, 0.0  ;;  %v7879_v33 = vadd.f32 %v7834_v3, %v436_v31 }
  0xf6   :  { %v800_v34 = vadd.f32 %v799_v32, %v798_v29  ;;  %v11275_v36 = vmax.f32 %v7873_v30, 0.0 }
  0xf7   :  { %v11276_v37 = vmax.f32 %v7879_v33, 0.0  ;;  %v6962_v38 = vpop.f32.mrb[8].mxu0 }
  0xf8   :  { %v802_v39 = vadd.f32 %v801_v35, %v800_v34  ;;  %v7887_v40 = vadd.f32 %v6962_v38, %v7834_v3  ;;  %v446_v41 = vpop.f32.mrb[9].mxu0  ;;  %v805_v45 = vsel %vm791_vm4, %v11275_v36, 0.0 }
  0xf9   :  { %v803_v42 = vsel %vm791_vm4, %v11276_v37, 0.0  ;;  %v7893_v43 = vadd.f32 %v7834_v3, %v446_v41 }
  0xfa   :  { %v804_v44 = vadd.f32 %v803_v42, %v802_v39  ;;  %v11271_v46 = vmax.f32 %v7887_v40, 0.0 }
  0xfb   :  { %v11272_v47 = vmax.f32 %v7893_v43, 0.0  ;;  %v6965_v48 = vpop.f32.mrb[10].mxu0 }
  0xfc   :  { %v806_v49 = vadd.f32 %v805_v45, %v804_v44  ;;  %v7901_v50 = vadd.f32 %v6965_v48, %v7834_v3  ;;  %v456_v51 = vpop.f32.mrb[11].mxu0  ;;  %v809_v55 = vsel %vm791_vm4, %v11271_v46, 0.0 }
  0xfd   :  { %v807_v52 = vsel %vm791_vm4, %v11272_v47, 0.0  ;;  %v7907_v53 = vadd.f32 %v7834_v3, %v456_v51 }
  0xfe   :  { %v808_v54 = vadd.f32 %v807_v52, %v806_v49  ;;  %v11267_v56 = vmax.f32 %v7901_v50, 0.0 }
  0xff   :  { %v11268_v57 = vmax.f32 %v7907_v53, 0.0  ;;  %v6968_v58 = vpop.f32.mrb[12].mxu0 }
 0x100   :  { %v810_v59 = vadd.f32 %v809_v55, %v808_v54  ;;  %v7915_v60 = vadd.f32 %v6968_v58, %v7834_v3  ;;  %v466_v61 = vpop.f32.mrb[13].mxu0  ;;  %v813_v1 = vsel %vm791_vm4, %v11267_v56, 0.0 }
 0x101   :  { %v811_v62 = vsel %vm791_vm4, %v11268_v57, 0.0  ;;  %v7921_v63 = vadd.f32 %v7834_v3, %v466_v61 }
 0x102   :  { %v812_v0 = vadd.f32 %v811_v62, %v810_v59  ;;  %v11263_v2 = vmax.f32 %v7915_v60, 0.0 }
 0x103   :  { %v11264_v4 = vmax.f32 %v7921_v63, 0.0  ;;  %v6971_v6 = vpop.f32.mrb[14].mxu0 }
 0x104   :  { %v814_v10 = vadd.f32 %v813_v1, %v812_v0  ;;  %v7929_v12 = vadd.f32 %v6971_v6, %v7834_v3  ;;  %v476_v13 = vpop.f32.mrb[15].mxu0  ;;  %v817_v21 = vsel %vm791_vm4, %v11263_v2, 0.0 }
 0x105   :  { %v815_v14 = vsel %vm791_vm4, %v11264_v4, 0.0  ;;  %v7935_v18 = vadd.f32 %v7834_v3, %v476_v13 }
 0x106   :  { %v816_v19 = vadd.f32 %v815_v14, %v814_v10  ;;  %v11259_v22 = vmax.f32 %v7929_v12, 0.0 }
 0x107   :  { %v11260_v24 = vmax.f32 %v7935_v18, 0.0  ;;  %v6974_v25 = vpop.f32.mrb[16].mxu0 }
 0x108   :  { %v818_v28 = vadd.f32 %v817_v21, %v816_v19  ;;  %v7943_v29 = vadd.f32 %v6974_v25, %v7834_v3  ;;  %v486_v31 = vpop.f32.mrb[17].mxu0  ;;  %v821_v38 = vsel %vm791_vm4, %v11259_v22, 0.0 }
 0x109   :  { %v819_v32 = vsel %vm791_vm4, %v11260_v24, 0.0  ;;  %v7949_v34 = vadd.f32 %v7834_v3, %v486_v31 }
 0x10a   :  { %v820_v35 = vadd.f32 %v819_v32, %v818_v28  ;;  %v11255_v39 = vmax.f32 %v7943_v29, 0.0 }
 0x10b   :  { %v11256_v41 = vmax.f32 %v7949_v34, 0.0  ;;  %v6977_v42 = vpop.f32.mrb[18].mxu0 }
 0x10c   :  { %v822_v44 = vadd.f32 %v821_v38, %v820_v35  ;;  %v7957_v45 = vadd.f32 %v6977_v42, %v7834_v3  ;;  %v496_v48 = vpop.f32.mrb[19].mxu0  ;;  %v825_v54 = vsel %vm791_vm4, %v11255_v39, 0.0 }
 0x10d   :  { %v823_v49 = vsel %vm791_vm4, %v11256_v41, 0.0  ;;  %v7963_v51 = vadd.f32 %v7834_v3, %v496_v48 }
 0x10e   :  { %v824_v52 = vadd.f32 %v823_v49, %v822_v44  ;;  %v11251_v55 = vmax.f32 %v7957_v45, 0.0 }
 0x10f   :  { %v11252_v58 = vmax.f32 %v7963_v51, 0.0  ;;  %v6980_v59 = vpop.f32.mrb[20].mxu0 }
 0x110   :  { %v826_v61 = vadd.f32 %v825_v54, %v824_v52  ;;  %v7971_v62 = vadd.f32 %v6980_v59, %v7834_v3  ;;  %v506_v0 = vpop.f32.mrb[21].mxu0  ;;  %v829_v13 = vsel %vm791_vm4, %v11251_v55, 0.0 }
 0x111   :  { %v827_v1 = vsel %vm791_vm4, %v11252_v58, 0.0  ;;  %v7977_v6 = vadd.f32 %v7834_v3, %v506_v0 }
 0x112   :  { %v828_v10 = vadd.f32 %v827_v1, %v826_v61  ;;  %v11247_v14 = vmax.f32 %v7971_v62, 0.0 }
 0x113   :  { %v11248_v19 = vmax.f32 %v7977_v6, 0.0  ;;  %v6983_v21 = vpop.f32.mrb[22].mxu0 }
 0x114   :  { %v830_v25 = vadd.f32 %v829_v13, %v828_v10  ;;  %v7985_v28 = vadd.f32 %v6983_v21, %v7834_v3  ;;  %v516_v31 = vpop.f32.mrb[23].mxu0  ;;  %v833_v42 = vsel %vm791_vm4, %v11247_v14, 0.0 }
 0x115   :  { %v831_v32 = vsel %vm791_vm4, %v11248_v19, 0.0  ;;  %v7991_v35 = vadd.f32 %v7834_v3, %v516_v31 }
 0x116   :  { %v832_v38 = vadd.f32 %v831_v32, %v830_v25  ;;  %v11243_v44 = vmax.f32 %v7985_v28, 0.0 }
 0x117   :  { %v11244_v48 = vmax.f32 %v7991_v35, 0.0  ;;  %v6986_v49 = vpop.f32.mrb[24].mxu0 }
 0x118   :  { %v834_v52 = vadd.f32 %v833_v42, %v832_v38  ;;  %v7999_v54 = vadd.f32 %v6986_v49, %v7834_v3  ;;  %v526_v59 = vpop.f32.mrb[25].mxu0  ;;  %v837_v10 = vsel %vm791_vm4, %v11243_v44, 0.0 }
 0x119   :  { %v835_v61 = vsel %vm791_vm4, %v11244_v48, 0.0  ;;  %v8005_v0 = vadd.f32 %v7834_v3, %v526_v59 }
 0x11a   :  { %v836_v1 = vadd.f32 %v835_v61, %v834_v52  ;;  %v11245_v13 = vmax.f32 %v7999_v54, 0.0 }
 0x11b   :  { %v11246_v21 = vmax.f32 %v8005_v0, 0.0  ;;  %v6989_v25 = vpop.f32.mrb[26].mxu0 }
 0x11c   :  { %v838_v31 = vadd.f32 %v837_v10, %v836_v1  ;;  %v8013_v32 = vadd.f32 %v6989_v25, %v7834_v3  ;;  %v536_v38 = vpop.f32.mrb[27].mxu0  ;;  %v841_v59 = vsel %vm791_vm4, %v11245_v13, 0.0 }
 0x11d   :  { %v839_v42 = vsel %vm791_vm4, %v11246_v21, 0.0  ;;  %v8019_v49 = vadd.f32 %v7834_v3, %v536_v38 }
 0x11e   :  { %11351 = vst [vmem:[#allocation11_spill] sm:$0xff] %v8013_v32  ;;  %v840_v52 = vadd.f32 %v839_v42, %v838_v31  ;;  %v11249_v61 = vmax.f32 %v8013_v32, 0.0 }
 0x11f   :  { %11352 = vst [vmem:[#allocation12_spill] sm:$0xff] %v8019_v49  ;;  %v11250_v1 = vmax.f32 %v8019_v49, 0.0  ;;  %v6992_v10 = vpop.f32.mrb[28].mxu0 }
 0x120   :  { %v842_v25 = vadd.f32 %v841_v59, %v840_v52  ;;  %v8027_v44 = vadd.f32 %v6992_v10, %v7834_v3  ;;  %v546_v48 = vpop.f32.mrb[29].mxu0  ;;  %v845_v13 = vsel %vm791_vm4, %v11249_v61, 0.0 }
 0x121   :  { %v843_v38 = vsel %vm791_vm4, %v11250_v1, 0.0  ;;  %v8033_v31 = vadd.f32 %v7834_v3, %v546_v48 }
 0x122   :  { %11353 = vst [vmem:[#allocation13_spill] sm:$0xff] %v8027_v44  ;;  %v844_v42 = vadd.f32 %v843_v38, %v842_v25  ;;  %v11253_v21 = vmax.f32 %v8027_v44, 0.0 }
 0x123   :  { %11354 = vst [vmem:[#allocation14_spill] sm:$0xff] %v8033_v31  ;;  %v11254_v52 = vmax.f32 %v8033_v31, 0.0  ;;  %v6995_v59 = vpop.f32.mrb[30].mxu0 }
 0x124   :  { %v846_v10 = vadd.f32 %v845_v13, %v844_v42  ;;  %v8041_v14 = vadd.f32 %v6995_v59, %v7834_v3  ;;  %v556_v19 = vpop.f32.mrb[31].mxu0  ;;  %v849_v61 = vsel %vm791_vm4, %v11253_v21, 0.0 }
 0x125   :  { %v847_v48 = vsel %vm791_vm4, %v11254_v52, 0.0  ;;  %v8047_v25 = vadd.f32 %v7834_v3, %v556_v19 }
 0x126   :  { %11355 = vst [vmem:[#allocation15_spill] sm:$0xff] %v8041_v14  ;;  %v848_v38 = vadd.f32 %v847_v48, %v846_v10  ;;  %v11257_v1 = vmax.f32 %v8041_v14, 0.0 }
 0x127   :  { %11356 = vst [vmem:[#allocation16_spill] sm:$0xff] %v8047_v25  ;;  %v11258_v13 = vmax.f32 %v8047_v25, 0.0  ;;  %v6998_v42 = vpop.f32.mrb[32].mxu0 }
 0x128   :  { %v850_v59 = vadd.f32 %v849_v61, %v848_v38  ;;  %v8055_v55 = vadd.f32 %v6998_v42, %v7834_v3  ;;  %v566_v58 = vpop.f32.mrb[33].mxu0  ;;  %v853_v21 = vsel %vm791_vm4, %v11257_v1, 0.0 }
 0x129   :  { %v851_v19 = vsel %vm791_vm4, %v11258_v13, 0.0  ;;  %v8061_v10 = vadd.f32 %v7834_v3, %v566_v58 }
 0x12a   :  { %11357 = vst [vmem:[#allocation17_spill] sm:$0xff] %v8055_v55  ;;  %v852_v48 = vadd.f32 %v851_v19, %v850_v59  ;;  %v11261_v52 = vmax.f32 %v8055_v55, 0.0 }
 0x12b   :  { %11358 = vst [vmem:[#allocation18_spill] sm:$0xff] %v8061_v10  ;;  %v11262_v61 = vmax.f32 %v8061_v10, 0.0  ;;  %v7001_v38 = vpop.f32.mrb[34].mxu0 }
 0x12c   :  { %v854_v42 = vadd.f32 %v853_v21, %v852_v48  ;;  %v8069_v39 = vadd.f32 %v7001_v38, %v7834_v3  ;;  %v576_v41 = vpop.f32.mrb[35].mxu0  ;;  %v857_v1 = vsel %vm791_vm4, %v11261_v52, 0.0 }
 0x12d   :  { %v855_v58 = vsel %vm791_vm4, %v11262_v61, 0.0  ;;  %v8075_v59 = vadd.f32 %v7834_v3, %v576_v41 }
 0x12e   :  { %11359 = vst [vmem:[#allocation19_spill] sm:$0xff] %v8069_v39  ;;  %v856_v19 = vadd.f32 %v855_v58, %v854_v42  ;;  %v11265_v13 = vmax.f32 %v8069_v39, 0.0 }
 0x12f   :  { %11360 = vst [vmem:[#allocation20_spill] sm:$0xff] %v8075_v59  ;;  %v11266_v21 = vmax.f32 %v8075_v59, 0.0  ;;  %v7004_v48 = vpop.f32.mrb[36].mxu0 }
 0x130   :  { %v858_v38 = vadd.f32 %v857_v1, %v856_v19  ;;  %v8083_v22 = vadd.f32 %v7004_v48, %v7834_v3  ;;  %v586_v24 = vpop.f32.mrb[37].mxu0  ;;  %v861_v52 = vsel %vm791_vm4, %v11265_v13, 0.0 }
 0x131   :  { %v859_v41 = vsel %vm791_vm4, %v11266_v21, 0.0  ;;  %v8089_v42 = vadd.f32 %v7834_v3, %v586_v24 }
 0x132   :  { %11361 = vst [vmem:[#allocation21_spill] sm:$0xff] %v8083_v22  ;;  %v860_v58 = vadd.f32 %v859_v41, %v858_v38  ;;  %v11269_v61 = vmax.f32 %v8083_v22, 0.0 }
 0x133   :  { %11362 = vst [vmem:[#allocation22_spill] sm:$0xff] %v8089_v42  ;;  %v11270_v1 = vmax.f32 %v8089_v42, 0.0  ;;  %v7007_v19 = vpop.f32.mrb[38].mxu0 }
 0x134   :  { %v862_v48 = vadd.f32 %v861_v52, %v860_v58  ;;  %v8097_v2 = vadd.f32 %v7007_v19, %v7834_v3  ;;  %v596_v4 = vpop.f32.mrb[39].mxu0  ;;  %v865_v13 = vsel %vm791_vm4, %v11269_v61, 0.0 }
 0x135   :  { %v863_v24 = vsel %vm791_vm4, %v11270_v1, 0.0  ;;  %v8103_v38 = vadd.f32 %v7834_v3, %v596_v4 }
 0x136   :  { %11363 = vst [vmem:[#allocation23_spill] sm:$0xff] %v8097_v2  ;;  %v864_v41 = vadd.f32 %v863_v24, %v862_v48  ;;  %v11273_v21 = vmax.f32 %v8097_v2, 0.0 }
 0x137   :  { %11364 = vst [vmem:[#allocation24_spill] sm:$0xff] %v8103_v38  ;;  %v11274_v52 = vmax.f32 %v8103_v38, 0.0  ;;  %v7010_v58 = vpop.f32.mrb[40].mxu0 }
 0x138   :  { %v866_v19 = vadd.f32 %v865_v13, %v864_v41  ;;  %v8111_v56 = vadd.f32 %v7010_v58, %v7834_v3  ;;  %v606_v57 = vpop.f32.mrb[41].mxu0  ;;  %v869_v61 = vsel %vm791_vm4, %v11273_v21, 0.0 }
 0x139   :  { %v867_v4 = vsel %vm791_vm4, %v11274_v52, 0.0  ;;  %v8117_v48 = vadd.f32 %v7834_v3, %v606_v57 }
 0x13a   :  { %11365 = vst [vmem:[#allocation25_spill] sm:$0xff] %v8111_v56  ;;  %v868_v24 = vadd.f32 %v867_v4, %v866_v19  ;;  %v11277_v1 = vmax.f32 %v8111_v56, 0.0 }
 0x13b   :  { %11366 = vst [vmem:[#allocation26_spill] sm:$0xff] %v8117_v48  ;;  %v11278_v13 = vmax.f32 %v8117_v48, 0.0  ;;  %v7013_v41 = vpop.f32.mrb[42].mxu0 }
 0x13c   :  { %v870_v58 = vadd.f32 %v869_v61, %v868_v24  ;;  %v8125_v46 = vadd.f32 %v7013_v41, %v7834_v3  ;;  %v616_v47 = vpop.f32.mrb[43].mxu0  ;;  %v873_v21 = vsel %vm791_vm4, %v11277_v1, 0.0 }
 0x13d   :  { %v871_v57 = vsel %vm791_vm4, %v11278_v13, 0.0  ;;  %v8131_v19 = vadd.f32 %v7834_v3, %v616_v47 }
 0x13e   :  { %11367 = vst [vmem:[#allocation27_spill] sm:$0xff] %v8125_v46  ;;  %v872_v4 = vadd.f32 %v871_v57, %v870_v58  ;;  %v11281_v52 = vmax.f32 %v8125_v46, 0.0 }
 0x13f   :  { %11368 = vst [vmem:[#allocation28_spill] sm:$0xff] %v8131_v19  ;;  %v11282_v61 = vmax.f32 %v8131_v19, 0.0  ;;  %v7016_v24 = vpop.f32.mrb[44].mxu0 }
 0x140   :  { %v874_v41 = vadd.f32 %v873_v21, %v872_v4  ;;  %v8139_v36 = vadd.f32 %v7016_v24, %v7834_v3  ;;  %v626_v37 = vpop.f32.mrb[45].mxu0  ;;  %v877_v1 = vsel %vm791_vm4, %v11281_v52, 0.0 }
 0x141   :  { %v875_v47 = vsel %vm791_vm4, %v11282_v61, 0.0  ;;  %v8145_v58 = vadd.f32 %v7834_v3, %v626_v37 }
 0x142   :  { %11369 = vst [vmem:[#allocation29_spill] sm:$0xff] %v8139_v36  ;;  %v876_v57 = vadd.f32 %v875_v47, %v874_v41  ;;  %v11285_v13 = vmax.f32 %v8139_v36, 0.0 }
 0x143   :  { %11370 = vst [vmem:[#allocation30_spill] sm:$0xff] %v8145_v58  ;;  %v11286_v21 = vmax.f32 %v8145_v58, 0.0  ;;  %v7019_v4 = vpop.f32.mrb[46].mxu0 }
 0x144   :  { %v878_v24 = vadd.f32 %v877_v1, %v876_v57  ;;  %v8153_v26 = vadd.f32 %v7019_v4, %v7834_v3  ;;  %v636_v27 = vpop.f32.mrb[47].mxu0  ;;  %v881_v52 = vsel %vm791_vm4, %v11285_v13, 0.0 }
 0x145   :  { %v879_v37 = vsel %vm791_vm4, %v11286_v21, 0.0  ;;  %v8159_v41 = vadd.f32 %v7834_v3, %v636_v27 }
 0x146   :  { %v880_v47 = vadd.f32 %v879_v37, %v878_v24  ;;  %v11289_v61 = vmax.f32 %v8153_v26, 0.0 }
 0x147   :  { %v11290_v1 = vmax.f32 %v8159_v41, 0.0  ;;  %v7022_v57 = vpop.f32.mrb[48].mxu0 }
 0x148   :  { %v882_v4 = vadd.f32 %v881_v52, %v880_v47  ;;  %v8167_v16 = vadd.f32 %v7022_v57, %v7834_v3  ;;  %v646_v17 = vpop.f32.mrb[49].mxu0  ;;  %v885_v13 = vsel %vm791_vm4, %v11289_v61, 0.0 }
 0x149   :  { %v883_v27 = vsel %vm791_vm4, %v11290_v1, 0.0  ;;  %v8173_v24 = vadd.f32 %v7834_v3, %v646_v17 }
 0x14a   :  { %v884_v37 = vadd.f32 %v883_v27, %v882_v4  ;;  %v11293_v21 = vmax.f32 %v8167_v16, 0.0 }
 0x14b   :  { %v11294_v52 = vmax.f32 %v8173_v24, 0.0  ;;  %v7025_v47 = vpop.f32.mrb[50].mxu0 }
 0x14c   :  { %v886_v57 = vadd.f32 %v885_v13, %v884_v37  ;;  %v8181_v8 = vadd.f32 %v7025_v47, %v7834_v3  ;;  %v656_v9 = vpop.f32.mrb[51].mxu0  ;;  %v889_v61 = vsel %vm791_vm4, %v11293_v21, 0.0 }
 0x14d   :  { %v887_v17 = vsel %vm791_vm4, %v11294_v52, 0.0  ;;  %v8187_v4 = vadd.f32 %v7834_v3, %v656_v9 }
 0x14e   :  { %v888_v27 = vadd.f32 %v887_v17, %v886_v57  ;;  %v11297_v1 = vmax.f32 %v8181_v8, 0.0 }
 0x14f   :  { %v11298_v13 = vmax.f32 %v8187_v4, 0.0  ;;  %v7028_v37 = vpop.f32.mrb[52].mxu0 }
 0x150   :  { %v890_v47 = vadd.f32 %v889_v61, %v888_v27  ;;  %v8195_v36 = vadd.f32 %v7028_v37, %v7834_v3  ;;  %v666_v58 = vpop.f32.mrb[53].mxu0  ;;  %v893_v21 = vsel %vm791_vm4, %v11297_v1, 0.0 }
 0x151   :  { %v891_v9 = vsel %vm791_vm4, %v11298_v13, 0.0  ;;  %v8201_v57 = vadd.f32 %v7834_v3, %v666_v58 }
 0x152   :  { %v892_v17 = vadd.f32 %v891_v9, %v890_v47  ;;  %v11303_v52 = vmax.f32 %v8195_v36, 0.0 }
 0x153   :  { %v11302_v61 = vmax.f32 %v8201_v57, 0.0  ;;  %v7031_v27 = vpop.f32.mrb[54].mxu0 }
 0x154   :  { %v894_v37 = vadd.f32 %v893_v21, %v892_v17  ;;  %v8209_v46 = vadd.f32 %v7031_v27, %v7834_v3  ;;  %v676_v19 = vpop.f32.mrb[55].mxu0  ;;  %v897_v1 = vsel %vm791_vm4, %v11303_v52, 0.0 }
 0x155   :  { %v895_v58 = vsel %vm791_vm4, %v11302_v61, 0.0  ;;  %v8215_v47 = vadd.f32 %v7834_v3, %v676_v19 }
 0x156   :  { %v896_v9 = vadd.f32 %v895_v58, %v894_v37  ;;  %v11309_v13 = vmax.f32 %v8209_v46, 0.0 }
 0x157   :  { %v781_v21 = vmax.f32 %v8215_v47, 0.0  ;;  %v7034_v17 = vpop.f32.mrb[56].mxu0 }
 0x158   :  { %v898_v27 = vadd.f32 %v897_v1, %v896_v9  ;;  %v692_v56 = vadd.f32 %v7034_v17, %v7834_v3  ;;  %v686_v48 = vpop.f32.mrb[57].mxu0  ;;  %v901_v37 = vsel %vm791_vm4, %v11309_v13, 0.0 }
 0x159   :  { %v899_v2 = vsel %vm791_vm4, %v781_v21, 0.0  ;;  %v687_v61 = vadd.f32 %v7834_v3, %v686_v48 }
 0x15a   :  { %v900_v19 = vadd.f32 %v899_v2, %v898_v27  ;;  %v784_v58 = vmax.f32 %v692_v56, 0.0 }
 0x15b   :  { %v783_v52 = vmax.f32 %v687_v61, 0.0  ;;  %v7037_v38 = vpop.f32.mrb[58].mxu0 }
 0x15c   :  { %v902_v22 = vadd.f32 %v901_v37, %v900_v19  ;;  %v702_v47 = vadd.f32 %v7037_v38, %v7834_v3  ;;  %v696_v42 = vpop.f32.mrb[59].mxu0  ;;  %v905_v39 = vsel %vm791_vm4, %v784_v58, 0.0 }
 0x15d   :  { %v903_v1 = vsel %vm791_vm4, %v783_v52, 0.0  ;;  %v697_v9 = vadd.f32 %v7834_v3, %v696_v42 }
 0x15e   :  { %v904_v17 = vadd.f32 %v903_v1, %v902_v22  ;;  %v786_v48 = vmax.f32 %v702_v47, 0.0 }
 0x15f   :  { %v785_v2 = vmax.f32 %v697_v9, 0.0  ;;  %v7040_v27 = vpop.f32.mrb[60].mxu0 }
 0x160   :  { %v906_v59 = vadd.f32 %v905_v39, %v904_v17  ;;  %v712_v13 = vadd.f32 %v7040_v27, %v7834_v3  ;;  %v706_v56 = vpop.f32.mrb[61].mxu0  ;;  %v909_v37 = vsel %vm791_vm4, %v786_v48, 0.0 }
 0x161   :  { %v907_v61 = vsel %vm791_vm4, %v785_v2, 0.0  ;;  %v707_v19 = vadd.f32 %v7834_v3, %v706_v56 }
 0x162   :  { %v908_v38 = vadd.f32 %v907_v61, %v906_v59  ;;  %v788_v55 = vmax.f32 %v712_v13, 0.0 }
 0x163   :  { %v787_v10 = vmax.f32 %v707_v19, 0.0  ;;  %v7043_v42 = vpop.f32.mrb[62].mxu0 }
 0x164   :  { %v910_v22 = vadd.f32 %v909_v37, %v908_v38  ;;  %v722_v1 = vadd.f32 %v7043_v42, %v7834_v3  ;;  %v716_v47 = vpop.f32.mrb[63].mxu0  ;;  %v913_v27 = vsel %vm791_vm4, %v788_v55, 0.0 }
 0x165   :  { %v911_v9 = vsel %vm791_vm4, %v787_v10, 0.0  ;;  %v717_v39 = vadd.f32 %v7834_v3, %v716_v47  ;;  %v11371_v3 = vmax.f32 %v8159_v41, 0.0 }
 0x166   :  { %v912_v17 = vadd.f32 %v911_v9, %v910_v22  ;;  %v790_v14 = vmax.f32 %v722_v1, 0.0  ;;  %v11372_v1 = vmax.f32 %v8153_v26, 0.0  ;;  %v11373_v9 = vmax.f32 %v8173_v24, 0.0 }
 0x167   :  { %v789_v25 = vmax.f32 %v717_v39, 0.0  ;;  %v11376_v26 = vmax.f32 %v8181_v8, 0.0  ;;  %v11377_v24 = vmax.f32 %v8201_v57, 0.0 }
 0x168   :  { %v914_v56 = vadd.f32 %v913_v27, %v912_v17  ;;  %v917_v13 = vsel %vm791_vm4, %v790_v14, 0.0 }
 0x169   :  { %v915_v59 = vsel %vm791_vm4, %v789_v25, 0.0 }
 0x16a   :  { %v916_v61 = vadd.f32 %v915_v59, %v914_v56 }
 0x16c   :  { %v918_v19 = vadd.f32 %v917_v13, %v916_v61 }
 0x16e   :  { %v919_v38 = vrot.slane %v918_v19, 4 }
 0x170   :  { %v920_v37 = vadd.f32 %v919_v38, %v918_v19 }
 0x172   :  { %v921_v42 = vrot.slane %v920_v37, 2 }
 0x174   :  { %v922_v44 = vadd.f32 %v921_v42, %v920_v37 }
 0x176   :  { %v923_v31 = vrot.slane %v922_v44, 1 }
 0x178   :  { %v924_v32 = vadd.f32 %v923_v31, %v922_v44  ;;  %v11374_v44 = vmax.f32 %v8167_v16, 0.0  ;;  %v11375_v31 = vmax.f32 %v8187_v4, 0.0  ;;  %v11378_v16 = vmax.f32 %v8195_v36, 0.0 }
 0x179   :  { %v11379_v4 = vmax.f32 %v8209_v46, 0.0 }
 0x17a   :  { %v8242_v49 = vmul.f32 0.001953125, %v924_v32 }
 0x17c   :  { %v8247_v22 = vsub.f32 %v11371_v3, %v8242_v49  ;;  %v8252_v47 = vsub.f32 %v11372_v1, %v8242_v49  ;;  %v8257_v39 = vsub.f32 %v11373_v9, %v8242_v49  ;;  %v8262_v32 = vsub.f32 %v11374_v44, %v8242_v49 }
 0x17d   :  { %v8267_v41 = vsub.f32 %v11375_v31, %v8242_v49  ;;  %v8272_v17 = vsub.f32 %v11376_v26, %v8242_v49  ;;  %v8277_v27 = vsub.f32 %v11377_v24, %v8242_v49  ;;  %v8282_v56 = vsub.f32 %v11378_v16, %v8242_v49 }
 0x17e   :  { %v8285_v59 = vsub.f32 %v781_v21, %v8242_v49  ;;  %v8290_v61 = vsub.f32 %v11379_v4, %v8242_v49  ;;  %v8293_v8 = vsub.f32 %v783_v52, %v8242_v49  ;;  %v8296_v57 = vsub.f32 %v784_v58, %v8242_v49 }
 0x17f   :  { %v8299_v13 = vsub.f32 %v785_v2, %v8242_v49  ;;  %v8302_v36 = vsub.f32 %v786_v48, %v8242_v49  ;;  %v8305_v21 = vsub.f32 %v787_v10, %v8242_v49  ;;  %v8308_v19 = vsub.f32 %v788_v55, %v8242_v49 }
 0x180   :  { %v8311_v46 = vsub.f32 %v789_v25, %v8242_v49  ;;  %v8314_v52 = vsub.f32 %v790_v14, %v8242_v49  ;;  %v11385_v58 = vmax.f32 %v7840_v7, 0.0  ;;  %v11386_v48 = vmax.f32 %v7837_v5, 0.0 }
 0x181   :  { %11380 = vst [vmem:[#allocation31_spill] sm:$0xff] %v8299_v13  ;;  %11381 = vst [vmem:[#allocation32_spill] sm:$0xff] %v8302_v36  ;;  %v11387_v55 = vmax.f32 %v7854_v15, 0.0  ;;  %v11388_v25 = vmax.f32 %v7845_v11, 0.0  ;;  %v11389_v5 = vmax.f32 %v7865_v23, 0.0  ;;  %v11390_v3 = vmax.f32 %v7859_v20, 0.0 }
 0x182   :  { %11382 = vst [vmem:[#allocation33_spill] sm:$0xff] %v8305_v21  ;;  %11383 = vst [vmem:[#allocation34_spill] sm:$0xff] %v8308_v19  ;;  %v8319_v2 = vsub.f32 %v11385_v58, %v8242_v49  ;;  %v8324_v38 = vsub.f32 %v11386_v48, %v8242_v49  ;;  %v11391_v23 = vmax.f32 %v7879_v33, 0.0  ;;  %v11392_v4 = vmax.f32 %v7873_v30, 0.0 }
 0x183   :  { %11384 = vst [vmem:[#allocation35_spill] sm:$0xff] %v8314_v52  ;;  %v8329_v10 = vsub.f32 %v11387_v55, %v8242_v49  ;;  %v8334_v14 = vsub.f32 %v11388_v25, %v8242_v49  ;;  %v8343_v42 = vsub.f32 %v11389_v5, %v8242_v49  ;;  %v8350_v11 = vsub.f32 %v11390_v3, %v8242_v49 }
 0x184   :  { %v991_v7 = vmul.f32 %v8319_v2, %v8319_v2  ;;  %v992_v37 = vmul.f32 %v8324_v38, %v8324_v38  ;;  %v8359_v26 = vsub.f32 %v11391_v23, %v8242_v49  ;;  %v8367_v58 = vsub.f32 %v11392_v4, %v8242_v49 }
 0x185   :  { %v993_v15 = vmul.f32 %v8329_v10, %v8329_v10  ;;  %v994_v1 = vmul.f32 %v8334_v14, %v8334_v14  ;;  %v995_v24 = vmul.f32 %v8343_v42, %v8343_v42  ;;  %v996_v48 = vmul.f32 %v8350_v11, %v8350_v11 }
 0x186   :  { %v1055_v9 = vsel %vm791_vm4, %v991_v7, 0.0  ;;  %v1056_v44 = vsel %vm791_vm4, %v992_v37, 0.0  ;;  %v11393_v33 = vmax.f32 %v7893_v43, 0.0  ;;  %v997_v37 = vmul.f32 %v8359_v26, %v8359_v26 }
 0x187   :  { %v1057_v31 = vadd.f32 %v1056_v44, %v1055_v9  ;;  %v1058_v20 = vsel %vm791_vm4, %v993_v15, 0.0  ;;  %v1060_v55 = vsel %vm791_vm4, %v994_v1, 0.0  ;;  %v1062_v5 = vsel %vm791_vm4, %v995_v24, 0.0 }
 0x188   :  { %v8375_v7 = vsub.f32 %v11393_v33, %v8242_v49  ;;  %v11394_v30 = vmax.f32 %v7887_v40, 0.0  ;;  %v998_v1 = vmul.f32 %v8367_v58, %v8367_v58  ;;  %v1064_v9 = vsel %vm791_vm4, %v996_v48, 0.0 }
 0x189   :  { %v1059_v16 = vadd.f32 %v1058_v20, %v1057_v31  ;;  %v11395_v43 = vmax.f32 %v7907_v53, 0.0  ;;  %v1066_v24 = vsel %vm791_vm4, %v997_v37, 0.0  ;;  %v11396_v40 = vmax.f32 %v7901_v50, 0.0 }
 0x18a   :  { %v8383_v3 = vsub.f32 %v11394_v30, %v8242_v49  ;;  %v999_v23 = vmul.f32 %v8375_v7, %v8375_v7  ;;  %v1068_v48 = vsel %vm791_vm4, %v998_v1, 0.0  ;;  %v11397_v53 = vmax.f32 %v7921_v63, 0.0 }
 0x18b   :  { %v1061_v25 = vadd.f32 %v1060_v55, %v1059_v16  ;;  %v8391_v31 = vsub.f32 %v11395_v43, %v8242_v49  ;;  %v8399_v16 = vsub.f32 %v11396_v40, %v8242_v49  ;;  %v11398_v50 = vmax.f32 %v7915_v60, 0.0 }
 0x18c   :  { %v1000_v4 = vmul.f32 %v8383_v3, %v8383_v3  ;;  %v1070_v37 = vsel %vm791_vm4, %v999_v23, 0.0  ;;  %v11399_v63 = vmax.f32 %v7935_v18, 0.0  ;;  %v11400_v60 = vmax.f32 %v7929_v12, 0.0 }
 0x18d   :  { %v1063_v15 = vadd.f32 %v1062_v5, %v1061_v25  ;;  %v8407_v25 = vsub.f32 %v11397_v53, %v8242_v49  ;;  %v1001_v33 = vmul.f32 %v8391_v31, %v8391_v31  ;;  %v1002_v30 = vmul.f32 %v8399_v16, %v8399_v16 }
 0x18e   :  { %v1072_v1 = vsel %vm791_vm4, %v1000_v4, 0.0  ;;  %v11401_v18 = vmax.f32 %v7949_v34, 0.0  ;;  %v11402_v12 = vmax.f32 %v7943_v29, 0.0  ;;  %v11403_v34 = vmax.f32 %v7963_v51, 0.0 }
 0x18f   :  { %v1065_v44 = vadd.f32 %v1064_v9, %v1063_v15  ;;  %v8415_v15 = vsub.f32 %v11398_v50, %v8242_v49  ;;  %v1003_v43 = vmul.f32 %v8407_v25, %v8407_v25  ;;  %v1074_v23 = vsel %vm791_vm4, %v1001_v33, 0.0 }
 0x190   :  { %v1076_v4 = vsel %vm791_vm4, %v1002_v30, 0.0  ;;  %v11404_v29 = vmax.f32 %v7957_v45, 0.0  ;;  %v11405_v51 = vmax.f32 %v7977_v6, 0.0  ;;  %v11406_v45 = vmax.f32 %v7971_v62, 0.0 }
 0x191   :  { %v1067_v20 = vadd.f32 %v1066_v24, %v1065_v44  ;;  %v8423_v44 = vsub.f32 %v11399_v63, %v8242_v49  ;;  %v1004_v40 = vmul.f32 %v8415_v15, %v8415_v15  ;;  %v1078_v33 = vsel %vm791_vm4, %v1003_v43, 0.0 }
 0x192   :  { %v11407_v6 = vmax.f32 %v7991_v35, 0.0  ;;  %v11408_v62 = vmax.f32 %v7985_v28, 0.0  ;;  %v11318_v35 = vmov 0.0  }
 0x193   :  { %v1069_v55 = vadd.f32 %v1068_v48, %v1067_v20  ;;  %v8431_v20 = vsub.f32 %v11400_v60, %v8242_v49  ;;  %v1005_v53 = vmul.f32 %v8423_v44, %v8423_v44  ;;  %v1080_v30 = vsel %vm791_vm4, %v1004_v40, 0.0  ;;  %1395 = vst.msk [vmem:[#allocation2] sm:$0xff] %vm791_vm4, %v11318_v35  ;;  %1396 = vst.msk [vmem:[#allocation2 + $0x8] sm:$0xff] %vm791_vm4, %v11318_v35 }
 0x194   :  { %1398 = vst.msk [vmem:[#allocation2 + $0x10] sm:$0x3] %vm1397_vm5, %v11318_v35  ;;  %1401 = vst.msk [vmem:[#allocation2 + $0x1c0] sm:$0x3] %vm1397_vm5, %v11318_v35 }
 0x195   :  { %v1071_v5 = vadd.f32 %v1070_v37, %v1069_v55  ;;  %v8439_v55 = vsub.f32 %v11401_v18, %v8242_v49  ;;  %v1006_v50 = vmul.f32 %v8431_v20, %v8431_v20  ;;  %v1082_v43 = vsel %vm791_vm4, %v1005_v53, 0.0  ;;  %1399 = vst.msk [vmem:[#allocation2 + $0x1b0] sm:$0xff] %vm791_vm4, %v11318_v35  ;;  %1400 = vst.msk [vmem:[#allocation2 + $0x1b8] sm:$0xff] %vm791_vm4, %v11318_v35 }
 0x196   :  { %4657 = vst [vmem:[#allocation4] sm:$0xff] %v11318_v35  ;;  %4658 = vst [vmem:[#allocation4 + $0x8] sm:$0x3] %v11318_v35 }
 0x197   :  { %v1073_v9 = vadd.f32 %v1072_v1, %v1071_v5  ;;  %v8447_v5 = vsub.f32 %v11402_v12, %v8242_v49  ;;  %v1007_v63 = vmul.f32 %v8439_v55, %v8439_v55  ;;  %v1084_v40 = vsel %vm791_vm4, %v1006_v50, 0.0  ;;  %4659 = vst [vmem:[#allocation4 + $0xa0] sm:$0xff] %v11318_v35  ;;  %4660 = vst [vmem:[#allocation4 + $0xa8] sm:$0x3] %v11318_v35 }
 0x198   :  { %4666 = vst [vmem:[#allocation4 + $0x10] sm:$0x1] %v11318_v35  ;;  %4667 = vst [vmem:[#allocation4 + $0x20] sm:$0x1] %v11318_v35 }
 0x199   :  { %v1075_v24 = vadd.f32 %v1074_v23, %v1073_v9  ;;  %v8455_v9 = vsub.f32 %v11403_v34, %v8242_v49  ;;  %v1008_v60 = vmul.f32 %v8447_v5, %v8447_v5  ;;  %v1086_v53 = vsel %vm791_vm4, %v1007_v63, 0.0  ;;  %4668 = vst [vmem:[#allocation4 + $0x30] sm:$0x1] %v11318_v35  ;;  %4669 = vst [vmem:[#allocation4 + $0x40] sm:$0x1] %v11318_v35 }
 0x19a   :  { %4670 = vst [vmem:[#allocation4 + $0x50] sm:$0x1] %v11318_v35  ;;  %4671 = vst [vmem:[#allocation4 + $0x60] sm:$0x1] %v11318_v35 }
 0x19b   :  { %v1077_v48 = vadd.f32 %v1076_v4, %v1075_v24  ;;  %v8463_v24 = vsub.f32 %v11404_v29, %v8242_v49  ;;  %v1009_v18 = vmul.f32 %v8455_v9, %v8455_v9  ;;  %v1088_v50 = vsel %vm791_vm4, %v1008_v60, 0.0  ;;  %4672 = vst [vmem:[#allocation4 + $0x70] sm:$0x1] %v11318_v35  ;;  %4673 = vst [vmem:[#allocation4 + $0x80] sm:$0x1] %v11318_v35 }
 0x19c   :  { %4674 = vst [vmem:[#allocation4 + $0xb0] sm:$0x1] %v11318_v35  ;;  %4675 = vst [vmem:[#allocation4 + $0xc0] sm:$0x1] %v11318_v35 }
 0x19d   :  { %v1079_v37 = vadd.f32 %v1078_v33, %v1077_v48  ;;  %v8471_v48 = vsub.f32 %v11405_v51, %v8242_v49  ;;  %v1010_v12 = vmul.f32 %v8463_v24, %v8463_v24  ;;  %v1090_v63 = vsel %vm791_vm4, %v1009_v18, 0.0  ;;  %4676 = vst [vmem:[#allocation4 + $0xd0] sm:$0x1] %v11318_v35  ;;  %4677 = vst [vmem:[#allocation4 + $0xe0] sm:$0x1] %v11318_v35 }
 0x19e   :  { %4678 = vst [vmem:[#allocation4 + $0xf0] sm:$0x1] %v11318_v35  ;;  %4679 = vst [vmem:[#allocation4 + $0x100] sm:$0x1] %v11318_v35 }
 0x19f   :  { %v1081_v1 = vadd.f32 %v1080_v30, %v1079_v37  ;;  %v8479_v37 = vsub.f32 %v11406_v45, %v8242_v49  ;;  %v1011_v34 = vmul.f32 %v8471_v48, %v8471_v48  ;;  %v1092_v60 = vsel %vm791_vm4, %v1010_v12, 0.0  ;;  %4680 = vst [vmem:[#allocation4 + $0x110] sm:$0x1] %v11318_v35  ;;  %4681 = vst [vmem:[#allocation4 + $0x120] sm:$0x1] %v11318_v35 }
 0x1a0   :  { %4682 = vst [vmem:[#allocation4 + $0x19] sm:$0x1] %v11318_v35  ;;  %4683 = vst [vmem:[#allocation4 + $0x29] sm:$0x1] %v11318_v35 }
 0x1a1   :  { %v1083_v23 = vadd.f32 %v1082_v43, %v1081_v1  ;;  %v8487_v1 = vsub.f32 %v11407_v6, %v8242_v49  ;;  %v1012_v29 = vmul.f32 %v8479_v37, %v8479_v37  ;;  %4684 = vst [vmem:[#allocation4 + $0x39] sm:$0x1] %v11318_v35  ;;  %4685 = vst [vmem:[#allocation4 + $0x49] sm:$0x1] %v11318_v35  ;;  %v1094_v18 = vsel %vm791_vm4, %v1011_v34, 0.0 }
 0x1a2   :  { %4686 = vst [vmem:[#allocation4 + $0x59] sm:$0x1] %v11318_v35  ;;  %4687 = vst [vmem:[#allocation4 + $0x69] sm:$0x1] %v11318_v35 }
 0x1a3   :  { %v1085_v4 = vadd.f32 %v1084_v40, %v1083_v23  ;;  %v8495_v23 = vsub.f32 %v11408_v62, %v8242_v49  ;;  %4688 = vst [vmem:[#allocation4 + $0x79] sm:$0x1] %v11318_v35  ;;  %4689 = vst [vmem:[#allocation4 + $0x89] sm:$0x1] %v11318_v35  ;;  %v11409_v40 = vmax.f32 %v8005_v0, 0.0  ;;  %v1013_v51 = vmul.f32 %v8487_v1, %v8487_v1  ;;  %v11412_v0 = vld [vmem:[#allocation12_spill] sm:$0xff] }
 0x1a4   :  { %4690 = vst [vmem:[#allocation4 + $0xb9] sm:$0x1] %v11318_v35  ;;  %4691 = vst [vmem:[#allocation4 + $0xc9] sm:$0x1] %v11318_v35  ;;  %v11413_v6 = vmax.f32 %v11412_v0, 0.0  ;;  %v11418_v0 = vld [vmem:[#allocation14_spill] sm:$0xff] }
 0x1a5   :  { %v1087_v33 = vadd.f32 %v1086_v53, %v1085_v4  ;;  %4692 = vst [vmem:[#allocation4 + $0xd9] sm:$0x1] %v11318_v35  ;;  %4693 = vst [vmem:[#allocation4 + $0xe9] sm:$0x1] %v11318_v35  ;;  %v8549_v4 = vsub.f32 %v11409_v40, %v8242_v49  ;;  %v1014_v12 = vmul.f32 %v8495_v23, %v8495_v23 }
 0x1a6   :  { %4694 = vst [vmem:[#allocation4 + $0xf9] sm:$0x1] %v11318_v35  ;;  %4695 = vst [vmem:[#allocation4 + $0x109] sm:$0x1] %v11318_v35 }
 0x1a7   :  { %v1089_v30 = vadd.f32 %v1088_v50, %v1087_v33  ;;  %4696 = vst [vmem:[#allocation4 + $0x119] sm:$0x1] %v11318_v35  ;;  %4697 = vst [vmem:[#allocation4 + $0x129] sm:$0x1] %v11318_v35  ;;  %v11410_v33 = vmax.f32 %v7999_v54, 0.0  ;;  %v1096_v50 = vsel %vm791_vm4, %v1012_v29, 0.0  ;;  %v1015_v34 = vmul.f32 %v8549_v4, %v8549_v4 }
 0x1a8   :  { %v1538_v54 = vld [vmem:[#allocation2 + $0x1] sm:$0xff] }
 0x1a9   :  { %v1091_v43 = vadd.f32 %v1090_v63, %v1089_v30  ;;  %v8557_v45 = vsub.f32 %v11410_v33, %v8242_v49  ;;  %v8565_v63 = vsub.f32 %v11413_v6, %v8242_v49  ;;  %v11419_v6 = vmax.f32 %v11418_v0, 0.0 }
 0x1ab   :  { %v1093_v28 = vadd.f32 %v1092_v60, %v1091_v43  ;;  %11411 = vst [vmem:[#allocation36_spill] sm:$0xff] %v8557_v45  ;;  %11414 = vst [vmem:[#allocation12_spill] sm:$0xff] %v8565_v63  ;;  %v1098_v43 = vsel %vm791_vm4, %v1013_v51, 0.0  ;;  %v1539_v60 = vld [vmem:[#allocation2 + $0x9] sm:$0xff]  ;;  %v1016_v29 = vmul.f32 %v8557_v45, %v8557_v45  ;;  %v8581_v35 = vsub.f32 %v11419_v6, %v8242_v49 }
 0x1ac   :  { %v1570_v33 = vpack.c.bf16 %v1539_v60, %v1538_v54  ;;  %v1017_v51 = vmul.f32 %v8565_v63, %v8565_v63  ;;  %v11438_v63 = vld [vmem:[#allocation19_spill] sm:$0xff] }
 0x1ad   :  { %v1095_v53 = vadd.f32 %v1094_v18, %v1093_v28  ;;  %v11415_v28 = vld [vmem:[#allocation11_spill] sm:$0xff]  ;;  %11420 = vst [vmem:[#allocation14_spill] sm:$0xff] %v8581_v35  ;;  %v1104_v54 = vsel %vm791_vm4, %v1016_v29, 0.0 }
 0x1ae   :  { %v11416_v40 = vmax.f32 %v11415_v28, 0.0  ;;  %1602 = vrot.lane.b32.xlu1 %v1570_v33, %s7453_s0  ;;  %v11421_v28 = vld [vmem:[#allocation13_spill] sm:$0xff]  ;;  %v1106_v33 = vsel %vm791_vm4, %v1017_v51, 0.0 }
 0x1af   :  { %v1097_v30 = vadd.f32 %v1096_v50, %v1095_v53  ;;  %v1100_v53 = vsel %vm791_vm4, %v1014_v12, 0.0 }
 0x1b0   :  { %v8573_v18 = vsub.f32 %v11416_v40, %v8242_v49  ;;  %v11422_v40 = vmax.f32 %v11421_v28, 0.0 }
 0x1b1   :  { %v1099_v62 = vadd.f32 %v1098_v43, %v1097_v30  ;;  %v1102_v30 = vsel %vm791_vm4, %v1015_v34, 0.0  ;;  %v1019_v34 = vmul.f32 %v8581_v35, %v8581_v35 }
 0x1b2   :  { %11417 = vst [vmem:[#allocation11_spill] sm:$0xff] %v8573_v18  ;;  %v8590_v12 = vsub.f32 %v11422_v40, %v8242_v49 }
 0x1b3   :  { %v1101_v50 = vadd.f32 %v1100_v53, %v1099_v62  ;;  %v1018_v62 = vmul.f32 %v8573_v18, %v8573_v18  ;;  %v11424_v53 = vld [vmem:[#allocation16_spill] sm:$0xff] }
 0x1b4   :  { %11423 = vst [vmem:[#allocation13_spill] sm:$0xff] %v8590_v12  ;;  %v11425_v0 = vmax.f32 %v11424_v53, 0.0  ;;  %v1020_v29 = vmul.f32 %v8590_v12, %v8590_v12  ;;  %v11430_v53 = vld [vmem:[#allocation18_spill] sm:$0xff] }
 0x1b5   :  { %v1103_v43 = vadd.f32 %v1102_v30, %v1101_v50  ;;  %v11427_v30 = vld [vmem:[#allocation15_spill] sm:$0xff] }
 0x1b6   :  { %v8598_v6 = vsub.f32 %v11425_v0, %v8242_v49  ;;  %v11428_v28 = vmax.f32 %v11427_v30, 0.0  ;;  %v11431_v0 = vmax.f32 %v11430_v53, 0.0  ;;  %v11432_v30 = vld [vmem:[#allocation17_spill] sm:$0xff]  ;;  %v11435_v53 = vld [vmem:[#allocation20_spill] sm:$0xff] }
 0x1b7   :  { %v1105_v60 = vadd.f32 %v1104_v54, %v1103_v43  ;;  %v1108_v43 = vsel %vm791_vm4, %v1018_v62, 0.0 }
 0x1b8   :  { %11426 = vst [vmem:[#allocation16_spill] sm:$0xff] %v8598_v6  ;;  %v8606_v40 = vsub.f32 %v11428_v28, %v8242_v49  ;;  %v8614_v18 = vsub.f32 %v11431_v0, %v8242_v49  ;;  %v1021_v51 = vmul.f32 %v8598_v6, %v8598_v6  ;;  %v11433_v28 = vmax.f32 %v11432_v30, 0.0  ;;  %v1668_v30 = vld [vmem:[#allocation2 + $0xa] sm:$0xff] }
 0x1b9   :  { %v1107_v50 = vadd.f32 %v1106_v33, %v1105_v60  ;;  %v1110_v60 = vsel %vm791_vm4, %v1019_v34, 0.0  ;;  %v11436_v0 = vmax.f32 %v11435_v53, 0.0 }
 0x1ba   :  { %11429 = vst [vmem:[#allocation15_spill] sm:$0xff] %v8606_v40  ;;  %v8622_v35 = vsub.f32 %v11433_v28, %v8242_v49  ;;  %v1022_v62 = vmul.f32 %v8606_v40, %v8606_v40  ;;  %v1023_v34 = vmul.f32 %v8614_v18, %v8614_v18  ;;  %v11439_v40 = vmax.f32 %v11438_v63, 0.0 }
 0x1bb   :  { %v1109_v54 = vadd.f32 %v1108_v43, %v1107_v50  ;;  %v1112_v50 = vsel %vm791_vm4, %v1020_v29, 0.0  ;;  %v8630_v12 = vsub.f32 %v11436_v0, %v8242_v49  ;;  %v8656_v0 = vld [vmem:[#allocation2 + $0x1b1] sm:$0xff] }
 0x1bc   :  { %11434 = vst [vmem:[#allocation18_spill] sm:$0xff] %v8622_v35  ;;  %v8638_v45 = vsub.f32 %v11439_v40, %v8242_v49  ;;  %v8642_v29 = vmul.f32 %v8622_v35, %v8622_v35  ;;  %v1118_v40 = vsel %vm791_vm4, %v1023_v34, 0.0  ;;  %v11444_v34 = vld [vmem:[#allocation21_spill] sm:$0xff] }
 0x1bd   :  { %v1111_v33 = vadd.f32 %v1110_v60, %v1109_v54  ;;  %11437 = vst [vmem:[#allocation17_spill] sm:$0xff] %v8630_v12  ;;  %v1114_v54 = vsel %vm791_vm4, %v1021_v51, 0.0  ;;  %v1667_v60 = vld [vmem:[#allocation2 + $0x2] sm:$0xff]  ;;  %v11441_v51 = vld [vmem:[#allocation22_spill] sm:$0xff]  ;;  %v8653_v63 = vmul.f32 %v8630_v12, %v8630_v12 }
 0x1be   :  { %v1699_v6 = vpack.c.bf16 %v1668_v30, %v1667_v60  ;;  %11440 = vst [vmem:[#allocation20_spill] sm:$0xff] %v8638_v45  ;;  %v11442_v53 = vmax.f32 %v11441_v51, 0.0  ;;  %v8664_v60 = vld [vmem:[#allocation2 + $0x1b2] sm:$0xff]  ;;  %v8666_v30 = vld [vmem:[#allocation2 + $0x1ba] sm:$0xff]  ;;  %v1026_v51 = vmul.f32 %v8638_v45, %v8638_v45 }
 0x1bf   :  { %v1113_v43 = vadd.f32 %v1112_v50, %v1111_v33  ;;  %v1116_v33 = vsel %vm791_vm4, %v1022_v62, 0.0 }
 0x1c0   :  { %1731 = vrot.lane.b32.xlu1 %v1699_v6, %s7454_s22 }
 0x1c1   :  { %v1115_v28 = vadd.f32 %v1114_v54, %v1113_v43  ;;  %v8649_v43 = vsub.f32 %v11442_v53, %v8242_v49  ;;  %v8658_v54 = vld [vmem:[#allocation2 + $0x1b9] sm:$0xff]  ;;  %v1120_v53 = vsel %vm791_vm4, %v8642_v29, 0.0  ;;  %v1122_v29 = vsel %vm791_vm4, %v8653_v63, 0.0 }
 0x1c2   :  { %v1578_v6 = vpack.c.bf16 %v8658_v54, %v8656_v0 }
 0x1c3   :  { %v1117_v50 = vadd.f32 %v1116_v33, %v1115_v28  ;;  %v11443_v28 = vmov 0.0   ;;  %v11445_v33 = vmax.f32 %v11444_v34, 0.0  ;;  %v11447_v34 = vld [vmem:[#allocation24_spill] sm:$0xff]  ;;  %v1027_v45 = vmul.f32 %v8649_v43, %v8649_v43 }
 0x1c4   :  { %1413 = vst.msk [vmem:[#allocation2 + $0x60] sm:$0x1] %vm1409_vm6, %v11443_v28  ;;  %1410 = vst.msk [vmem:[#allocation2 + $0x18] sm:$0x1] %vm1409_vm6, %v11443_v28  ;;  %1618 = vrot.lane.b32.xlu1 %v1578_v6, %s7453_s0  ;;  %v1124_v6 = vsel %vm791_vm4, %v1026_v51, 0.0 }
 0x1c5   :  { %v8660_v62 = vadd.f32 %v1118_v40, %v1117_v50  ;;  %1411 = vst.msk [vmem:[#allocation2 + $0x30] sm:$0x1] %vm1409_vm6, %v11443_v28  ;;  %1412 = vst.msk [vmem:[#allocation2 + $0x48] sm:$0x1] %vm1409_vm6, %v11443_v28  ;;  %v8799_v50 = vsub.f32 %v11445_v33, %v8242_v49  ;;  %v11448_v33 = vmax.f32 %v11447_v34, 0.0 }
 0x1c6   :  { %1414 = vst.msk [vmem:[#allocation2 + $0x78] sm:$0x1] %vm1409_vm6, %v11443_v28  ;;  %1415 = vst.msk [vmem:[#allocation2 + $0x90] sm:$0x1] %vm1409_vm6, %v11443_v28 }
 0x1c7   :  { %1416 = vst.msk [vmem:[#allocation2 + $0xa8] sm:$0x1] %vm1409_vm6, %v11443_v28  ;;  %1417 = vst.msk [vmem:[#allocation2 + $0xc0] sm:$0x1] %vm1409_vm6, %v11443_v28  ;;  %v1121_v40 = vadd.f32 %v1120_v53, %v8660_v62  ;;  %v8815_v12 = vsub.f32 %v11448_v33, %v8242_v49  ;;  %v11450_v53 = vld [vmem:[#allocation23_spill] sm:$0xff]  ;;  %v1028_v54 = vmul.f32 %v8799_v50, %v8799_v50 }
 0x1c8   :  { %1418 = vst.msk [vmem:[#allocation2 + $0xd8] sm:$0x1] %vm1409_vm6, %v11443_v28  ;;  %1419 = vst.msk [vmem:[#allocation2 + $0xf0] sm:$0x1] %vm1409_vm6, %v11443_v28  ;;  %v11451_v35 = vmax.f32 %v11450_v53, 0.0 }
 0x1c9   :  { %1420 = vst.msk [vmem:[#allocation2 + $0x108] sm:$0x1] %vm1409_vm6, %v11443_v28  ;;  %1421 = vst.msk [vmem:[#allocation2 + $0x120] sm:$0x1] %vm1409_vm6, %v11443_v28  ;;  %v1123_v62 = vadd.f32 %v1122_v29, %v1121_v40  ;;  %v1029_v63 = vmul.f32 %v8815_v12, %v8815_v12  ;;  %v1126_v40 = vsel %vm791_vm4, %v1027_v45, 0.0  ;;  %v11456_v29 = vld [vmem:[#allocation25_spill] sm:$0xff] }
 0x1ca   :  { %1422 = vst.msk [vmem:[#allocation2 + $0x138] sm:$0x1] %vm1409_vm6, %v11443_v28  ;;  %1423 = vst.msk [vmem:[#allocation2 + $0x150] sm:$0x1] %vm1409_vm6, %v11443_v28  ;;  %v8824_v0 = vsub.f32 %v11451_v35, %v8242_v49  ;;  %v11457_v53 = vmax.f32 %v11456_v29, 0.0  ;;  %v11461_v29 = vld [vmem:[#allocation27_spill] sm:$0xff] }
 0x1cb   :  { %1424 = vst.msk [vmem:[#allocation2 + $0x168] sm:$0x1] %vm1409_vm6, %v11443_v28  ;;  %1425 = vst.msk [vmem:[#allocation2 + $0x180] sm:$0x1] %vm1409_vm6, %v11443_v28 }
 0x1cc   :  { %1426 = vst.msk [vmem:[#allocation2 + $0x1c8] sm:$0x1] %vm1409_vm6, %v11443_v28  ;;  %1427 = vst.msk [vmem:[#allocation2 + $0x1e0] sm:$0x1] %vm1409_vm6, %v11443_v28  ;;  %v1030_v51 = vmul.f32 %v8824_v0, %v8824_v0 }
 0x1cd   :  { %1428 = vst.msk [vmem:[#allocation2 + $0x1f8] sm:$0x1] %vm1409_vm6, %v11443_v28  ;;  %1429 = vst.msk [vmem:[#allocation2 + $0x210] sm:$0x1] %vm1409_vm6, %v11443_v28 }
 0x1ce   :  { %1430 = vst.msk [vmem:[#allocation2 + $0x228] sm:$0x1] %vm1409_vm6, %v11443_v28  ;;  %1431 = vst.msk [vmem:[#allocation2 + $0x240] sm:$0x1] %vm1409_vm6, %v11443_v28 }
 0x1cf   :  { %1432 = vst.msk [vmem:[#allocation2 + $0x258] sm:$0x1] %vm1409_vm6, %v11443_v28  ;;  %1433 = vst.msk [vmem:[#allocation2 + $0x270] sm:$0x1] %vm1409_vm6, %v11443_v28 }
 0x1d0   :  { %1434 = vst.msk [vmem:[#allocation2 + $0x288] sm:$0x1] %vm1409_vm6, %v11443_v28  ;;  %1435 = vst.msk [vmem:[#allocation2 + $0x2a0] sm:$0x1] %vm1409_vm6, %v11443_v28 }
 0x1d1   :  { %1436 = vst.msk [vmem:[#allocation2 + $0x2b8] sm:$0x1] %vm1409_vm6, %v11443_v28  ;;  %1437 = vst.msk [vmem:[#allocation2 + $0x2d0] sm:$0x1] %vm1409_vm6, %v11443_v28 }
 0x1d2   :  { %1438 = vst.msk [vmem:[#allocation2 + $0x2e8] sm:$0x1] %vm1409_vm6, %v11443_v28  ;;  %1439 = vst.msk [vmem:[#allocation2 + $0x300] sm:$0x1] %vm1409_vm6, %v11443_v28 }
 0x1d3   :  { %1440 = vst.msk [vmem:[#allocation2 + $0x318] sm:$0x1] %vm1409_vm6, %v11443_v28  ;;  %1441 = vst.msk [vmem:[#allocation2 + $0x330] sm:$0x1] %vm1409_vm6, %v11443_v28 }
 0x1d4   :  { %1442 = vst.msk [vmem:[#allocation2 + $0x29] sm:$0x1] %vm1409_vm6, %v11443_v28  ;;  %1443 = vst.msk [vmem:[#allocation2 + $0x41] sm:$0x1] %vm1409_vm6, %v11443_v28 }
 0x1d5   :  { %1444 = vst.msk [vmem:[#allocation2 + $0x59] sm:$0x1] %vm1409_vm6, %v11443_v28  ;;  %1445 = vst.msk [vmem:[#allocation2 + $0x71] sm:$0x1] %vm1409_vm6, %v11443_v28 }
 0x1d6   :  { %1446 = vst.msk [vmem:[#allocation2 + $0x89] sm:$0x1] %vm1409_vm6, %v11443_v28  ;;  %1447 = vst.msk [vmem:[#allocation2 + $0xa1] sm:$0x1] %vm1409_vm6, %v11443_v28 }
 0x1d7   :  { %1448 = vst.msk [vmem:[#allocation2 + $0xb9] sm:$0x1] %vm1409_vm6, %v11443_v28  ;;  %1449 = vst.msk [vmem:[#allocation2 + $0xd1] sm:$0x1] %vm1409_vm6, %v11443_v28 }
 0x1d8   :  { %1450 = vst.msk [vmem:[#allocation2 + $0xe9] sm:$0x1] %vm1409_vm6, %v11443_v28  ;;  %1451 = vst.msk [vmem:[#allocation2 + $0x101] sm:$0x1] %vm1409_vm6, %v11443_v28 }
 0x1d9   :  { %1452 = vst.msk [vmem:[#allocation2 + $0x119] sm:$0x1] %vm1409_vm6, %v11443_v28  ;;  %1453 = vst.msk [vmem:[#allocation2 + $0x131] sm:$0x1] %vm1409_vm6, %v11443_v28 }
 0x1da   :  { %1454 = vst.msk [vmem:[#allocation2 + $0x149] sm:$0x1] %vm1409_vm6, %v11443_v28  ;;  %1455 = vst.msk [vmem:[#allocation2 + $0x161] sm:$0x1] %vm1409_vm6, %v11443_v28 }
 0x1db   :  { %1456 = vst.msk [vmem:[#allocation2 + $0x179] sm:$0x1] %vm1409_vm6, %v11443_v28  ;;  %1457 = vst.msk [vmem:[#allocation2 + $0x191] sm:$0x1] %vm1409_vm6, %v11443_v28 }
 0x1dc   :  { %1458 = vst.msk [vmem:[#allocation2 + $0x1d9] sm:$0x1] %vm1409_vm6, %v11443_v28  ;;  %1459 = vst.msk [vmem:[#allocation2 + $0x1f1] sm:$0x1] %vm1409_vm6, %v11443_v28 }
 0x1dd   :  { %1460 = vst.msk [vmem:[#allocation2 + $0x209] sm:$0x1] %vm1409_vm6, %v11443_v28  ;;  %1461 = vst.msk [vmem:[#allocation2 + $0x221] sm:$0x1] %vm1409_vm6, %v11443_v28 }
 0x1de   :  { %1462 = vst.msk [vmem:[#allocation2 + $0x239] sm:$0x1] %vm1409_vm6, %v11443_v28  ;;  %1463 = vst.msk [vmem:[#allocation2 + $0x251] sm:$0x1] %vm1409_vm6, %v11443_v28 }
 0x1df   :  { %1464 = vst.msk [vmem:[#allocation2 + $0x269] sm:$0x1] %vm1409_vm6, %v11443_v28  ;;  %1465 = vst.msk [vmem:[#allocation2 + $0x281] sm:$0x1] %vm1409_vm6, %v11443_v28 }
 0x1e0   :  { %1466 = vst.msk [vmem:[#allocation2 + $0x299] sm:$0x1] %vm1409_vm6, %v11443_v28  ;;  %1467 = vst.msk [vmem:[#allocation2 + $0x2b1] sm:$0x1] %vm1409_vm6, %v11443_v28 }
 0x1e1   :  { %1468 = vst.msk [vmem:[#allocation2 + $0x2c9] sm:$0x1] %vm1409_vm6, %v11443_v28  ;;  %1469 = vst.msk [vmem:[#allocation2 + $0x2e1] sm:$0x1] %vm1409_vm6, %v11443_v28 }
 0x1e2   :  { %1470 = vst.msk [vmem:[#allocation2 + $0x2f9] sm:$0x1] %vm1409_vm6, %v11443_v28  ;;  %1471 = vst.msk [vmem:[#allocation2 + $0x311] sm:$0x1] %vm1409_vm6, %v11443_v28 }
 0x1e3   :  { %1472 = vst.msk [vmem:[#allocation2 + $0x329] sm:$0x1] %vm1409_vm6, %v11443_v28  ;;  %1473 = vst.msk [vmem:[#allocation2 + $0x341] sm:$0x1] %vm1409_vm6, %v11443_v28  ;;  %v1707_v28 = vpack.c.bf16 %v8666_v30, %v8664_v60  ;;  %v1125_v60 = vadd.f32 %v1124_v6, %v1123_v62  ;;  %v11453_v30 = vld [vmem:[#allocation26_spill] sm:$0xff]  ;;  %v11458_v6 = vld [vmem:[#allocation28_spill] sm:$0xff] }
 0x1e4   :  { %11446 = vst [vmem:[#allocation19_spill] sm:$0xff] %v8799_v50  ;;  %11449 = vst [vmem:[#allocation22_spill] sm:$0xff] %v8815_v12  ;;  %v11454_v34 = vmax.f32 %v11453_v30, 0.0  ;;  %v8841_v50 = vsub.f32 %v11457_v53, %v8242_v49  ;;  %v11459_v30 = vmax.f32 %v11458_v6, 0.0  ;;  %v11462_v53 = vmax.f32 %v11461_v29, 0.0  ;;  %v11463_v6 = vld [vmem:[#allocation30_spill] sm:$0xff] }
 0x1e5   :  { %11452 = vst [vmem:[#allocation21_spill] sm:$0xff] %v8824_v0  ;;  %1747 = vrot.lane.b32.xlu1 %v1707_v28, %s7454_s22  ;;  %v1127_v35 = vadd.f32 %v1126_v40, %v1125_v60  ;;  %v1128_v28 = vsel %vm791_vm4, %v1028_v54, 0.0  ;;  %v1130_v60 = vsel %vm791_vm4, %v1029_v63, 0.0  ;;  %v11465_v29 = vld [vmem:[#allocation29_spill] sm:$0xff] }
 0x1e6   :  { %v8833_v33 = vsub.f32 %v11454_v34, %v8242_v49  ;;  %v8849_v34 = vsub.f32 %v11459_v30, %v8242_v49  ;;  %v8857_v12 = vsub.f32 %v11462_v53, %v8242_v49  ;;  %v1032_v54 = vmul.f32 %v8841_v50, %v8841_v50 }
 0x1e7   :  { %v1129_v62 = vadd.f32 %v1128_v28, %v1127_v35  ;;  %v1132_v35 = vsel %vm791_vm4, %v1030_v51, 0.0  ;;  %v11464_v30 = vmax.f32 %v11463_v6, 0.0  ;;  %v11466_v53 = vmax.f32 %v11465_v29, 0.0 }
 0x1e8   :  { %11455 = vst [vmem:[#allocation24_spill] sm:$0xff] %v8833_v33  ;;  %11460 = vst [vmem:[#allocation23_spill] sm:$0xff] %v8849_v34  ;;  %v1031_v45 = vmul.f32 %v8833_v33, %v8833_v33  ;;  %v1033_v63 = vmul.f32 %v8849_v34, %v8849_v34  ;;  %v1034_v51 = vmul.f32 %v8857_v12, %v8857_v12 }
 0x1e9   :  { %v1131_v40 = vadd.f32 %v1130_v60, %v1129_v62  ;;  %v8865_v0 = vsub.f32 %v11464_v30, %v8242_v49  ;;  %v8873_v33 = vsub.f32 %v11466_v53, %v8242_v49  ;;  %v1037_v49 = vmul.f32 %v8247_v22, %v8247_v22 }
 0x1ea   :  { %v1134_v62 = vsel %vm791_vm4, %v1031_v45, 0.0  ;;  %v1138_v30 = vsel %vm791_vm4, %v1033_v63, 0.0  ;;  %v1039_v63 = vmul.f32 %v8257_v39, %v8257_v39 }
 0x1eb   :  { %v1133_v28 = vadd.f32 %v1132_v35, %v1131_v40  ;;  %v1136_v40 = vsel %vm791_vm4, %v1032_v54, 0.0  ;;  %v1035_v6 = vmul.f32 %v8865_v0, %v8865_v0  ;;  %v1036_v45 = vmul.f32 %v8873_v33, %v8873_v33 }
 0x1ec   :  { %v1038_v54 = vmul.f32 %v8252_v47, %v8252_v47 }
 0x1ed   :  { %v1135_v60 = vadd.f32 %v1134_v62, %v1133_v28  ;;  %v1140_v28 = vsel %vm791_vm4, %v1034_v51, 0.0  ;;  %v1142_v29 = vsel %vm791_vm4, %v1035_v6, 0.0  ;;  %v1041_v6 = vmul.f32 %v8267_v41, %v8267_v41 }
 0x1ee   :  { %v1148_v51 = vsel %vm791_vm4, %v1038_v54, 0.0  ;;  %v1044_v54 = vmul.f32 %v8282_v56, %v8282_v56 }
 0x1ef   :  { %v1137_v35 = vadd.f32 %v1136_v40, %v1135_v60  ;;  %v1144_v60 = vsel %vm791_vm4, %v1036_v45, 0.0  ;;  %v1042_v45 = vmul.f32 %v8272_v17, %v8272_v17 }
 0x1f1   :  { %v1139_v34 = vadd.f32 %v1138_v30, %v1137_v35  ;;  %v1146_v35 = vsel %vm791_vm4, %v1037_v49, 0.0  ;;  %v1043_v49 = vmul.f32 %v8277_v27, %v8277_v27 }
 0x1f3   :  { %v1141_v62 = vadd.f32 %v1140_v28, %v1139_v34  ;;  %v1040_v34 = vmul.f32 %v8262_v32, %v8262_v32 }
 0x1f5   :  { %v1143_v53 = vadd.f32 %v1142_v29, %v1141_v62  ;;  %v1150_v62 = vsel %vm791_vm4, %v1039_v63, 0.0  ;;  %v1045_v63 = vmul.f32 %v8285_v59, %v8285_v59 }
 0x1f7   :  { %v1145_v40 = vadd.f32 %v1144_v60, %v1143_v53  ;;  %v1152_v53 = vsel %vm791_vm4, %v1040_v34, 0.0  ;;  %v1046_v34 = vmul.f32 %v8290_v61, %v8290_v61 }
 0x1f9   :  { %v1147_v30 = vadd.f32 %v1146_v35, %v1145_v40  ;;  %v1154_v40 = vsel %vm791_vm4, %v1041_v6, 0.0  ;;  %v1047_v6 = vmul.f32 %v8293_v8, %v8293_v8 }
 0x1fb   :  { %v1149_v28 = vadd.f32 %v1148_v51, %v1147_v30  ;;  %v1156_v30 = vsel %vm791_vm4, %v1042_v45, 0.0  ;;  %v1048_v45 = vmul.f32 %v8296_v57, %v8296_v57 }
 0x1fd   :  { %v1151_v29 = vadd.f32 %v1150_v62, %v1149_v28  ;;  %v1158_v28 = vsel %vm791_vm4, %v1043_v49, 0.0  ;;  %v1049_v49 = vmul.f32 %v8299_v13, %v8299_v13 }
 0x1ff   :  { %v1153_v60 = vadd.f32 %v1152_v53, %v1151_v29  ;;  %v1160_v29 = vsel %vm791_vm4, %v1044_v54, 0.0  ;;  %v1050_v54 = vmul.f32 %v8302_v36, %v8302_v36 }
 0x201   :  { %v1155_v35 = vadd.f32 %v1154_v40, %v1153_v60  ;;  %v1162_v60 = vsel %vm791_vm4, %v1045_v63, 0.0  ;;  %v1051_v63 = vmul.f32 %v8305_v21, %v8305_v21 }
 0x203   :  { %v1157_v51 = vadd.f32 %v1156_v30, %v1155_v35  ;;  %v1164_v35 = vsel %vm791_vm4, %v1046_v34, 0.0  ;;  %v1052_v34 = vmul.f32 %v8308_v19, %v8308_v19 }
 0x205   :  { %v1159_v62 = vadd.f32 %v1158_v28, %v1157_v51  ;;  %v1166_v51 = vsel %vm791_vm4, %v1047_v6, 0.0  ;;  %v1053_v6 = vmul.f32 %v8311_v46, %v8311_v46 }
 0x207   :  { %v1161_v53 = vadd.f32 %v1160_v29, %v1159_v62  ;;  %v1168_v62 = vsel %vm791_vm4, %v1048_v45, 0.0  ;;  %v1054_v45 = vmul.f32 %v8314_v52, %v8314_v52 }
 0x209   :  { %v1163_v40 = vadd.f32 %v1162_v60, %v1161_v53  ;;  %v1170_v53 = vsel %vm791_vm4, %v1049_v49, 0.0  ;;  %v1178_v49 = vsel %vm791_vm4, %v1053_v6, 0.0 }
 0x20b   :  { %v1165_v30 = vadd.f32 %v1164_v35, %v1163_v40  ;;  %v1172_v40 = vsel %vm791_vm4, %v1050_v54, 0.0 }
 0x20d   :  { %v1167_v28 = vadd.f32 %v1166_v51, %v1165_v30  ;;  %v1174_v30 = vsel %vm791_vm4, %v1051_v63, 0.0 }
 0x20f   :  { %v1169_v29 = vadd.f32 %v1168_v62, %v1167_v28  ;;  %v1176_v28 = vsel %vm791_vm4, %v1052_v34, 0.0  ;;  %v725_v34 = vld [vmem:[%s11467_s24] sm:$0x1]  ;;  %s7455_s24 = smov 96  }
 0x211   :  { %v1171_v60 = vadd.f32 %v1170_v53, %v1169_v29  ;;  %v1180_v53 = vsel %vm791_vm4, %v1054_v45, 0.0 }
 0x213   :  { %v1173_v35 = vadd.f32 %v1172_v40, %v1171_v60 }
 0x215   :  { %v1175_v51 = vadd.f32 %v1174_v30, %v1173_v35  ;;  %v1192_v30 = vlaneseq }
 0x217   :  { %v1177_v62 = vadd.f32 %v1176_v28, %v1175_v51  ;;  %v1193_v52 = vshrl.u32 %v1192_v30, 7 }
 0x219   :  { %v1179_v29 = vadd.f32 %v1178_v49, %v1177_v62  ;;  %v8943_v6 = vsub.s32 0, %v1193_v52 }
 0x21b   :  { %v1181_v19 = vadd.f32 %v1180_v53, %v1179_v29  ;;  %11468 = vst [vmem:[#allocation26_spill] sm:$0xff] %v8943_v6  ;;  %v11471_v53 = vld [vmem:[#allocation36_spill] sm:$0xff] }
 0x21d   :  { %v1182_v54 = vrot.slane %v1181_v19, 4 }
 0x21f   :  { %v1183_v60 = vadd.f32 %v1182_v54, %v1181_v19  ;;  %v11472_v54 = vld [vmem:[#allocation12_spill] sm:$0xff] }
 0x221   :  { %v1184_v40 = vrot.slane %v1183_v60, 2 }
 0x223   :  { %v1185_v21 = vadd.f32 %v1184_v40, %v1183_v60  ;;  %v11473_v60 = vld [vmem:[#allocation11_spill] sm:$0xff]  ;;  %v11474_v40 = vld [vmem:[#allocation14_spill] sm:$0xff] }
 0x225   :  { %v1186_v36 = vrot.slane %v1185_v21, 1 }
 0x227   :  { %v1187_v13 = vadd.f32 %v1186_v36, %v1185_v21  ;;  %v8951_v36 = vld [vmem:[%s11469_s26] ss:$0 sm:$0xff] }
 0x229   :  { %v1188_v63 = vmul.f32 0.001953125, %v1187_v13 }
 0x22b   :  { %v1189_v35 = vadd.f32 1e-05, %v1188_v63 }
 0x22d   :  { %7413 = vrsqrt.f32 %v1189_v35  ;;  %v11475_v35 = vld [vmem:[#allocation13_spill] sm:$0xff] }
 0x237   :  { %v7414_v51 = vpop.eup %7413 }
 0x238   :  { %v1191_v45 = vmul.f32 %v7414_v51, %v725_v34  ;;  %v11476_v34 = vld [vmem:[#allocation16_spill] sm:$0xff] }
 0x23a   :  { %v8946_v28 = vrot.slane %v1191_v45, %v8943_v6  ;;  %v11477_v45 = vld [vmem:[#allocation15_spill] sm:$0xff] }
 0x23c   :  { %v1258_v13 = vmul.f32 %v8946_v28, %v8311_v46  ;;  %v8957_v21 = vmul.f32 %v8946_v28, %v8319_v2  ;;  %v8961_v19 = vmul.f32 %v8946_v28, %v8324_v38  ;;  %v8965_v52 = vmul.f32 %v8946_v28, %v8329_v10 }
 0x23d   :  { %v8969_v62 = vmul.f32 %v8946_v28, %v8334_v14  ;;  %v8973_v49 = vmul.f32 %v8946_v28, %v8343_v42  ;;  %v8977_v46 = vmul.f32 %v8946_v28, %v8350_v11  ;;  %v8981_v2 = vmul.f32 %v8946_v28, %v8359_v26  ;;  %v7287_v11 = vld [vmem:[%s11470_s28 + $0x40] sm:$0xff]  }
 0x23e   :  { %v1328_v38 = vadd.f32 %v8951_v36, %v1258_v13  ;;  %v8986_v10 = vmul.f32 %v8946_v28, %v8367_v58  ;;  %v8990_v14 = vmul.f32 %v8946_v28, %v8375_v7  ;;  %v8994_v42 = vmul.f32 %v8946_v28, %v8383_v3  ;;  %7263 = vmatprep.subr.bf16.mxu1 %v7287_v11 }
 0x23f   :  { %v9001_v26 = vmul.f32 %v8946_v28, %v8391_v31  ;;  %v9005_v58 = vmul.f32 %v8946_v28, %v8399_v16  ;;  %v9009_v7 = vmul.f32 %v8946_v28, %v8407_v25  ;;  %v9013_v3 = vmul.f32 %v8946_v28, %v8415_v15  ;;  %6393 = vmatprep.subr.bf16.mxu0 %v7287_v11  ;;  %v11478_v11 = vld [vmem:[#allocation18_spill] sm:$0xff] }
 0x240   :  { %1393 = vst.msk [vmem:[#allocation2 + $0x331] sm:$0xff] %vm791_vm4, %v1328_v38  ;;  %v9018_v29 = vmul.f32 %v8946_v28, %v8423_v44  ;;  %v9022_v31 = vmul.f32 %v8946_v28, %v8431_v20  ;;  %v9026_v16 = vmul.f32 %v8946_v28, %v8439_v55  ;;  %v9030_v25 = vmul.f32 %v8946_v28, %v8447_v5 }
 0x241   :  { %v9034_v15 = vmul.f32 %v8946_v28, %v8455_v9  ;;  %v9038_v44 = vmul.f32 %v8946_v28, %v8463_v24  ;;  %v9042_v20 = vmul.f32 %v8946_v28, %v8471_v48  ;;  %v9046_v55 = vmul.f32 %v8946_v28, %v8479_v37  ;;  %v7288_v37 = vld [vmem:[%s11470_s28] sm:$0xff]  }
 0x242   :  { %v9050_v5 = vmul.f32 %v8946_v28, %v8487_v1  ;;  %v9054_v9 = vmul.f32 %v8946_v28, %v8495_v23  ;;  %v9058_v24 = vmul.f32 %v8946_v28, %v8549_v4  ;;  %v9062_v48 = vmul.f32 %v8946_v28, %v11471_v53  ;;  %v7289_v1 = vld [vmem:[%s11470_s28 + $0x48] sm:$0xff]   ;;  %7271 = vmatpush3.bf16.msra.mxu1 %v7288_v37 }
 0x243   :  { %v9072_v23 = vmul.f32 %v8946_v28, %v11472_v54  ;;  %v9076_v4 = vmul.f32 %v8946_v28, %v11473_v60  ;;  %v9080_v63 = vmul.f32 %v8946_v28, %v11474_v40  ;;  %v9084_v30 = vmul.f32 %v8946_v28, %v11475_v35  ;;  %v11480_v54 = vld [vmem:[#allocation17_spill] sm:$0xff]  ;;  %v11482_v40 = vld [vmem:[#allocation20_spill] sm:$0xff]  ;;  %7264 = vmatprep.subr.bf16.mxu1 %v7289_v1 }
 0x244   :  { %v9088_v51 = vmul.f32 %v8946_v28, %v11476_v34  ;;  %v9092_v13 = vmul.f32 %v8946_v28, %v11477_v45  ;;  %v9096_v38 = vmul.f32 %v8946_v28, %v8614_v18  ;;  %v9100_v53 = vmul.f32 %v8946_v28, %v11478_v11  ;;  %v11483_v45 = vld [vmem:[#allocation19_spill] sm:$0xff]  ;;  %v11485_v11 = vld [vmem:[#allocation22_spill] sm:$0xff]  ;;  %6394 = vmatpush3.bf16.msra.mxu0 %v7288_v37  ;;  %v7291_v37 = vld [vmem:[%s11470_s28 + $0x50] sm:$0xff]  }
 0x245   :  { %v9104_v60 = vmul.f32 %v8946_v28, %v11480_v54  ;;  %v9108_v35 = vmul.f32 %v8946_v28, %v11482_v40  ;;  %v9112_v34 = vmul.f32 %v8946_v28, %v8649_v43  ;;  %v9116_v18 = vmul.f32 %v8946_v28, %v11483_v45  ;;  %v7290_v45 = vld [vmem:[%s11470_s28 + $0x8] sm:$0xff]   ;;  %6395 = vmatprep.subr.bf16.mxu0 %v7289_v1 }
 0x246   :  { %11479 = vst [vmem:[#allocation25_spill] sm:$0xff] %v9100_v53  ;;  %v9120_v6 = vmul.f32 %v8946_v28, %v11485_v11  ;;  %v11486_v53 = vld [vmem:[#allocation21_spill] sm:$0xff]  ;;  %v9132_v43 = vmul.f32 %v8946_v28, %v8841_v50  ;;  %v9151_v50 = vmul.f32 %v8946_v28, %v8873_v33  ;;  %v9170_v33 = vmul.f32 %v8946_v28, %v8262_v32 }
 0x247   :  { %11481 = vst [vmem:[#allocation28_spill] sm:$0xff] %v9104_v60  ;;  %11484 = vst [vmem:[#allocation27_spill] sm:$0xff] %v9116_v18  ;;  %v9124_v54 = vmul.f32 %v8946_v28, %v11486_v53  ;;  %v11487_v60 = vld [vmem:[#allocation24_spill] sm:$0xff]  ;;  %v11488_v18 = vld [vmem:[#allocation23_spill] sm:$0xff]  ;;  %v9143_v53 = vmul.f32 %v8946_v28, %v8857_v12  ;;  %v9162_v12 = vmul.f32 %v8946_v28, %v8252_v47  ;;  %7272 = vmatpush3.bf16.msra.mxu1 %v7290_v45 }
 0x248   :  { %v9128_v40 = vmul.f32 %v8946_v28, %v11487_v60  ;;  %v9139_v11 = vmul.f32 %v8946_v28, %v11488_v18  ;;  %v9147_v60 = vmul.f32 %v8946_v28, %v8865_v0  ;;  %v9158_v18 = vmul.f32 %v8946_v28, %v8247_v22  ;;  %7265 = vmatprep.subr.bf16.mxu1 %v7291_v37 }
 0x249   :  { %v9166_v0 = vmul.f32 %v8946_v28, %v8257_v39  ;;  %v9174_v1 = vmul.f32 %v8946_v28, %v8267_v41  ;;  %v9178_v22 = vmul.f32 %v8946_v28, %v8272_v17  ;;  %v9182_v47 = vmul.f32 %v8946_v28, %v8277_v27  ;;  %6396 = vmatpush3.bf16.msra.mxu0 %v7290_v45 }
 0x24a   :  { %v9186_v39 = vmul.f32 %v8946_v28, %v8282_v56  ;;  %v9190_v32 = vmul.f32 %v8946_v28, %v8285_v59  ;;  %v9194_v41 = vmul.f32 %v8946_v28, %v8290_v61  ;;  %v9198_v17 = vmul.f32 %v8946_v28, %v8293_v8  ;;  %v7292_v56 = vld [vmem:[%s11470_s28 + $0x10] sm:$0xff]   ;;  %v7293_v59 = vld [vmem:[%s11470_s28 + $0x58] sm:$0xff]   ;;  %6397 = vmatprep.subr.bf16.mxu0 %v7291_v37 }
 0x24b   :  { %11489 = vst [vmem:[#allocation30_spill] sm:$0xff] %v9182_v47  ;;  %v9202_v27 = vmul.f32 %v8946_v28, %v8296_v57  ;;  %v11500_v47 = vld [vmem:[#allocation35_spill] sm:$0xff]  ;;  %7273 = vmatpush3.bf16.msra.mxu1 %v7292_v56  ;;  %v1270_v37 = vadd.f32 %v8951_v36, %v8973_v49  ;;  %v7294_v49 = vld [vmem:[%s11470_s28 + $0x18] sm:$0xff]  }
 0x24c   :  { %11490 = vst [vmem:[#allocation29_spill] sm:$0xff] %v9186_v39  ;;  %11491 = vst [vmem:[#allocation36_spill] sm:$0xff] %v9190_v32  ;;  %v11495_v32 = vld [vmem:[#allocation31_spill] sm:$0xff]  ;;  %v9228_v45 = vmul.f32 %v8946_v28, %v11500_v47  ;;  %v1272_v47 = vadd.f32 %v8951_v36, %v8981_v2  ;;  %7266 = vmatprep.subr.bf16.mxu1 %v7293_v59  ;;  %v1278_v2 = vadd.f32 %v8951_v36, %v9009_v7 }
 0x24d   :  { %11492 = vst [vmem:[#allocation12_spill] sm:$0xff] %v9194_v41  ;;  %11493 = vst [vmem:[#allocation11_spill] sm:$0xff] %v9198_v17  ;;  %v9212_v61 = vmul.f32 %v8946_v28, %v11495_v32  ;;  %v11496_v41 = vld [vmem:[#allocation32_spill] sm:$0xff]  ;;  %v11498_v17 = vld [vmem:[#allocation33_spill] sm:$0xff]  ;;  %v1266_v32 = vadd.f32 %v8951_v36, %v8957_v21  ;;  %v1273_v21 = vadd.f32 %v8951_v36, %v8986_v10  ;;  %6398 = vmatpush3.bf16.msra.mxu0 %v7292_v56 }
 0x24e   :  { %11494 = vst [vmem:[#allocation14_spill] sm:$0xff] %v9202_v27  ;;  %v9216_v8 = vmul.f32 %v8946_v28, %v11496_v41  ;;  %v9220_v57 = vmul.f32 %v8946_v28, %v11498_v17  ;;  %v11499_v27 = vld [vmem:[#allocation34_spill] sm:$0xff]  ;;  %v1267_v41 = vadd.f32 %v8951_v36, %v8961_v19  ;;  %v1269_v17 = vadd.f32 %v8951_v36, %v8969_v62  ;;  %v11501_v56 = vld [vmem:[#allocation25_spill] sm:$0xff] }
 0x24f   :  { %v9224_v39 = vmul.f32 %v8946_v28, %v11499_v27  ;;  %v1271_v28 = vadd.f32 %v8951_v36, %v8977_v46  ;;  %v1274_v19 = vadd.f32 %v8951_v36, %v8990_v14  ;;  %v1276_v62 = vadd.f32 %v8951_v36, %v9001_v26  ;;  %1331 = vst.msk [vmem:[#allocation2 + $0x19] sm:$0xff] %vm791_vm4, %v1266_v32 }
 0x250   :  { %11497 = vst [vmem:[#allocation13_spill] sm:$0xff] %v9216_v8  ;;  %v1268_v8 = vadd.f32 %v8951_v36, %v8965_v52  ;;  %v1275_v52 = vadd.f32 %v8951_v36, %v8994_v42  ;;  %1332 = vst.msk [vmem:[#allocation2 + $0x21] sm:$0xff] %vm791_vm4, %v1267_v41  ;;  %v1277_v46 = vadd.f32 %v8951_v36, %v9005_v58  ;;  %6399 = vmatprep.subr.bf16.mxu0 %v7293_v59  ;;  %v11502_v59 = vld [vmem:[#allocation28_spill] sm:$0xff] }
 0x251   :  { %v1279_v10 = vadd.f32 %v8951_v36, %v9013_v3  ;;  %v1280_v14 = vadd.f32 %v8951_v36, %v9018_v29  ;;  %1334 = vst.msk [vmem:[#allocation2 + $0x39] sm:$0xff] %vm791_vm4, %v1269_v17  ;;  %1335 = vst.msk [vmem:[#allocation2 + $0x49] sm:$0xff] %vm791_vm4, %v1270_v37  ;;  %v1281_v42 = vadd.f32 %v8951_v36, %v9022_v31  ;;  %7274 = vmatpush3.bf16.msra.mxu1 %v7294_v49 }
 0x252   :  { %1333 = vst.msk [vmem:[#allocation2 + $0x31] sm:$0xff] %vm791_vm4, %v1268_v8  ;;  %1336 = vst.msk [vmem:[#allocation2 + $0x51] sm:$0xff] %vm791_vm4, %v1271_v28  ;;  %v1282_v26 = vadd.f32 %v8951_v36, %v9026_v16  ;;  %v1283_v58 = vadd.f32 %v8951_v36, %v9030_v25  ;;  %v1284_v7 = vadd.f32 %v8951_v36, %v9034_v15  ;;  %v9294_v25 = vpop.permute.xlu1 %1602  ;;  %6400 = vmatpush3.bf16.msra.mxu0 %v7294_v49  ;;  %v11503_v8 = vld [vmem:[#allocation27_spill] sm:$0xff] }
 0x253   :  { %1337 = vst.msk [vmem:[#allocation2 + $0x61] sm:$0xff] %vm791_vm4, %v1272_v47  ;;  %1338 = vst.msk [vmem:[#allocation2 + $0x69] sm:$0xff] %vm791_vm4, %v1273_v21  ;;  %v1285_v3 = vadd.f32 %v8951_v36, %v9038_v44  ;;  %v1286_v29 = vadd.f32 %v8951_v36, %v9042_v20  ;;  %v1287_v31 = vadd.f32 %v8951_v36, %v9046_v55  ;;  %v11504_v47 = vld [vmem:[#allocation30_spill] sm:$0xff]  ;;  %v11505_v21 = vld [vmem:[#allocation29_spill] sm:$0xff] }
 0x254   :  { %1339 = vst.msk [vmem:[#allocation2 + $0x79] sm:$0xff] %vm791_vm4, %v1274_v19  ;;  %1340 = vst.msk [vmem:[#allocation2 + $0x81] sm:$0xff] %vm791_vm4, %v1275_v52  ;;  %v1288_v16 = vadd.f32 %v8951_v36, %v9050_v5  ;;  %v1289_v15 = vadd.f32 %v8951_v36, %v9054_v9  ;;  %v1290_v44 = vadd.f32 %v8951_v36, %v9058_v24  ;;  %v7295_v5 = vld [vmem:[%s11470_s28 + $0x60] sm:$0xff]   ;;  %v11506_v19 = vld [vmem:[#allocation36_spill] sm:$0xff] }
 0x255   :  { %1341 = vst.msk [vmem:[#allocation2 + $0x91] sm:$0xff] %vm791_vm4, %v1276_v62  ;;  %1342 = vst.msk [vmem:[#allocation2 + $0x99] sm:$0xff] %vm791_vm4, %v1277_v46  ;;  %v1291_v20 = vadd.f32 %v8951_v36, %v9062_v48  ;;  %v1292_v55 = vadd.f32 %v8951_v36, %v9072_v23  ;;  %v7296_v9 = vld [vmem:[%s11470_s28 + $0x20] sm:$0xff]   ;;  %v1293_v24 = vadd.f32 %v8951_v36, %v9076_v4  ;;  %7267 = vmatprep.subr.bf16.mxu1 %v7295_v5  ;;  %v11507_v49 = vld [vmem:[#allocation12_spill] sm:$0xff] }
 0x256   :  { %1343 = vst.msk [vmem:[#allocation2 + $0xa9] sm:$0xff] %vm791_vm4, %v1278_v2  ;;  %1344 = vst.msk [vmem:[#allocation2 + $0xb1] sm:$0xff] %vm791_vm4, %v1279_v10  ;;  %v1294_v48 = vadd.f32 %v8951_v36, %v9080_v63  ;;  %v1295_v23 = vadd.f32 %v8951_v36, %v9084_v30  ;;  %v1296_v27 = vadd.f32 %v8951_v36, %v9088_v51  ;;  %7275 = vmatpush3.bf16.msra.mxu1 %v7296_v9  ;;  %v9374_v37 = vpop.permute.xlu1 %1731  ;;  %v11508_v2 = vld [vmem:[#allocation11_spill] sm:$0xff] }
 0x257   :  { %1345 = vst.msk [vmem:[#allocation2 + $0xc1] sm:$0xff] %vm791_vm4, %v1280_v14  ;;  %1346 = vst.msk [vmem:[#allocation2 + $0xc9] sm:$0xff] %vm791_vm4, %v1281_v42  ;;  %v1297_v4 = vadd.f32 %v8951_v36, %v9092_v13  ;;  %v1298_v63 = vadd.f32 %v8951_v36, %v9096_v38  ;;  %v1299_v30 = vadd.f32 %v8951_v36, %v11501_v56  ;;  %6401 = vmatprep.subr.bf16.mxu0 %v7295_v5  ;;  %v11509_v14 = vld [vmem:[#allocation14_spill] sm:$0xff] }
 0x258   :  { %1347 = vst.msk [vmem:[#allocation2 + $0xd9] sm:$0xff] %vm791_vm4, %v1282_v26  ;;  %1348 = vst.msk [vmem:[#allocation2 + $0xe1] sm:$0xff] %vm791_vm4, %v1283_v58  ;;  %v1300_v51 = vadd.f32 %v8951_v36, %v11502_v59  ;;  %v1301_v13 = vadd.f32 %v8951_v36, %v9108_v35  ;;  %v1302_v38 = vadd.f32 %v8951_v36, %v9112_v34  ;;  %6402 = vmatpush3.bf16.msra.mxu0 %v7296_v9  ;;  %v11510_v58 = vld [vmem:[#allocation13_spill] sm:$0xff] }
 0x259   :  { %1349 = vst.msk [vmem:[#allocation2 + $0xf1] sm:$0xff] %vm791_vm4, %v1284_v7  ;;  %1350 = vst.msk [vmem:[#allocation2 + $0xf9] sm:$0xff] %vm791_vm4, %v1285_v3  ;;  %v1303_v32 = vadd.f32 %v8951_v36, %v11503_v8  ;;  %v1304_v41 = vadd.f32 %v8951_v36, %v9120_v6  ;;  %v1305_v35 = vadd.f32 %v8951_v36, %v9124_v54  ;;  %v1991_v62 = vld [vmem:[#allocation2 + $0x4a] sm:$0xff]  ;;  %v1541_v5 = vld [vmem:[#allocation2 + $0x39] sm:$0xff] }
 0x25a   :  { %1351 = vst.msk [vmem:[#allocation2 + $0x109] sm:$0xff] %vm791_vm4, %v1286_v29  ;;  %1352 = vst.msk [vmem:[#allocation2 + $0x111] sm:$0xff] %vm791_vm4, %v1287_v31  ;;  %v1306_v34 = vadd.f32 %v8951_v36, %v9128_v40  ;;  %v1307_v17 = vadd.f32 %v8951_v36, %v9132_v43  ;;  %v1308_v6 = vadd.f32 %v8951_v36, %v9139_v11  ;;  %v2120_v28 = vld [vmem:[#allocation2 + $0x60] sm:$0xff]  ;;  %v2121_v52 = vld [vmem:[#allocation2 + $0x68] sm:$0xff] }
 0x25b   :  { %1353 = vst.msk [vmem:[#allocation2 + $0x121] sm:$0xff] %vm791_vm4, %v1288_v16  ;;  %1354 = vst.msk [vmem:[#allocation2 + $0x129] sm:$0xff] %vm791_vm4, %v1289_v15  ;;  %v1309_v54 = vadd.f32 %v8951_v36, %v9143_v53  ;;  %v1310_v40 = vadd.f32 %v8951_v36, %v9147_v60  ;;  %v1311_v43 = vadd.f32 %v8951_v36, %v9151_v50  ;;  %v1475_v15 = vld [vmem:[#allocation2 + $0x8] sm:$0xff]  ;;  %v1491_v9 = vld [vmem:[#allocation2 + $0x1b8] sm:$0xff] }
 0x25c   :  { %1355 = vst.msk [vmem:[#allocation2 + $0x139] sm:$0xff] %vm791_vm4, %v1290_v44  ;;  %1356 = vst.msk [vmem:[#allocation2 + $0x141] sm:$0xff] %vm791_vm4, %v1291_v20  ;;  %v1312_v11 = vadd.f32 %v8951_v36, %v9158_v18  ;;  %v1313_v53 = vadd.f32 %v8951_v36, %v9162_v12  ;;  %v1314_v60 = vadd.f32 %v8951_v36, %v9166_v0  ;;  %v2122_v31 = vld [vmem:[#allocation2 + $0x90] sm:$0xff]  ;;  %v2123_v16 = vld [vmem:[#allocation2 + $0x98] sm:$0xff] }
 0x25d   :  { %1357 = vst.msk [vmem:[#allocation2 + $0x151] sm:$0xff] %vm791_vm4, %v1292_v55  ;;  %1358 = vst.msk [vmem:[#allocation2 + $0x159] sm:$0xff] %vm791_vm4, %v1293_v24  ;;  %v1315_v50 = vadd.f32 %v8951_v36, %v9170_v33  ;;  %v1316_v18 = vadd.f32 %v8951_v36, %v9174_v1  ;;  %v1317_v12 = vadd.f32 %v8951_v36, %v9178_v22  ;;  %v1992_v22 = vld [vmem:[#allocation2 + $0x52] sm:$0xff]  ;;  %v1474_v44 = vld [vmem:[#allocation2] sm:$0xff]  ;;  %v1619_v24 = vpop.permute.xlu1 %1618 }
 0x25e   :  { %1359 = vst.msk [vmem:[#allocation2 + $0x169] sm:$0xff] %vm791_vm4, %v1294_v48  ;;  %1360 = vst.msk [vmem:[#allocation2 + $0x171] sm:$0xff] %vm791_vm4, %v1295_v23  ;;  %v1318_v0 = vadd.f32 %v8951_v36, %v11504_v47  ;;  %v1319_v33 = vadd.f32 %v8951_v36, %v11505_v21  ;;  %v1320_v1 = vadd.f32 %v8951_v36, %v11506_v19  ;;  %v1490_v20 = vld [vmem:[#allocation2 + $0x1b0] sm:$0xff]  ;;  %v2124_v23 = vld [vmem:[#allocation2 + $0xc0] sm:$0xff] }
 0x25f   :  { %1361 = vst.msk [vmem:[#allocation2 + $0x181] sm:$0xff] %vm791_vm4, %v1296_v27  ;;  %1362 = vst.msk [vmem:[#allocation2 + $0x189] sm:$0xff] %vm791_vm4, %v1297_v4  ;;  %v1321_v46 = vadd.f32 %v8951_v36, %v11507_v49  ;;  %v1322_v10 = vadd.f32 %v8951_v36, %v11508_v2  ;;  %v1323_v42 = vadd.f32 %v8951_v36, %v11509_v14  ;;  %v1540_v55 = vld [vmem:[#allocation2 + $0x31] sm:$0xff]  ;;  %v2125_v27 = vld [vmem:[#allocation2 + $0xc8] sm:$0xff] }
 0x260   :  { %1363 = vst.msk [vmem:[#allocation2 + $0x1c9] sm:$0xff] %vm791_vm4, %v1298_v63  ;;  %1364 = vst.msk [vmem:[#allocation2 + $0x1d1] sm:$0xff] %vm791_vm4, %v1299_v30  ;;  %v1324_v26 = vadd.f32 %v8951_v36, %v9212_v61  ;;  %v1325_v7 = vadd.f32 %v8951_v36, %v11510_v58  ;;  %v1326_v3 = vadd.f32 %v8951_v36, %v9220_v57  ;;  %v1669_v57 = vld [vmem:[#allocation2 + $0x32] sm:$0xff]  ;;  %v1798_v30 = vld [vmem:[#allocation2 + $0x48] sm:$0xff] }
 0x261   :  { %1365 = vst.msk [vmem:[#allocation2 + $0x1e1] sm:$0xff] %vm791_vm4, %v1300_v51  ;;  %1366 = vst.msk [vmem:[#allocation2 + $0x1e9] sm:$0xff] %vm791_vm4, %v1301_v13  ;;  %v1327_v29 = vadd.f32 %v8951_v36, %v9224_v39  ;;  %v1329_v61 = vadd.f32 %v8951_v36, %v9228_v45  ;;  %v2151_v36 = vpack.c.bf16 %v2121_v52, %v2120_v28  ;;  %v1670_v45 = vld [vmem:[#allocation2 + $0x3a] sm:$0xff]  ;;  %v1799_v59 = vld [vmem:[#allocation2 + $0x50] sm:$0xff] }
 0x262   :  { %1367 = vst.msk [vmem:[#allocation2 + $0x1f9] sm:$0xff] %vm791_vm4, %v1302_v38  ;;  %1368 = vst.msk [vmem:[#allocation2 + $0x201] sm:$0xff] %vm791_vm4, %v1303_v32  ;;  %v2022_v39 = vpack.c.bf16 %v1992_v22, %v1991_v62  ;;  %v2152_v48 = vpack.c.bf16 %v2123_v16, %v2122_v31  ;;  %v1700_v4 = vpack.c.bf16 %v1670_v45, %v1669_v57  ;;  %v2248_v38 = vld [vmem:[#allocation2 + $0x61] sm:$0xff]  ;;  %v2249_v8 = vld [vmem:[#allocation2 + $0x69] sm:$0xff] }
 0x263   :  { %1369 = vst.msk [vmem:[#allocation2 + $0x211] sm:$0xff] %vm791_vm4, %v1304_v41  ;;  %1370 = vst.msk [vmem:[#allocation2 + $0x219] sm:$0xff] %vm791_vm4, %v1305_v35  ;;  %2184 = vrot.lane.b32.xlu1 %v2151_v36, %s7454_s22  ;;  %v9435_v63 = vpack.c.bf16 %v2125_v27, %v2124_v23  ;;  %v9437_v56 = vpack.c.bf16 %v1541_v5, %v1540_v55  ;;  %v1506_v51 = vpack.c.bf16 %v1475_v15, %v1474_v44  ;;  %v2126_v32 = vld [vmem:[#allocation2 + $0xf0] sm:$0xff]  ;;  %v2127_v41 = vld [vmem:[#allocation2 + $0xf8] sm:$0xff] }
 0x264   :  { %1371 = vst.msk [vmem:[#allocation2 + $0x229] sm:$0xff] %vm791_vm4, %v1306_v34  ;;  %1372 = vst.msk [vmem:[#allocation2 + $0x231] sm:$0xff] %vm791_vm4, %v1307_v17  ;;  %2055 = vrot.lane.b32.xlu0 %v2022_v39, %s7453_s0  ;;  %v1514_v13 = vpack.c.bf16 %v1491_v9, %v1490_v20  ;;  %v9447_v35 = vpack.c.bf16 %v2127_v41, %v2126_v32  ;;  %v1748_v34 = vpop.permute.xlu1 %1747  ;;  %v1829_v17 = vpack.c.bf16 %v1799_v59, %v1798_v30  ;;  %v2119_v47 = vld [vmem:[#allocation2 + $0x38] sm:$0xff]  ;;  %v1801_v19 = vld [vmem:[#allocation2 + $0x80] sm:$0xff] }
 0x265   :  { %1373 = vst.msk [vmem:[#allocation2 + $0x241] sm:$0xff] %vm791_vm4, %v1308_v6  ;;  %1374 = vst.msk [vmem:[#allocation2 + $0x249] sm:$0xff] %vm791_vm4, %v1309_v54  ;;  %v2279_v6 = vpack.c.bf16 %v2249_v8, %v2248_v38  ;;  %v1993_v54 = vld [vmem:[#allocation2 + $0x7a] sm:$0xff]  ;;  %v1995_v49 = vld [vmem:[#allocation2 + $0xaa] sm:$0xff] }
 0x266   :  { %1375 = vst.msk [vmem:[#allocation2 + $0x259] sm:$0xff] %vm791_vm4, %v1310_v40  ;;  %1376 = vst.msk [vmem:[#allocation2 + $0x261] sm:$0xff] %vm791_vm4, %v1311_v43  ;;  %v1994_v40 = vld [vmem:[#allocation2 + $0x82] sm:$0xff]  ;;  %v2251_v52 = vld [vmem:[#allocation2 + $0x99] sm:$0xff] }
 0x267   :  { %1377 = vst.msk [vmem:[#allocation2 + $0x271] sm:$0xff] %vm791_vm4, %v1312_v11  ;;  %1378 = vst.msk [vmem:[#allocation2 + $0x279] sm:$0xff] %vm791_vm4, %v1313_v53  ;;  %1733 = vrot.lane.b32.xlu1 %v1700_v4, %s7454_s22  ;;  %v2128_v43 = vld [vmem:[#allocation2 + $0x120] sm:$0xff]  ;;  %v2129_v11 = vld [vmem:[#allocation2 + $0x128] sm:$0xff]  ;;  %v2023_v53 = vpack.c.bf16 %v1994_v40, %v1993_v54 }
 0x268   :  { %1379 = vst.msk [vmem:[#allocation2 + $0x289] sm:$0xff] %vm791_vm4, %v1314_v60  ;;  %1380 = vst.msk [vmem:[#allocation2 + $0x291] sm:$0xff] %vm791_vm4, %v1315_v50  ;;  %1604 = vrot.lane.b32.xlu0 %v9437_v56, %s7453_s0  ;;  %v2130_v60 = vld [vmem:[#allocation2 + $0x150] sm:$0xff]  ;;  %v2131_v50 = vld [vmem:[#allocation2 + $0x158] sm:$0xff] }
 0x269   :  { %1381 = vst.msk [vmem:[#allocation2 + $0x2a1] sm:$0xff] %vm791_vm4, %v1316_v18  ;;  %1382 = vst.msk [vmem:[#allocation2 + $0x2a9] sm:$0xff] %vm791_vm4, %v1317_v12  ;;  %v1672_v18 = vld [vmem:[#allocation2 + $0x6a] sm:$0xff]  ;;  %v9463_v28 = vpack.c.bf16 %v2131_v50, %v2130_v60  ;;  %v2134_v2 = vld [vmem:[#allocation2 + $0x1e0] sm:$0xff] }
 0x26a   :  { %1383 = vst.msk [vmem:[#allocation2 + $0x2b9] sm:$0xff] %vm791_vm4, %v1318_v0  ;;  %1384 = vst.msk [vmem:[#allocation2 + $0x2c1] sm:$0xff] %vm791_vm4, %v1319_v33  ;;  %v2118_v12 = vld [vmem:[#allocation2 + $0x30] sm:$0xff]  ;;  %v1800_v33 = vld [vmem:[#allocation2 + $0x78] sm:$0xff] }
 0x26b   :  { %1385 = vst.msk [vmem:[#allocation2 + $0x2d1] sm:$0xff] %vm791_vm4, %v1320_v1  ;;  %1386 = vst.msk [vmem:[#allocation2 + $0x2d9] sm:$0xff] %vm791_vm4, %v1321_v46  ;;  %1862 = vrot.lane.b32.xlu1 %v1829_v17, %s7455_s24  ;;  %v9467_v0 = vpack.c.bf16 %v2119_v47, %v2118_v12  ;;  %v2250_v1 = vld [vmem:[#allocation2 + $0x91] sm:$0xff]  ;;  %v1830_v62 = vpack.c.bf16 %v1801_v19, %v1800_v33  ;;  %v1674_v58 = vld [vmem:[#allocation2 + $0x9a] sm:$0xff] }
 0x26c   :  { %1387 = vst.msk [vmem:[#allocation2 + $0x2e9] sm:$0xff] %vm791_vm4, %v1322_v10  ;;  %1388 = vst.msk [vmem:[#allocation2 + $0x2f1] sm:$0xff] %vm791_vm4, %v1323_v42  ;;  %2312 = vrot.lane.b32.xlu0 %v2279_v6, %s7455_s24  ;;  %v2280_v22 = vpack.c.bf16 %v2251_v52, %v2250_v1  ;;  %v1996_v46 = vld [vmem:[#allocation2 + $0xb2] sm:$0xff]  ;;  %v2135_v10 = vld [vmem:[#allocation2 + $0x1e8] sm:$0xff] }
 0x26d   :  { %1389 = vst.msk [vmem:[#allocation2 + $0x301] sm:$0xff] %vm791_vm4, %v1324_v26  ;;  %1390 = vst.msk [vmem:[#allocation2 + $0x309] sm:$0xff] %vm791_vm4, %v1325_v7  ;;  %v9477_v14 = vpack.c.bf16 %v2135_v10, %v2134_v2  ;;  %v2024_v42 = vpack.c.bf16 %v1996_v46, %v1995_v49  ;;  %v1673_v26 = vld [vmem:[#allocation2 + $0x92] sm:$0xff]  ;;  %v1927_v31 = vld [vmem:[#allocation2 + $0x49] sm:$0xff] }
 0x26e   :  { %1391 = vst.msk [vmem:[#allocation2 + $0x319] sm:$0xff] %vm791_vm4, %v1326_v3  ;;  %1392 = vst.msk [vmem:[#allocation2 + $0x321] sm:$0xff] %vm791_vm4, %v1327_v29  ;;  %v2136_v7 = vld [vmem:[#allocation2 + $0x210] sm:$0xff]  ;;  %v2137_v3 = vld [vmem:[#allocation2 + $0x218] sm:$0xff]  ;;  %v1702_v39 = vpack.c.bf16 %v1674_v58, %v1673_v26 }
 0x26f   :  { %1394 = vst.msk [vmem:[#allocation2 + $0x339] sm:$0xff] %vm791_vm4, %v1329_v61  ;;  %1524 = vst.msk [vmem:[#allocation5 + $0x30] sm:$0xff] %vm791_vm4, %v2151_v36  ;;  %1606 = vrot.lane.b32.xlu1 %v2279_v6, %s7453_s0  ;;  %v9483_v29 = vpack.c.bf16 %v2137_v3, %v2136_v7  ;;  %v1928_v61 = vld [vmem:[#allocation2 + $0x51] sm:$0xff]  ;;  %v1802_v16 = vld [vmem:[#allocation2 + $0xa8] sm:$0xff] }
 0x270   :  { %1525 = vst.msk [vmem:[#allocation5 + $0x48] sm:$0xff] %vm791_vm4, %v2152_v48  ;;  %1526 = vst.msk [vmem:[#allocation5 + $0x60] sm:$0xff] %vm791_vm4, %v9435_v63  ;;  %2057 = vrot.lane.b32.xlu0 %v2023_v53, %s7453_s0  ;;  %v1803_v15 = vld [vmem:[#allocation2 + $0xb0] sm:$0xff]  ;;  %v1958_v44 = vpack.c.bf16 %v1928_v61, %v1927_v31  ;;  %v7297_v36 = vld [vmem:[%s11470_s28 + $0x68] sm:$0xff]  }
 0x271   :  { %1522 = vst.msk [vmem:[#allocation5] sm:$0xff] %vm791_vm4, %v1506_v51  ;;  %1530 = vst.msk [vmem:[#allocation5 + $0xc0] sm:$0xff] %vm791_vm4, %v1514_v13  ;;  %v2252_v57 = vld [vmem:[#allocation2 + $0xc1] sm:$0xff]  ;;  %v2253_v45 = vld [vmem:[#allocation2 + $0xc9] sm:$0xff]  ;;  %7268 = vmatprep.subr.bf16.mxu1 %v7297_v36  ;;  %6403 = vmatprep.subr.bf16.mxu0 %v7297_v36  ;;  %v1831_v59 = vpack.c.bf16 %v1803_v15, %v1802_v16 }
 0x272   :  { %1651 = vst.msk [vmem:[#allocation5] sm:$0xff] %vm1650_vm7, %v9294_v25  ;;  %1659 = vst.msk [vmem:[#allocation5 + $0xc0] sm:$0xff] %vm1650_vm7, %v1619_v24  ;;  %v9459_v25 = vpack.c.bf16 %v2129_v11, %v2128_v43  ;;  %v1689_v20 = vld [vmem:[#allocation2 + $0x242] sm:$0xff]  ;;  %v1690_v55 = vld [vmem:[#allocation2 + $0x24a] sm:$0xff]  ;;  %v2281_v51 = vpack.c.bf16 %v2253_v45, %v2252_v57 }
 0x273   :  { %1780 = vst.msk [vmem:[#allocation5] sm:$0xff] %vm1779_vm8, %v9374_v37  ;;  %1788 = vst.msk [vmem:[#allocation5 + $0xc0] sm:$0xff] %vm1779_vm8, %v1748_v34  ;;  %v1671_v37 = vld [vmem:[#allocation2 + $0x62] sm:$0xff]  ;;  %v7299_v9 = vld [vmem:[%s11470_s28 + $0x70] sm:$0xff]   ;;  %v9500_v24 = vpack.c.bf16 %v1690_v55, %v1689_v20 }
 0x274   :  { %1527 = vst.msk [vmem:[#allocation5 + $0x78] sm:$0xff] %vm791_vm4, %v9447_v35  ;;  %1528 = vst.msk [vmem:[#allocation5 + $0x90] sm:$0xff] %vm791_vm4, %v9459_v25  ;;  %v1701_v21 = vpack.c.bf16 %v1672_v18, %v1671_v37  ;;  %2186 = vrot.lane.b32.xlu0 %v2152_v48, %s7454_s22  ;;  %v7298_v5 = vld [vmem:[%s11470_s28 + $0x28] sm:$0xff]   ;;  %v2138_v48 = vld [vmem:[#allocation2 + $0x240] sm:$0xff] }
 0x275   :  { %1529 = vst.msk [vmem:[#allocation5 + $0xa8] sm:$0xff] %vm791_vm4, %v9463_v28  ;;  %1523 = vst.msk [vmem:[#allocation5 + $0x18] sm:$0xff] %vm791_vm4, %v9467_v0  ;;  %v2139_v23 = vld [vmem:[#allocation2 + $0x248] sm:$0xff]  ;;  %7276 = vmatpush3.bf16.msra.mxu1 %v7298_v5  ;;  %v7300_v4 = vld [vmem:[%s11470_s28 + $0x30] sm:$0xff]   ;;  %6404 = vmatpush3.bf16.msra.mxu0 %v7298_v5 }
 0x276   :  { %1735 = vrot.lane.b32.xlu1 %v1701_v21, %s7454_s22  ;;  %1531 = vst.msk [vmem:[#allocation5 + $0xd8] sm:$0xff] %vm791_vm4, %v9477_v14  ;;  %1532 = vst.msk [vmem:[#allocation5 + $0xf0] sm:$0xff] %vm791_vm4, %v9483_v29  ;;  %v9502_v27 = vpack.c.bf16 %v2139_v23, %v2138_v48  ;;  %v1929_v30 = vld [vmem:[#allocation2 + $0x79] sm:$0xff]  ;;  %7269 = vmatprep.subr.bf16.mxu1 %v7299_v9  ;;  %v1930_v13 = vld [vmem:[#allocation2 + $0x81] sm:$0xff] }
 0x277   :  { %1974 = vst.msk [vmem:[#allocation5 + $0x20] sm:$0xff] %vm791_vm4, %v1958_v44  ;;  %6405 = vmatprep.subr.bf16.mxu0 %v7299_v9  ;;  %2432 = vst.msk [vmem:[#allocation5 + $0x100] sm:$0xff] %vm791_vm4, %v9500_v24  ;;  %v1997_v38 = vld [vmem:[#allocation2 + $0xda] sm:$0xff]  ;;  %v1998_v8 = vld [vmem:[#allocation2 + $0xe2] sm:$0xff]  ;;  %v1959_v32 = vpack.c.bf16 %v1930_v13, %v1929_v30 }
 0x278   :  { %2314 = vrot.lane.b32.xlu0 %v2280_v22, %s7455_s24  ;;  %1533 = vst.msk [vmem:[#allocation5 + $0x108] sm:$0xff] %vm791_vm4, %v9502_v27  ;;  %v1691_v41 = vld [vmem:[#allocation2 + $0x272] sm:$0xff]  ;;  %v1692_v34 = vld [vmem:[#allocation2 + $0x27a] sm:$0xff]  ;;  %v2025_v43 = vpack.c.bf16 %v1998_v8, %v1997_v38  ;;  %v1931_v53 = vld [vmem:[#allocation2 + $0xa9] sm:$0xff] }
 0x279   :  { %7277 = vmatpush3.bf16.msra.mxu1 %v7300_v4  ;;  %1975 = vst.msk [vmem:[#allocation5 + $0x38] sm:$0xff] %vm791_vm4, %v1959_v32  ;;  %v7302_v17 = vld [vmem:[%s11470_s28 + $0x38] sm:$0xff]   ;;  %v9520_v6 = vpack.c.bf16 %v1692_v34, %v1691_v41  ;;  %v2140_v54 = vld [vmem:[#allocation2 + $0x270] sm:$0xff]  ;;  %6406 = vmatpush3.bf16.msra.mxu0 %v7300_v4  ;;  %v1675_v50 = vld [vmem:[#allocation2 + $0xc2] sm:$0xff] }
 0x27a   :  { %1864 = vrot.lane.b32.xlu1 %v1830_v62, %s7455_s24  ;;  %v2141_v40 = vld [vmem:[#allocation2 + $0x278] sm:$0xff]  ;;  %v1676_v37 = vld [vmem:[#allocation2 + $0xca] sm:$0xff]  ;;  %v1693_v12 = vld [vmem:[#allocation2 + $0x2a2] sm:$0xff] }
 0x27b   :  { %v9522_v11 = vpack.c.bf16 %v2141_v40, %v2140_v54  ;;  %v1932_v60 = vld [vmem:[#allocation2 + $0xb1] sm:$0xff]  ;;  %2433 = vst.msk [vmem:[#allocation5 + $0x118] sm:$0xff] %vm791_vm4, %v9520_v6  ;;  %v2142_v33 = vld [vmem:[#allocation2 + $0x2a0] sm:$0xff]  ;;  %v2143_v19 = vld [vmem:[#allocation2 + $0x2a8] sm:$0xff]  ;;  %v1703_v1 = vpack.c.bf16 %v1676_v37, %v1675_v50 }
 0x27c   :  { %2059 = vrot.lane.b32.xlu0 %v2024_v42, %s7453_s0  ;;  %v1960_v18 = vpack.c.bf16 %v1932_v60, %v1931_v53  ;;  %v1694_v47 = vld [vmem:[#allocation2 + $0x2aa] sm:$0xff]  ;;  %v1804_v52 = vld [vmem:[#allocation2 + $0xd8] sm:$0xff]  ;;  %v9533_v62 = vpack.c.bf16 %v2143_v19, %v2142_v33  ;;  %v1934_v49 = vld [vmem:[#allocation2 + $0xe1] sm:$0xff] }
 0x27d   :  { %1534 = vst.msk [vmem:[#allocation5 + $0x120] sm:$0xff] %vm791_vm4, %v9522_v11  ;;  %v9531_v21 = vpack.c.bf16 %v1694_v47, %v1693_v12  ;;  %v1805_v46 = vld [vmem:[#allocation2 + $0xe0] sm:$0xff]  ;;  %v2254_v2 = vld [vmem:[#allocation2 + $0xf1] sm:$0xff]  ;;  %v1935_v44 = vld [vmem:[#allocation2 + $0x109] sm:$0xff] }
 0x27e   :  { %1608 = vrot.lane.b32.xlu1 %v2280_v22, %s7453_s0  ;;  %1976 = vst.msk [vmem:[#allocation5 + $0x50] sm:$0xff] %vm791_vm4, %v1960_v18  ;;  %v1933_v22 = vld [vmem:[#allocation2 + $0xd9] sm:$0xff]  ;;  %1535 = vst.msk [vmem:[#allocation5 + $0x138] sm:$0xff] %vm791_vm4, %v9533_v62  ;;  %v2144_v3 = vld [vmem:[#allocation2 + $0x2d0] sm:$0xff]  ;;  %v1832_v31 = vpack.c.bf16 %v1805_v46, %v1804_v52 }
 0x27f   :  { %v2255_v10 = vld [vmem:[#allocation2 + $0xf9] sm:$0xff]  ;;  %v1961_v42 = vpack.c.bf16 %v1934_v49, %v1933_v22  ;;  %2434 = vst.msk [vmem:[#allocation5 + $0x130] sm:$0xff] %vm791_vm4, %v9531_v21  ;;  %v1936_v36 = vld [vmem:[#allocation2 + $0x111] sm:$0xff]  ;;  %v1697_v45 = vld [vmem:[#allocation2 + $0x302] sm:$0xff] }
 0x280   :  { %2188 = vrot.lane.b32.xlu0 %v9435_v63, %s7454_s22  ;;  %v7301_v63 = vld [vmem:[%s11470_s28 + $0x78] sm:$0xff]   ;;  %v2282_v16 = vpack.c.bf16 %v2255_v10, %v2254_v2  ;;  %v1698_v20 = vld [vmem:[#allocation2 + $0x30a] sm:$0xff]  ;;  %v2146_v5 = vld [vmem:[#allocation2 + $0x300] sm:$0xff] }
 0x281   :  { %7270 = vmatprep.subr.bf16.mxu1 %v7301_v63  ;;  %6407 = vmatprep.subr.bf16.mxu0 %v7301_v63  ;;  %v1695_v26 = vld [vmem:[#allocation2 + $0x2d2] sm:$0xff]  ;;  %v1696_v58 = vld [vmem:[#allocation2 + $0x2da] sm:$0xff]  ;;  %1977 = vst.msk [vmem:[#allocation5 + $0x68] sm:$0xff] %vm791_vm4, %v1961_v42  ;;  %v9554_v55 = vpack.c.bf16 %v1698_v20, %v1697_v45  ;;  %v2147_v9 = vld [vmem:[#allocation2 + $0x308] sm:$0xff] }
 0x282   :  { %1737 = vrot.lane.b32.xlu1 %v1702_v39, %s7454_s22  ;;  %7278 = vmatpush3.bf16.msra.mxu1 %v7302_v17  ;;  %v9543_v7 = vpack.c.bf16 %v1696_v58, %v1695_v26  ;;  %v2145_v61 = vld [vmem:[#allocation2 + $0x2d8] sm:$0xff]  ;;  %v1999_v39 = vld [vmem:[#allocation2 + $0x10a] sm:$0xff]  ;;  %v9556_v23 = vpack.c.bf16 %v2147_v9, %v2146_v5  ;;  %v1938_v30 = vld [vmem:[#allocation2 + $0x141] sm:$0xff] }
 0x283   :  { %6408 = vmatpush3.bf16.msra.mxu0 %v7302_v17  ;;  %v9545_v15 = vpack.c.bf16 %v2145_v61, %v2144_v3  ;;  %v2000_v57 = vld [vmem:[#allocation2 + $0x112] sm:$0xff]  ;;  %2436 = vst.msk [vmem:[#allocation5 + $0x160] sm:$0xff] %vm791_vm4, %v9554_v55  ;;  %v1926_v63 = vld [vmem:[#allocation2 + $0x21] sm:$0xff]  ;;  %v2257_v34 = vld [vmem:[#allocation2 + $0x129] sm:$0xff] }
 0x284   :  { %2316 = vrot.lane.b32.xlu0 %v2281_v51, %s7455_s24  ;;  %2435 = vst.msk [vmem:[#allocation5 + $0x148] sm:$0xff] %vm791_vm4, %v9543_v7  ;;  %v2026_v48 = vpack.c.bf16 %v2000_v57, %v1999_v39  ;;  %v1937_v4 = vld [vmem:[#allocation2 + $0x139] sm:$0xff]  ;;  %1537 = vst.msk [vmem:[#allocation5 + $0x168] sm:$0xff] %vm791_vm4, %v9556_v23  ;;  %v1806_v8 = vld [vmem:[#allocation2 + $0x108] sm:$0xff] }
 0x285   :  { %1536 = vst.msk [vmem:[#allocation5 + $0x150] sm:$0xff] %vm791_vm4, %v9545_v15  ;;  %v1963_v13 = vpack.c.bf16 %v1938_v30, %v1937_v4  ;;  %v1925_v38 = vld [vmem:[#allocation2 + $0x19] sm:$0xff]  ;;  %v1807_v32 = vld [vmem:[#allocation2 + $0x110] sm:$0xff]  ;;  %v2256_v41 = vld [vmem:[#allocation2 + $0x121] sm:$0xff] }
 0x286   :  { %1866 = vrot.lane.b32.xlu1 %v1831_v59, %s7455_s24  ;;  %v1677_v59 = vld [vmem:[#allocation2 + $0xf2] sm:$0xff]  ;;  %v1957_v17 = vpack.c.bf16 %v1926_v63, %v1925_v38  ;;  %v1939_v54 = vld [vmem:[#allocation2 + $0x169] sm:$0xff]  ;;  %v2375_v50 = vld [vmem:[#allocation2 + $0x3a] sm:$0xff] }
 0x287   :  { %1979 = vst.msk [vmem:[#allocation5 + $0x98] sm:$0xff] %vm791_vm4, %v1963_v13  ;;  %v1940_v40 = vld [vmem:[#allocation2 + $0x171] sm:$0xff]  ;;  %v2376_v37 = vld [vmem:[#allocation2 + $0x62] sm:$0xff]  ;;  %v2379_v22 = vld [vmem:[#allocation2 + $0x9a] sm:$0xff] }
 0x288   :  { %2061 = vrot.lane.b32.xlu0 %v2025_v43, %s7453_s0  ;;  %v2374_v43 = vld [vmem:[#allocation2 + $0x32] sm:$0xff]  ;;  %v1964_v60 = vpack.c.bf16 %v1940_v40, %v1939_v54  ;;  %v2377_v18 = vld [vmem:[#allocation2 + $0x6a] sm:$0xff]  ;;  %1973 = vst.msk [vmem:[#allocation5 + $0x8] sm:$0xff] %vm791_vm4, %v1957_v17  ;;  %v2380_v49 = vld [vmem:[#allocation2 + $0xc2] sm:$0xff] }
 0x289   :  { %v2406_v12 = vpack.c.bf16 %v2375_v50, %v2374_v43  ;;  %v2407_v47 = vpack.c.bf16 %v2377_v18, %v2376_v37  ;;  %v1941_v33 = vld [vmem:[#allocation2 + $0x1c9] sm:$0xff]  ;;  %v1942_v19 = vld [vmem:[#allocation2 + $0x1d1] sm:$0xff]  ;;  %v2001_v2 = vld [vmem:[#allocation2 + $0x13a] sm:$0xff] }
 0x28a   :  { %1610 = vrot.lane.b32.xlu1 %v2281_v51, %s7453_s0  ;;  %v1678_v51 = vld [vmem:[#allocation2 + $0xfa] sm:$0xff]  ;;  %1980 = vst.msk [vmem:[#allocation5 + $0xb0] sm:$0xff] %vm791_vm4, %v1964_v60  ;;  %v1965_v52 = vpack.c.bf16 %v1942_v19, %v1941_v33  ;;  %v2381_v46 = vld [vmem:[#allocation2 + $0xca] sm:$0xff]  ;;  %v2002_v10 = vld [vmem:[#allocation2 + $0x142] sm:$0xff] }
 0x28b   :  { %v1704_v53 = vpack.c.bf16 %v1678_v51, %v1677_v59  ;;  %2422 = vst.msk [vmem:[#allocation5 + $0x10] sm:$0xff] %vm791_vm4, %v2406_v12  ;;  %2423 = vst.msk [vmem:[#allocation5 + $0x28] sm:$0xff] %vm791_vm4, %v2407_v47  ;;  %v2409_v26 = vpack.c.bf16 %v2381_v46, %v2380_v49  ;;  %v2382_v58 = vld [vmem:[#allocation2 + $0xf2] sm:$0xff]  ;;  %v2383_v3 = vld [vmem:[#allocation2 + $0xfa] sm:$0xff] }
 0x28c   :  { %2190 = vrot.lane.b32.xlu0 %v9447_v35, %s7454_s22  ;;  %v1962_v35 = vpack.c.bf16 %v1936_v36, %v1935_v44  ;;  %v1943_v61 = vld [vmem:[#allocation2 + $0x1f9] sm:$0xff]  ;;  %1981 = vst.msk [vmem:[#allocation5 + $0xc8] sm:$0xff] %vm791_vm4, %v1965_v52  ;;  %v1944_v44 = vld [vmem:[#allocation2 + $0x201] sm:$0xff]  ;;  %v2385_v39 = vld [vmem:[#allocation2 + $0x12a] sm:$0xff] }
 0x28d   :  { %v2384_v36 = vld [vmem:[#allocation2 + $0x122] sm:$0xff]  ;;  %2425 = vst.msk [vmem:[#allocation5 + $0x58] sm:$0xff] %vm791_vm4, %v2409_v26  ;;  %v1966_v57 = vpack.c.bf16 %v1944_v44, %v1943_v61  ;;  %v2386_v45 = vld [vmem:[#allocation2 + $0x152] sm:$0xff]  ;;  %v2387_v20 = vld [vmem:[#allocation2 + $0x15a] sm:$0xff] }
 0x28e   :  { %1739 = vrot.lane.b32.xlu1 %v1703_v1, %s7454_s22  ;;  %1978 = vst.msk [vmem:[#allocation5 + $0x80] sm:$0xff] %vm791_vm4, %v1962_v35  ;;  %v2378_v1 = vld [vmem:[#allocation2 + $0x92] sm:$0xff]  ;;  %v2411_v35 = vpack.c.bf16 %v2385_v39, %v2384_v36  ;;  %v2388_v5 = vld [vmem:[#allocation2 + $0x182] sm:$0xff]  ;;  %v2412_v9 = vpack.c.bf16 %v2387_v20, %v2386_v45  ;;  %v2391_v63 = vld [vmem:[#allocation2 + $0x1ea] sm:$0xff] }
 0x28f   :  { %v2408_v42 = vpack.c.bf16 %v2379_v22, %v2378_v1  ;;  %v1945_v4 = vld [vmem:[#allocation2 + $0x229] sm:$0xff]  ;;  %v1946_v30 = vld [vmem:[#allocation2 + $0x231] sm:$0xff]  ;;  %1982 = vst.msk [vmem:[#allocation5 + $0xe0] sm:$0xff] %vm791_vm4, %v1966_v57  ;;  %v1948_v43 = vld [vmem:[#allocation2 + $0x261] sm:$0xff] }
 0x290   :  { %2318 = vrot.lane.b32.xlu0 %v2282_v16, %s7455_s24  ;;  %2427 = vst.msk [vmem:[#allocation5 + $0x88] sm:$0xff] %vm791_vm4, %v2411_v35  ;;  %v1967_v51 = vpack.c.bf16 %v1946_v30, %v1945_v4  ;;  %v2390_v13 = vld [vmem:[#allocation2 + $0x1e2] sm:$0xff]  ;;  %v2392_v38 = vld [vmem:[#allocation2 + $0x212] sm:$0xff]  ;;  %2428 = vst.msk [vmem:[#allocation5 + $0xa0] sm:$0xff] %vm791_vm4, %v2412_v9 }
 0x291   :  { %2424 = vst.msk [vmem:[#allocation5 + $0x40] sm:$0xff] %vm791_vm4, %v2408_v42  ;;  %v1679_v17 = vld [vmem:[#allocation2 + $0x122] sm:$0xff]  ;;  %v1680_v54 = vld [vmem:[#allocation2 + $0x12a] sm:$0xff]  ;;  %v1808_v60 = vld [vmem:[#allocation2 + $0x138] sm:$0xff] }
 0x292   :  { %1868 = vrot.lane.b32.xlu1 %v1832_v31, %s7455_s24  ;;  %v1833_v31 = vpack.c.bf16 %v1807_v32, %v1806_v8  ;;  %v2027_v8 = vpack.c.bf16 %v2002_v10, %v2001_v2  ;;  %v2414_v32 = vpack.c.bf16 %v2391_v63, %v2390_v13  ;;  %1983 = vst.msk [vmem:[#allocation5 + $0xf8] sm:$0xff] %vm791_vm4, %v1967_v51  ;;  %v1949_v50 = vld [vmem:[#allocation2 + $0x289] sm:$0xff]  ;;  %v1950_v37 = vld [vmem:[#allocation2 + $0x291] sm:$0xff]  ;;  %v1809_v12 = vld [vmem:[#allocation2 + $0x140] sm:$0xff] }
 0x293   :  { %v1705_v18 = vpack.c.bf16 %v1680_v54, %v1679_v17  ;;  %v2258_v47 = vld [vmem:[#allocation2 + $0x151] sm:$0xff]  ;;  %v1969_v33 = vpack.c.bf16 %v1950_v37, %v1949_v50  ;;  %v2259_v1 = vld [vmem:[#allocation2 + $0x159] sm:$0xff]  ;;  %v1952_v46 = vld [vmem:[#allocation2 + $0x2c1] sm:$0xff] }
 0x294   :  { %2063 = vrot.lane.b32.xlu0 %v2026_v48, %s7453_s0  ;;  %v2389_v48 = vld [vmem:[#allocation2 + $0x18a] sm:$0xff]  ;;  %2430 = vst.msk [vmem:[#allocation5 + $0xd0] sm:$0xff] %vm791_vm4, %v2414_v32  ;;  %v2404_v19 = vld [vmem:[#allocation2 + $0x332] sm:$0xff]  ;;  %v2405_v52 = vld [vmem:[#allocation2 + $0x33a] sm:$0xff] }
 0x295   :  { %v2413_v59 = vpack.c.bf16 %v2389_v48, %v2388_v5  ;;  %v1951_v22 = vld [vmem:[#allocation2 + $0x2b9] sm:$0xff]  ;;  %1985 = vst.msk [vmem:[#allocation5 + $0x128] sm:$0xff] %vm791_vm4, %v1969_v33  ;;  %v2421_v49 = vpack.c.bf16 %v2405_v52, %v2404_v19  ;;  %v1953_v2 = vld [vmem:[#allocation2 + $0x2e9] sm:$0xff]  ;;  %v1954_v42 = vld [vmem:[#allocation2 + $0x2f1] sm:$0xff] }
 0x296   :  { %1612 = vrot.lane.b32.xlu1 %v2282_v16, %s7453_s0  ;;  %v2283_v16 = vpack.c.bf16 %v2257_v34, %v2256_v41  ;;  %v2393_v41 = vld [vmem:[#allocation2 + $0x21a] sm:$0xff]  ;;  %v1970_v10 = vpack.c.bf16 %v1952_v46, %v1951_v22  ;;  %v1971_v61 = vpack.c.bf16 %v1954_v42, %v1953_v2  ;;  %v2003_v45 = vld [vmem:[#allocation2 + $0x16a] sm:$0xff]  ;;  %v2004_v20 = vld [vmem:[#allocation2 + $0x172] sm:$0xff] }
 0x297   :  { %v1947_v34 = vld [vmem:[#allocation2 + $0x259] sm:$0xff]  ;;  %2429 = vst.msk [vmem:[#allocation5 + $0xb8] sm:$0xff] %vm791_vm4, %v2413_v59  ;;  %v2415_v40 = vpack.c.bf16 %v2393_v41, %v2392_v38  ;;  %2437 = vst.msk [vmem:[#allocation5 + $0x178] sm:$0xff] %vm791_vm4, %v2421_v49  ;;  %v1810_v4 = vld [vmem:[#allocation2 + $0x168] sm:$0xff] }
 0x298   :  { %2192 = vrot.lane.b32.xlu0 %v9459_v25, %s7454_s22  ;;  %v2410_v25 = vpack.c.bf16 %v2383_v3, %v2382_v58  ;;  %v1955_v26 = vld [vmem:[#allocation2 + $0x319] sm:$0xff]  ;;  %v1834_v58 = vpack.c.bf16 %v1809_v12, %v1808_v60  ;;  %v2284_v3 = vpack.c.bf16 %v2259_v1, %v2258_v47  ;;  %1986 = vst.msk [vmem:[#allocation5 + $0x140] sm:$0xff] %vm791_vm4, %v1970_v10  ;;  %1987 = vst.msk [vmem:[#allocation5 + $0x158] sm:$0xff] %vm791_vm4, %v1971_v61  ;;  %v1811_v30 = vld [vmem:[#allocation2 + $0x170] sm:$0xff] }
 0x299   :  { %2431 = vst.msk [vmem:[#allocation5 + $0xe8] sm:$0xff] %vm791_vm4, %v2415_v40  ;;  %v1796_v36 = vld [vmem:[#allocation2 + $0x18] sm:$0xff]  ;;  %v1797_v39 = vld [vmem:[#allocation2 + $0x20] sm:$0xff]  ;;  %v1835_v59 = vpack.c.bf16 %v1811_v30, %v1810_v4  ;;  %v2133_v13 = vld [vmem:[#allocation2 + $0x188] sm:$0xff] }
 0x29a   :  { %1741 = vrot.lane.b32.xlu1 %v1704_v53, %s7454_s22  ;;  %2426 = vst.msk [vmem:[#allocation5 + $0x70] sm:$0xff] %vm791_vm4, %v2410_v25  ;;  %v1968_v53 = vpack.c.bf16 %v1948_v43, %v1947_v34  ;;  %v1990_v25 = vld [vmem:[#allocation2 + $0x22] sm:$0xff]  ;;  %v1828_v35 = vpack.c.bf16 %v1797_v39, %v1796_v36  ;;  %v1681_v5 = vld [vmem:[#allocation2 + $0x152] sm:$0xff]  ;;  %v1682_v9 = vld [vmem:[#allocation2 + $0x15a] sm:$0xff] }
 0x29b   :  { %v9604_v57 = vld [vmem:[%s11470_s28 + $0x80] sm:$0xff]   ;;  %v1706_v48 = vpack.c.bf16 %v1682_v9, %v1681_v5  ;;  %v1812_v63 = vld [vmem:[#allocation2 + $0x1c8] sm:$0xff]  ;;  %v1813_v38 = vld [vmem:[#allocation2 + $0x1d0] sm:$0xff] }
 0x29c   :  { %2320 = vrot.lane.b32.xlu0 %v2283_v16, %s7455_s24  ;;  %1984 = vst.msk [vmem:[#allocation5 + $0x110] sm:$0xff] %vm791_vm4, %v1968_v53  ;;  %7044 = vmatprep.subr.bf16.mxu0 %v9604_v57  ;;  %v2132_v51 = vld [vmem:[#allocation2 + $0x180] sm:$0xff]  ;;  %v2261_v41 = vld [vmem:[#allocation2 + $0x189] sm:$0xff]  ;;  %v2006_v53 = vld [vmem:[#allocation2 + $0x1d2] sm:$0xff] }
 0x29d   :  { %v2260_v32 = vld [vmem:[#allocation2 + $0x181] sm:$0xff]  ;;  %v1557_v17 = vld [vmem:[#allocation2 + $0x1e9] sm:$0xff]  ;;  %v1814_v12 = vld [vmem:[#allocation2 + $0x1f8] sm:$0xff] }
 0x29e   :  { %1870 = vrot.lane.b32.xlu1 %v1833_v31, %s7455_s24  ;;  %v1956_v31 = vld [vmem:[#allocation2 + $0x321] sm:$0xff]  ;;  %v2285_v54 = vpack.c.bf16 %v2261_v41, %v2260_v32  ;;  %v2005_v43 = vld [vmem:[#allocation2 + $0x1ca] sm:$0xff]  ;;  %v1559_v1 = vld [vmem:[#allocation2 + $0x219] sm:$0xff] }
 0x29f   :  { %v1972_v44 = vpack.c.bf16 %v1956_v31, %v1955_v26  ;;  %v1556_v34 = vld [vmem:[#allocation2 + $0x1e1] sm:$0xff]  ;;  %v1686_v50 = vld [vmem:[#allocation2 + $0x1ea] sm:$0xff]  ;;  %v2029_v37 = vpack.c.bf16 %v2006_v53, %v2005_v43  ;;  %v1687_v46 = vld [vmem:[#allocation2 + $0x212] sm:$0xff] }
 0x2a0   :  { %2065 = vrot.lane.b32.xlu0 %v2027_v8, %s7453_s0  ;;  %v1836_v8 = vpack.c.bf16 %v1813_v38, %v1812_v63  ;;  %v1579_v40 = vpack.c.bf16 %v1557_v17, %v1556_v34  ;;  %v1685_v60 = vld [vmem:[#allocation2 + $0x1e2] sm:$0xff]  ;;  %v1558_v19 = vld [vmem:[#allocation2 + $0x211] sm:$0xff]  ;;  %v2007_v22 = vld [vmem:[#allocation2 + $0x1fa] sm:$0xff] }
 0x2a1   :  { %1988 = vst.msk [vmem:[#allocation5 + $0x170] sm:$0xff] %vm791_vm4, %v1972_v44  ;;  %v1815_v47 = vld [vmem:[#allocation2 + $0x200] sm:$0xff]  ;;  %v1580_v52 = vpack.c.bf16 %v1559_v1, %v1558_v19  ;;  %v1816_v26 = vld [vmem:[#allocation2 + $0x228] sm:$0xff]  ;;  %v1821_v32 = vld [vmem:[#allocation2 + $0x290] sm:$0xff] }
 0x2a2   :  { %1614 = vrot.lane.b32.xlu1 %v2283_v16, %s7453_s0  ;;  %v1989_v16 = vld [vmem:[#allocation2 + $0x1a] sm:$0xff]  ;;  %v1837_v33 = vpack.c.bf16 %v1815_v47, %v1814_v12  ;;  %v2008_v49 = vld [vmem:[#allocation2 + $0x202] sm:$0xff]  ;;  %v2009_v44 = vld [vmem:[#allocation2 + $0x22a] sm:$0xff] }
 0x2a3   :  { %v1688_v2 = vld [vmem:[#allocation2 + $0x21a] sm:$0xff]  ;;  %v2030_v10 = vpack.c.bf16 %v2008_v49, %v2007_v22  ;;  %v1561_v61 = vld [vmem:[#allocation2 + $0x249] sm:$0xff]  ;;  %v1566_v49 = vld [vmem:[#allocation2 + $0x2d1] sm:$0xff] }
 0x2a4   :  { %2194 = vrot.lane.b32.xlu0 %v9463_v28, %s7454_s22  ;;  %v2021_v28 = vpack.c.bf16 %v1990_v25, %v1989_v16  ;;  %v1709_v42 = vpack.c.bf16 %v1688_v2, %v1687_v46  ;;  %v1823_v19 = vld [vmem:[#allocation2 + $0x2c0] sm:$0xff] }
 0x2a5   :  { %v1567_v46 = vld [vmem:[#allocation2 + $0x2d9] sm:$0xff] }
 0x2a6   :  { %1743 = vrot.lane.b32.xlu1 %v1705_v18, %s7454_s22  ;;  %v1708_v18 = vpack.c.bf16 %v1686_v50, %v1685_v60  ;;  %v2013_v60 = vld [vmem:[#allocation2 + $0x28a] sm:$0xff]  ;;  %v2014_v50 = vld [vmem:[#allocation2 + $0x292] sm:$0xff] }
 0x2a7   :  { %v2033_v47 = vpack.c.bf16 %v2014_v50, %v2013_v60 }
 0x2a8   :  { %2322 = vrot.lane.b32.xlu0 %v2284_v3, %s7455_s24 }
 0x2aa   :  { %1872 = vrot.lane.b32.xlu1 %v1834_v58, %s7455_s24  ;;  %v1817_v58 = vld [vmem:[#allocation2 + $0x230] sm:$0xff] }
 0x2ac   :  { %2053 = vrot.lane.b32.xlu0 %v2021_v28, %s7453_s0  ;;  %v2010_v28 = vld [vmem:[#allocation2 + $0x232] sm:$0xff] }
 0x2ae   :  { %2310 = vrot.lane.b32.xlu1 %v9437_v56, %s7455_s24  ;;  %v2028_v56 = vpack.c.bf16 %v2004_v20, %v2003_v45  ;;  %v1819_v45 = vld [vmem:[#allocation2 + $0x260] sm:$0xff] }
 0x2b0   :  { %2182 = vrot.lane.b32.xlu0 %v9467_v0, %s7454_s22  ;;  %v2157_v0 = vpack.c.bf16 %v2133_v13, %v2132_v51  ;;  %v2012_v51 = vld [vmem:[#allocation2 + $0x262] sm:$0xff] }
 0x2b2   :  { %1860 = vrot.lane.b32.xlu1 %v1828_v35, %s7455_s24  ;;  %v2031_v35 = vpack.c.bf16 %v2010_v28, %v2009_v44 }
 0x2b4   :  { %2067 = vrot.lane.b32.xlu0 %v2028_v56, %s7453_s0  ;;  %v1562_v56 = vld [vmem:[#allocation2 + $0x271] sm:$0xff] }
 0x2b6   :  { %1745 = vrot.lane.b32.xlu1 %v1706_v48, %s7454_s22  ;;  %v1563_v48 = vld [vmem:[#allocation2 + $0x279] sm:$0xff] }
 0x2b8   :  { %1616 = vrot.lane.b32.xlu0 %v2284_v3, %s7453_s0  ;;  %v1560_v3 = vld [vmem:[#allocation2 + $0x241] sm:$0xff] }
 0x2b9   :  { %v1581_v25 = vpack.c.bf16 %v1561_v61, %v1560_v3 }
 0x2ba   :  { %1874 = vrot.lane.b32.xlu1 %v1835_v59, %s7455_s24  ;;  %v1582_v59 = vpack.c.bf16 %v1563_v48, %v1562_v56 }
 0x2bc   :  { %2196 = vrot.lane.b32.xlu0 %v2157_v0, %s7454_s22 }
 0x2be   :  { %1876 = vrot.lane.b32.xlu1 %v1836_v8, %s7455_s24  ;;  %v1820_v8 = vld [vmem:[#allocation2 + $0x288] sm:$0xff] }
 0x2bf   :  { %v1840_v17 = vpack.c.bf16 %v1821_v32, %v1820_v8 }
 0x2c0   :  { %2324 = vrot.lane.b32.xlu0 %v2285_v54, %s7455_s24  ;;  %v1564_v54 = vld [vmem:[#allocation2 + $0x2a1] sm:$0xff] }
 0x2c2   :  { %1620 = vrot.lane.b32.xlu1 %v1579_v40, %s7453_s0 }
 0x2c4   :  { %2069 = vrot.lane.b32.xlu0 %v2029_v37, %s7453_s0 }
 0x2c6   :  { %1749 = vrot.lane.b32.xlu1 %v1708_v18, %s7454_s22 }
 0x2c8   :  { %2198 = vrot.lane.b32.xlu0 %v9477_v14, %s7454_s22  ;;  %v1838_v14 = vpack.c.bf16 %v1817_v58, %v1816_v26  ;;  %v2016_v26 = vld [vmem:[#allocation2 + $0x2c2] sm:$0xff] }
 0x2ca   :  { %1878 = vrot.lane.b32.xlu1 %v1837_v33, %s7455_s24  ;;  %v1822_v33 = vld [vmem:[#allocation2 + $0x2b8] sm:$0xff] }
 0x2cb   :  { %v1841_v22 = vpack.c.bf16 %v1823_v19, %v1822_v33 }
 0x2cc   :  { %2326 = vrot.lane.b32.xlu0 %v1579_v40, %s7455_s24  ;;  %v1565_v40 = vld [vmem:[#allocation2 + $0x2a9] sm:$0xff] }
 0x2ce   :  { %1622 = vrot.lane.b32.xlu1 %v1580_v52, %s7453_s0 }
 0x2d0   :  { %2071 = vrot.lane.b32.xlu0 %v2030_v10, %s7453_s0 }
 0x2d2   :  { %1751 = vrot.lane.b32.xlu1 %v1709_v42, %s7454_s22  ;;  %v2015_v42 = vld [vmem:[#allocation2 + $0x2ba] sm:$0xff] }
 0x2d3   :  { %v2034_v61 = vpack.c.bf16 %v2016_v26, %v2015_v42  ;;  %v2443_v26 = vld [vmem:[#allocation5 + $0x28] sm:$0xff] }
 0x2d4   :  { %2200 = vrot.lane.b32.xlu0 %v9483_v29, %s7454_s22  ;;  %v1818_v29 = vld [vmem:[#allocation2 + $0x258] sm:$0xff] }
 0x2d5   :  { %v2185_v31 = vpop.permute.xlu1 %2184  ;;  %v1839_v9 = vpack.c.bf16 %v1819_v45, %v1818_v29  ;;  %v2017_v45 = vld [vmem:[#allocation2 + $0x2ea] sm:$0xff] }
 0x2d6   :  { %1880 = vrot.lane.b32.xlu1 %v1838_v14, %s7455_s24  ;;  %v2056_v16 = vpop.permute.xlu0 %2055 }
 0x2d7   :  { %2102 = vst.msk [vmem:[#allocation5 + $0x20] sm:$0xff] %vm1650_vm7, %v2056_v16  ;;  %v1825_v16 = vld [vmem:[#allocation2 + $0x2f0] sm:$0xff] }
 0x2d8   :  { %2231 = vst.msk [vmem:[#allocation5 + $0x20] sm:$0xff] %vm1779_vm8, %v2185_v31  ;;  %2328 = vrot.lane.b32.xlu0 %v1580_v52, %s7455_s24  ;;  %v1824_v31 = vld [vmem:[#allocation2 + $0x2e8] sm:$0xff] }
 0x2d9   :  { %v1734_v36 = vpop.permute.xlu1 %1733  ;;  %v1842_v28 = vpack.c.bf16 %v1825_v16, %v1824_v31  ;;  %v2449_v16 = vld [vmem:[#allocation5 + $0x58] sm:$0xff] }
 0x2da   :  { %1624 = vrot.lane.b32.xlu1 %v1581_v25, %s7453_s0  ;;  %v1605_v39 = vpop.permute.xlu0 %1604 }
 0x2db   :  { %1652 = vst.msk [vmem:[#allocation5 + $0x18] sm:$0xff] %vm1650_vm7, %v1605_v39  ;;  %v1569_v39 = vld [vmem:[#allocation2 + $0x309] sm:$0xff] }
 0x2dc   :  { %1781 = vst.msk [vmem:[#allocation5 + $0x18] sm:$0xff] %vm1779_vm8, %v1734_v36  ;;  %2073 = vrot.lane.b32.xlu0 %v2031_v35, %s7453_s0  ;;  %v1568_v36 = vld [vmem:[#allocation2 + $0x301] sm:$0xff] }
 0x2dd   :  { %v1863_v20 = vpop.permute.xlu1 %1862 }
 0x2de   :  { %1753 = vrot.lane.b32.xlu1 %v9500_v24, %s7454_s22  ;;  %v2313_v5 = vpop.permute.xlu0 %2312  ;;  %1910 = vst.msk [vmem:[#allocation5 + $0x18] sm:$0xff] %vm1908_vm9, %v1863_v20  ;;  %v2011_v24 = vld [vmem:[#allocation2 + $0x25a] sm:$0xff]  ;;  %v2018_v20 = vld [vmem:[#allocation2 + $0x2f2] sm:$0xff] }
 0x2df   :  { %2359 = vst.msk [vmem:[#allocation5 + $0x20] sm:$0xff] %vm1908_vm9, %v2313_v5  ;;  %v2035_v48 = vpack.c.bf16 %v2018_v20, %v2017_v45 }
 0x2e0   :  { %2202 = vrot.lane.b32.xlu0 %v9502_v27, %s7454_s22  ;;  %v2032_v27 = vpack.c.bf16 %v2012_v51, %v2011_v24 }
 0x2e1   :  { %v1607_v4 = vpop.permute.xlu1 %1606 }
 0x2e2   :  { %1882 = vrot.lane.b32.xlu1 %v1839_v9, %s7455_s24  ;;  %v2058_v30 = vpop.permute.xlu0 %2057  ;;  %1653 = vst.msk [vmem:[#allocation5 + $0x30] sm:$0xff] %vm1650_vm7, %v1607_v4  ;;  %v1826_v4 = vld [vmem:[#allocation2 + $0x318] sm:$0xff] }
 0x2e3   :  { %2103 = vst.msk [vmem:[#allocation5 + $0x38] sm:$0xff] %vm1650_vm7, %v2058_v30  ;;  %v1827_v30 = vld [vmem:[#allocation2 + $0x320] sm:$0xff] }
 0x2e4   :  { %2330 = vrot.lane.b32.xlu0 %v1581_v25, %s7455_s24  ;;  %v1843_v51 = vpack.c.bf16 %v1827_v30, %v1826_v4 }
 0x2e5   :  { %v2441_v0 = vld [vmem:[#allocation5 + $0x18] sm:$0xff] }
 0x2e6   :  { %1626 = vrot.lane.b32.xlu1 %v1582_v59, %s7453_s0  ;;  %v2187_v63 = vpop.permute.xlu0 %2186  ;;  %v2442_v38 = vld [vmem:[#allocation5 + $0x20] sm:$0xff] }
 0x2e7   :  { %2232 = vst.msk [vmem:[#allocation5 + $0x38] sm:$0xff] %vm1779_vm8, %v2187_v63  ;;  %2718 = vmatprep.mubr.bf16.mxu1 %v2442_v38  ;;  %v2019_v38 = vld [vmem:[#allocation2 + $0x31a] sm:$0xff] }
 0x2e8   :  { %v1736_v13 = vpop.permute.xlu1 %1735  ;;  %2719 = vmatmul.mubr.bf16.vlgmr.msra.gmra.mrb[0].mxu1 %v2441_v0  ;;  %2075 = vrot.lane.b32.xlu0 %v2032_v27, %s7453_s0 }
 0x2e9   :  { %1782 = vst.msk [vmem:[#allocation5 + $0x30] sm:$0xff] %vm1779_vm8, %v1736_v13 }
 0x2ea   :  { %1755 = vrot.lane.b32.xlu1 %v9520_v6, %s7454_s22  ;;  %v2315_v34 = vpop.permute.xlu0 %2314  ;;  %v1583_v6 = vpack.c.bf16 %v1565_v40, %v1564_v54 }
 0x2eb   :  { %2360 = vst.msk [vmem:[#allocation5 + $0x38] sm:$0xff] %vm1908_vm9, %v2315_v34  ;;  %v2149_v34 = vld [vmem:[#allocation2 + $0x338] sm:$0xff] }
 0x2ec   :  { %v1865_v41 = vpop.permute.xlu1 %1864  ;;  %2204 = vrot.lane.b32.xlu0 %v9522_v11, %s7454_s22 }
 0x2ed   :  { %1911 = vst.msk [vmem:[#allocation5 + $0x30] sm:$0xff] %vm1908_vm9, %v1865_v41 }
 0x2ee   :  { %1884 = vrot.lane.b32.xlu1 %v1840_v17, %s7455_s24  ;;  %v2060_v53 = vpop.permute.xlu0 %2059 }
 0x2ef   :  { %2104 = vst.msk [vmem:[#allocation5 + $0x50] sm:$0xff] %vm1650_vm7, %v2060_v53  ;;  %v2277_v53 = vld [vmem:[#allocation2 + $0x339] sm:$0xff] }
 0x2f0   :  { %v1609_v43 = vpop.permute.xlu1 %1608  ;;  %2332 = vrot.lane.b32.xlu0 %v1582_v59, %s7455_s24 }
 0x2f1   :  { %1654 = vst.msk [vmem:[#allocation5 + $0x48] sm:$0xff] %vm1650_vm7, %v1609_v43  ;;  %v2276_v43 = vld [vmem:[#allocation2 + $0x331] sm:$0xff] }
 0x2f2   :  { %1628 = vrot.lane.b32.xlu1 %v1583_v6, %s7453_s0  ;;  %v2189_v18 = vpop.permute.xlu0 %2188  ;;  %v2445_v11 = vld [vmem:[#allocation5 + $0x38] sm:$0xff]  ;;  %v2293_v50 = vpack.c.bf16 %v2277_v53, %v2276_v43  ;;  %v2479_v53 = vld [vmem:[#allocation5 + $0x148] sm:$0xff] }
 0x2f3   :  { %2233 = vst.msk [vmem:[#allocation5 + $0x50] sm:$0xff] %vm1779_vm8, %v2189_v18  ;;  %2726 = vmatprep.mubr.bf16.mxu1 %v2445_v11 }
 0x2f4   :  { %v1738_v37 = vpop.permute.xlu1 %1737  ;;  %v2444_v12 = vld [vmem:[#allocation5 + $0x30] sm:$0xff]  ;;  %2077 = vrot.lane.b32.xlu0 %v2033_v47, %s7453_s0 }
 0x2f5   :  { %1783 = vst.msk [vmem:[#allocation5 + $0x48] sm:$0xff] %vm1779_vm8, %v1738_v37  ;;  %2727 = vmatmul.mubr.bf16.gmra.mrb[4].mxu1 %v2444_v12 }
 0x2f6   :  { %1757 = vrot.lane.b32.xlu1 %v9531_v21, %s7454_s22  ;;  %v2317_v52 = vpop.permute.xlu0 %2316  ;;  %v1584_v21 = vpack.c.bf16 %v1567_v46, %v1566_v49  ;;  %v2440_v46 = vld [vmem:[#allocation5 + $0x10] sm:$0xff] }
 0x2f7   :  { %2361 = vst.msk [vmem:[#allocation5 + $0x50] sm:$0xff] %vm1908_vm9, %v2317_v52 }
 0x2f8   :  { %v1867_v1 = vpop.permute.xlu1 %1866  ;;  %2206 = vrot.lane.b32.xlu0 %v9533_v62, %s7454_s22 }
 0x2f9   :  { %1912 = vst.msk [vmem:[#allocation5 + $0x48] sm:$0xff] %vm1908_vm9, %v1867_v1 }
 0x2fa   :  { %1886 = vrot.lane.b32.xlu1 %v1841_v22, %s7455_s24  ;;  %v2062_v10 = vpop.permute.xlu0 %2061  ;;  %v7304_v22 = vld [vmem:[%s11470_s28 + $0x88] sm:$0xff]  }
 0x2fb   :  { %2105 = vst.msk [vmem:[#allocation5 + $0x68] sm:$0xff] %vm1650_vm7, %v2062_v10 }
 0x2fc   :  { %v1611_v2 = vpop.permute.xlu1 %1610  ;;  %2334 = vrot.lane.b32.xlu0 %v1583_v6, %s7455_s24 }
 0x2fd   :  { %1655 = vst.msk [vmem:[#allocation5 + $0x60] sm:$0xff] %vm1650_vm7, %v1611_v2 }
 0x2fe   :  { %1630 = vrot.lane.b32.xlu1 %v1584_v21, %s7453_s0  ;;  %v2191_v14 = vpop.permute.xlu0 %2190  ;;  %v2448_v62 = vld [vmem:[#allocation5 + $0x50] sm:$0xff] }
 0x2ff   :  { %2234 = vst.msk [vmem:[#allocation5 + $0x68] sm:$0xff] %vm1779_vm8, %v2191_v14  ;;  %2734 = vmatprep.mubr.bf16.mxu1 %v2448_v62 }
 0x300   :  { %v1740_v58 = vpop.permute.xlu1 %1739  ;;  %v2447_v3 = vld [vmem:[#allocation5 + $0x48] sm:$0xff]  ;;  %2079 = vrot.lane.b32.xlu0 %v2034_v61, %s7453_s0 }
 0x301   :  { %1784 = vst.msk [vmem:[#allocation5 + $0x60] sm:$0xff] %vm1779_vm8, %v1740_v58  ;;  %2735 = vmatmul.mubr.bf16.gmra.mrb[8].mxu1 %v2447_v3  ;;  %v2446_v58 = vld [vmem:[#allocation5 + $0x40] sm:$0xff] }
 0x302   :  { %1759 = vrot.lane.b32.xlu1 %v9543_v7, %s7454_s22  ;;  %v2319_v44 = vpop.permute.xlu0 %2318  ;;  %v1585_v7 = vpack.c.bf16 %v1569_v39, %v1568_v36 }
 0x303   :  { %2362 = vst.msk [vmem:[#allocation5 + $0x68] sm:$0xff] %vm1908_vm9, %v2319_v44 }
 0x304   :  { %v1869_v25 = vpop.permute.xlu1 %1868  ;;  %2208 = vrot.lane.b32.xlu0 %v9545_v15, %s7454_s22 }
 0x305   :  { %1913 = vst.msk [vmem:[#allocation5 + $0x60] sm:$0xff] %vm1908_vm9, %v1869_v25  ;;  %v2452_v25 = vld [vmem:[#allocation5 + $0x70] sm:$0xff] }
 0x306   :  { %1888 = vrot.lane.b32.xlu1 %v1842_v28, %s7455_s24  ;;  %v2064_v29 = vpop.permute.xlu0 %2063 }
 0x307   :  { %2106 = vst.msk [vmem:[#allocation5 + $0x80] sm:$0xff] %vm1650_vm7, %v2064_v29  ;;  %v2458_v29 = vld [vmem:[#allocation5 + $0xa0] sm:$0xff] }
 0x308   :  { %v1613_v35 = vpop.permute.xlu1 %1612  ;;  %2336 = vrot.lane.b32.xlu0 %v1584_v21, %s7455_s24 }
 0x309   :  { %1656 = vst.msk [vmem:[#allocation5 + $0x78] sm:$0xff] %vm1650_vm7, %v1613_v35  ;;  %v2455_v35 = vld [vmem:[#allocation5 + $0x88] sm:$0xff] }
 0x30a   :  { %1632 = vrot.lane.b32.xlu1 %v1585_v7, %s7453_s0  ;;  %v2193_v9 = vpop.permute.xlu0 %2192  ;;  %v2451_v15 = vld [vmem:[#allocation5 + $0x68] sm:$0xff] }
 0x30b   :  { %2235 = vst.msk [vmem:[#allocation5 + $0x80] sm:$0xff] %vm1779_vm8, %v2193_v9  ;;  %2742 = vmatprep.mubr.bf16.mxu1 %v2451_v15 }
 0x30c   :  { %v1742_v5 = vpop.permute.xlu1 %1741  ;;  %v2450_v56 = vld [vmem:[#allocation5 + $0x60] sm:$0xff]  ;;  %2081 = vrot.lane.b32.xlu0 %v2035_v48, %s7453_s0  ;;  %v2464_v48 = vld [vmem:[#allocation5 + $0xd0] sm:$0xff] }
 0x30d   :  { %1785 = vst.msk [vmem:[#allocation5 + $0x78] sm:$0xff] %vm1779_vm8, %v1742_v5  ;;  %2743 = vmatmul.mubr.bf16.gmra.mrb[12].mxu1 %v2450_v56  ;;  %v2461_v56 = vld [vmem:[#allocation5 + $0xb8] sm:$0xff] }
 0x30e   :  { %1761 = vrot.lane.b32.xlu1 %v9554_v55, %s7454_s22  ;;  %v2321_v24 = vpop.permute.xlu0 %2320  ;;  %v2020_v55 = vld [vmem:[#allocation2 + $0x322] sm:$0xff] }
 0x30f   :  { %2363 = vst.msk [vmem:[#allocation5 + $0x80] sm:$0xff] %vm1908_vm9, %v2321_v24  ;;  %v2036_v41 = vpack.c.bf16 %v2020_v55, %v2019_v38  ;;  %v2470_v38 = vld [vmem:[#allocation5 + $0x100] sm:$0xff] }
 0x310   :  { %v1871_v59 = vpop.permute.xlu1 %1870  ;;  %2210 = vrot.lane.b32.xlu0 %v9556_v23, %s7454_s22  ;;  %v2148_v23 = vld [vmem:[#allocation2 + $0x330] sm:$0xff] }
 0x311   :  { %1914 = vst.msk [vmem:[#allocation5 + $0x78] sm:$0xff] %vm1908_vm9, %v1871_v59  ;;  %v2165_v40 = vpack.c.bf16 %v2149_v34, %v2148_v23 }
 0x312   :  { %1890 = vrot.lane.b32.xlu1 %v1843_v51, %s7455_s24  ;;  %v2066_v63 = vpop.permute.xlu0 %2065 }
 0x313   :  { %2107 = vst.msk [vmem:[#allocation5 + $0x98] sm:$0xff] %vm1650_vm7, %v2066_v63  ;;  %v2467_v63 = vld [vmem:[#allocation5 + $0xe8] sm:$0xff] }
 0x314   :  { %v1615_v13 = vpop.permute.xlu1 %1614  ;;  %2338 = vrot.lane.b32.xlu0 %v1585_v7, %s7455_s24 }
 0x315   :  { %1657 = vst.msk [vmem:[#allocation5 + $0x90] sm:$0xff] %vm1650_vm7, %v1615_v13 }
 0x316   :  { %v2195_v27 = vpop.permute.xlu0 %2194  ;;  %v2454_v8 = vld [vmem:[#allocation5 + $0x80] sm:$0xff] }
 0x317   :  { %2236 = vst.msk [vmem:[#allocation5 + $0x98] sm:$0xff] %vm1779_vm8, %v2195_v27  ;;  %2750 = vmatprep.mubr.bf16.mxu1 %v2454_v8 }
 0x318   :  { %v1744_v0 = vpop.permute.xlu1 %1743  ;;  %v2453_v32 = vld [vmem:[#allocation5 + $0x78] sm:$0xff]  ;;  %2083 = vrot.lane.b32.xlu0 %v2036_v41, %s7453_s0  ;;  %v2476_v41 = vld [vmem:[#allocation5 + $0x130] sm:$0xff] }
 0x319   :  { %1786 = vst.msk [vmem:[#allocation5 + $0x90] sm:$0xff] %vm1779_vm8, %v1744_v0  ;;  %2751 = vmatmul.mubr.bf16.gmra.mrb[16].mxu1 %v2453_v32  ;;  %v2473_v32 = vld [vmem:[#allocation5 + $0x118] sm:$0xff] }
 0x31a   :  { %v2323_v54 = vpop.permute.xlu0 %2322 }
 0x31b   :  { %2364 = vst.msk [vmem:[#allocation5 + $0x98] sm:$0xff] %vm1908_vm9, %v2323_v54 }
 0x31c   :  { %v1873_v17 = vpop.permute.xlu1 %1872  ;;  %2212 = vrot.lane.b32.xlu0 %v2165_v40, %s7454_s22 }
 0x31d   :  { %1915 = vst.msk [vmem:[#allocation5 + $0x90] sm:$0xff] %vm1908_vm9, %v1873_v17 }
 0x31e   :  { %v2054_v60 = vpop.permute.xlu0 %2053 }
 0x31f   :  { %2101 = vst.msk [vmem:[#allocation5 + $0x8] sm:$0xff] %vm1650_vm7, %v2054_v60 }
 0x320   :  { %v2311_v6 = vpop.permute.xlu1 %2310  ;;  %2340 = vrot.lane.b32.xlu0 %v2293_v50, %s7455_s24 }
 0x322   :  { %v2183_v37 = vpop.permute.xlu0 %2182  ;;  %v2457_v11 = vld [vmem:[#allocation5 + $0x98] sm:$0xff] }
 0x323   :  { %2230 = vst.msk [vmem:[#allocation5 + $0x8] sm:$0xff] %vm1779_vm8, %v2183_v37  ;;  %2758 = vmatprep.mubr.bf16.mxu1 %v2457_v11 }
 0x324   :  { %v1861_v18 = vpop.permute.xlu1 %1860  ;;  %v2456_v12 = vld [vmem:[#allocation5 + $0x90] sm:$0xff]  ;;  %2358 = vst.msk [vmem:[#allocation5 + $0x8] sm:$0xff] %vm1908_vm9, %v2311_v6  ;;  %v2482_v6 = vld [vmem:[#allocation5 + $0x160] sm:$0xff] }
 0x325   :  { %1909 = vst.msk [vmem:[#allocation5] sm:$0xff] %vm1908_vm9, %v1861_v18  ;;  %2759 = vmatmul.mubr.bf16.gmra.mrb[20].mxu1 %v2456_v12 }
 0x326   :  { %v2068_v47 = vpop.permute.xlu0 %2067 }
 0x327   :  { %2108 = vst.msk [vmem:[#allocation5 + $0xb0] sm:$0xff] %vm1650_vm7, %v2068_v47  ;;  %v2485_v47 = vld [vmem:[#allocation5 + $0x178] sm:$0xff] }
 0x328   :  { %v1746_v33 = vpop.permute.xlu1 %1745 }
 0x32a   :  { %v1617_v19 = vpop.permute.xlu0 %1616 }
 0x32b   :  { %1658 = vst.msk [vmem:[#allocation5 + $0xa8] sm:$0xff] %vm1650_vm7, %v1617_v19  ;;  %v2439_v52 = vld [vmem:[#allocation5 + $0x8] sm:$0xff] }
 0x32c   :  { %v1875_v1 = vpop.permute.xlu1 %1874  ;;  %1787 = vst.msk [vmem:[#allocation5 + $0xa8] sm:$0xff] %vm1779_vm8, %v1746_v33  ;;  %2710 = vmatprep.mubr.bf16.mxu0 %v2439_v52  ;;  %v2438_v49 = vld [vmem:[#allocation5] sm:$0xff] }
 0x32d   :  { %1916 = vst.msk [vmem:[#allocation5 + $0xa8] sm:$0xff] %vm1908_vm9, %v1875_v1  ;;  %2711 = vmatmul.mubr.bf16.vlgmr.msra.gmra.mrb[64].mxu0 %v2438_v49 }
 0x32e   :  { %v2197_v2 = vpop.permute.xlu0 %2196  ;;  %7045 = vmatpush3.bf16.msra.mxu0 %v9604_v57  ;;  %7048 = vmatprep.mubr.msk.bf16.mxu0 %vm791_vm4, %v2440_v46 }
 0x32f   :  { %2237 = vst.msk [vmem:[#allocation5 + $0xb0] sm:$0xff] %vm1779_vm8, %v2197_v2  ;;  %7046 = vmatprep.subr.bf16.mxu0 %v7304_v22 }
 0x330   :  { %v1877_v10 = vpop.permute.xlu1 %1876 }
 0x331   :  { %1917 = vst.msk [vmem:[#allocation5 + $0xc0] sm:$0xff] %vm1908_vm9, %v1877_v10 }
 0x332   :  { %v2325_v21 = vpop.permute.xlu0 %2324  ;;  %7047 = vmatpush3.bf16.msra.mxu0 %v7304_v22 }
 0x333   :  { %2365 = vst.msk [vmem:[#allocation5 + $0xb0] sm:$0xff] %vm1908_vm9, %v2325_v21 }
 0x334   :  { %v1621_v42 = vpop.permute.xlu1 %1620  ;;  %v2459_v31 = vld [vmem:[#allocation5 + $0xa8] sm:$0xff] }
 0x335   :  { %1660 = vst.msk [vmem:[#allocation5 + $0xd8] sm:$0xff] %vm1650_vm7, %v1621_v42  ;;  %7049 = vmatmul.mubr.msk.bf16.vlgmr.msra.gmra.mrb[68].mxu0 %vm791_vm4, %v2443_v26 }
 0x336   :  { %v2070_v57 = vpop.permute.xlu0 %2069  ;;  %7052 = vmatprep.mubr.msk.bf16.mxu0 %vm791_vm4, %v2446_v58 }
 0x337   :  { %2109 = vst.msk [vmem:[#allocation5 + $0xc8] sm:$0xff] %vm1650_vm7, %v2070_v57 }
 0x338   :  { %v1750_v14 = vpop.permute.xlu1 %1749  ;;  %v2462_v5 = vld [vmem:[#allocation5 + $0xc0] sm:$0xff] }
 0x339   :  { %1789 = vst.msk [vmem:[#allocation5 + $0xd8] sm:$0xff] %vm1779_vm8, %v1750_v14 }
 0x33a   :  { %v2199_v62 = vpop.permute.xlu0 %2198  ;;  %v2460_v61 = vld [vmem:[#allocation5 + $0xb0] sm:$0xff] }
 0x33b   :  { %2238 = vst.msk [vmem:[#allocation5 + $0xc8] sm:$0xff] %vm1779_vm8, %v2199_v62  ;;  %2766 = vmatprep.mubr.bf16.mxu1 %v2460_v61 }
 0x33c   :  { %v1879_v3 = vpop.permute.xlu1 %1878  ;;  %2767 = vmatmul.mubr.bf16.gmra.mrb[24].mxu1 %v2459_v31 }
 0x33d   :  { %1918 = vst.msk [vmem:[#allocation5 + $0xd8] sm:$0xff] %vm1908_vm9, %v1879_v3  ;;  %7053 = vmatmul.mubr.msk.bf16.gmra.mrb[72].mxu0 %vm791_vm4, %v2449_v16 }
 0x33e   :  { %v2327_v44 = vpop.permute.xlu0 %2326  ;;  %7056 = vmatprep.mubr.msk.bf16.mxu0 %vm791_vm4, %v2452_v25 }
 0x33f   :  { %2366 = vst.msk [vmem:[#allocation5 + $0xc8] sm:$0xff] %vm1908_vm9, %v2327_v44 }
 0x340   :  { %v1623_v28 = vpop.permute.xlu1 %1622 }
 0x341   :  { %1661 = vst.msk [vmem:[#allocation5 + $0xf0] sm:$0xff] %vm1650_vm7, %v1623_v28 }
 0x342   :  { %v2072_v36 = vpop.permute.xlu0 %2071 }
 0x343   :  { %2110 = vst.msk [vmem:[#allocation5 + $0xe0] sm:$0xff] %vm1650_vm7, %v2072_v36 }
 0x344   :  { %v1752_v39 = vpop.permute.xlu1 %1751  ;;  %v2465_v13 = vld [vmem:[#allocation5 + $0xd8] sm:$0xff] }
 0x345   :  { %1790 = vst.msk [vmem:[#allocation5 + $0xf0] sm:$0xff] %vm1779_vm8, %v1752_v39  ;;  %7057 = vmatmul.mubr.msk.bf16.gmra.mrb[76].mxu0 %vm791_vm4, %v2455_v35 }
 0x346   :  { %v2201_v7 = vpop.permute.xlu0 %2200  ;;  %7060 = vmatprep.mubr.msk.bf16.mxu0 %vm791_vm4, %v2458_v29  ;;  %v2463_v20 = vld [vmem:[#allocation5 + $0xc8] sm:$0xff] }
 0x347   :  { %2239 = vst.msk [vmem:[#allocation5 + $0xe0] sm:$0xff] %vm1779_vm8, %v2201_v7  ;;  %2774 = vmatprep.mubr.bf16.mxu1 %v2463_v20 }
 0x348   :  { %v1881_v45 = vpop.permute.xlu1 %1880  ;;  %2775 = vmatmul.mubr.bf16.gmra.mrb[28].mxu1 %v2462_v5 }
 0x349   :  { %1919 = vst.msk [vmem:[#allocation5 + $0xf0] sm:$0xff] %vm1908_vm9, %v1881_v45 }
 0x34a   :  { %v2329_v9 = vpop.permute.xlu0 %2328 }
 0x34b   :  { %2367 = vst.msk [vmem:[#allocation5 + $0xe0] sm:$0xff] %vm1908_vm9, %v2329_v9 }
 0x34c   :  { %v1625_v15 = vpop.permute.xlu1 %1624 }
 0x34d   :  { %1662 = vst.msk [vmem:[#allocation5 + $0x108] sm:$0xff] %vm1650_vm7, %v1625_v15  ;;  %7061 = vmatmul.mubr.msk.bf16.gmra.mrb[80].mxu0 %vm791_vm4, %v2461_v56 }
 0x34e   :  { %v2074_v4 = vpop.permute.xlu0 %2073  ;;  %7064 = vmatprep.mubr.msk.bf16.mxu0 %vm791_vm4, %v2464_v48 }
 0x34f   :  { %2111 = vst.msk [vmem:[#allocation5 + $0xf8] sm:$0xff] %vm1650_vm7, %v2074_v4 }
 0x350   :  { %v1754_v30 = vpop.permute.xlu1 %1753  ;;  %v2468_v54 = vld [vmem:[#allocation5 + $0xf0] sm:$0xff] }
 0x351   :  { %1791 = vst.msk [vmem:[#allocation5 + $0x108] sm:$0xff] %vm1779_vm8, %v1754_v30 }
 0x352   :  { %v2203_v59 = vpop.permute.xlu0 %2202  ;;  %v2466_v51 = vld [vmem:[#allocation5 + $0xe0] sm:$0xff] }
 0x353   :  { %2240 = vst.msk [vmem:[#allocation5 + $0xf8] sm:$0xff] %vm1779_vm8, %v2203_v59  ;;  %2782 = vmatprep.mubr.bf16.mxu1 %v2466_v51 }
 0x354   :  { %v1883_v24 = vpop.permute.xlu1 %1882  ;;  %2783 = vmatmul.mubr.bf16.gmra.mrb[32].mxu1 %v2465_v13 }
 0x355   :  { %1920 = vst.msk [vmem:[#allocation5 + $0x108] sm:$0xff] %vm1908_vm9, %v1883_v24  ;;  %7065 = vmatmul.mubr.msk.bf16.gmra.mrb[84].mxu0 %vm791_vm4, %v2467_v63 }
 0x356   :  { %v2331_v55 = vpop.permute.xlu0 %2330  ;;  %7068 = vmatprep.mubr.msk.bf16.mxu0 %vm791_vm4, %v2470_v38 }
 0x357   :  { %2368 = vst.msk [vmem:[#allocation5 + $0xf8] sm:$0xff] %vm1908_vm9, %v2331_v55 }
 0x358   :  { %v1627_v0 = vpop.permute.xlu1 %1626 }
 0x359   :  { %1663 = vst.msk [vmem:[#allocation5 + $0x120] sm:$0xff] %vm1650_vm7, %v1627_v0 }
 0x35a   :  { %v2076_v27 = vpop.permute.xlu0 %2075 }
 0x35b   :  { %2112 = vst.msk [vmem:[#allocation5 + $0x110] sm:$0xff] %vm1650_vm7, %v2076_v27 }
 0x35c   :  { %v1756_v8 = vpop.permute.xlu1 %1755  ;;  %v2471_v12 = vld [vmem:[#allocation5 + $0x108] sm:$0xff] }
 0x35d   :  { %1792 = vst.msk [vmem:[#allocation5 + $0x120] sm:$0xff] %vm1779_vm8, %v1756_v8  ;;  %7069 = vmatmul.mubr.msk.bf16.gmra.mrb[88].mxu0 %vm791_vm4, %v2473_v32 }
 0x35e   :  { %v2205_v23 = vpop.permute.xlu0 %2204  ;;  %7072 = vmatprep.mubr.msk.bf16.mxu0 %vm791_vm4, %v2476_v41  ;;  %v2469_v34 = vld [vmem:[#allocation5 + $0xf8] sm:$0xff] }
 0x35f   :  { %2241 = vst.msk [vmem:[#allocation5 + $0x110] sm:$0xff] %vm1779_vm8, %v2205_v23  ;;  %2790 = vmatprep.mubr.bf16.mxu1 %v2469_v34 }
 0x360   :  { %v1885_v17 = vpop.permute.xlu1 %1884  ;;  %2791 = vmatmul.mubr.bf16.gmra.mrb[36].mxu1 %v2468_v54 }
 0x361   :  { %1921 = vst.msk [vmem:[#allocation5 + $0x120] sm:$0xff] %vm1908_vm9, %v1885_v17 }
 0x362   :  { %v2333_v40 = vpop.permute.xlu0 %2332 }
 0x363   :  { %2369 = vst.msk [vmem:[#allocation5 + $0x110] sm:$0xff] %vm1908_vm9, %v2333_v40 }
 0x364   :  { %v1629_v43 = vpop.permute.xlu1 %1628 }
 0x365   :  { %1664 = vst.msk [vmem:[#allocation5 + $0x138] sm:$0xff] %vm1650_vm7, %v1629_v43  ;;  %7073 = vmatmul.mubr.msk.bf16.gmra.mrb[92].mxu0 %vm791_vm4, %v2479_v53 }
 0x366   :  { %v2078_v60 = vpop.permute.xlu0 %2077  ;;  %7076 = vmatprep.mubr.msk.bf16.mxu0 %vm791_vm4, %v2482_v6 }
 0x367   :  { %2113 = vst.msk [vmem:[#allocation5 + $0x128] sm:$0xff] %vm1650_vm7, %v2078_v60 }
 0x368   :  { %v1758_v50 = vpop.permute.xlu1 %1757  ;;  %v2474_v2 = vld [vmem:[#allocation5 + $0x120] sm:$0xff] }
 0x369   :  { %1793 = vst.msk [vmem:[#allocation5 + $0x138] sm:$0xff] %vm1779_vm8, %v1758_v50 }
 0x36a   :  { %v2207_v37 = vpop.permute.xlu0 %2206  ;;  %v2472_v18 = vld [vmem:[#allocation5 + $0x110] sm:$0xff] }
 0x36b   :  { %2242 = vst.msk [vmem:[#allocation5 + $0x128] sm:$0xff] %vm1779_vm8, %v2207_v37  ;;  %2798 = vmatprep.mubr.bf16.mxu1 %v2472_v18  ;;  %v9789_v37 = vld [vmem:[%s11235_s17] sm:$0xff] }
 0x36c   :  { %v1887_v11 = vpop.permute.xlu1 %1886  ;;  %2799 = vmatmul.mubr.bf16.gmra.mrb[40].mxu1 %v2471_v12 }
 0x36d   :  { %1922 = vst.msk [vmem:[#allocation5 + $0x138] sm:$0xff] %vm1908_vm9, %v1887_v11  ;;  %7077 = vmatmul.mubr.msk.bf16.gmra.mrb[96].mxu0 %vm791_vm4, %v2485_v47  ;;  %v3017_v11 = vunpack.c.h.bf16 %v9789_v37 }
 0x36e   :  { %v2335_v33 = vpop.permute.xlu0 %2334 }
 0x36f   :  { %2370 = vst.msk [vmem:[#allocation5 + $0x128] sm:$0xff] %vm1908_vm9, %v2335_v33 }
 0x370   :  { %v1631_v19 = vpop.permute.xlu1 %1630 }
 0x371   :  { %1665 = vst.msk [vmem:[#allocation5 + $0x150] sm:$0xff] %vm1650_vm7, %v1631_v19 }
 0x372   :  { %v2080_v1 = vpop.permute.xlu0 %2079 }
 0x373   :  { %2114 = vst.msk [vmem:[#allocation5 + $0x140] sm:$0xff] %vm1650_vm7, %v2080_v1 }
 0x374   :  { %v1760_v52 = vpop.permute.xlu1 %1759  ;;  %v2477_v62 = vld [vmem:[#allocation5 + $0x138] sm:$0xff] }
 0x375   :  { %1794 = vst.msk [vmem:[#allocation5 + $0x150] sm:$0xff] %vm1779_vm8, %v1760_v52 }
 0x376   :  { %v2209_v22 = vpop.permute.xlu0 %2208  ;;  %v2475_v49 = vld [vmem:[#allocation5 + $0x128] sm:$0xff] }
 0x377   :  { %2243 = vst.msk [vmem:[#allocation5 + $0x140] sm:$0xff] %vm1779_vm8, %v2209_v22  ;;  %2806 = vmatprep.mubr.bf16.mxu1 %v2475_v49 }
 0x378   :  { %v1889_v46 = vpop.permute.xlu1 %1888  ;;  %2807 = vmatmul.mubr.bf16.gmra.mrb[44].mxu1 %v2474_v2 }
 0x379   :  { %1923 = vst.msk [vmem:[#allocation5 + $0x150] sm:$0xff] %vm1908_vm9, %v1889_v46 }
 0x37a   :  { %v2337_v10 = vpop.permute.xlu0 %2336 }
 0x37b   :  { %2371 = vst.msk [vmem:[#allocation5 + $0x140] sm:$0xff] %vm1908_vm9, %v2337_v10 }
 0x37c   :  { %v1633_v21 = vpop.permute.xlu1 %1632 }
 0x37d   :  { %1666 = vst.msk [vmem:[#allocation5 + $0x168] sm:$0xff] %vm1650_vm7, %v1633_v21 }
 0x37e   :  { %v2082_v42 = vpop.permute.xlu0 %2081 }
 0x37f   :  { %2115 = vst.msk [vmem:[#allocation5 + $0x158] sm:$0xff] %vm1650_vm7, %v2082_v42 }
 0x380   :  { %v1762_v26 = vpop.permute.xlu1 %1761  ;;  %v2480_v25 = vld [vmem:[#allocation5 + $0x150] sm:$0xff] }
 0x381   :  { %1795 = vst.msk [vmem:[#allocation5 + $0x168] sm:$0xff] %vm1779_vm8, %v1762_v26 }
 0x382   :  { %v2211_v58 = vpop.permute.xlu0 %2210  ;;  %v2478_v57 = vld [vmem:[#allocation5 + $0x140] sm:$0xff] }
 0x383   :  { %2244 = vst.msk [vmem:[#allocation5 + $0x158] sm:$0xff] %vm1779_vm8, %v2211_v58  ;;  %2814 = vmatprep.mubr.bf16.mxu1 %v2478_v57 }
 0x384   :  { %v1891_v14 = vpop.permute.xlu1 %1890  ;;  %2815 = vmatmul.mubr.bf16.gmra.mrb[48].mxu1 %v2477_v62 }
 0x385   :  { %1924 = vst.msk [vmem:[#allocation5 + $0x168] sm:$0xff] %vm1908_vm9, %v1891_v14 }
 0x386   :  { %v2339_v3 = vpop.permute.xlu0 %2338 }
 0x387   :  { %2372 = vst.msk [vmem:[#allocation5 + $0x158] sm:$0xff] %vm1908_vm9, %v2339_v3 }
 0x38a   :  { %v2084_v61 = vpop.permute.xlu0 %2083 }
 0x38b   :  { %2116 = vst.msk [vmem:[#allocation5 + $0x170] sm:$0xff] %vm1650_vm7, %v2084_v61 }
 0x38c   :  { %v2483_v36 = vld [vmem:[#allocation5 + $0x168] sm:$0xff] }
 0x38e   :  { %v2213_v31 = vpop.permute.xlu0 %2212  ;;  %v2481_v16 = vld [vmem:[#allocation5 + $0x158] sm:$0xff] }
 0x38f   :  { %2245 = vst.msk [vmem:[#allocation5 + $0x170] sm:$0xff] %vm1779_vm8, %v2213_v31  ;;  %2822 = vmatprep.mubr.bf16.mxu1 %v2481_v16 }
 0x390   :  { %2823 = vmatmul.mubr.bf16.gmra.mrb[52].mxu1 %v2480_v25 }
 0x392   :  { %v2341_v44 = vpop.permute.xlu0 %2340 }
 0x393   :  { %2373 = vst.msk [vmem:[#allocation5 + $0x170] sm:$0xff] %vm1908_vm9, %v2341_v44 }
 0x39a   :  { %v2484_v28 = vld [vmem:[#allocation5 + $0x170] sm:$0xff] }
 0x39b   :  { %2830 = vmatprep.mubr.bf16.mxu1 %v2484_v28 }
 0x39c   :  { %2831 = vmatmul.mubr.bf16.gmra.mrb[56].mxu1 %v2483_v36 }
 0x39d   :  { %3119 = vmatprep.mubr.f32.mxu1 %v3017_v11 }
 0x3bb   :  { %v6415_v39 = vpop.f32.mrb[0].mxu1 }
 0x3bc   :  { %v6416_v35 = vpop.f32.mrb[1].mxu1 }
 0x3bd   :  { %v6417_v29 = vadd.f32 %v6416_v35, %v6415_v39  ;;  %v6418_v7 = vpop.f32.mrb[2].mxu1 }
 0x3be   :  { %v6419_v45 = vpop.f32.mrb[3].mxu1 }
 0x3bf   :  { %v6420_v20 = vadd.f32 %v6419_v45, %v6418_v7 }
 0x3c8   :  { %v6421_v5 = vpop.f32.mrb[4].mxu1 }
 0x3c9   :  { %v6422_v9 = vpop.f32.mrb[5].mxu1 }
 0x3ca   :  { %v6423_v15 = vadd.f32 %v6422_v9, %v6421_v5  ;;  %v6424_v56 = vpop.f32.mrb[6].mxu1 }
 0x3cb   :  { %v6425_v48 = vpop.f32.mrb[7].mxu1 }
 0x3cc   :  { %v6426_v4 = vadd.f32 %v6425_v48, %v6424_v56 }
 0x3d4   :  { %v6427_v30 = vpop.f32.mrb[8].mxu1 }
 0x3d5   :  { %v6428_v59 = vpop.f32.mrb[9].mxu1 }
 0x3d6   :  { %v6429_v24 = vadd.f32 %v6428_v59, %v6427_v30  ;;  %v6430_v51 = vpop.f32.mrb[10].mxu1 }
 0x3d7   :  { %v6431_v13 = vpop.f32.mrb[11].mxu1 }
 0x3d8   :  { %v6432_v63 = vadd.f32 %v6431_v13, %v6430_v51 }
 0x3e0   :  { %v6433_v38 = vpop.f32.mrb[12].mxu1 }
 0x3e1   :  { %v6434_v55 = vpop.f32.mrb[13].mxu1 }
 0x3e2   :  { %v6435_v0 = vadd.f32 %v6434_v55, %v6433_v38  ;;  %v6436_v27 = vpop.f32.mrb[14].mxu1 }
 0x3e3   :  { %v6437_v8 = vpop.f32.mrb[15].mxu1 }
 0x3e4   :  { %v6438_v32 = vadd.f32 %v6437_v8, %v6436_v27 }
 0x3ec   :  { %v6439_v41 = vpop.f32.mrb[16].mxu1 }
 0x3ed   :  { %v6440_v23 = vpop.f32.mrb[17].mxu1 }
 0x3ee   :  { %v6441_v34 = vadd.f32 %v6440_v23, %v6439_v41  ;;  %v6442_v17 = vpop.f32.mrb[18].mxu1 }
 0x3ef   :  { %v6443_v54 = vpop.f32.mrb[19].mxu1 }
 0x3f0   :  { %v6444_v40 = vadd.f32 %v6443_v54, %v6442_v17 }
 0x3f8   :  { %v6445_v43 = vpop.f32.mrb[20].mxu1 }
 0x3f9   :  { %v6446_v53 = vpop.f32.mrb[21].mxu1 }
 0x3fa   :  { %v6447_v6 = vadd.f32 %v6446_v53, %v6445_v43  ;;  %v6448_v60 = vpop.f32.mrb[22].mxu1 }
 0x3fb   :  { %v6449_v50 = vpop.f32.mrb[23].mxu1 }
 0x3fc   :  { %v6450_v18 = vadd.f32 %v6449_v50, %v6448_v60 }
 0x400   :  { %v6409_v12 = vpop.f32.mrb[64].mxu0 }
 0x401   :  { %v6410_v47 = vpop.f32.mrb[65].mxu0 }
 0x402   :  { %v6411_v33 = vadd.f32 %v6410_v47, %v6409_v12  ;;  %v6412_v19 = vpop.f32.mrb[66].mxu0 }
 0x403   :  { %v6413_v1 = vpop.f32.mrb[67].mxu0 }
 0x404   :  { %v6414_v52 = vadd.f32 %v6413_v1, %v6412_v19 }
 0x408   :  { %v7050_v22 = vpop.f32.mrb[68].mxu0 }
 0x409   :  { %v9792_v49 = vadd.f32 %v7050_v22, %v6417_v29  ;;  %v2873_v46 = vpop.f32.mrb[69].mxu0 }
 0x40a   :  { %v9794_v2 = vadd.f32 %v6411_v33, %v2873_v46  ;;  %v7051_v10 = vpop.f32.mrb[70].mxu0 }
 0x40b   :  { %v9796_v21 = vadd.f32 %v7051_v10, %v6420_v20  ;;  %v2876_v42 = vpop.f32.mrb[71].mxu0 }
 0x40c   :  { %v9798_v26 = vadd.f32 %v6414_v52, %v2876_v42 }
 0x40d   :  { %v7197_v58 = vpack.c.bf16 %v9796_v21, %v9792_v49 }
 0x40e   :  { %v7193_v57 = vpack.c.bf16 %v9798_v26, %v9794_v2 }
 0x40f   :  { %v6451_v14 = vpop.f32.mrb[24].mxu1 }
 0x410   :  { %v6452_v62 = vpop.f32.mrb[25].mxu1  ;;  %v7054_v3 = vpop.f32.mrb[72].mxu0 }
 0x411   :  { %v6453_v61 = vadd.f32 %v6452_v62, %v6451_v14  ;;  %v9804_v31 = vadd.f32 %v7054_v3, %v6429_v24  ;;  %v6454_v16 = vpop.f32.mrb[26].mxu1  ;;  %v2889_v25 = vpop.f32.mrb[73].mxu0 }
 0x412   :  { %v9806_v44 = vadd.f32 %v6423_v15, %v2889_v25  ;;  %v6455_v28 = vpop.f32.mrb[27].mxu1  ;;  %v7055_v36 = vpop.f32.mrb[74].mxu0 }
 0x413   :  { %v6456_v39 = vadd.f32 %v6455_v28, %v6454_v16  ;;  %v9808_v35 = vadd.f32 %v7055_v36, %v6432_v63  ;;  %v2892_v29 = vpop.f32.mrb[75].mxu0 }
 0x414   :  { %v9810_v7 = vadd.f32 %v6426_v4, %v2892_v29 }
 0x415   :  { %v7205_v45 = vpack.c.bf16 %v9808_v35, %v9804_v31 }
 0x416   :  { %v7201_v20 = vpack.c.bf16 %v9810_v7, %v9806_v44 }
 0x418   :  { %v7058_v5 = vpop.f32.mrb[76].mxu0 }
 0x419   :  { %v9816_v9 = vadd.f32 %v7058_v5, %v6441_v34  ;;  %v2905_v56 = vpop.f32.mrb[77].mxu0 }
 0x41a   :  { %v9818_v15 = vadd.f32 %v6435_v0, %v2905_v56  ;;  %v7059_v48 = vpop.f32.mrb[78].mxu0 }
 0x41b   :  { %v9820_v30 = vadd.f32 %v7059_v48, %v6444_v40  ;;  %v6457_v59 = vpop.f32.mrb[28].mxu1  ;;  %v2908_v24 = vpop.f32.mrb[79].mxu0 }
 0x41c   :  { %v9822_v51 = vadd.f32 %v6438_v32, %v2908_v24  ;;  %v6458_v4 = vpop.f32.mrb[29].mxu1 }
 0x41d   :  { %v7213_v13 = vpack.c.bf16 %v9820_v30, %v9816_v9  ;;  %v6459_v63 = vadd.f32 %v6458_v4, %v6457_v59  ;;  %v6460_v38 = vpop.f32.mrb[30].mxu1 }
 0x41e   :  { %v7209_v55 = vpack.c.bf16 %v9822_v51, %v9818_v15  ;;  %v6461_v27 = vpop.f32.mrb[31].mxu1 }
 0x41f   :  { %v6462_v8 = vadd.f32 %v6461_v27, %v6460_v38 }
 0x420   :  { %v7062_v0 = vpop.f32.mrb[80].mxu0 }
 0x421   :  { %v9828_v41 = vadd.f32 %v7062_v0, %v6453_v61  ;;  %v2921_v23 = vpop.f32.mrb[81].mxu0 }
 0x422   :  { %v9830_v34 = vadd.f32 %v6447_v6, %v2921_v23  ;;  %v7063_v17 = vpop.f32.mrb[82].mxu0 }
 0x423   :  { %v9832_v32 = vadd.f32 %v7063_v17, %v6456_v39  ;;  %v2924_v54 = vpop.f32.mrb[83].mxu0 }
 0x424   :  { %v9834_v40 = vadd.f32 %v6450_v18, %v2924_v54 }
 0x425   :  { %v7221_v43 = vpack.c.bf16 %v9832_v32, %v9828_v41  ;;  %v3004_v41 = vld [vmem:[%s11235_s17 + $0x20] sm:$0xff] }
 0x426   :  { %v7217_v53 = vpack.c.bf16 %v9834_v40, %v9830_v34  ;;  %v3002_v40 = vld [vmem:[%s11235_s17 + $0x10] sm:$0xff] }
 0x427   :  { %v6463_v60 = vpop.f32.mrb[32].mxu1 }
 0x428   :  { %v6464_v50 = vpop.f32.mrb[33].mxu1  ;;  %v7066_v11 = vpop.f32.mrb[84].mxu0 }
 0x429   :  { %v6465_v12 = vadd.f32 %v6464_v50, %v6463_v60  ;;  %v6466_v47 = vpop.f32.mrb[34].mxu1  ;;  %v2937_v33 = vpop.f32.mrb[85].mxu0 }
 0x42a   :  { %v2938_v6 = vadd.f32 %v6459_v63, %v2937_v33  ;;  %v6467_v19 = vpop.f32.mrb[35].mxu1  ;;  %v7067_v1 = vpop.f32.mrb[86].mxu0 }
 0x42b   :  { %v2946_v52 = vadd.f32 %v7066_v11, %v6465_v12  ;;  %v6468_v22 = vadd.f32 %v6467_v19, %v6466_v47  ;;  %v2940_v46 = vpop.f32.mrb[87].mxu0 }
 0x42c   :  { %v2941_v18 = vadd.f32 %v6462_v8, %v2940_v46 }
 0x42d   :  { %v2949_v2 = vadd.f32 %v7067_v1, %v6468_v22 }
 0x42e   :  { %v7191_v10 = vpack.c.bf16 %v2941_v18, %v2938_v6 }
 0x42f   :  { %v7195_v42 = vpack.c.bf16 %v2949_v2, %v2946_v52 }
 0x430   :  { %v7070_v26 = vpop.f32.mrb[88].mxu0  ;;  %7192 = vmatprep.subr.bf16.mxu1 %v7191_v10 }
 0x431   :  { %v2953_v14 = vpop.f32.mrb[89].mxu0  ;;  %7194 = vmatpush3.bf16.msra.mxu1 %v7193_v57 }
 0x432   :  { %v7071_v62 = vpop.f32.mrb[90].mxu0  ;;  %7196 = vmatprep.subr.bf16.mxu1 %v7195_v42 }
 0x433   :  { %v6469_v3 = vpop.f32.mrb[36].mxu1  ;;  %v2956_v61 = vpop.f32.mrb[91].mxu0 }
 0x434   :  { %v6470_v16 = vpop.f32.mrb[37].mxu1 }
 0x435   :  { %v6471_v25 = vadd.f32 %v6470_v16, %v6469_v3  ;;  %v6472_v28 = vpop.f32.mrb[38].mxu1  ;;  %7198 = vmatpush3.bf16.msra.mxu1 %v7197_v58 }
 0x436   :  { %v6473_v36 = vpop.f32.mrb[39].mxu1 }
 0x437   :  { %v2954_v39 = vadd.f32 %v6471_v25, %v2953_v14  ;;  %v6474_v29 = vadd.f32 %v6473_v36, %v6472_v28 }
 0x438   :  { %v7074_v5 = vpop.f32.mrb[92].mxu0 }
 0x439   :  { %v2957_v56 = vadd.f32 %v6474_v29, %v2956_v61  ;;  %v2969_v48 = vpop.f32.mrb[93].mxu0  ;;  %v3016_v29 = vunpack.c.l.bf16 %v9789_v37 }
 0x43a   :  { %v7075_v59 = vpop.f32.mrb[94].mxu0 }
 0x43b   :  { %v2972_v24 = vpop.f32.mrb[95].mxu0  ;;  %v7199_v57 = vpack.c.bf16 %v2957_v56, %v2954_v39  ;;  %v3001_v39 = vld [vmem:[%s11235_s17 + $0x8] sm:$0xff]  ;;  %v3003_v56 = vld [vmem:[%s11235_s17 + $0x18] sm:$0xff] }
 0x43c   :  { %v3019_v34 = vunpack.c.h.bf16 %v3001_v39  ;;  %v3023_v37 = vunpack.c.h.bf16 %v3003_v56  ;;  %v3022_v32 = vunpack.c.l.bf16 %v3003_v56 }
 0x43d   :  { %7200 = vmatprep.subr.bf16.mxu1 %v7199_v57 }
 0x43e   :  { %7202 = vmatpush3.bf16.msra.mxu1 %v7201_v20 }
 0x43f   :  { %v6475_v4 = vpop.f32.mrb[40].mxu1 }
 0x440   :  { %v6476_v63 = vpop.f32.mrb[41].mxu1  ;;  %v7078_v38 = vpop.f32.mrb[96].mxu0 }
 0x441   :  { %v6477_v27 = vadd.f32 %v6476_v63, %v6475_v4  ;;  %v6478_v49 = vpop.f32.mrb[42].mxu1  ;;  %v2985_v21 = vpop.f32.mrb[97].mxu0  ;;  %v3006_v4 = vld [vmem:[%s11235_s17 + $0x30] sm:$0xff] }
 0x442   :  { %v6479_v58 = vpop.f32.mrb[43].mxu1  ;;  %v7079_v8 = vpop.f32.mrb[98].mxu0 }
 0x443   :  { %v2962_v0 = vadd.f32 %v7070_v26, %v6477_v27  ;;  %v6480_v23 = vadd.f32 %v6479_v58, %v6478_v49  ;;  %v2988_v17 = vpop.f32.mrb[99].mxu0  ;;  %v3007_v27 = vld [vmem:[%s11235_s17 + $0x38] sm:$0xff]  ;;  %v3028_v49 = vunpack.c.l.bf16 %v3006_v4  ;;  %v3008_v58 = vld [vmem:[%s11235_s17 + $0x40] sm:$0xff] }
 0x445   :  { %v2965_v54 = vadd.f32 %v7071_v62, %v6480_v23  ;;  %v3009_v23 = vld [vmem:[%s11235_s17 + $0x48] sm:$0xff] }
 0x447   :  { %v7203_v60 = vpack.c.bf16 %v2965_v54, %v2962_v0  ;;  %v3033_v0 = vunpack.c.h.bf16 %v3008_v58  ;;  %v3035_v54 = vunpack.c.h.bf16 %v3009_v23 }
 0x449   :  { %7204 = vmatprep.subr.bf16.mxu1 %v7203_v60  ;;  %v3010_v60 = vld [vmem:[%s11235_s17 + $0x50] sm:$0xff] }
 0x44a   :  { %7206 = vmatpush3.bf16.msra.mxu1 %v7205_v45 }
 0x44b   :  { %v6481_v44 = vpop.f32.mrb[44].mxu1 }
 0x44c   :  { %v6482_v7 = vpop.f32.mrb[45].mxu1 }
 0x44d   :  { %v6483_v20 = vadd.f32 %v6482_v7, %v6481_v44  ;;  %v6484_v50 = vpop.f32.mrb[46].mxu1  ;;  %v3034_v44 = vunpack.c.l.bf16 %v3009_v23  ;;  %v3037_v7 = vunpack.c.h.bf16 %v3010_v60 }
 0x44e   :  { %v6485_v11 = vpop.f32.mrb[47].mxu1 }
 0x44f   :  { %v2970_v12 = vadd.f32 %v6483_v20, %v2969_v48  ;;  %v6486_v47 = vadd.f32 %v6485_v11, %v6484_v50  ;;  %v3020_v48 = vunpack.c.l.bf16 %v3002_v40  ;;  %v3011_v20 = vld [vmem:[%s11235_s17 + $0x58] sm:$0xff]  ;;  %v3036_v50 = vunpack.c.l.bf16 %v3010_v60 }
 0x450   :  { %v3039_v11 = vunpack.c.h.bf16 %v3011_v20 }
 0x451   :  { %v2973_v33 = vadd.f32 %v6486_v47, %v2972_v24  ;;  %v3024_v24 = vunpack.c.l.bf16 %v3004_v41  ;;  %v3038_v47 = vunpack.c.l.bf16 %v3011_v20 }
 0x453   :  { %v7207_v6 = vpack.c.bf16 %v2973_v33, %v2970_v12  ;;  %v3012_v12 = vld [vmem:[%s11235_s17 + $0x60] sm:$0xff] }
 0x454   :  { %v3041_v33 = vunpack.c.h.bf16 %v3012_v12 }
 0x455   :  { %7208 = vmatprep.subr.bf16.mxu1 %v7207_v6  ;;  %v3013_v6 = vld [vmem:[%s11235_s17 + $0x68] sm:$0xff] }
 0x456   :  { %7210 = vmatpush3.bf16.msra.mxu1 %v7209_v55 }
 0x457   :  { %v6487_v19 = vpop.f32.mrb[48].mxu1 }
 0x458   :  { %v6488_v1 = vpop.f32.mrb[49].mxu1 }
 0x459   :  { %v6489_v52 = vadd.f32 %v6488_v1, %v6487_v19  ;;  %v6490_v22 = vpop.f32.mrb[50].mxu1  ;;  %v3040_v19 = vunpack.c.l.bf16 %v3012_v12  ;;  %v3043_v1 = vunpack.c.h.bf16 %v3013_v6 }
 0x45a   :  { %v6491_v31 = vpop.f32.mrb[51].mxu1 }
 0x45b   :  { %v2978_v35 = vadd.f32 %v7074_v5, %v6489_v52  ;;  %v6492_v45 = vadd.f32 %v6491_v31, %v6490_v22  ;;  %v3021_v5 = vunpack.c.h.bf16 %v3002_v40  ;;  %v3014_v52 = vld [vmem:[%s11235_s17 + $0x70] sm:$0xff]  ;;  %v3042_v22 = vunpack.c.l.bf16 %v3013_v6 }
 0x45c   :  { %v3045_v31 = vunpack.c.h.bf16 %v3014_v52 }
 0x45d   :  { %v2981_v46 = vadd.f32 %v7075_v59, %v6492_v45  ;;  %v3005_v59 = vld [vmem:[%s11235_s17 + $0x28] sm:$0xff]  ;;  %v3044_v45 = vunpack.c.l.bf16 %v3014_v52 }
 0x45e   :  { %v3027_v57 = vunpack.c.h.bf16 %v3005_v59  ;;  %v3026_v63 = vunpack.c.l.bf16 %v3005_v59 }
 0x45f   :  { %v7211_v18 = vpack.c.bf16 %v2981_v46, %v2978_v35  ;;  %v3015_v35 = vld [vmem:[%s11235_s17 + $0x78] sm:$0xff] }
 0x460   :  { %v3047_v46 = vunpack.c.h.bf16 %v3015_v35 }
 0x461   :  { %7212 = vmatprep.subr.bf16.mxu1 %v7211_v18  ;;  %v3046_v18 = vunpack.c.l.bf16 %v3015_v35 }
 0x462   :  { %7214 = vmatpush3.bf16.msra.mxu1 %v7213_v13 }
 0x463   :  { %v6493_v2 = vpop.f32.mrb[52].mxu1 }
 0x464   :  { %v6494_v10 = vpop.f32.mrb[53].mxu1 }
 0x465   :  { %v6495_v42 = vadd.f32 %v6494_v10, %v6493_v2  ;;  %v6496_v26 = vpop.f32.mrb[54].mxu1  ;;  %v9907_v2 = vld [vmem:[#allocation4] sm:$0xff] }
 0x466   :  { %v6497_v15 = vpop.f32.mrb[55].mxu1  ;;  %3390 = vst.msk [vmem:[#allocation3] sm:$0xff] %vm3218_vm10, %v9907_v2  ;;  %3393 = vst.msk [vmem:[#allocation3 + $0xa0] sm:$0xff] %vm3218_vm10, %v9907_v2 }
 0x467   :  { %v2986_v51 = vadd.f32 %v6495_v42, %v2985_v21  ;;  %v6498_v55 = vadd.f32 %v6497_v15, %v6496_v26  ;;  %v3031_v21 = vunpack.c.h.bf16 %v3007_v27  ;;  %3396 = vst.msk [vmem:[#allocation3 + $0x90] sm:$0xff] %vm3218_vm10, %v9907_v2  ;;  %3398 = vst.msk [vmem:[#allocation3 + $0x130] sm:$0xff] %vm3218_vm10, %v9907_v2  ;;  %v9920_v42 = vld [vmem:[%s11224_s6] ss:$0 sm:$0xff] }
 0x468   :  { %3401 = vst.msk [vmem:[#allocation3 + $0x10] sm:$0x1] %vm3400_vm11, %v9907_v2  ;;  %3402 = vst.msk [vmem:[#allocation3 + $0x20] sm:$0x1] %vm3400_vm11, %v9907_v2 }
 0x469   :  { %v2989_v14 = vadd.f32 %v6498_v55, %v2988_v17  ;;  %v3032_v17 = vunpack.c.l.bf16 %v3008_v58  ;;  %3403 = vst.msk [vmem:[#allocation3 + $0x30] sm:$0x1] %vm3400_vm11, %v9907_v2  ;;  %3404 = vst.msk [vmem:[#allocation3 + $0x40] sm:$0x1] %vm3400_vm11, %v9907_v2 }
 0x46a   :  { %3405 = vst.msk [vmem:[#allocation3 + $0x50] sm:$0x1] %vm3400_vm11, %v9907_v2  ;;  %3406 = vst.msk [vmem:[#allocation3 + $0x60] sm:$0x1] %vm3400_vm11, %v9907_v2 }
 0x46b   :  { %v7215_v62 = vpack.c.bf16 %v2989_v14, %v2986_v51  ;;  %3407 = vst.msk [vmem:[#allocation3 + $0x70] sm:$0x1] %vm3400_vm11, %v9907_v2  ;;  %3408 = vst.msk [vmem:[#allocation3 + $0x80] sm:$0x1] %vm3400_vm11, %v9907_v2 }
 0x46c   :  { %3409 = vst.msk [vmem:[#allocation3 + $0xb0] sm:$0x1] %vm3400_vm11, %v9907_v2  ;;  %3410 = vst.msk [vmem:[#allocation3 + $0xc0] sm:$0x1] %vm3400_vm11, %v9907_v2 }
 0x46d   :  { %7216 = vmatprep.subr.bf16.mxu1 %v7215_v62  ;;  %3411 = vst.msk [vmem:[#allocation3 + $0xd0] sm:$0x1] %vm3400_vm11, %v9907_v2  ;;  %3412 = vst.msk [vmem:[#allocation3 + $0xe0] sm:$0x1] %vm3400_vm11, %v9907_v2 }
 0x46e   :  { %7218 = vmatpush3.bf16.msra.mxu1 %v7217_v53  ;;  %v3018_v53 = vunpack.c.l.bf16 %v3001_v39  ;;  %3413 = vst.msk [vmem:[#allocation3 + $0xf0] sm:$0x1] %vm3400_vm11, %v9907_v2  ;;  %3414 = vst.msk [vmem:[#allocation3 + $0x100] sm:$0x1] %vm3400_vm11, %v9907_v2 }
 0x46f   :  { %v6499_v3 = vpop.f32.mrb[56].mxu1  ;;  %3415 = vst.msk [vmem:[#allocation3 + $0x110] sm:$0x1] %vm3400_vm11, %v9907_v2  ;;  %3416 = vst.msk [vmem:[#allocation3 + $0x120] sm:$0x1] %vm3400_vm11, %v9907_v2 }
 0x470   :  { %v6500_v61 = vpop.f32.mrb[57].mxu1  ;;  %3417 = vst.msk [vmem:[#allocation3 + $0x19] sm:$0x1] %vm3400_vm11, %v9907_v2  ;;  %3418 = vst.msk [vmem:[#allocation3 + $0x29] sm:$0x1] %vm3400_vm11, %v9907_v2 }
 0x471   :  { %v6501_v16 = vadd.f32 %v6500_v61, %v6499_v3  ;;  %v6502_v25 = vpop.f32.mrb[58].mxu1  ;;  %3419 = vst.msk [vmem:[#allocation3 + $0x39] sm:$0x1] %vm3400_vm11, %v9907_v2  ;;  %3420 = vst.msk [vmem:[#allocation3 + $0x49] sm:$0x1] %vm3400_vm11, %v9907_v2 }
 0x472   :  { %v6503_v9 = vpop.f32.mrb[59].mxu1  ;;  %3421 = vst.msk [vmem:[#allocation3 + $0x59] sm:$0x1] %vm3400_vm11, %v9907_v2  ;;  %3422 = vst.msk [vmem:[#allocation3 + $0x69] sm:$0x1] %vm3400_vm11, %v9907_v2 }
 0x473   :  { %v2994_v30 = vadd.f32 %v7078_v38, %v6501_v16  ;;  %v6504_v13 = vadd.f32 %v6503_v9, %v6502_v25  ;;  %v3029_v38 = vunpack.c.h.bf16 %v3006_v4  ;;  %3423 = vst.msk [vmem:[#allocation3 + $0x79] sm:$0x1] %vm3400_vm11, %v9907_v2  ;;  %3424 = vst.msk [vmem:[#allocation3 + $0x89] sm:$0x1] %vm3400_vm11, %v9907_v2 }
 0x474   :  { %3425 = vst.msk [vmem:[#allocation3 + $0xb9] sm:$0x1] %vm3400_vm11, %v9907_v2  ;;  %3426 = vst.msk [vmem:[#allocation3 + $0xc9] sm:$0x1] %vm3400_vm11, %v9907_v2 }
 0x475   :  { %v2997_v28 = vadd.f32 %v7079_v8, %v6504_v13  ;;  %v3030_v8 = vunpack.c.l.bf16 %v3007_v27  ;;  %3427 = vst.msk [vmem:[#allocation3 + $0xd9] sm:$0x1] %vm3400_vm11, %v9907_v2  ;;  %3428 = vst.msk [vmem:[#allocation3 + $0xe9] sm:$0x1] %vm3400_vm11, %v9907_v2 }
 0x476   :  { %3429 = vst.msk [vmem:[#allocation3 + $0xf9] sm:$0x1] %vm3400_vm11, %v9907_v2  ;;  %3430 = vst.msk [vmem:[#allocation3 + $0x109] sm:$0x1] %vm3400_vm11, %v9907_v2 }
 0x477   :  { %v7219_v36 = vpack.c.bf16 %v2997_v28, %v2994_v30  ;;  %3431 = vst.msk [vmem:[#allocation3 + $0x119] sm:$0x1] %vm3400_vm11, %v9907_v2  ;;  %3432 = vst.msk [vmem:[#allocation3 + $0x129] sm:$0x1] %vm3400_vm11, %v9907_v2 }
 0x478   :  { %3392 = vst.msk [vmem:[#allocation3 + $0x8] sm:$0x3] %vm3391_vm12, %v9907_v2  ;;  %3394 = vst.msk [vmem:[#allocation3 + $0xa8] sm:$0x3] %vm3391_vm12, %v9907_v2 }
 0x479   :  { %7220 = vmatprep.subr.bf16.mxu1 %v7219_v36  ;;  %3397 = vst.msk [vmem:[#allocation3 + $0x98] sm:$0x3] %vm3391_vm12, %v9907_v2  ;;  %3399 = vst.msk [vmem:[#allocation3 + $0x138] sm:$0x3] %vm3391_vm12, %v9907_v2 }
 0x47a   :  { %7222 = vmatpush3.bf16.msra.mxu1 %v7221_v43  ;;  %v3025_v43 = vunpack.c.h.bf16 %v3004_v41 }
 0x47d   :  { %3120 = vmatmul.mubr.f32.vlgmr.msra.gmra.mrb[60].mxu1 %v3016_v29 }
 0x47e   :  { %3124 = vmatprep.mubr.f32.mxu1 %v3019_v34 }
 0x481   :  { %3125 = vmatmul.mubr.f32.gmra.mrb[62].mxu1 %v3018_v53 }
 0x482   :  { %3129 = vmatprep.mubr.f32.mxu1 %v3021_v5 }
 0x485   :  { %3130 = vmatmul.mubr.f32.gmra.mrb[64].mxu1 %v3020_v48 }
 0x486   :  { %3134 = vmatprep.mubr.f32.mxu1 %v3023_v37 }
 0x489   :  { %3135 = vmatmul.mubr.f32.gmra.mrb[66].mxu1 %v3022_v32 }
 0x48a   :  { %3139 = vmatprep.mubr.f32.mxu1 %v3025_v43 }
 0x48d   :  { %3140 = vmatmul.mubr.f32.gmra.mrb[68].mxu1 %v3024_v24 }
 0x48e   :  { %3144 = vmatprep.mubr.f32.mxu1 %v3027_v57 }
 0x491   :  { %3145 = vmatmul.mubr.f32.gmra.mrb[70].mxu1 %v3026_v63 }
 0x492   :  { %3149 = vmatprep.mubr.f32.mxu1 %v3029_v38 }
 0x495   :  { %3150 = vmatmul.mubr.f32.gmra.mrb[72].mxu1 %v3028_v49 }
 0x496   :  { %3154 = vmatprep.mubr.f32.mxu1 %v3031_v21 }
 0x499   :  { %3155 = vmatmul.mubr.f32.gmra.mrb[74].mxu1 %v3030_v8 }
 0x49a   :  { %3159 = vmatprep.mubr.f32.mxu1 %v3033_v0 }
 0x49d   :  { %3160 = vmatmul.mubr.f32.gmra.mrb[76].mxu1 %v3032_v17 }
 0x49e   :  { %3164 = vmatprep.mubr.f32.mxu1 %v3035_v54 }
 0x4a1   :  { %3165 = vmatmul.mubr.f32.gmra.mrb[78].mxu1 %v3034_v44 }
 0x4a2   :  { %3169 = vmatprep.mubr.f32.mxu1 %v3037_v7 }
 0x4a5   :  { %3170 = vmatmul.mubr.f32.gmra.mrb[80].mxu1 %v3036_v50 }
 0x4a6   :  { %3174 = vmatprep.mubr.f32.mxu1 %v3039_v11 }
 0x4a9   :  { %3175 = vmatmul.mubr.f32.gmra.mrb[82].mxu1 %v3038_v47 }
 0x4aa   :  { %3179 = vmatprep.mubr.f32.mxu1 %v3041_v33 }
 0x4ad   :  { %3180 = vmatmul.mubr.f32.gmra.mrb[84].mxu1 %v3040_v19 }
 0x4ae   :  { %3184 = vmatprep.mubr.f32.mxu1 %v3043_v1 }
 0x4b1   :  { %3185 = vmatmul.mubr.f32.gmra.mrb[86].mxu1 %v3042_v22 }
 0x4b2   :  { %3189 = vmatprep.mubr.f32.mxu1 %v3045_v31 }
 0x4b5   :  { %3190 = vmatmul.mubr.f32.gmra.mrb[88].mxu1 %v3044_v45 }
 0x4b6   :  { %3194 = vmatprep.mubr.f32.mxu1 %v3047_v46 }
 0x4b9   :  { %3195 = vmatmul.mubr.f32.gmra.mrb[90].mxu1 %v3046_v18 }
 0x550   :  { %v6555_v10 = vpop.f32.mrb[60].mxu1 }
 0x551   :  { %v6556_v26 = vpop.f32.mrb[61].mxu1 }
 0x552   :  { %v6557_v15 = vadd.f32 %v6556_v26, %v6555_v10 }
 0x554   :  { %v9923_v51 = vadd.f32 %v6557_v15, %v9920_v42  ;;  %v6558_v55 = vpop.f32.mrb[62].mxu1 }
 0x555   :  { %v6559_v14 = vpop.f32.mrb[63].mxu1 }
 0x556   :  { %v6560_v62 = vadd.f32 %v6559_v14, %v6558_v55  ;;  %v3202_v3 = vmax.f32 %v9923_v51, 0.0 }
 0x558   :  { %v9927_v61 = vadd.f32 %v6560_v62, %v9920_v42  ;;  %v6561_v16 = vpop.f32.mrb[64].mxu1  ;;  %v3219_v13 = vsel %vm3218_vm10, %v3202_v3, 0.0 }
 0x559   :  { %v6562_v25 = vpop.f32.mrb[65].mxu1 }
 0x55a   :  { %v3203_v9 = vmax.f32 %v9927_v61, 0.0  ;;  %v6563_v30 = vadd.f32 %v6562_v25, %v6561_v16 }
 0x55c   :  { %v3220_v28 = vsel %vm3218_vm10, %v3203_v9, 0.0  ;;  %v9937_v36 = vadd.f32 %v6563_v30, %v9920_v42  ;;  %v6564_v39 = vpop.f32.mrb[66].mxu1 }
 0x55d   :  { %v3221_v29 = vadd.f32 %v3220_v28, %v3219_v13  ;;  %v6565_v34 = vpop.f32.mrb[67].mxu1 }
 0x55e   :  { %v3204_v40 = vmax.f32 %v9937_v36, 0.0  ;;  %v6566_v53 = vadd.f32 %v6565_v34, %v6564_v39 }
 0x560   :  { %v3222_v5 = vsel %vm3218_vm10, %v3204_v40, 0.0  ;;  %v9944_v56 = vadd.f32 %v6566_v53, %v9920_v42  ;;  %v6567_v48 = vpop.f32.mrb[68].mxu1 }
 0x561   :  { %v3223_v37 = vadd.f32 %v3222_v5, %v3221_v29  ;;  %v6568_v41 = vpop.f32.mrb[69].mxu1 }
 0x562   :  { %v3205_v32 = vmax.f32 %v9944_v56, 0.0  ;;  %v6569_v43 = vadd.f32 %v6568_v41, %v6567_v48 }
 0x564   :  { %v3224_v59 = vsel %vm3218_vm10, %v3205_v32, 0.0  ;;  %v9951_v24 = vadd.f32 %v6569_v43, %v9920_v42  ;;  %v6570_v57 = vpop.f32.mrb[70].mxu1 }
 0x565   :  { %v3225_v4 = vadd.f32 %v3224_v59, %v3223_v37  ;;  %v6571_v63 = vpop.f32.mrb[71].mxu1 }
 0x566   :  { %v3206_v38 = vmax.f32 %v9951_v24, 0.0  ;;  %v6572_v27 = vadd.f32 %v6571_v63, %v6570_v57 }
 0x568   :  { %v3226_v49 = vsel %vm3218_vm10, %v3206_v38, 0.0  ;;  %v9958_v21 = vadd.f32 %v6572_v27, %v9920_v42  ;;  %v6573_v58 = vpop.f32.mrb[72].mxu1 }
 0x569   :  { %v3227_v8 = vadd.f32 %v3226_v49, %v3225_v4  ;;  %v6574_v0 = vpop.f32.mrb[73].mxu1 }
 0x56a   :  { %v3207_v23 = vmax.f32 %v9958_v21, 0.0  ;;  %v6575_v17 = vadd.f32 %v6574_v0, %v6573_v58 }
 0x56c   :  { %v3228_v54 = vsel %vm3218_vm10, %v3207_v23, 0.0  ;;  %v9965_v60 = vadd.f32 %v6575_v17, %v9920_v42  ;;  %v6576_v44 = vpop.f32.mrb[74].mxu1 }
 0x56d   :  { %v3229_v7 = vadd.f32 %v3228_v54, %v3227_v8  ;;  %v6577_v20 = vpop.f32.mrb[75].mxu1 }
 0x56e   :  { %v3208_v50 = vmax.f32 %v9965_v60, 0.0  ;;  %v6578_v11 = vadd.f32 %v6577_v20, %v6576_v44 }
 0x570   :  { %v3230_v12 = vsel %vm3218_vm10, %v3208_v50, 0.0  ;;  %v9972_v47 = vadd.f32 %v6578_v11, %v9920_v42  ;;  %v6579_v33 = vpop.f32.mrb[76].mxu1 }
 0x571   :  { %v3231_v6 = vadd.f32 %v3230_v12, %v3229_v7  ;;  %v6580_v19 = vpop.f32.mrb[77].mxu1 }
 0x572   :  { %v3209_v1 = vmax.f32 %v9972_v47, 0.0  ;;  %v6581_v52 = vadd.f32 %v6580_v19, %v6579_v33 }
 0x574   :  { %v3232_v22 = vsel %vm3218_vm10, %v3209_v1, 0.0  ;;  %v9979_v31 = vadd.f32 %v6581_v52, %v9920_v42  ;;  %v6582_v35 = vpop.f32.mrb[78].mxu1 }
 0x575   :  { %v3233_v45 = vadd.f32 %v3232_v22, %v3231_v6  ;;  %v6583_v46 = vpop.f32.mrb[79].mxu1 }
 0x576   :  { %v3210_v18 = vmax.f32 %v9979_v31, 0.0  ;;  %v6584_v10 = vadd.f32 %v6583_v46, %v6582_v35 }
 0x578   :  { %v3234_v26 = vsel %vm3218_vm10, %v3210_v18, 0.0  ;;  %v10050_v15 = vadd.f32 %v6584_v10, %v9920_v42  ;;  %v6585_v55 = vpop.f32.mrb[80].mxu1 }
 0x579   :  { %v3235_v14 = vadd.f32 %v3234_v26, %v3233_v45  ;;  %v6586_v62 = vpop.f32.mrb[81].mxu1 }
 0x57a   :  { %v3211_v16 = vmax.f32 %v10050_v15, 0.0  ;;  %v6587_v25 = vadd.f32 %v6586_v62, %v6585_v55 }
 0x57c   :  { %v3236_v30 = vsel %vm3218_vm10, %v3211_v16, 0.0  ;;  %v10057_v13 = vadd.f32 %v6587_v25, %v9920_v42  ;;  %v6588_v28 = vpop.f32.mrb[82].mxu1 }
 0x57d   :  { %v3237_v39 = vadd.f32 %v3236_v30, %v3235_v14  ;;  %v6589_v29 = vpop.f32.mrb[83].mxu1 }
 0x57e   :  { %v3212_v34 = vmax.f32 %v10057_v13, 0.0  ;;  %v6590_v53 = vadd.f32 %v6589_v29, %v6588_v28 }
 0x580   :  { %v3238_v5 = vsel %vm3218_vm10, %v3212_v34, 0.0  ;;  %v3177_v48 = vadd.f32 %v6590_v53, %v9920_v42  ;;  %v6591_v37 = vpop.f32.mrb[84].mxu1 }
 0x581   :  { %v3239_v41 = vadd.f32 %v3238_v5, %v3237_v39  ;;  %v6592_v43 = vpop.f32.mrb[85].mxu1 }
 0x582   :  { %v3213_v59 = vmax.f32 %v3177_v48, 0.0  ;;  %v6593_v57 = vadd.f32 %v6592_v43, %v6591_v37 }
 0x584   :  { %v3240_v4 = vsel %vm3218_vm10, %v3213_v59, 0.0  ;;  %v3182_v63 = vadd.f32 %v6593_v57, %v9920_v42  ;;  %v6594_v27 = vpop.f32.mrb[86].mxu1 }
 0x585   :  { %v3241_v49 = vadd.f32 %v3240_v4, %v3239_v41  ;;  %v6595_v58 = vpop.f32.mrb[87].mxu1 }
 0x586   :  { %v3214_v8 = vmax.f32 %v3182_v63, 0.0  ;;  %v6596_v0 = vadd.f32 %v6595_v58, %v6594_v27 }
 0x588   :  { %v3242_v17 = vsel %vm3218_vm10, %v3214_v8, 0.0  ;;  %v3187_v54 = vadd.f32 %v6596_v0, %v9920_v42  ;;  %v6597_v44 = vpop.f32.mrb[88].mxu1 }
 0x589   :  { %v3243_v7 = vadd.f32 %v3242_v17, %v3241_v49  ;;  %v6598_v2 = vpop.f32.mrb[89].mxu1 }
 0x58a   :  { %v3215_v20 = vmax.f32 %v3187_v54, 0.0  ;;  %v6599_v11 = vadd.f32 %v6598_v2, %v6597_v44 }
 0x58c   :  { %v3244_v12 = vsel %vm3218_vm10, %v3215_v20, 0.0  ;;  %v3192_v33 = vadd.f32 %v6599_v11, %v9920_v42  ;;  %v6600_v6 = vpop.f32.mrb[90].mxu1  ;;  %v7305_v11 = vld [vmem:[%s11227_s9 + $0x40] sm:$0xff]  }
 0x58d   :  { %v3245_v19 = vadd.f32 %v3244_v12, %v3243_v7  ;;  %v6601_v52 = vpop.f32.mrb[91].mxu1  ;;  %v7306_v12 = vld [vmem:[%s11227_s9] sm:$0xff]   ;;  %6603 = vmatprep.subr.bf16.mxu0 %v7305_v11 }
 0x58e   :  { %v3216_v22 = vmax.f32 %v3192_v33, 0.0  ;;  %v6602_v35 = vadd.f32 %v6601_v52, %v6600_v6  ;;  %v7307_v33 = vld [vmem:[%s11227_s9 + $0x48] sm:$0xff]   ;;  %6604 = vmatpush3.bf16.msra.mxu0 %v7306_v12 }
 0x58f   :  { %6605 = vmatprep.subr.bf16.mxu0 %v7307_v33 }
 0x590   :  { %v3246_v45 = vsel %vm3218_vm10, %v3216_v22, 0.0  ;;  %v3197_v46 = vadd.f32 %v6602_v35, %v9920_v42  ;;  %v7308_v35 = vld [vmem:[%s11227_s9 + $0x8] sm:$0xff]  }
 0x591   :  { %v3247_v10 = vadd.f32 %v3246_v45, %v3245_v19  ;;  %v7315_v45 = vld [vmem:[%s11227_s9 + $0xc0] sm:$0xff]  }
 0x592   :  { %v3217_v26 = vmax.f32 %v3197_v46, 0.0  ;;  %6667 = vmatprep.subr.bf16.mxu1 %v7315_v45  ;;  %6606 = vmatpush3.bf16.msra.mxu0 %v7308_v35 }
 0x594   :  { %v3248_v55 = vsel %vm3218_vm10, %v3217_v26, 0.0 }
 0x595   :  { %v3249_v14 = vadd.f32 %v3248_v55, %v3247_v10  ;;  %v7317_v55 = vld [vmem:[%s11227_s9 + $0x80] sm:$0xff]  }
 0x596   :  { %6668 = vmatpush3.bf16.msra.mxu1 %v7317_v55 }
 0x597   :  { %v3250_v62 = vrot.slane %v3249_v14, 4 }
 0x599   :  { %v3251_v25 = vadd.f32 %v3250_v62, %v3249_v14 }
 0x59b   :  { %v3252_v30 = vrot.slane %v3251_v25, 2 }
 0x59d   :  { %v3253_v13 = vadd.f32 %v3252_v30, %v3251_v25 }
 0x59f   :  { %v3254_v28 = vrot.slane %v3253_v13, 1 }
 0x5a1   :  { %v3255_v39 = vadd.f32 %v3254_v28, %v3253_v13  ;;  %v7310_v13 = vld [vmem:[%s11227_s9 + $0x10] sm:$0xff]  }
 0x5a3   :  { %v3257_v29 = vmul.f32 0.0078125, %v3255_v39 }
 0x5a5   :  { %v10077_v53 = vsub.f32 %v3202_v3, %v3257_v29  ;;  %v10081_v5 = vsub.f32 %v3203_v9, %v3257_v29  ;;  %v10085_v42 = vsub.f32 %v3204_v40, %v3257_v29  ;;  %v10089_v48 = vsub.f32 %v3205_v32, %v3257_v29 }
 0x5a6   :  { %v10093_v37 = vsub.f32 %v3206_v38, %v3257_v29  ;;  %v10097_v51 = vsub.f32 %v3207_v23, %v3257_v29  ;;  %v10101_v3 = vsub.f32 %v3208_v50, %v3257_v29  ;;  %v10105_v61 = vsub.f32 %v3209_v1, %v3257_v29 }
 0x5a7   :  { %v10109_v9 = vsub.f32 %v3210_v18, %v3257_v29  ;;  %v10113_v36 = vsub.f32 %v3211_v16, %v3257_v29  ;;  %v10115_v40 = vsub.f32 %v3212_v34, %v3257_v29  ;;  %v10117_v56 = vsub.f32 %v3213_v59, %v3257_v29 }
 0x5a8   :  { %v10119_v32 = vsub.f32 %v3214_v8, %v3257_v29  ;;  %v10121_v24 = vsub.f32 %v3215_v20, %v3257_v29  ;;  %v10123_v38 = vsub.f32 %v3216_v22, %v3257_v29  ;;  %v10125_v21 = vsub.f32 %v3217_v26, %v3257_v29  ;;  %v7309_v26 = vld [vmem:[%s11227_s9 + $0x50] sm:$0xff]   ;;  %v7311_v29 = vld [vmem:[%s11227_s9 + $0x58] sm:$0xff]  }
 0x5a9   :  { %v3274_v23 = vmul.f32 %v10077_v53, %v10077_v53  ;;  %v3275_v60 = vmul.f32 %v10081_v5, %v10081_v5  ;;  %v3276_v50 = vmul.f32 %v10085_v42, %v10085_v42  ;;  %v3277_v47 = vmul.f32 %v10089_v48, %v10089_v48  ;;  %6607 = vmatprep.subr.bf16.mxu0 %v7309_v26 }
 0x5aa   :  { %v3278_v15 = vmul.f32 %v10093_v37, %v10093_v37  ;;  %v3279_v41 = vmul.f32 %v10097_v51, %v10097_v51  ;;  %v3280_v57 = vmul.f32 %v10101_v3, %v10101_v3  ;;  %v3281_v27 = vmul.f32 %v10105_v61, %v10105_v61  ;;  %6608 = vmatpush3.bf16.msra.mxu0 %v7310_v13 }
 0x5ab   :  { %v3290_v1 = vsel %vm3218_vm10, %v3274_v23, 0.0  ;;  %v3291_v31 = vsel %vm3218_vm10, %v3275_v60, 0.0  ;;  %v3293_v16 = vsel %vm3218_vm10, %v3276_v50, 0.0  ;;  %v3295_v43 = vsel %vm3218_vm10, %v3277_v47, 0.0  ;;  %6609 = vmatprep.subr.bf16.mxu0 %v7311_v29  ;;  %v3730_v29 = vld [vmem:[#allocation3 + $0x90] sm:$0xff] }
 0x5ac   :  { %v3292_v18 = vadd.f32 %v3291_v31, %v3290_v1  ;;  %v3297_v4 = vsel %vm3218_vm10, %v3278_v15, 0.0  ;;  %v3299_v49 = vsel %vm3218_vm10, %v3279_v41, 0.0  ;;  %v3282_v8 = vmul.f32 %v10109_v9, %v10109_v9  ;;  %v7312_v1 = vld [vmem:[%s11227_s9 + $0x18] sm:$0xff]   ;;  %v7314_v41 = vld [vmem:[%s11227_s9 + $0x20] sm:$0xff]  }
 0x5ad   :  { %v3301_v0 = vsel %vm3218_vm10, %v3280_v57, 0.0  ;;  %v3283_v54 = vmul.f32 %v10113_v36, %v10113_v36  ;;  %v3303_v44 = vsel %vm3218_vm10, %v3281_v27, 0.0  ;;  %v3284_v2 = vmul.f32 %v10115_v40, %v10115_v40 }
 0x5ae   :  { %v3294_v34 = vadd.f32 %v3293_v16, %v3292_v18  ;;  %v3305_v20 = vsel %vm3218_vm10, %v3282_v8, 0.0  ;;  %v3285_v19 = vmul.f32 %v10117_v56, %v10117_v56  ;;  %v3286_v46 = vmul.f32 %v10119_v32, %v10119_v32  ;;  %v7313_v18 = vld [vmem:[%s11227_s9 + $0x60] sm:$0xff]   ;;  %6610 = vmatpush3.bf16.msra.mxu0 %v7312_v1 }
 0x5af   :  { %v3307_v52 = vsel %vm3218_vm10, %v3283_v54, 0.0  ;;  %v3309_v10 = vsel %vm3218_vm10, %v3284_v2, 0.0  ;;  %v3287_v62 = vmul.f32 %v10121_v24, %v10121_v24  ;;  %v3288_v28 = vmul.f32 %v10123_v38, %v10123_v38  ;;  %6611 = vmatprep.subr.bf16.mxu0 %v7313_v18  ;;  %v3465_v18 = vld [vmem:[#allocation3 + $0x1] sm:$0xff] }
 0x5b0   :  { %v3296_v59 = vadd.f32 %v3295_v43, %v3294_v34  ;;  %v3311_v25 = vsel %vm3218_vm10, %v3285_v19, 0.0  ;;  %v3313_v39 = vsel %vm3218_vm10, %v3286_v46, 0.0  ;;  %v3289_v60 = vmul.f32 %v10125_v21, %v10125_v21  ;;  %v7316_v43 = vld [vmem:[%s11227_s9 + $0x68] sm:$0xff]  }
 0x5b1   :  { %v3315_v50 = vsel %vm3218_vm10, %v3287_v62, 0.0  ;;  %v3317_v31 = vsel %vm3218_vm10, %v3288_v28, 0.0 }
 0x5b2   :  { %v3298_v63 = vadd.f32 %v3297_v4, %v3296_v59  ;;  %v3319_v16 = vsel %vm3218_vm10, %v3289_v60, 0.0  ;;  %6612 = vmatpush3.bf16.msra.mxu0 %v7314_v41  ;;  %v7318_v4 = vld [vmem:[%s11227_s9 + $0x28] sm:$0xff]   ;;  %v7324_v60 = vld [vmem:[%s11227_s9 + $0x78] sm:$0xff]  }
 0x5b3   :  { %6613 = vmatprep.subr.bf16.mxu0 %v7316_v43 }
 0x5b4   :  { %v3300_v58 = vadd.f32 %v3299_v49, %v3298_v63 }
 0x5b6   :  { %v3302_v17 = vadd.f32 %v3301_v0, %v3300_v58  ;;  %6614 = vmatpush3.bf16.msra.mxu0 %v7318_v4 }
 0x5b8   :  { %v3304_v7 = vadd.f32 %v3303_v44, %v3302_v17  ;;  %v3200_v17 = vld [vmem:[%s11225_s7] sm:$0x1] }
 0x5ba   :  { %v3306_v6 = vadd.f32 %v3305_v20, %v3304_v7  ;;  %v11511_v7 = vld [vmem:[#allocation26_spill] sm:$0xff] }
 0x5bb   :  { %v6192_v20 = vld [vmem:[%s11226_s8] ss:$0 sm:$0xff] }
 0x5bc   :  { %v3308_v22 = vadd.f32 %v3307_v52, %v3306_v6 }
 0x5be   :  { %v3310_v14 = vadd.f32 %v3309_v10, %v3308_v22 }
 0x5c0   :  { %v3312_v30 = vadd.f32 %v3311_v25, %v3310_v14 }
 0x5c2   :  { %v3314_v23 = vadd.f32 %v3313_v39, %v3312_v30  ;;  %v7319_v30 = vld [vmem:[%s11227_s9 + $0xc8] sm:$0xff]   ;;  %v7322_v39 = vld [vmem:[%s11227_s9 + $0x30] sm:$0xff]  }
 0x5c3   :  { %6669 = vmatprep.subr.bf16.mxu1 %v7319_v30 }
 0x5c4   :  { %v3316_v47 = vadd.f32 %v3315_v50, %v3314_v23  ;;  %v7323_v23 = vld [vmem:[%s11227_s9 + $0xd0] sm:$0xff]  }
 0x5c5   :  { %v7325_v50 = vld [vmem:[%s11227_s9 + $0x90] sm:$0xff]  }
 0x5c6   :  { %v3318_v15 = vadd.f32 %v3317_v31, %v3316_v47  ;;  %v3441_v31 = vld [vmem:[#allocation3 + $0xa0] sm:$0xff] }
 0x5c8   :  { %v3320_v34 = vadd.f32 %v3319_v16, %v3318_v15 }
 0x5ca   :  { %v3321_v59 = vrot.slane %v3320_v34, 4 }
 0x5cc   :  { %v3322_v57 = vadd.f32 %v3321_v59, %v3320_v34 }
 0x5ce   :  { %v3323_v63 = vrot.slane %v3322_v57, 2 }
 0x5d0   :  { %v3324_v27 = vadd.f32 %v3323_v63, %v3322_v57 }
 0x5d2   :  { %v3325_v49 = vrot.slane %v3324_v27, 1 }
 0x5d4   :  { %v3326_v58 = vadd.f32 %v3325_v49, %v3324_v27  ;;  %v3530_v49 = vld [vmem:[#allocation3 + $0x2] sm:$0xff] }
 0x5d6   :  { %v3327_v8 = vmul.f32 0.0078125, %v3326_v58  ;;  %v3433_v58 = vld [vmem:[#allocation3] sm:$0xff] }
 0x5d8   :  { %v3328_v0 = vadd.f32 1e-05, %v3327_v8 }
 0x5da   :  { %7415 = vrsqrt.f32 %v3328_v0 }
 0x5e4   :  { %v7416_v54 = vpop.eup %7415 }
 0x5e5   :  { %v3330_v44 = vmul.f32 %v7416_v54, %v3200_v17 }
 0x5e7   :  { %v3334_v2 = vrot.slane %v3330_v44, %v11511_v7 }
 0x5e9   :  { %v3337_v11 = vmul.f32 %v3334_v2, %v10085_v42  ;;  %v3338_v12 = vmul.f32 %v3334_v2, %v10089_v48  ;;  %v3339_v33 = vmul.f32 %v3334_v2, %v10093_v37  ;;  %v3340_v6 = vmul.f32 %v3334_v2, %v10097_v51 }
 0x5ea   :  { %v3341_v19 = vmul.f32 %v3334_v2, %v10101_v3  ;;  %v3342_v52 = vmul.f32 %v3334_v2, %v10105_v61  ;;  %v3343_v22 = vmul.f32 %v3334_v2, %v10109_v9  ;;  %v3344_v35 = vmul.f32 %v3334_v2, %v10113_v36 }
 0x5eb   :  { %v3345_v45 = vmul.f32 %v3334_v2, %v10115_v40  ;;  %v3346_v46 = vmul.f32 %v3334_v2, %v10117_v56  ;;  %v3347_v42 = vmul.f32 %v3334_v2, %v10119_v32  ;;  %v3348_v48 = vmul.f32 %v3334_v2, %v10121_v24 }
 0x5ec   :  { %v3349_v37 = vmul.f32 %v3334_v2, %v10123_v38  ;;  %v3350_v51 = vmul.f32 %v3334_v2, %v10125_v21  ;;  %v3361_v10 = vadd.f32 %v6192_v20, %v3339_v33  ;;  %v3362_v3 = vadd.f32 %v6192_v20, %v3340_v6 }
 0x5ed   :  { %v3363_v26 = vadd.f32 %v6192_v20, %v3341_v19  ;;  %v3364_v61 = vadd.f32 %v6192_v20, %v3342_v52  ;;  %v3365_v55 = vadd.f32 %v6192_v20, %v3343_v22  ;;  %v3366_v9 = vadd.f32 %v6192_v20, %v3344_v35 }
 0x5ee   :  { %v3367_v14 = vadd.f32 %v6192_v20, %v3345_v45  ;;  %v3368_v36 = vadd.f32 %v6192_v20, %v3346_v46  ;;  %v3369_v62 = vadd.f32 %v6192_v20, %v3347_v42  ;;  %v3370_v40 = vadd.f32 %v6192_v20, %v3348_v48  ;;  %3378 = vst.msk [vmem:[#allocation3 + $0x51] sm:$0xff] %vm3218_vm10, %v3361_v10 }
 0x5ef   :  { %3379 = vst.msk [vmem:[#allocation3 + $0x61] sm:$0xff] %vm3218_vm10, %v3362_v3  ;;  %v3371_v56 = vadd.f32 %v6192_v20, %v3349_v37  ;;  %v3372_v32 = vadd.f32 %v6192_v20, %v3350_v51  ;;  %3380 = vst.msk [vmem:[#allocation3 + $0x71] sm:$0xff] %vm3218_vm10, %v3363_v26  ;;  %v3335_v24 = vmul.f32 %v3334_v2, %v10077_v53  ;;  %v7320_v53 = vld [vmem:[%s11227_s9 + $0x70] sm:$0xff]  }
 0x5f0   :  { %3381 = vst.msk [vmem:[#allocation3 + $0x81] sm:$0xff] %vm3218_vm10, %v3364_v61  ;;  %3382 = vst.msk [vmem:[#allocation3 + $0xb1] sm:$0xff] %vm3218_vm10, %v3365_v55  ;;  %v3336_v38 = vmul.f32 %v3334_v2, %v10081_v5  ;;  %v3359_v21 = vadd.f32 %v6192_v20, %v3337_v11  ;;  %v3360_v25 = vadd.f32 %v6192_v20, %v3338_v12  ;;  %v7321_v5 = vld [vmem:[%s11227_s9 + $0x88] sm:$0xff]   ;;  %6615 = vmatprep.subr.bf16.mxu0 %v7320_v53 }
 0x5f1   :  { %3383 = vst.msk [vmem:[#allocation3 + $0xc1] sm:$0xff] %vm3218_vm10, %v3366_v9  ;;  %3384 = vst.msk [vmem:[#allocation3 + $0xd1] sm:$0xff] %vm3218_vm10, %v3367_v14  ;;  %v3357_v13 = vadd.f32 %v6192_v20, %v3335_v24  ;;  %6670 = vmatpush3.bf16.msra.mxu1 %v7321_v5  ;;  %6616 = vmatpush3.bf16.msra.mxu0 %v7322_v39  ;;  %v3826_v39 = vld [vmem:[#allocation3 + $0x92] sm:$0xff] }
 0x5f2   :  { %3385 = vst.msk [vmem:[#allocation3 + $0xe1] sm:$0xff] %vm3218_vm10, %v3368_v36  ;;  %3386 = vst.msk [vmem:[#allocation3 + $0xf1] sm:$0xff] %vm3218_vm10, %v3369_v62  ;;  %v3358_v28 = vadd.f32 %v6192_v20, %v3336_v38  ;;  %6671 = vmatprep.subr.bf16.mxu1 %v7323_v23  ;;  %6617 = vmatprep.subr.bf16.mxu0 %v7324_v60 }
 0x5f3   :  { %3387 = vst.msk [vmem:[#allocation3 + $0x101] sm:$0xff] %vm3218_vm10, %v3370_v40  ;;  %3388 = vst.msk [vmem:[#allocation3 + $0x111] sm:$0xff] %vm3218_vm10, %v3371_v56 }
 0x5f4   :  { %3389 = vst.msk [vmem:[#allocation3 + $0x121] sm:$0xff] %vm3218_vm10, %v3372_v32  ;;  %3376 = vst.msk [vmem:[#allocation3 + $0x31] sm:$0xff] %vm3218_vm10, %v3359_v21  ;;  %v3538_v32 = vld [vmem:[#allocation3 + $0xa2] sm:$0xff]  ;;  %v3738_v21 = vld [vmem:[#allocation3 + $0x130] sm:$0xff] }
 0x5f5   :  { %3377 = vst.msk [vmem:[#allocation3 + $0x41] sm:$0xff] %vm3218_vm10, %v3360_v25  ;;  %3374 = vst.msk [vmem:[#allocation3 + $0x11] sm:$0xff] %vm3218_vm10, %v3357_v13  ;;  %v10279_v1 = vld [vmem:[#allocation3 + $0x51] sm:$0xff]  ;;  %6672 = vmatpush3.bf16.msra.mxu1 %v7325_v50 }
 0x5f6   :  { %3375 = vst.msk [vmem:[#allocation3 + $0x21] sm:$0xff] %vm3218_vm10, %v3358_v28  ;;  %v10277_v47 = vld [vmem:[#allocation3 + $0x60] sm:$0xff]  ;;  %v10281_v15 = vld [vmem:[#allocation3 + $0x70] sm:$0xff] }
 0x5f7   :  { %v10283_v16 = vld [vmem:[#allocation3 + $0x80] sm:$0xff]  ;;  %v10287_v41 = vld [vmem:[#allocation3 + $0x50] sm:$0xff]  ;;  %v3452_v57 = vpack.c.bf16 %v10281_v15, %v10277_v47 }
 0x5f8   :  { %v10285_v34 = vld [vmem:[#allocation3 + $0x61] sm:$0xff]  ;;  %v10289_v43 = vld [vmem:[#allocation3 + $0xb0] sm:$0xff]  ;;  %v3742_v63 = vpack.c.bf16 %v3730_v29, %v10283_v16 }
 0x5f9   :  { %v10291_v59 = vld [vmem:[#allocation3 + $0xc0] sm:$0xff]  ;;  %v3644_v4 = vpack.c.bf16 %v10285_v34, %v10279_v1  ;;  %v10298_v27 = vld [vmem:[#allocation3 + $0xd0] sm:$0xff]  ;;  %v3453_v8 = vpack.c.bf16 %v10289_v43, %v3441_v31  ;;  %3460 = vst.msk [vmem:[#allocation6 + $0x78] sm:$0xff] %vm3218_vm10, %v3452_v57  ;;  %3749 = vst.msk [vmem:[#allocation6 + $0x68] sm:$0xff] %vm3218_vm10, %v3452_v57 }
 0x5fa   :  { %v10305_v44 = vld [vmem:[#allocation3 + $0xb1] sm:$0xff]  ;;  %v10307_v2 = vld [vmem:[#allocation3 + $0xe0] sm:$0xff]  ;;  %v3454_v20 = vpack.c.bf16 %v10298_v27, %v10291_v59  ;;  %3750 = vst.msk [vmem:[#allocation6 + $0x90] sm:$0xff] %vm3218_vm10, %v3742_v63 }
 0x5fb   :  { %v10301_v0 = vld [vmem:[#allocation3 + $0x30] sm:$0xff]  ;;  %3652 = vst.msk [vmem:[#allocation6 + $0x60] sm:$0xff] %vm3218_vm10, %v3644_v4  ;;  %3461 = vst.msk [vmem:[#allocation6 + $0xa0] sm:$0xff] %vm3218_vm10, %v3453_v8  ;;  %v10329_v51 = vld [vmem:[#allocation3 + $0xc1] sm:$0xff] }
 0x5fc   :  { %v10303_v17 = vld [vmem:[#allocation3 + $0x40] sm:$0xff]  ;;  %v3468_v54 = vld [vmem:[#allocation3 + $0x31] sm:$0xff]  ;;  %3462 = vst.msk [vmem:[#allocation6 + $0xc8] sm:$0xff] %vm3218_vm10, %v3454_v20  ;;  %3751 = vst.msk [vmem:[#allocation6 + $0xb8] sm:$0xff] %vm3218_vm10, %v3454_v20  ;;  %v3646_v38 = vpack.c.bf16 %v10329_v51, %v10305_v44 }
 0x5fd   :  { %v3562_v11 = vld [vmem:[#allocation3 + $0x10] sm:$0xff]  ;;  %v3563_v12 = vld [vmem:[#allocation3 + $0x20] sm:$0xff]  ;;  %v3451_v6 = vpack.c.bf16 %v10287_v41, %v10303_v17  ;;  %v3579_v25 = vpack.c.bf16 %v10303_v17, %v10301_v0 }
 0x5fe   :  { %v3466_v33 = vld [vmem:[#allocation3 + $0x11] sm:$0xff]  ;;  %v3578_v19 = vpack.c.bf16 %v3563_v12, %v3562_v11  ;;  %v3467_v22 = vld [vmem:[#allocation3 + $0x21] sm:$0xff]  ;;  %v3449_v46 = vpack.c.bf16 %v3562_v11, %v3433_v58  ;;  %v3450_v42 = vpack.c.bf16 %v10301_v0, %v3563_v12  ;;  %3654 = vst.msk [vmem:[#allocation6 + $0xb0] sm:$0xff] %vm3218_vm10, %v3646_v38  ;;  %v3580_v58 = vpack.c.bf16 %v10277_v47, %v10287_v41 }
 0x5ff   :  { %v3481_v52 = vpack.c.bf16 %v3466_v33, %v3465_v18  ;;  %v10318_v35 = vld [vmem:[#allocation3 + $0x41] sm:$0xff]  ;;  %v10320_v45 = vld [vmem:[#allocation3 + $0x12] sm:$0xff]  ;;  %3459 = vst.msk [vmem:[#allocation6 + $0x50] sm:$0xff] %vm3218_vm10, %v3451_v6  ;;  %v3642_v26 = vpack.c.bf16 %v3467_v22, %v3466_v33  ;;  %3748 = vst.msk [vmem:[#allocation6 + $0x40] sm:$0xff] %vm3218_vm10, %v3451_v6  ;;  %v10364_v30 = vpack.c.bf16 %v3468_v54, %v3467_v22 }
 0x600   :  { %v10325_v48 = vld [vmem:[#allocation3 + $0x71] sm:$0xff]  ;;  %v10327_v37 = vld [vmem:[#allocation3 + $0x22] sm:$0xff]  ;;  %v3546_v3 = vpack.c.bf16 %v10320_v45, %v3530_v49  ;;  %3594 = vrot.lane.b32.xlu0 %v3578_v19, %s7454_s22  ;;  %3457 = vst.msk [vmem:[#allocation6] sm:$0xff] %vm3218_vm10, %v3449_v46  ;;  %3458 = vst.msk [vmem:[#allocation6 + $0x28] sm:$0xff] %vm3218_vm10, %v3450_v42  ;;  %v3643_v14 = vpack.c.bf16 %v10318_v35, %v3468_v54  ;;  %v10420_v47 = vpack.c.bf16 %v10279_v1, %v10318_v35 }
 0x601   :  { %v10331_v10 = vld [vmem:[#allocation3 + $0xd1] sm:$0xff]  ;;  %3497 = vrot.lane.b32.xlu1 %v3481_v52, %s7454_s22  ;;  %v10340_v55 = vld [vmem:[#allocation3 + $0x42] sm:$0xff]  ;;  %3747 = vst.msk [vmem:[#allocation6 + $0x18] sm:$0xff] %vm3218_vm10, %v3450_v42  ;;  %3650 = vst.msk [vmem:[#allocation6 + $0x10] sm:$0xff] %vm3218_vm10, %v3642_v26  ;;  %v3581_v38 = vpack.c.bf16 %v10283_v16, %v10281_v15  ;;  %v3582_v16 = vpack.c.bf16 %v10291_v59, %v10289_v43  ;;  %v3674_v43 = vpack.c.bf16 %v10327_v37, %v10320_v45 }
 0x602   :  { %v10338_v61 = vld [vmem:[#allocation3 + $0x32] sm:$0xff]  ;;  %v10348_v36 = vld [vmem:[#allocation3 + $0x100] sm:$0xff]  ;;  %3554 = vst.msk [vmem:[#allocation6 + $0x8] sm:$0xff] %vm3218_vm10, %v3546_v3  ;;  %3651 = vst.msk [vmem:[#allocation6 + $0x38] sm:$0xff] %vm3218_vm10, %v3643_v14 }
 0x603   :  { %v10342_v9 = vld [vmem:[#allocation3 + $0xf0] sm:$0xff]  ;;  %v10350_v62 = vld [vmem:[#allocation3 + $0xe1] sm:$0xff]  ;;  %v3547_v56 = vpack.c.bf16 %v10338_v61, %v10327_v37  ;;  %v7326_v42 = vld [vmem:[%s11227_s9 + $0x38] sm:$0xff]   ;;  %v3486_v37 = vpack.c.bf16 %v10331_v10, %v10329_v51 }
 0x604   :  { %v10352_v40 = vld [vmem:[#allocation3 + $0xf1] sm:$0xff]  ;;  %v3455_v24 = vpack.c.bf16 %v10342_v9, %v10307_v2  ;;  %v10368_v5 = vld [vmem:[#allocation3 + $0x62] sm:$0xff]  ;;  %v3647_v28 = vpack.c.bf16 %v10350_v62, %v10331_v10  ;;  %3596 = vrot.lane.b32.xlu0 %v3579_v25, %s7454_s22  ;;  %6618 = vmatpush3.bf16.msra.mxu0 %v7326_v42 }
 0x605   :  { %v10366_v53 = vld [vmem:[#allocation3 + $0x52] sm:$0xff]  ;;  %v10375_v29 = vld [vmem:[#allocation3 + $0x120] sm:$0xff]  ;;  %3555 = vst.msk [vmem:[#allocation6 + $0x30] sm:$0xff] %vm3218_vm10, %v3547_v56  ;;  %3843 = vst.msk [vmem:[#allocation6 + $0x20] sm:$0xff] %vm3218_vm10, %v3547_v56  ;;  %3499 = vrot.lane.b32.xlu1 %v10364_v30, %s7454_s22 }
 0x606   :  { %v10370_v13 = vld [vmem:[#allocation3 + $0x110] sm:$0xff]  ;;  %v10377_v23 = vld [vmem:[#allocation3 + $0x81] sm:$0xff]  ;;  %v3548_v50 = vpack.c.bf16 %v10366_v53, %v10340_v55  ;;  %3463 = vst.msk [vmem:[#allocation6 + $0xf0] sm:$0xff] %vm3218_vm10, %v3455_v24  ;;  %3752 = vst.msk [vmem:[#allocation6 + $0xe0] sm:$0xff] %vm3218_vm10, %v3455_v24  ;;  %v3746_v19 = vpack.c.bf16 %v3738_v21, %v10375_v29  ;;  %v3484_v21 = vpack.c.bf16 %v10325_v48, %v10285_v34 }
 0x607   :  { %v10379_v60 = vld [vmem:[#allocation3 + $0x101] sm:$0xff]  ;;  %v3456_v31 = vpack.c.bf16 %v10370_v13, %v10348_v36  ;;  %v10393_v18 = vld [vmem:[#allocation3 + $0x111] sm:$0xff]  ;;  %v3645_v63 = vpack.c.bf16 %v10377_v23, %v10325_v48  ;;  %3655 = vst.msk [vmem:[#allocation6 + $0xd8] sm:$0xff] %vm3218_vm10, %v3647_v28  ;;  %v3676_v51 = vpack.c.bf16 %v10368_v5, %v10366_v53 }
 0x608   :  { %v10395_v57 = vld [vmem:[#allocation3 + $0x72] sm:$0xff]  ;;  %v10397_v4 = vld [vmem:[#allocation3 + $0x82] sm:$0xff]  ;;  %3556 = vst.msk [vmem:[#allocation6 + $0x58] sm:$0xff] %vm3218_vm10, %v3548_v50  ;;  %v3648_v20 = vpack.c.bf16 %v10379_v60, %v10352_v40  ;;  %3844 = vst.msk [vmem:[#allocation6 + $0x48] sm:$0xff] %vm3218_vm10, %v3548_v50  ;;  %3598 = vrot.lane.b32.xlu0 %v3580_v58, %s7454_s22  ;;  %v3675_v50 = vpack.c.bf16 %v10340_v55, %v10338_v61  ;;  %v3585_v61 = vpack.c.bf16 %v10375_v29, %v10370_v13 }
 0x609   :  { %v3834_v49 = vld [vmem:[#allocation3 + $0x132] sm:$0xff]  ;;  %v10406_v0 = vld [vmem:[#allocation3 + $0xc2] sm:$0xff]  ;;  %v3549_v54 = vpack.c.bf16 %v10395_v57, %v10368_v5  ;;  %3464 = vst.msk [vmem:[#allocation6 + $0x118] sm:$0xff] %vm3218_vm10, %v3456_v31  ;;  %3753 = vst.msk [vmem:[#allocation6 + $0x108] sm:$0xff] %vm3218_vm10, %v3456_v31  ;;  %v3838_v46 = vpack.c.bf16 %v3826_v39, %v10397_v4  ;;  %3501 = vrot.lane.b32.xlu1 %v10420_v47, %s7454_s22 }
 0x60a   :  { %v10404_v8 = vld [vmem:[#allocation3 + $0xb2] sm:$0xff]  ;;  %v10422_v41 = vld [vmem:[#allocation3 + $0xe2] sm:$0xff]  ;;  %3653 = vst.msk [vmem:[#allocation6 + $0x88] sm:$0xff] %vm3218_vm10, %v3645_v63  ;;  %3656 = vst.msk [vmem:[#allocation6 + $0x100] sm:$0xff] %vm3218_vm10, %v3648_v20 }
 0x60b   :  { %v10408_v17 = vld [vmem:[#allocation3 + $0xd2] sm:$0xff]  ;;  %v10426_v12 = vld [vmem:[#allocation3 + $0x102] sm:$0xff]  ;;  %v3550_v33 = vpack.c.bf16 %v10404_v8, %v3538_v32  ;;  %3557 = vst.msk [vmem:[#allocation6 + $0x80] sm:$0xff] %vm3218_vm10, %v3549_v54  ;;  %3845 = vst.msk [vmem:[#allocation6 + $0x70] sm:$0xff] %vm3218_vm10, %v3549_v54 }
 0x60c   :  { %v10424_v11 = vld [vmem:[#allocation3 + $0xf2] sm:$0xff]  ;;  %v3551_v6 = vpack.c.bf16 %v10408_v17, %v10406_v0  ;;  %v10433_v52 = vld [vmem:[#allocation3 + $0x121] sm:$0xff]  ;;  %3754 = vst.msk [vmem:[#allocation6 + $0x130] sm:$0xff] %vm3218_vm10, %v3746_v19  ;;  %3846 = vst.msk [vmem:[#allocation6 + $0x98] sm:$0xff] %vm3218_vm10, %v3838_v46  ;;  %3600 = vrot.lane.b32.xlu0 %v3581_v38, %s7454_s22  ;;  %v3679_v53 = vpack.c.bf16 %v10422_v41, %v10408_v17 }
 0x60d   :  { %v10435_v22 = vld [vmem:[#allocation3 + $0x112] sm:$0xff]  ;;  %v10437_v1 = vld [vmem:[#allocation3 + $0x122] sm:$0xff]  ;;  %v3552_v35 = vpack.c.bf16 %v10424_v11, %v10422_v41  ;;  %3558 = vst.msk [vmem:[#allocation6 + $0xa8] sm:$0xff] %vm3218_vm10, %v3550_v33  ;;  %v3649_v32 = vpack.c.bf16 %v10433_v52, %v10393_v18  ;;  %3503 = vrot.lane.b32.xlu1 %v3484_v21, %s7454_s22  ;;  %v3680_v5 = vpack.c.bf16 %v10426_v12, %v10424_v11 }
 0x60e   :  { %v7327_v3 = vld [vmem:[%s11227_s9 + $0xd8] sm:$0xff]   ;;  %3559 = vst.msk [vmem:[#allocation6 + $0xd0] sm:$0xff] %vm3218_vm10, %v3551_v6  ;;  %v3553_v26 = vpack.c.bf16 %v10435_v22, %v10426_v12  ;;  %3847 = vst.msk [vmem:[#allocation6 + $0xc0] sm:$0xff] %vm3218_vm10, %v3551_v6  ;;  %v7329_v56 = vld [vmem:[%s11227_s9 + $0xe0] sm:$0xff]   ;;  %v3842_v24 = vpack.c.bf16 %v3834_v49, %v10437_v1 }
 0x60f   :  { %v7328_v14 = vld [vmem:[%s11227_s9 + $0x98] sm:$0xff]   ;;  %3560 = vst.msk [vmem:[#allocation6 + $0xf8] sm:$0xff] %vm3218_vm10, %v3552_v35  ;;  %3848 = vst.msk [vmem:[#allocation6 + $0xe8] sm:$0xff] %vm3218_vm10, %v3552_v35  ;;  %6673 = vmatprep.subr.bf16.mxu1 %v7327_v3  ;;  %v7330_v25 = vld [vmem:[%s11227_s9 + $0xa0] sm:$0xff]  }
 0x610   :  { %3561 = vst.msk [vmem:[#allocation6 + $0x120] sm:$0xff] %vm3218_vm10, %v3553_v26  ;;  %3849 = vst.msk [vmem:[#allocation6 + $0x110] sm:$0xff] %vm3218_vm10, %v3553_v26  ;;  %6674 = vmatpush3.bf16.msra.mxu1 %v7328_v14  ;;  %v7331_v15 = vld [vmem:[%s11227_s9 + $0xe8] sm:$0xff]   ;;  %3602 = vrot.lane.b32.xlu0 %v3582_v16, %s7454_s22  ;;  %v7333_v28 = vld [vmem:[%s11227_s9 + $0xf0] sm:$0xff]  }
 0x611   :  { %3657 = vst.msk [vmem:[#allocation6 + $0x128] sm:$0xff] %vm3218_vm10, %v3649_v32  ;;  %3850 = vst.msk [vmem:[#allocation6 + $0x138] sm:$0xff] %vm3218_vm10, %v3842_v24  ;;  %6675 = vmatprep.subr.bf16.mxu1 %v7329_v56  ;;  %v3473_v34 = vld [vmem:[#allocation3 + $0xa1] sm:$0xff]  ;;  %3787 = vrot.lane.b32.xlu1 %v10364_v30, %s7454_s22  ;;  %v7334_v59 = vld [vmem:[%s11227_s9 + $0xb0] sm:$0xff]  }
 0x612   :  { %v7332_v48 = vld [vmem:[%s11227_s9 + $0xa8] sm:$0xff]   ;;  %v3485_v39 = vpack.c.bf16 %v10305_v44, %v3473_v34  ;;  %v7335_v30 = vld [vmem:[%s11227_s9 + $0xf8] sm:$0xff]   ;;  %v3583_v44 = vpack.c.bf16 %v10307_v2, %v10298_v27  ;;  %v3584_v27 = vpack.c.bf16 %v10348_v36, %v10342_v9  ;;  %v3487_v2 = vpack.c.bf16 %v10352_v40, %v10350_v62  ;;  %v7337_v9 = vld [vmem:[%s11227_s9 + $0x100] sm:$0xff]  }
 0x613   :  { %v7336_v45 = vld [vmem:[%s11227_s9 + $0xb8] sm:$0xff]   ;;  %7080 = vmatprep.subr.bf16.mxu0 %v7337_v9  ;;  %v3488_v36 = vpack.c.bf16 %v10393_v18, %v10379_v60  ;;  %v3677_v62 = vpack.c.bf16 %v10397_v4, %v10395_v57  ;;  %v3678_v40 = vpack.c.bf16 %v10406_v0, %v10404_v8  ;;  %v7338_v8 = vld [vmem:[%s11227_s9 + $0x108] sm:$0xff]   ;;  %v7339_v20 = vld [vmem:[%s11227_s9 + $0x110] sm:$0xff]  }
 0x614   :  { %6676 = vmatpush3.bf16.msra.mxu1 %v7330_v25  ;;  %3505 = vrot.lane.b32.xlu0 %v3485_v39, %s7454_s22  ;;  %v3762_v10 = vld [vmem:[#allocation3 + $0x91] sm:$0xff] }
 0x615   :  { %6677 = vmatprep.subr.bf16.mxu1 %v7331_v15  ;;  %3690 = vrot.lane.b32.xlu1 %v3674_v43, %s7454_s22  ;;  %v3774_v55 = vpack.c.bf16 %v3762_v10, %v10377_v23  ;;  %v3770_v13 = vld [vmem:[#allocation3 + $0x131] sm:$0xff]  ;;  %v3681_v23 = vpack.c.bf16 %v10437_v1, %v10435_v22 }
 0x616   :  { %v3778_v29 = vpack.c.bf16 %v3770_v13, %v10433_v52  ;;  %v7340_v11 = vld [vmem:[%s11227_s9 + $0x118] sm:$0xff]  }
 0x618   :  { %6678 = vmatpush3.bf16.msra.mxu1 %v7332_v48  ;;  %3604 = vrot.lane.b32.xlu0 %v3583_v44, %s7454_s22 }
 0x619   :  { %6679 = vmatprep.subr.bf16.mxu1 %v7333_v28  ;;  %3789 = vrot.lane.b32.xlu1 %v10420_v47, %s7454_s22 }
 0x61c   :  { %6680 = vmatpush3.bf16.msra.mxu1 %v7334_v59  ;;  %3507 = vrot.lane.b32.xlu0 %v3486_v37, %s7454_s22 }
 0x61d   :  { %6681 = vmatprep.subr.bf16.mxu1 %v7335_v30  ;;  %3692 = vrot.lane.b32.xlu1 %v3675_v50, %s7454_s22 }
 0x620   :  { %6682 = vmatpush3.bf16.msra.mxu1 %v7336_v45  ;;  %3606 = vrot.lane.b32.xlu0 %v3584_v27, %s7454_s22 }
 0x621   :  { %3791 = vrot.lane.b32.xlu1 %v3484_v21, %s7454_s22 }
 0x624   :  { %3509 = vrot.lane.b32.xlu0 %v3487_v2, %s7454_s22 }
 0x625   :  { %3694 = vrot.lane.b32.xlu1 %v3676_v51, %s7454_s22 }
 0x628   :  { %3608 = vrot.lane.b32.xlu0 %v3585_v61, %s7454_s22 }
 0x629   :  { %3793 = vrot.lane.b32.xlu1 %v3774_v55, %s7454_s22 }
 0x62c   :  { %3511 = vrot.lane.b32.xlu0 %v3488_v36, %s7454_s22 }
 0x62d   :  { %3696 = vrot.lane.b32.xlu1 %v3677_v62, %s7454_s22 }
 0x630   :  { %3795 = vrot.lane.b32.xlu0 %v3486_v37, %s7454_s22 }
 0x631   :  { %3698 = vrot.lane.b32.xlu1 %v3678_v40, %s7454_s22 }
 0x634   :  { %3797 = vrot.lane.b32.xlu0 %v3487_v2, %s7454_s22 }
 0x635   :  { %3700 = vrot.lane.b32.xlu1 %v3679_v53, %s7454_s22 }
 0x638   :  { %3799 = vrot.lane.b32.xlu0 %v3488_v36, %s7454_s22 }
 0x639   :  { %3702 = vrot.lane.b32.xlu1 %v3680_v5, %s7454_s22 }
 0x63c   :  { %3801 = vrot.lane.b32.xlu0 %v3778_v29, %s7454_s22 }
 0x63d   :  { %3704 = vrot.lane.b32.xlu1 %v3681_v23, %s7454_s22  ;;  %v3855_v23 = vld [vmem:[#allocation6 + $0x20] sm:$0xff] }
 0x672   :  { %v3595_v60 = vpop.permute.xlu0 %3594 }
 0x673   :  { %v3498_v31 = vpop.permute.xlu1 %3497  ;;  %3618 = vst.msk [vmem:[#allocation6 + $0x8] sm:$0xff] %vm3521_vm13, %v3595_v60 }
 0x674   :  { %3522 = vst.msk [vmem:[#allocation6] sm:$0xff] %vm3521_vm13, %v3498_v31 }
 0x676   :  { %v3597_v18 = vpop.permute.xlu0 %3596 }
 0x677   :  { %v3500_v57 = vpop.permute.xlu1 %3499  ;;  %3619 = vst.msk [vmem:[#allocation6 + $0x30] sm:$0xff] %vm3521_vm13, %v3597_v18  ;;  %v3860_v18 = vld [vmem:[#allocation6 + $0x48] sm:$0xff] }
 0x678   :  { %3523 = vst.msk [vmem:[#allocation6 + $0x28] sm:$0xff] %vm3521_vm13, %v3500_v57  ;;  %v3865_v57 = vld [vmem:[#allocation6 + $0x70] sm:$0xff] }
 0x67a   :  { %v3599_v4 = vpop.permute.xlu0 %3598  ;;  %v3852_v49 = vld [vmem:[#allocation6 + $0x8] sm:$0xff] }
 0x67b   :  { %v3502_v63 = vpop.permute.xlu1 %3501  ;;  %v3851_v58 = vld [vmem:[#allocation6] sm:$0xff]  ;;  %3620 = vst.msk [vmem:[#allocation6 + $0x58] sm:$0xff] %vm3521_vm13, %v3599_v4  ;;  %4242 = vmatprep.mubr.bf16.mxu0 %v3852_v49  ;;  %v3870_v49 = vld [vmem:[#allocation6 + $0x98] sm:$0xff] }
 0x67c   :  { %3524 = vst.msk [vmem:[#allocation6 + $0x50] sm:$0xff] %vm3521_vm13, %v3502_v63  ;;  %4243 = vmatmul.mubr.bf16.vlgmr.msra.gmra.mrb[100].mxu0 %v3851_v58  ;;  %v3875_v58 = vld [vmem:[#allocation6 + $0xc0] sm:$0xff] }
 0x67d   :  { %7081 = vmatpush3.bf16.msra.mxu0 %v7337_v9 }
 0x67e   :  { %v3601_v0 = vpop.permute.xlu0 %3600  ;;  %v3857_v54 = vld [vmem:[#allocation6 + $0x30] sm:$0xff]  ;;  %7082 = vmatprep.subr.bf16.mxu0 %v7338_v8 }
 0x67f   :  { %v3504_v17 = vpop.permute.xlu1 %3503  ;;  %3621 = vst.msk [vmem:[#allocation6 + $0x80] sm:$0xff] %vm3521_vm13, %v3601_v0  ;;  %4250 = vmatprep.mubr.bf16.mxu0 %v3857_v54  ;;  %v3856_v12 = vld [vmem:[#allocation6 + $0x28] sm:$0xff]  ;;  %v3890_v54 = vld [vmem:[#allocation6 + $0x138] sm:$0xff] }
 0x680   :  { %3525 = vst.msk [vmem:[#allocation6 + $0x78] sm:$0xff] %vm3521_vm13, %v3504_v17  ;;  %v3880_v0 = vld [vmem:[#allocation6 + $0xe8] sm:$0xff]  ;;  %v3885_v17 = vld [vmem:[#allocation6 + $0x110] sm:$0xff] }
 0x681   :  { %7083 = vmatpush3.bf16.msra.mxu0 %v7338_v8 }
 0x682   :  { %v3603_v47 = vpop.permute.xlu0 %3602  ;;  %7084 = vmatprep.subr.bf16.mxu0 %v7339_v20  ;;  %v3862_v33 = vld [vmem:[#allocation6 + $0x58] sm:$0xff] }
 0x683   :  { %v3788_v41 = vpop.permute.xlu1 %3787  ;;  %3622 = vst.msk [vmem:[#allocation6 + $0xa8] sm:$0xff] %vm3521_vm13, %v3603_v47  ;;  %v3861_v35 = vld [vmem:[#allocation6 + $0x50] sm:$0xff] }
 0x684   :  { %3811 = vst.msk [vmem:[#allocation6 + $0x18] sm:$0xff] %vm3521_vm13, %v3788_v41  ;;  %4251 = vmatmul.mubr.bf16.gmra.mrb[104].mxu0 %v3856_v12 }
 0x685   :  { %4258 = vmatprep.mubr.bf16.mxu0 %v3862_v33  ;;  %7085 = vmatpush3.bf16.msra.mxu0 %v7339_v20 }
 0x686   :  { %v3506_v6 = vpop.permute.xlu0 %3505  ;;  %7086 = vmatprep.subr.bf16.mxu0 %v7340_v11  ;;  %v3867_v46 = vld [vmem:[#allocation6 + $0x80] sm:$0xff] }
 0x687   :  { %v3691_v19 = vpop.permute.xlu1 %3690  ;;  %3526 = vst.msk [vmem:[#allocation6 + $0xa0] sm:$0xff] %vm3521_vm13, %v3506_v6  ;;  %v3866_v24 = vld [vmem:[#allocation6 + $0x78] sm:$0xff] }
 0x688   :  { %3714 = vst.msk [vmem:[#allocation6 + $0x10] sm:$0xff] %vm3521_vm13, %v3691_v19 }
 0x689   :  { %7087 = vmatpush3.bf16.msra.mxu0 %v7340_v11 }
 0x68a   :  { %v3605_v52 = vpop.permute.xlu0 %3604  ;;  %v3872_v38 = vld [vmem:[#allocation6 + $0xa8] sm:$0xff] }
 0x68b   :  { %v3790_v22 = vpop.permute.xlu1 %3789  ;;  %v3854_v1 = vld [vmem:[#allocation6 + $0x18] sm:$0xff]  ;;  %3623 = vst.msk [vmem:[#allocation6 + $0xd0] sm:$0xff] %vm3521_vm13, %v3605_v52 }
 0x68c   :  { %3812 = vst.msk [vmem:[#allocation6 + $0x40] sm:$0xff] %vm3521_vm13, %v3790_v22  ;;  %4339 = vmatprep.mubr.bf16.mxu1 %v3854_v1  ;;  %4259 = vmatmul.mubr.bf16.gmra.mrb[108].mxu0 %v3861_v35 }
 0x68d   :  { %4266 = vmatprep.mubr.bf16.mxu0 %v3867_v46 }
 0x68e   :  { %v3508_v42 = vpop.permute.xlu0 %3507  ;;  %v3871_v28 = vld [vmem:[#allocation6 + $0xa0] sm:$0xff] }
 0x68f   :  { %v3693_v3 = vpop.permute.xlu1 %3692  ;;  %v3853_v26 = vld [vmem:[#allocation6 + $0x10] sm:$0xff]  ;;  %3527 = vst.msk [vmem:[#allocation6 + $0xc8] sm:$0xff] %vm3521_vm13, %v3508_v42 }
 0x690   :  { %3715 = vst.msk [vmem:[#allocation6 + $0x38] sm:$0xff] %vm3521_vm13, %v3693_v3  ;;  %4340 = vmatmul.mubr.bf16.vlgmr.msra.gmra.mrb[92].mxu1 %v3853_v26  ;;  %v10617_v3 = vld [vmem:[%s11228_s10] ss:$0 sm:$0xff] }
 0x692   :  { %v3607_v14 = vpop.permute.xlu0 %3606  ;;  %v3877_v39 = vld [vmem:[#allocation6 + $0xd0] sm:$0xff] }
 0x693   :  { %v3792_v56 = vpop.permute.xlu1 %3791  ;;  %v3859_v32 = vld [vmem:[#allocation6 + $0x40] sm:$0xff]  ;;  %3624 = vst.msk [vmem:[#allocation6 + $0xf8] sm:$0xff] %vm3521_vm13, %v3607_v14 }
 0x694   :  { %3813 = vst.msk [vmem:[#allocation6 + $0x68] sm:$0xff] %vm3521_vm13, %v3792_v56  ;;  %4347 = vmatprep.mubr.bf16.mxu1 %v3859_v32  ;;  %4267 = vmatmul.mubr.bf16.gmra.mrb[112].mxu0 %v3866_v24 }
 0x695   :  { %4274 = vmatprep.mubr.bf16.mxu0 %v3872_v38 }
 0x696   :  { %v3510_v21 = vpop.permute.xlu0 %3509  ;;  %v3876_v50 = vld [vmem:[#allocation6 + $0xc8] sm:$0xff] }
 0x697   :  { %v3695_v25 = vpop.permute.xlu1 %3694  ;;  %v3858_v15 = vld [vmem:[#allocation6 + $0x38] sm:$0xff]  ;;  %3528 = vst.msk [vmem:[#allocation6 + $0xf0] sm:$0xff] %vm3521_vm13, %v3510_v21 }
 0x698   :  { %3716 = vst.msk [vmem:[#allocation6 + $0x60] sm:$0xff] %vm3521_vm13, %v3695_v25  ;;  %4348 = vmatmul.mubr.bf16.gmra.mrb[96].mxu1 %v3858_v15 }
 0x69a   :  { %v3609_v16 = vpop.permute.xlu0 %3608  ;;  %v3882_v27 = vld [vmem:[#allocation6 + $0xf8] sm:$0xff] }
 0x69b   :  { %v3794_v34 = vpop.permute.xlu1 %3793  ;;  %v3864_v48 = vld [vmem:[#allocation6 + $0x68] sm:$0xff]  ;;  %3625 = vst.msk [vmem:[#allocation6 + $0x120] sm:$0xff] %vm3521_vm13, %v3609_v16 }
 0x69c   :  { %3814 = vst.msk [vmem:[#allocation6 + $0x90] sm:$0xff] %vm3521_vm13, %v3794_v34  ;;  %4355 = vmatprep.mubr.bf16.mxu1 %v3864_v48  ;;  %4275 = vmatmul.mubr.bf16.gmra.mrb[116].mxu0 %v3871_v28 }
 0x69d   :  { %4282 = vmatprep.mubr.bf16.mxu0 %v3877_v39 }
 0x69e   :  { %v3512_v43 = vpop.permute.xlu0 %3511  ;;  %v3881_v36 = vld [vmem:[#allocation6 + $0xf0] sm:$0xff] }
 0x69f   :  { %v3697_v59 = vpop.permute.xlu1 %3696  ;;  %v3863_v30 = vld [vmem:[#allocation6 + $0x60] sm:$0xff]  ;;  %3529 = vst.msk [vmem:[#allocation6 + $0x118] sm:$0xff] %vm3521_vm13, %v3512_v43 }
 0x6a0   :  { %3717 = vst.msk [vmem:[#allocation6 + $0x88] sm:$0xff] %vm3521_vm13, %v3697_v59  ;;  %4356 = vmatmul.mubr.bf16.gmra.mrb[100].mxu1 %v3863_v30 }
 0x6a2   :  { %v3796_v44 = vpop.permute.xlu0 %3795  ;;  %v3887_v62 = vld [vmem:[#allocation6 + $0x120] sm:$0xff] }
 0x6a3   :  { %v3699_v45 = vpop.permute.xlu1 %3698  ;;  %v3869_v37 = vld [vmem:[#allocation6 + $0x90] sm:$0xff]  ;;  %3815 = vst.msk [vmem:[#allocation6 + $0xb8] sm:$0xff] %vm3521_vm13, %v3796_v44 }
 0x6a4   :  { %3718 = vst.msk [vmem:[#allocation6 + $0xb0] sm:$0xff] %vm3521_vm13, %v3699_v45  ;;  %4363 = vmatprep.mubr.bf16.mxu1 %v3869_v37  ;;  %4283 = vmatmul.mubr.bf16.gmra.mrb[120].mxu0 %v3876_v50 }
 0x6a5   :  { %4290 = vmatprep.mubr.bf16.mxu0 %v3882_v27 }
 0x6a6   :  { %v3798_v2 = vpop.permute.xlu0 %3797  ;;  %v3886_v29 = vld [vmem:[#allocation6 + $0x118] sm:$0xff] }
 0x6a7   :  { %v3701_v51 = vpop.permute.xlu1 %3700  ;;  %v3868_v10 = vld [vmem:[#allocation6 + $0x88] sm:$0xff]  ;;  %3816 = vst.msk [vmem:[#allocation6 + $0xe0] sm:$0xff] %vm3521_vm13, %v3798_v2 }
 0x6a8   :  { %3719 = vst.msk [vmem:[#allocation6 + $0xd8] sm:$0xff] %vm3521_vm13, %v3701_v51  ;;  %4364 = vmatmul.mubr.bf16.gmra.mrb[104].mxu1 %v3868_v10 }
 0x6aa   :  { %v3800_v61 = vpop.permute.xlu0 %3799  ;;  %v3874_v9 = vld [vmem:[#allocation6 + $0xb8] sm:$0xff] }
 0x6ab   :  { %v3703_v55 = vpop.permute.xlu1 %3702  ;;  %3817 = vst.msk [vmem:[#allocation6 + $0x108] sm:$0xff] %vm3521_vm13, %v3800_v61  ;;  %4371 = vmatprep.mubr.bf16.mxu1 %v3874_v9  ;;  %v3873_v5 = vld [vmem:[#allocation6 + $0xb0] sm:$0xff] }
 0x6ac   :  { %3720 = vst.msk [vmem:[#allocation6 + $0x100] sm:$0xff] %vm3521_vm13, %v3703_v55  ;;  %4291 = vmatmul.mubr.bf16.gmra.mrb[124].mxu0 %v3881_v36 }
 0x6ad   :  { %4298 = vmatprep.mubr.bf16.mxu0 %v3887_v62 }
 0x6ae   :  { %v3802_v40 = vpop.permute.xlu0 %3801  ;;  %v3879_v13 = vld [vmem:[#allocation6 + $0xe0] sm:$0xff] }
 0x6af   :  { %v3705_v53 = vpop.permute.xlu1 %3704  ;;  %3818 = vst.msk [vmem:[#allocation6 + $0x130] sm:$0xff] %vm3521_vm13, %v3802_v40  ;;  %v3878_v60 = vld [vmem:[#allocation6 + $0xd8] sm:$0xff] }
 0x6b0   :  { %3721 = vst.msk [vmem:[#allocation6 + $0x128] sm:$0xff] %vm3521_vm13, %v3705_v53  ;;  %4372 = vmatmul.mubr.bf16.gmra.mrb[108].mxu1 %v3873_v5 }
 0x6b1   :  { %4379 = vmatprep.mubr.bf16.mxu1 %v3879_v13 }
 0x6b2   :  { %v3884_v31 = vld [vmem:[#allocation6 + $0x108] sm:$0xff] }
 0x6b3   :  { %v3883_v4 = vld [vmem:[#allocation6 + $0x100] sm:$0xff] }
 0x6b4   :  { %4299 = vmatmul.mubr.bf16.gmra.mrb[128].mxu0 %v3886_v29 }
 0x6b5   :  { %7088 = vmatprep.mubr.msk.bf16.mxu0 %vm3218_vm10, %v3855_v23 }
 0x6b6   :  { %v3889_v63 = vld [vmem:[#allocation6 + $0x130] sm:$0xff] }
 0x6b7   :  { %v3888_v8 = vld [vmem:[#allocation6 + $0x128] sm:$0xff] }
 0x6b8   :  { %4380 = vmatmul.mubr.bf16.gmra.mrb[112].mxu1 %v3878_v60 }
 0x6b9   :  { %4387 = vmatprep.mubr.bf16.mxu1 %v3884_v31 }
 0x6bc   :  { %7089 = vmatmul.mubr.msk.bf16.vlgmr.msra.gmra.mrb[132].mxu0 %vm3218_vm10, %v3860_v18 }
 0x6bd   :  { %7092 = vmatprep.mubr.msk.bf16.mxu0 %vm3218_vm10, %v3865_v57 }
 0x6c0   :  { %4388 = vmatmul.mubr.bf16.gmra.mrb[116].mxu1 %v3883_v4 }
 0x6c1   :  { %4395 = vmatprep.mubr.bf16.mxu1 %v3889_v63 }
 0x6c4   :  { %7093 = vmatmul.mubr.msk.bf16.gmra.mrb[136].mxu0 %vm3218_vm10, %v3870_v49 }
 0x6c5   :  { %7096 = vmatprep.mubr.msk.bf16.mxu0 %vm3218_vm10, %v3875_v58 }
 0x6c8   :  { %4396 = vmatmul.mubr.bf16.gmra.mrb[120].mxu1 %v3888_v8 }
 0x6cc   :  { %7097 = vmatmul.mubr.msk.bf16.gmra.mrb[140].mxu0 %vm3218_vm10, %v3880_v0 }
 0x6cd   :  { %7100 = vmatprep.mubr.msk.bf16.mxu0 %vm3218_vm10, %v3885_v17 }
 0x6d4   :  { %7101 = vmatmul.mubr.msk.bf16.gmra.mrb[144].mxu0 %vm3218_vm10, %v3890_v54 }
 0x74f   :  { %v6619_v20 = vpop.f32.mrb[100].mxu0 }
 0x750   :  { %v6620_v47 = vpop.f32.mrb[101].mxu0 }
 0x751   :  { %v6621_v41 = vadd.f32 %v6620_v47, %v6619_v20  ;;  %v6622_v11 = vpop.f32.mrb[102].mxu0 }
 0x752   :  { %v6623_v12 = vpop.f32.mrb[103].mxu0 }
 0x753   :  { %v6624_v33 = vadd.f32 %v6623_v12, %v6622_v11  ;;  %v4245_v21 = vadd.f32 %v6621_v41, %v10617_v3 }
 0x755   :  { %v4248_v34 = vadd.f32 %v6624_v33, %v10617_v3 }
 0x757   :  { %v6625_v6 = vpop.f32.mrb[104].mxu0 }
 0x758   :  { %v6626_v19 = vpop.f32.mrb[105].mxu0 }
 0x759   :  { %v6627_v52 = vadd.f32 %v6626_v19, %v6625_v6  ;;  %v6628_v22 = vpop.f32.mrb[106].mxu0 }
 0x75a   :  { %v6629_v1 = vpop.f32.mrb[107].mxu0 }
 0x75b   :  { %v6630_v35 = vadd.f32 %v6629_v1, %v6628_v22  ;;  %v4253_v2 = vadd.f32 %v6627_v52, %v10617_v3 }
 0x75d   :  { %v4256_v55 = vadd.f32 %v6630_v35, %v10617_v3 }
 0x75f   :  { %v6631_v46 = vpop.f32.mrb[108].mxu0 }
 0x760   :  { %v6632_v42 = vpop.f32.mrb[109].mxu0 }
 0x761   :  { %v6633_v26 = vadd.f32 %v6632_v42, %v6631_v46  ;;  %v6634_v14 = vpop.f32.mrb[110].mxu0 }
 0x762   :  { %v6635_v56 = vpop.f32.mrb[111].mxu0 }
 0x763   :  { %v6683_v32 = vpop.f32.mrb[92].mxu1  ;;  %v6636_v24 = vadd.f32 %v6635_v56, %v6634_v14  ;;  %v4261_v18 = vadd.f32 %v6633_v26, %v10617_v3 }
 0x764   :  { %v6684_v38 = vpop.f32.mrb[93].mxu1 }
 0x765   :  { %v6685_v25 = vadd.f32 %v6684_v38, %v6683_v32  ;;  %v6686_v15 = vpop.f32.mrb[94].mxu1  ;;  %v4264_v49 = vadd.f32 %v6636_v24, %v10617_v3 }
 0x766   :  { %v6687_v16 = vpop.f32.mrb[95].mxu1 }
 0x767   :  { %v6688_v48 = vadd.f32 %v6687_v16, %v6686_v15  ;;  %v10621_v28 = vadd.f32 %v6685_v25, %v4245_v21  ;;  %v6637_v39 = vpop.f32.mrb[112].mxu0 }
 0x768   :  { %v6638_v43 = vpop.f32.mrb[113].mxu0 }
 0x769   :  { %v10623_v59 = vadd.f32 %v6688_v48, %v4248_v34  ;;  %v6639_v30 = vadd.f32 %v6638_v43, %v6637_v39  ;;  %v6640_v44 = vpop.f32.mrb[114].mxu0 }
 0x76a   :  { %v6641_v45 = vpop.f32.mrb[115].mxu0 }
 0x76b   :  { %v6689_v37 = vpop.f32.mrb[96].mxu1  ;;  %v6642_v50 = vadd.f32 %v6641_v45, %v6640_v44  ;;  %v4269_v6 = vadd.f32 %v6639_v30, %v10617_v3 }
 0x76c   :  { %v6690_v27 = vpop.f32.mrb[97].mxu1 }
 0x76d   :  { %v6691_v51 = vadd.f32 %v6690_v27, %v6689_v37  ;;  %v6692_v10 = vpop.f32.mrb[98].mxu1  ;;  %v4272_v1 = vadd.f32 %v6642_v50, %v10617_v3 }
 0x76e   :  { %v6693_v61 = vpop.f32.mrb[99].mxu1 }
 0x76f   :  { %v6694_v9 = vadd.f32 %v6693_v61, %v6692_v10  ;;  %v10627_v36 = vadd.f32 %v6691_v51, %v4253_v2  ;;  %v6643_v62 = vpop.f32.mrb[116].mxu0 }
 0x770   :  { %v6644_v40 = vpop.f32.mrb[117].mxu0 }
 0x771   :  { %v10629_v53 = vadd.f32 %v6694_v9, %v4256_v55  ;;  %v6645_v5 = vadd.f32 %v6644_v40, %v6643_v62  ;;  %v6646_v13 = vpop.f32.mrb[118].mxu0 }
 0x772   :  { %v6647_v29 = vpop.f32.mrb[119].mxu0 }
 0x773   :  { %v6695_v23 = vpop.f32.mrb[100].mxu1  ;;  %v6648_v60 = vadd.f32 %v6647_v29, %v6646_v13  ;;  %v4277_v15 = vadd.f32 %v6645_v5, %v10617_v3 }
 0x774   :  { %v6696_v31 = vpop.f32.mrb[101].mxu1 }
 0x775   :  { %v6697_v57 = vadd.f32 %v6696_v31, %v6695_v23  ;;  %v6698_v4 = vpop.f32.mrb[102].mxu1  ;;  %v4280_v39 = vadd.f32 %v6648_v60, %v10617_v3 }
 0x776   :  { %v6699_v63 = vpop.f32.mrb[103].mxu1 }
 0x777   :  { %v6700_v58 = vadd.f32 %v6699_v63, %v6698_v4  ;;  %v10633_v8 = vadd.f32 %v6697_v57, %v4261_v18  ;;  %v6649_v0 = vpop.f32.mrb[120].mxu0  ;;  %v7341_v63 = vld [vmem:[%s11231_s13 + $0x40] sm:$0xff]  }
 0x778   :  { %v6650_v17 = vpop.f32.mrb[121].mxu0  ;;  %6743 = vmatprep.subr.bf16.mxu1 %v7341_v63 }
 0x779   :  { %v10635_v54 = vadd.f32 %v6700_v58, %v4264_v49  ;;  %v6651_v20 = vadd.f32 %v6650_v17, %v6649_v0  ;;  %v6652_v47 = vpop.f32.mrb[122].mxu0  ;;  %v7342_v49 = vld [vmem:[%s11231_s13 + $0xc0] sm:$0xff]  }
 0x77a   :  { %v6653_v41 = vpop.f32.mrb[123].mxu0  ;;  %6783 = vmatprep.subr.bf16.mxu0 %v7342_v49 }
 0x77b   :  { %v6701_v11 = vpop.f32.mrb[104].mxu1  ;;  %v6654_v12 = vadd.f32 %v6653_v41, %v6652_v47  ;;  %v4285_v55 = vadd.f32 %v6651_v20, %v10617_v3  ;;  %v7345_v20 = vld [vmem:[%s11231_s13 + $0x48] sm:$0xff]  }
 0x77c   :  { %v6702_v33 = vpop.f32.mrb[105].mxu1  ;;  %v7346_v47 = vld [vmem:[%s11231_s13 + $0xc8] sm:$0xff]  }
 0x77d   :  { %v6703_v19 = vadd.f32 %v6702_v33, %v6701_v11  ;;  %v6704_v52 = vpop.f32.mrb[106].mxu1  ;;  %v4288_v5 = vadd.f32 %v6654_v12, %v10617_v3 }
 0x77e   :  { %v6705_v22 = vpop.f32.mrb[107].mxu1 }
 0x77f   :  { %v6706_v35 = vadd.f32 %v6705_v22, %v6704_v52  ;;  %v10639_v46 = vadd.f32 %v6703_v19, %v4269_v6  ;;  %v6655_v42 = vpop.f32.mrb[124].mxu0  ;;  %v7347_v6 = vld [vmem:[%s11231_s13 + $0x8] sm:$0xff]  }
 0x780   :  { %v6656_v26 = vpop.f32.mrb[125].mxu0  ;;  %v7348_v19 = vld [vmem:[%s11231_s13 + $0x88] sm:$0xff]  }
 0x781   :  { %v10641_v14 = vadd.f32 %v6706_v35, %v4272_v1  ;;  %v6657_v56 = vadd.f32 %v6656_v26, %v6655_v42  ;;  %v6658_v32 = vpop.f32.mrb[126].mxu0  ;;  %v7349_v1 = vld [vmem:[%s11231_s13 + $0x50] sm:$0xff]  }
 0x782   :  { %v6659_v24 = vpop.f32.mrb[127].mxu0  ;;  %v7350_v35 = vld [vmem:[%s11231_s13 + $0xd0] sm:$0xff]  }
 0x783   :  { %v6707_v38 = vpop.f32.mrb[108].mxu1  ;;  %v6660_v21 = vadd.f32 %v6659_v24, %v6658_v32 }
 0x784   :  { %v6708_v25 = vpop.f32.mrb[109].mxu1 }
 0x785   :  { %v6709_v16 = vadd.f32 %v6708_v25, %v6707_v38  ;;  %v6710_v34 = vpop.f32.mrb[110].mxu1  ;;  %v4296_v42 = vadd.f32 %v6660_v21, %v10617_v3  ;;  %v7351_v21 = vld [vmem:[%s11231_s13 + $0x10] sm:$0xff]  }
 0x786   :  { %v6711_v48 = vpop.f32.mrb[111].mxu1 }
 0x787   :  { %v6712_v43 = vadd.f32 %v6711_v48, %v6710_v34  ;;  %v10645_v30 = vadd.f32 %v6709_v16, %v4277_v15  ;;  %v6661_v44 = vpop.f32.mrb[128].mxu0  ;;  %v7352_v34 = vld [vmem:[%s11231_s13 + $0x90] sm:$0xff]  }
 0x788   :  { %v6662_v45 = vpop.f32.mrb[129].mxu0 }
 0x789   :  { %v10647_v37 = vadd.f32 %v6712_v43, %v4280_v39  ;;  %v10649_v50 = vadd.f32 %v6662_v45, %v6661_v44  ;;  %v6664_v27 = vpop.f32.mrb[130].mxu0  ;;  %v7353_v44 = vld [vmem:[%s11231_s13 + $0x58] sm:$0xff]  }
 0x78a   :  { %v6665_v2 = vpop.f32.mrb[131].mxu0  ;;  %v7354_v45 = vld [vmem:[%s11231_s13 + $0xd8] sm:$0xff]  }
 0x78b   :  { %v6713_v51 = vpop.f32.mrb[112].mxu1  ;;  %v10651_v10 = vadd.f32 %v6665_v2, %v6664_v27 }
 0x78c   :  { %v6714_v61 = vpop.f32.mrb[113].mxu1 }
 0x78d   :  { %v6715_v9 = vadd.f32 %v6714_v61, %v6713_v51  ;;  %v6716_v62 = vpop.f32.mrb[114].mxu1  ;;  %v4304_v63 = vadd.f32 %v10651_v10, %v10617_v3 }
 0x78e   :  { %v6717_v40 = vpop.f32.mrb[115].mxu1 }
 0x78f   :  { %v6718_v13 = vadd.f32 %v6717_v40, %v6716_v62  ;;  %v10655_v29 = vadd.f32 %v6715_v9, %v4285_v55  ;;  %v7090_v23 = vpop.f32.mrb[132].mxu0  ;;  %v4301_v62 = vadd.f32 %v10649_v50, %v10617_v3  ;;  %v7357_v50 = vld [vmem:[%s11231_s13 + $0x60] sm:$0xff]  }
 0x790   :  { %v10658_v60 = vadd.f32 %v7090_v23, %v10627_v36  ;;  %v4438_v31 = vpop.f32.mrb[133].mxu0  ;;  %v7343_v36 = vld [vmem:[%s11231_s13] sm:$0xff]  }
 0x791   :  { %v10660_v18 = vadd.f32 %v6718_v13, %v4288_v5  ;;  %v10663_v57 = vadd.f32 %v4438_v31, %v10621_v28  ;;  %v7091_v4 = vpop.f32.mrb[134].mxu0  ;;  %v7344_v28 = vld [vmem:[%s11231_s13 + $0x80] sm:$0xff]   ;;  %6744 = vmatpush3.bf16.msra.mxu1 %v7343_v36  ;;  %v7356_v13 = vld [vmem:[%s11231_s13 + $0x98] sm:$0xff]  }
 0x792   :  { %v10675_v58 = vadd.f32 %v7091_v4, %v10629_v53  ;;  %v4441_v17 = vpop.f32.mrb[135].mxu0  ;;  %v4293_v53 = vadd.f32 %v6657_v56, %v10617_v3  ;;  %6784 = vmatpush3.bf16.msra.mxu0 %v7344_v28  ;;  %6745 = vmatprep.subr.bf16.mxu1 %v7345_v20  ;;  %v4505_v32 = vmax.f32 %v10658_v60, 0.0  ;;  %v7358_v4 = vld [vmem:[%s11231_s13 + $0xe0] sm:$0xff]  }
 0x793   :  { %v6719_v0 = vpop.f32.mrb[116].mxu1  ;;  %v10687_v41 = vadd.f32 %v4441_v17, %v10623_v59  ;;  %v4503_v59 = vmax.f32 %v10663_v57, 0.0  ;;  %6785 = vmatprep.subr.bf16.mxu0 %v7346_v47  ;;  %v7360_v3 = vld [vmem:[%s11231_s13 + $0xa0] sm:$0xff]  }
 0x794   :  { %v6720_v11 = vpop.f32.mrb[117].mxu1  ;;  %v4506_v48 = vmax.f32 %v10675_v58, 0.0 }
 0x795   :  { %v6721_v12 = vadd.f32 %v6720_v11, %v6719_v0  ;;  %v6722_v33 = vpop.f32.mrb[118].mxu1  ;;  %v4504_v52 = vmax.f32 %v10687_v41, 0.0  ;;  %6746 = vmatpush3.bf16.msra.mxu1 %v7347_v6  ;;  %v7361_v6 = vld [vmem:[%s11231_s13 + $0x68] sm:$0xff]  }
 0x796   :  { %v6723_v22 = vpop.f32.mrb[119].mxu1  ;;  %6786 = vmatpush3.bf16.msra.mxu0 %v7348_v19  ;;  %6747 = vmatprep.subr.bf16.mxu1 %v7349_v1  ;;  %v7362_v19 = vld [vmem:[%s11231_s13 + $0xe8] sm:$0xff]  }
 0x797   :  { %v6724_v26 = vadd.f32 %v6723_v22, %v6722_v33  ;;  %v10705_v56 = vadd.f32 %v6721_v12, %v4293_v53  ;;  %v4519_v24 = vadd.f32 %v4504_v52, %v4503_v59  ;;  %v7094_v38 = vpop.f32.mrb[136].mxu0  ;;  %6787 = vmatprep.subr.bf16.mxu0 %v7350_v35  ;;  %v7359_v53 = vld [vmem:[%s11231_s13 + $0x20] sm:$0xff]  }
 0x798   :  { %v10713_v25 = vadd.f32 %v7094_v38, %v10639_v46  ;;  %v4454_v15 = vpop.f32.mrb[137].mxu0 }
 0x799   :  { %v10715_v16 = vadd.f32 %v6724_v26, %v4296_v42  ;;  %v4520_v39 = vadd.f32 %v4519_v24, %v4505_v32  ;;  %v10727_v46 = vadd.f32 %v4454_v15, %v10633_v8  ;;  %v7095_v43 = vpop.f32.mrb[138].mxu0  ;;  %6748 = vmatpush3.bf16.msra.mxu1 %v7351_v21  ;;  %v7363_v26 = vld [vmem:[%s11231_s13 + $0x28] sm:$0xff]   ;;  %v7366_v15 = vld [vmem:[%s11231_s13 + $0xf0] sm:$0xff]  }
 0x79a   :  { %v10736_v27 = vadd.f32 %v7095_v43, %v10641_v14  ;;  %v4457_v51 = vpop.f32.mrb[139].mxu0  ;;  %6788 = vmatpush3.bf16.msra.mxu0 %v7352_v34  ;;  %v7355_v14 = vld [vmem:[%s11231_s13 + $0x18] sm:$0xff]   ;;  %6749 = vmatprep.subr.bf16.mxu1 %v7353_v44  ;;  %v4509_v0 = vmax.f32 %v10713_v25, 0.0 }
 0x79b   :  { %v6725_v2 = vpop.f32.mrb[120].mxu1  ;;  %v4507_v61 = vmax.f32 %v10727_v46, 0.0  ;;  %v4521_v8 = vadd.f32 %v4520_v39, %v4506_v48  ;;  %v10742_v55 = vadd.f32 %v4457_v51, %v10635_v54  ;;  %6789 = vmatprep.subr.bf16.mxu0 %v7354_v45  ;;  %v7367_v45 = vld [vmem:[%s11231_s13 + $0x30] sm:$0xff]  }
 0x79c   :  { %v6726_v9 = vpop.f32.mrb[121].mxu1  ;;  %v4510_v10 = vmax.f32 %v10736_v27, 0.0 }
 0x79d   :  { %v6727_v40 = vadd.f32 %v6726_v9, %v6725_v2  ;;  %v6728_v5 = vpop.f32.mrb[122].mxu1  ;;  %v4522_v54 = vadd.f32 %v4521_v8, %v4507_v61  ;;  %v4508_v23 = vmax.f32 %v10742_v55, 0.0  ;;  %6750 = vmatpush3.bf16.msra.mxu1 %v7355_v14  ;;  %v7368_v2 = vld [vmem:[%s11231_s13 + $0xb0] sm:$0xff]  }
 0x79e   :  { %v6729_v31 = vpop.f32.mrb[123].mxu1  ;;  %6790 = vmatpush3.bf16.msra.mxu0 %v7356_v13  ;;  %6751 = vmatprep.subr.bf16.mxu1 %v7357_v50 }
 0x79f   :  { %v6730_v49 = vadd.f32 %v6729_v31, %v6728_v5  ;;  %v4398_v36 = vadd.f32 %v6727_v40, %v4301_v62  ;;  %v4523_v17 = vadd.f32 %v4522_v54, %v4508_v23  ;;  %v7098_v28 = vpop.f32.mrb[140].mxu0  ;;  %6791 = vmatprep.subr.bf16.mxu0 %v7358_v4  ;;  %v7369_v40 = vld [vmem:[%s11231_s13 + $0x78] sm:$0xff]  }
 0x7a0   :  { %v10767_v20 = vadd.f32 %v7098_v28, %v10655_v29  ;;  %v4470_v47 = vpop.f32.mrb[141].mxu0  ;;  %v7370_v5 = vld [vmem:[%s11231_s13 + $0xf8] sm:$0xff]  }
 0x7a1   :  { %v4401_v11 = vadd.f32 %v6730_v49, %v4304_v63  ;;  %v4524_v12 = vadd.f32 %v4523_v17, %v4509_v0  ;;  %v10779_v29 = vadd.f32 %v4470_v47, %v10645_v30  ;;  %v7099_v33 = vpop.f32.mrb[142].mxu0  ;;  %6752 = vmatpush3.bf16.msra.mxu1 %v7359_v53  ;;  %v7372_v4 = vld [vmem:[%s11231_s13 + $0xb8] sm:$0xff]  }
 0x7a2   :  { %v10788_v22 = vadd.f32 %v7099_v33, %v10660_v18  ;;  %v4473_v1 = vpop.f32.mrb[143].mxu0  ;;  %6792 = vmatpush3.bf16.msra.mxu0 %v7360_v3  ;;  %v7364_v18 = vld [vmem:[%s11231_s13 + $0xa8] sm:$0xff]   ;;  %6753 = vmatprep.subr.bf16.mxu1 %v7361_v6  ;;  %v4513_v21 = vmax.f32 %v10767_v20, 0.0 }
 0x7a3   :  { %v4511_v35 = vmax.f32 %v10779_v29, 0.0  ;;  %v4525_v30 = vadd.f32 %v4524_v12, %v4510_v10  ;;  %v10794_v42 = vadd.f32 %v4473_v1, %v10647_v37  ;;  %6793 = vmatprep.subr.bf16.mxu0 %v7362_v19  ;;  %v7365_v37 = vld [vmem:[%s11231_s13 + $0x70] sm:$0xff]  }
 0x7a4   :  { %v4514_v51 = vmax.f32 %v10788_v22, 0.0 }
 0x7a5   :  { %v4526_v24 = vadd.f32 %v4525_v30, %v4511_v35  ;;  %v4512_v38 = vmax.f32 %v10794_v42, 0.0  ;;  %6754 = vmatpush3.bf16.msra.mxu1 %v7363_v26 }
 0x7a6   :  { %6794 = vmatpush3.bf16.msra.mxu0 %v7364_v18  ;;  %6755 = vmatprep.subr.bf16.mxu1 %v7365_v37 }
 0x7a7   :  { %v4527_v34 = vadd.f32 %v4526_v24, %v4512_v38  ;;  %v7102_v39 = vpop.f32.mrb[144].mxu0  ;;  %6795 = vmatprep.subr.bf16.mxu0 %v7366_v15 }
 0x7a8   :  { %v4495_v43 = vadd.f32 %v7102_v39, %v4398_v36  ;;  %v4486_v44 = vpop.f32.mrb[145].mxu0  ;;  %v7373_v36 = vld [vmem:[%s11231_s13 + $0x140] sm:$0xff]  }
 0x7a9   :  { %v4528_v8 = vadd.f32 %v4527_v34, %v4513_v21  ;;  %v4487_v9 = vadd.f32 %v4486_v44, %v10705_v56  ;;  %v7103_v62 = vpop.f32.mrb[146].mxu0  ;;  %6756 = vmatpush3.bf16.msra.mxu1 %v7367_v45  ;;  %v7371_v56 = vld [vmem:[%s11231_s13 + $0x38] sm:$0xff]  }
 0x7aa   :  { %v4498_v14 = vadd.f32 %v7103_v62, %v4401_v11  ;;  %v4489_v13 = vpop.f32.mrb[147].mxu0  ;;  %6796 = vmatpush3.bf16.msra.mxu0 %v7368_v2  ;;  %6757 = vmatprep.subr.bf16.mxu1 %v7369_v40  ;;  %v4517_v17 = vmax.f32 %v4495_v43, 0.0 }
 0x7ab   :  { %v4515_v54 = vmax.f32 %v4487_v9, 0.0  ;;  %v4529_v31 = vadd.f32 %v4528_v8, %v4514_v51  ;;  %v4490_v50 = vadd.f32 %v4489_v13, %v10715_v16  ;;  %6797 = vmatprep.subr.bf16.mxu0 %v7370_v5  ;;  %v7374_v16 = vld [vmem:[%s11231_s13 + $0x1c0] sm:$0xff]  }
 0x7ac   :  { %v4518_v20 = vmax.f32 %v4498_v14, 0.0 }
 0x7ad   :  { %v4530_v63 = vadd.f32 %v4529_v31, %v4515_v54  ;;  %v4516_v49 = vmax.f32 %v4490_v50, 0.0  ;;  %6758 = vmatpush3.bf16.msra.mxu1 %v7371_v56 }
 0x7ae   :  { %6798 = vmatpush3.bf16.msra.mxu0 %v7372_v4  ;;  %6823 = vmatprep.subr.bf16.mxu1 %v7373_v36 }
 0x7af   :  { %v4531_v28 = vadd.f32 %v4530_v63, %v4516_v49  ;;  %6863 = vmatprep.subr.bf16.mxu0 %v7374_v16 }
 0x7b1   :  { %v4532_v47 = vadd.f32 %v4531_v28, %v4517_v17 }
 0x7b3   :  { %v4533_v11 = vadd.f32 %v4532_v47, %v4518_v20 }
 0x7b5   :  { %v4534_v53 = vrot.slane %v4533_v11, 4 }
 0x7b7   :  { %v4535_v3 = vadd.f32 %v4534_v53, %v4533_v11  ;;  %v4501_v11 = vld [vmem:[%s11229_s11] sm:$0x1] }
 0x7b9   :  { %v4536_v12 = vrot.slane %v4535_v3, 2 }
 0x7bb   :  { %v4537_v33 = vadd.f32 %v4536_v12, %v4535_v3 }
 0x7bd   :  { %v4538_v6 = vrot.slane %v4537_v33, 1 }
 0x7bf   :  { %v4539_v19 = vadd.f32 %v4538_v6, %v4537_v33 }
 0x7c1   :  { %v4540_v22 = vmul.f32 0.0078125, %v4539_v19 }
 0x7c3   :  { %v4541_v1 = vsub.f32 %v4503_v59, %v4540_v22  ;;  %v4542_v30 = vsub.f32 %v4504_v52, %v4540_v22  ;;  %v4543_v42 = vsub.f32 %v4505_v32, %v4540_v22  ;;  %v4544_v26 = vsub.f32 %v4506_v48, %v4540_v22 }
 0x7c4   :  { %v4545_v18 = vsub.f32 %v4507_v61, %v4540_v22  ;;  %v4546_v24 = vsub.f32 %v4508_v23, %v4540_v22  ;;  %v4547_v37 = vsub.f32 %v4509_v0, %v4540_v22  ;;  %v4548_v57 = vsub.f32 %v4510_v10, %v4540_v22 }
 0x7c5   :  { %v4549_v41 = vsub.f32 %v4511_v35, %v4540_v22  ;;  %v4550_v60 = vsub.f32 %v4512_v38, %v4540_v22  ;;  %v4551_v59 = vsub.f32 %v4513_v21, %v4540_v22  ;;  %v4552_v52 = vsub.f32 %v4514_v51, %v4540_v22 }
 0x7c6   :  { %v4553_v58 = vsub.f32 %v4515_v54, %v4540_v22  ;;  %v4554_v32 = vsub.f32 %v4516_v49, %v4540_v22  ;;  %v4555_v48 = vsub.f32 %v4517_v17, %v4540_v22  ;;  %v4556_v46 = vsub.f32 %v4518_v20, %v4540_v22 }
 0x7c7   :  { %v4557_v61 = vmul.f32 %v4541_v1, %v4541_v1  ;;  %v4558_v15 = vmul.f32 %v4542_v30, %v4542_v30  ;;  %v4559_v55 = vmul.f32 %v4543_v42, %v4543_v42  ;;  %v4560_v34 = vmul.f32 %v4544_v26, %v4544_v26 }
 0x7c8   :  { %v4561_v0 = vmul.f32 %v4545_v18, %v4545_v18  ;;  %v4562_v27 = vmul.f32 %v4546_v24, %v4546_v24  ;;  %v4563_v43 = vmul.f32 %v4547_v37, %v4547_v37  ;;  %v4564_v35 = vmul.f32 %v4548_v57, %v4548_v57 }
 0x7c9   :  { %v4573_v23 = vadd.f32 %v4558_v15, %v4557_v61  ;;  %v4565_v21 = vmul.f32 %v4549_v41, %v4549_v41  ;;  %v4566_v45 = vmul.f32 %v4550_v60, %v4550_v60  ;;  %v4567_v51 = vmul.f32 %v4551_v59, %v4551_v59  ;;  %v6238_v61 = vld [vmem:[%s11230_s12] ss:$0 sm:$0xff] }
 0x7ca   :  { %v4568_v9 = vmul.f32 %v4552_v52, %v4552_v52  ;;  %v4569_v40 = vmul.f32 %v4553_v58, %v4553_v58  ;;  %v4570_v14 = vmul.f32 %v4554_v32, %v4554_v32  ;;  %v4571_v54 = vmul.f32 %v4555_v48, %v4555_v48 }
 0x7cb   :  { %v4574_v25 = vadd.f32 %v4573_v23, %v4559_v55  ;;  %v4572_v50 = vmul.f32 %v4556_v46, %v4556_v46 }
 0x7cd   :  { %v4575_v39 = vadd.f32 %v4574_v25, %v4560_v34 }
 0x7cf   :  { %v4576_v10 = vadd.f32 %v4575_v39, %v4561_v0 }
 0x7d1   :  { %v4577_v29 = vadd.f32 %v4576_v10, %v4562_v27 }
 0x7d3   :  { %v4578_v38 = vadd.f32 %v4577_v29, %v4563_v43 }
 0x7d5   :  { %v4579_v44 = vadd.f32 %v4578_v38, %v4564_v35 }
 0x7d7   :  { %v4580_v2 = vadd.f32 %v4579_v44, %v4565_v21 }
 0x7d9   :  { %v4581_v8 = vadd.f32 %v4580_v2, %v4566_v45 }
 0x7db   :  { %v4582_v62 = vadd.f32 %v4581_v8, %v4567_v51 }
 0x7dd   :  { %v4583_v5 = vadd.f32 %v4582_v62, %v4568_v9 }
 0x7df   :  { %v4584_v13 = vadd.f32 %v4583_v5, %v4569_v40 }
 0x7e1   :  { %v4585_v31 = vadd.f32 %v4584_v13, %v4570_v14 }
 0x7e3   :  { %v4586_v56 = vadd.f32 %v4585_v31, %v4571_v54  ;;  %v4730_v54 = vld [vmem:[#allocation4 + $0x2] sm:$0xff] }
 0x7e5   :  { %v4587_v4 = vadd.f32 %v4586_v56, %v4572_v50 }
 0x7e7   :  { %v4588_v63 = vrot.slane %v4587_v4, 4 }
 0x7e9   :  { %v4589_v49 = vadd.f32 %v4588_v63, %v4587_v4 }
 0x7eb   :  { %v4590_v36 = vrot.slane %v4589_v49, 2 }
 0x7ed   :  { %v4591_v16 = vadd.f32 %v4590_v36, %v4589_v49  ;;  %v10937_v36 = vld [vmem:[#allocation4] sm:$0xff] }
 0x7ef   :  { %v4592_v17 = vrot.slane %v4591_v16, 1 }
 0x7f1   :  { %v4593_v28 = vadd.f32 %v4592_v17, %v4591_v16 }
 0x7f3   :  { %v4594_v20 = vmul.f32 0.0078125, %v4593_v28  ;;  %v7375_v28 = vld [vmem:[%s11231_s13 + $0x100] sm:$0xff]  }
 0x7f5   :  { %v4595_v47 = vadd.f32 1e-05, %v4594_v20  ;;  %v7376_v20 = vld [vmem:[%s11231_s13 + $0x180] sm:$0xff]  }
 0x7f7   :  { %7417 = vrsqrt.f32 %v4595_v47  ;;  %v7377_v47 = vld [vmem:[%s11231_s13 + $0x148] sm:$0xff]  }
 0x801   :  { %v7418_v53 = vpop.eup %7417 }
 0x802   :  { %v4597_v3 = vmul.f32 %v7418_v53, %v4501_v11  ;;  %v7378_v53 = vld [vmem:[%s11231_s13 + $0x1c8] sm:$0xff]  }
 0x804   :  { %v4601_v12 = vrot.slane %v4597_v3, %v11511_v7  ;;  %v7379_v3 = vld [vmem:[%s11231_s13 + $0x108] sm:$0xff]  }
 0x806   :  { %v4602_v33 = vmul.f32 %v4601_v12, %v4541_v1  ;;  %v4603_v6 = vmul.f32 %v4601_v12, %v4542_v30  ;;  %v4604_v19 = vmul.f32 %v4601_v12, %v4543_v42  ;;  %v4605_v22 = vmul.f32 %v4601_v12, %v4544_v26 }
 0x807   :  { %v4606_v15 = vmul.f32 %v4601_v12, %v4545_v18  ;;  %v4607_v55 = vmul.f32 %v4601_v12, %v4546_v24  ;;  %v4608_v23 = vmul.f32 %v4601_v12, %v4547_v37  ;;  %v4609_v34 = vmul.f32 %v4601_v12, %v4548_v57 }
 0x808   :  { %v4610_v25 = vmul.f32 %v4601_v12, %v4549_v41  ;;  %v4611_v0 = vmul.f32 %v4601_v12, %v4550_v60  ;;  %v4612_v39 = vmul.f32 %v4601_v12, %v4551_v59  ;;  %v4613_v27 = vmul.f32 %v4601_v12, %v4552_v52 }
 0x809   :  { %v4614_v10 = vmul.f32 %v4601_v12, %v4553_v58  ;;  %v4615_v43 = vmul.f32 %v4601_v12, %v4554_v32  ;;  %v4616_v29 = vmul.f32 %v4601_v12, %v4555_v48  ;;  %v4617_v35 = vmul.f32 %v4601_v12, %v4556_v46  ;;  %v4714_v58 = vld [vmem:[#allocation4 + $0x1] sm:$0xff] }
 0x80a   :  { %v10864_v1 = vadd.f32 %v6238_v61, %v4604_v19  ;;  %v10866_v30 = vadd.f32 %v6238_v61, %v4605_v22  ;;  %v10868_v42 = vadd.f32 %v6238_v61, %v4606_v15  ;;  %v10870_v26 = vadd.f32 %v6238_v61, %v4607_v55  ;;  %v7380_v12 = vld [vmem:[%s11231_s13 + $0x188] sm:$0xff]   ;;  %v7382_v22 = vld [vmem:[%s11231_s13 + $0x1d0] sm:$0xff]  }
 0x80b   :  { %v10872_v18 = vadd.f32 %v6238_v61, %v4608_v23  ;;  %v10874_v24 = vadd.f32 %v6238_v61, %v4609_v34  ;;  %v10876_v37 = vadd.f32 %v6238_v61, %v4610_v25  ;;  %v10878_v57 = vadd.f32 %v6238_v61, %v4611_v0  ;;  %v4718_v55 = vld [vmem:[#allocation4 + $0xa1] sm:$0xff]  ;;  %v7383_v0 = vld [vmem:[%s11231_s13 + $0x110] sm:$0xff]  }
 0x80c   :  { %v10880_v41 = vadd.f32 %v6238_v61, %v4612_v39  ;;  %v10882_v60 = vadd.f32 %v6238_v61, %v4613_v27  ;;  %v10884_v59 = vadd.f32 %v6238_v61, %v4614_v10  ;;  %v10886_v52 = vadd.f32 %v6238_v61, %v4615_v43  ;;  %4644 = vst [vmem:[#allocation4 + $0x41] sm:$0xff] %v10866_v30  ;;  %v7384_v10 = vld [vmem:[%s11231_s13 + $0x190] sm:$0xff]   ;;  %v7385_v43 = vld [vmem:[%s11231_s13 + $0x158] sm:$0xff]  }
 0x80d   :  { %4645 = vst [vmem:[#allocation4 + $0x51] sm:$0xff] %v10868_v42  ;;  %4646 = vst [vmem:[#allocation4 + $0x61] sm:$0xff] %v10870_v26  ;;  %v10892_v32 = vadd.f32 %v6238_v61, %v4616_v29  ;;  %v10894_v48 = vadd.f32 %v6238_v61, %v4617_v35  ;;  %v10900_v46 = vadd.f32 %v6238_v61, %v4603_v6  ;;  %v7386_v35 = vld [vmem:[%s11231_s13 + $0x1d8] sm:$0xff]  }
 0x80e   :  { %4643 = vst [vmem:[#allocation4 + $0x31] sm:$0xff] %v10864_v1  ;;  %4647 = vst [vmem:[#allocation4 + $0x71] sm:$0xff] %v10872_v18  ;;  %v10902_v38 = vadd.f32 %v6238_v61, %v4602_v33  ;;  %v4723_v21 = vpack.c.bf16 %v10870_v26, %v10866_v30  ;;  %v4725_v44 = vpack.c.bf16 %v10886_v52, %v10882_v60  ;;  %v7381_v33 = vld [vmem:[%s11231_s13 + $0x150] sm:$0xff]  }
 0x80f   :  { %4648 = vst [vmem:[#allocation4 + $0x81] sm:$0xff] %v10874_v24  ;;  %4649 = vst [vmem:[#allocation4 + $0xb1] sm:$0xff] %v10876_v37  ;;  %v4820_v45 = vpack.c.bf16 %v10874_v24, %v10870_v26  ;;  %v4722_v2 = vpack.c.bf16 %v10900_v46, %v4714_v58  ;;  %v4819_v51 = vpack.c.bf16 %v10866_v30, %v10900_v46  ;;  %v7387_v58 = vld [vmem:[%s11231_s13 + $0x118] sm:$0xff]   ;;  %v7409_v26 = vld [vmem:[%s11231_s13 + $0x220] sm:$0xff]  }
 0x810   :  { %4650 = vst [vmem:[#allocation4 + $0xc1] sm:$0xff] %v10878_v57  ;;  %4651 = vst [vmem:[#allocation4 + $0xd1] sm:$0xff] %v10880_v41  ;;  %v4770_v8 = vpack.c.bf16 %v10864_v1, %v10902_v38  ;;  %v4771_v9 = vpack.c.bf16 %v10872_v18, %v10868_v42  ;;  %v4821_v62 = vpack.c.bf16 %v10882_v60, %v10878_v57  ;;  %v7410_v18 = vld [vmem:[%s11231_s13 + $0x228] sm:$0xff]  }
 0x811   :  { %4652 = vst [vmem:[#allocation4 + $0xe1] sm:$0xff] %v10882_v60  ;;  %4653 = vst [vmem:[#allocation4 + $0xf1] sm:$0xff] %v10884_v59  ;;  %v4772_v40 = vpack.c.bf16 %v10880_v41, %v10876_v37  ;;  %v4822_v5 = vpack.c.bf16 %v10894_v48, %v10886_v52  ;;  %v4773_v14 = vpack.c.bf16 %v10892_v32, %v10884_v59  ;;  %5487 = vmatprep.mubr.bf16.mxu1 %v4722_v2  ;;  %v7412_v41 = vld [vmem:[%s11231_s13 + $0x238] sm:$0xff]   ;;  %v11130_v59 = vld [vmem:[%s11236_s18] sm:$0xff]  }
 0x812   :  { %4654 = vst [vmem:[#allocation4 + $0x101] sm:$0xff] %v10886_v52  ;;  %4655 = vst [vmem:[#allocation4 + $0x111] sm:$0xff] %v10892_v32  ;;  %v4724_v27 = vpack.c.bf16 %v10878_v57, %v4718_v55  ;;  %v7411_v57 = vld [vmem:[%s11231_s13 + $0x230] sm:$0xff]   ;;  %v6320_v32 = vunpack.c.l.bf16 %v11130_v59 }
 0x813   :  { %4656 = vst [vmem:[#allocation4 + $0x121] sm:$0xff] %v10894_v48  ;;  %4642 = vst [vmem:[#allocation4 + $0x21] sm:$0xff] %v10900_v46  ;;  %v10963_v6 = vld [vmem:[#allocation4 + $0x40] sm:$0xff] }
 0x814   :  { %4641 = vst [vmem:[#allocation4 + $0x11] sm:$0xff] %v10902_v38  ;;  %v4748_v31 = vld [vmem:[#allocation4 + $0x50] sm:$0xff]  ;;  %v10965_v19 = vld [vmem:[#allocation4 + $0x60] sm:$0xff]  ;;  %v7408_v38 = vld [vmem:[%s11231_s13 + $0x218] sm:$0xff]  }
 0x815   :  { %v4747_v13 = vld [vmem:[#allocation4 + $0x30] sm:$0xff]  ;;  %v10970_v61 = vld [vmem:[#allocation4 + $0x42] sm:$0xff]  ;;  %v4707_v25 = vpack.c.bf16 %v10965_v19, %v10963_v6 }
 0x816   :  { %v4749_v50 = vld [vmem:[#allocation4 + $0x70] sm:$0xff]  ;;  %v10972_v15 = vld [vmem:[#allocation4 + $0x62] sm:$0xff] }
 0x817   :  { %v4755_v11 = vpack.c.bf16 %v4749_v50, %v4748_v31  ;;  %v4750_v23 = vld [vmem:[#allocation4 + $0xb0] sm:$0xff]  ;;  %v4739_v39 = vpack.c.bf16 %v10972_v15, %v10970_v61  ;;  %v10997_v2 = vld [vmem:[#allocation4 + $0xc0] sm:$0xff] }
 0x818   :  { %v4751_v34 = vld [vmem:[#allocation4 + $0xd0] sm:$0xff]  ;;  %v11002_v31 = vld [vmem:[#allocation4 + $0xc2] sm:$0xff] }
 0x819   :  { %v4756_v29 = vpack.c.bf16 %v4751_v34, %v4750_v23  ;;  %v7390_v50 = vld [vmem:[%s11231_s13 + $0x1e0] sm:$0xff]   ;;  %v4784_v24 = vld [vmem:[#allocation4 + $0xf2] sm:$0xff] }
 0x81a   :  { %v10933_v4 = vld [vmem:[#allocation4 + $0x20] sm:$0xff] }
 0x81b   :  { %v4746_v56 = vld [vmem:[#allocation4 + $0x10] sm:$0xff]  ;;  %v10935_v63 = vld [vmem:[#allocation4 + $0x22] sm:$0xff]  ;;  %v4706_v16 = vpack.c.bf16 %v10933_v4, %v10937_v36  ;;  %v4803_v30 = vpack.c.bf16 %v10963_v6, %v10933_v4 }
 0x81c   :  { %v4754_v49 = vpack.c.bf16 %v4747_v13, %v4746_v56  ;;  %v4738_v17 = vpack.c.bf16 %v10935_v63, %v4730_v54  ;;  %v7389_v13 = vld [vmem:[%s11231_s13 + $0x160] sm:$0xff]   ;;  %v4752_v56 = vld [vmem:[#allocation4 + $0xf0] sm:$0xff]  ;;  %v4835_v37 = vpack.c.bf16 %v10970_v61, %v10935_v63 }
 0x81d   :  { %5488 = vmatmul.mubr.bf16.vlgmr.msra.gmra.mrb[124].mxu1 %v4706_v16  ;;  %v4734_v54 = vld [vmem:[#allocation4 + $0xa2] sm:$0xff]  ;;  %v4708_v16 = vpack.c.bf16 %v10997_v2, %v10937_v36  ;;  %v7407_v4 = vld [vmem:[%s11231_s13 + $0x210] sm:$0xff]  }
 0x81e   :  { %5552 = vmatprep.mubr.bf16.mxu0 %v4754_v49  ;;  %5495 = vmatprep.mubr.bf16.mxu1 %v4723_v21  ;;  %v7388_v21 = vld [vmem:[%s11231_s13 + $0x198] sm:$0xff]   ;;  %v4753_v49 = vld [vmem:[#allocation4 + $0x110] sm:$0xff]  ;;  %v11039_v55 = vld [vmem:[#allocation4 + $0x100] sm:$0xff] }
 0x81f   :  { %5553 = vmatmul.mubr.bf16.vlgmr.msra.gmra.mrb[148].mxu0 %v4738_v17  ;;  %6824 = vmatpush3.bf16.msra.mxu1 %v7375_v28  ;;  %v7391_v17 = vld [vmem:[%s11231_s13 + $0x120] sm:$0xff]   ;;  %v4740_v28 = vpack.c.bf16 %v11002_v31, %v4734_v54 }
 0x820   :  { %5560 = vmatprep.mubr.bf16.mxu0 %v4755_v11  ;;  %6864 = vmatpush3.bf16.msra.mxu0 %v7376_v20  ;;  %v7392_v20 = vld [vmem:[%s11231_s13 + $0x1a0] sm:$0xff]   ;;  %v4757_v11 = vpack.c.bf16 %v4753_v49, %v4752_v56  ;;  %v4781_v56 = vld [vmem:[#allocation4 + $0x72] sm:$0xff] }
 0x821   :  { %6825 = vmatprep.subr.bf16.mxu1 %v7377_v47  ;;  %6865 = vmatprep.subr.bf16.mxu0 %v7378_v53  ;;  %v7393_v47 = vld [vmem:[%s11231_s13 + $0x168] sm:$0xff]   ;;  %v7405_v54 = vld [vmem:[%s11231_s13 + $0x200] sm:$0xff]   ;;  %v4782_v49 = vld [vmem:[#allocation4 + $0xb2] sm:$0xff] }
 0x822   :  { %v7394_v53 = vld [vmem:[%s11231_s13 + $0x1e8] sm:$0xff]   ;;  %v4798_v6 = vld [vmem:[#allocation4 + $0x80] sm:$0xff] }
 0x823   :  { %6826 = vmatpush3.bf16.msra.mxu1 %v7379_v3  ;;  %v7395_v3 = vld [vmem:[%s11231_s13 + $0x128] sm:$0xff]   ;;  %v4802_v60 = vld [vmem:[#allocation4 + $0x120] sm:$0xff] }
 0x824   :  { %6866 = vmatpush3.bf16.msra.mxu0 %v7380_v12  ;;  %6827 = vmatprep.subr.bf16.mxu1 %v7381_v33  ;;  %v7396_v12 = vld [vmem:[%s11231_s13 + $0x1a8] sm:$0xff]   ;;  %v7397_v33 = vld [vmem:[%s11231_s13 + $0x170] sm:$0xff]  }
 0x825   :  { %5496 = vmatmul.mubr.bf16.gmra.mrb[128].mxu1 %v4707_v25  ;;  %6867 = vmatprep.subr.bf16.mxu0 %v7382_v22  ;;  %v7398_v22 = vld [vmem:[%s11231_s13 + $0x1f0] sm:$0xff]   ;;  %v11041_v23 = vld [vmem:[#allocation4 + $0xe2] sm:$0xff] }
 0x826   :  { %5503 = vmatprep.mubr.bf16.mxu1 %v4724_v27  ;;  %v11043_v34 = vld [vmem:[#allocation4 + $0x102] sm:$0xff]  ;;  %v4778_v25 = vld [vmem:[#allocation4 + $0x12] sm:$0xff] }
 0x827   :  { %5561 = vmatmul.mubr.bf16.gmra.mrb[152].mxu0 %v4739_v39  ;;  %6828 = vmatpush3.bf16.msra.mxu1 %v7383_v0  ;;  %v4779_v0 = vld [vmem:[#allocation4 + $0x32] sm:$0xff]  ;;  %v4830_v52 = vld [vmem:[#allocation4 + $0x82] sm:$0xff] }
 0x828   :  { %5568 = vmatprep.mubr.bf16.mxu0 %v4756_v29  ;;  %6868 = vmatpush3.bf16.msra.mxu0 %v7384_v10  ;;  %v7399_v27 = vld [vmem:[%s11231_s13 + $0x130] sm:$0xff]   ;;  %v4741_v10 = vpack.c.bf16 %v11043_v34, %v11041_v23  ;;  %v4836_v48 = vpack.c.bf16 %v4830_v52, %v10972_v15 }
 0x829   :  { %6829 = vmatprep.subr.bf16.mxu1 %v7385_v43  ;;  %6869 = vmatprep.subr.bf16.mxu0 %v7386_v35  ;;  %v4786_v43 = vpack.c.bf16 %v4779_v0, %v4778_v25  ;;  %v7400_v29 = vld [vmem:[%s11231_s13 + $0x1b0] sm:$0xff]   ;;  %v7401_v35 = vld [vmem:[%s11231_s13 + $0x178] sm:$0xff]  }
 0x82b   :  { %6830 = vmatpush3.bf16.msra.mxu1 %v7387_v58  ;;  %v7402_v58 = vld [vmem:[%s11231_s13 + $0x1f8] sm:$0xff]  }
 0x82c   :  { %6870 = vmatpush3.bf16.msra.mxu0 %v7388_v21  ;;  %6831 = vmatprep.subr.bf16.mxu1 %v7389_v13  ;;  %v7403_v21 = vld [vmem:[%s11231_s13 + $0x138] sm:$0xff]  }
 0x82d   :  { %5504 = vmatmul.mubr.bf16.gmra.mrb[132].mxu1 %v4708_v16  ;;  %6871 = vmatprep.subr.bf16.mxu0 %v7390_v50  ;;  %v7404_v13 = vld [vmem:[%s11231_s13 + $0x1b8] sm:$0xff]  }
 0x82e   :  { %5511 = vmatprep.mubr.bf16.mxu1 %v4725_v44  ;;  %v11037_v44 = vld [vmem:[#allocation4 + $0xe0] sm:$0xff]  ;;  %v4780_v50 = vld [vmem:[#allocation4 + $0x52] sm:$0xff] }
 0x82f   :  { %5569 = vmatmul.mubr.bf16.gmra.mrb[156].mxu0 %v4740_v28  ;;  %6832 = vmatpush3.bf16.msra.mxu1 %v7391_v17  ;;  %v4709_v39 = vpack.c.bf16 %v11039_v55, %v11037_v44  ;;  %v4787_v46 = vpack.c.bf16 %v4781_v56, %v4780_v50  ;;  %v4783_v16 = vld [vmem:[#allocation4 + $0xd2] sm:$0xff]  ;;  %v4804_v17 = vpack.c.bf16 %v4798_v6, %v10965_v19 }
 0x830   :  { %5576 = vmatprep.mubr.bf16.mxu0 %v4757_v11  ;;  %6872 = vmatpush3.bf16.msra.mxu0 %v7392_v20  ;;  %v4788_v1 = vpack.c.bf16 %v4783_v16, %v4782_v49 }
 0x831   :  { %6833 = vmatprep.subr.bf16.mxu1 %v7393_v47  ;;  %6873 = vmatprep.subr.bf16.mxu0 %v7394_v53 }
 0x833   :  { %6834 = vmatpush3.bf16.msra.mxu1 %v7395_v3 }
 0x834   :  { %6874 = vmatpush3.bf16.msra.mxu0 %v7396_v12  ;;  %6835 = vmatprep.subr.bf16.mxu1 %v7397_v33 }
 0x835   :  { %5512 = vmatmul.mubr.bf16.gmra.mrb[136].mxu1 %v4709_v39  ;;  %6875 = vmatprep.subr.bf16.mxu0 %v7398_v22 }
 0x836   :  { %5617 = vmatprep.mubr.bf16.mxu1 %v4786_v43 }
 0x837   :  { %5577 = vmatmul.mubr.bf16.gmra.mrb[160].mxu0 %v4741_v10  ;;  %6836 = vmatpush3.bf16.msra.mxu1 %v7399_v27 }
 0x838   :  { %5682 = vmatprep.mubr.bf16.mxu0 %v4819_v51  ;;  %6876 = vmatpush3.bf16.msra.mxu0 %v7400_v29  ;;  %v7406_v51 = vld [vmem:[%s11231_s13 + $0x208] sm:$0xff]  }
 0x839   :  { %6837 = vmatprep.subr.bf16.mxu1 %v7401_v35  ;;  %6877 = vmatprep.subr.bf16.mxu0 %v7402_v58 }
 0x83b   :  { %6838 = vmatpush3.bf16.msra.mxu1 %v7403_v21 }
 0x83c   :  { %6878 = vmatpush3.bf16.msra.mxu0 %v7404_v13  ;;  %7104 = vmatprep.subr.bf16.mxu1 %v7405_v54 }
 0x83e   :  { %5618 = vmatmul.mubr.bf16.vlgmr.msra.gmra.mrb[140].mxu1 %v4770_v8  ;;  %v4805_v8 = vpack.c.bf16 %v11037_v44, %v10997_v2 }
 0x83f   :  { %5683 = vmatmul.mubr.bf16.vlgmr.msra.gmra.mrb[164].mxu0 %v4803_v30  ;;  %5625 = vmatprep.mubr.bf16.mxu1 %v4787_v46 }
 0x840   :  { %5690 = vmatprep.mubr.bf16.mxu0 %v4820_v45  ;;  %7105 = vmatpush3.bf16.msra.mxu1 %v7405_v54  ;;  %v4785_v45 = vld [vmem:[#allocation4 + $0x112] sm:$0xff] }
 0x841   :  { %7106 = vmatprep.subr.bf16.mxu1 %v7406_v51  ;;  %v4789_v42 = vpack.c.bf16 %v4785_v45, %v4784_v24 }
 0x844   :  { %7107 = vmatpush3.bf16.msra.mxu1 %v7406_v51 }
 0x845   :  { %7108 = vmatprep.subr.bf16.mxu1 %v7407_v4 }
 0x846   :  { %5626 = vmatmul.mubr.bf16.gmra.mrb[144].mxu1 %v4771_v9  ;;  %v4806_v9 = vpack.c.bf16 %v4802_v60, %v11039_v55 }
 0x847   :  { %5691 = vmatmul.mubr.bf16.gmra.mrb[168].mxu0 %v4804_v17  ;;  %5633 = vmatprep.mubr.bf16.mxu1 %v4788_v1 }
 0x848   :  { %5698 = vmatprep.mubr.bf16.mxu0 %v4821_v62  ;;  %7109 = vmatpush3.bf16.msra.mxu1 %v7407_v4  ;;  %v4837_v62 = vpack.c.bf16 %v11041_v23, %v11002_v31 }
 0x849   :  { %7110 = vmatprep.subr.bf16.mxu1 %v7408_v38 }
 0x84c   :  { %7111 = vmatpush3.bf16.msra.mxu1 %v7408_v38 }
 0x84d   :  { %7112 = vmatprep.subr.bf16.mxu1 %v7409_v26 }
 0x84e   :  { %5634 = vmatmul.mubr.bf16.gmra.mrb[148].mxu1 %v4772_v40  ;;  %v4834_v40 = vld [vmem:[#allocation4 + $0x122] sm:$0xff] }
 0x84f   :  { %5699 = vmatmul.mubr.bf16.gmra.mrb[172].mxu0 %v4805_v8  ;;  %5641 = vmatprep.mubr.bf16.mxu1 %v4789_v42 }
 0x850   :  { %5706 = vmatprep.mubr.bf16.mxu0 %v4822_v5  ;;  %7113 = vmatpush3.bf16.msra.mxu1 %v7409_v26  ;;  %v4838_v5 = vpack.c.bf16 %v4834_v40, %v11043_v34 }
 0x851   :  { %7114 = vmatprep.subr.bf16.mxu1 %v7410_v18 }
 0x854   :  { %7115 = vmatpush3.bf16.msra.mxu1 %v7410_v18 }
 0x855   :  { %7116 = vmatprep.subr.bf16.mxu1 %v7411_v57 }
 0x856   :  { %5642 = vmatmul.mubr.bf16.gmra.mrb[152].mxu1 %v4773_v14 }
 0x857   :  { %5707 = vmatmul.mubr.bf16.gmra.mrb[176].mxu0 %v4806_v9  ;;  %7120 = vmatprep.mubr.bf16.mxu1 %v4835_v37 }
 0x858   :  { %7117 = vmatpush3.bf16.msra.mxu1 %v7411_v57  ;;  %7144 = vmatprep.mubr.msk.f32.mxu0 %vm3218_vm10, %v6320_v32 }
 0x859   :  { %7118 = vmatprep.subr.bf16.mxu1 %v7412_v41 }
 0x85c   :  { %7119 = vmatpush3.bf16.msra.mxu1 %v7412_v41 }
 0x85f   :  { %7121 = vmatmul.mubr.bf16.vlgmr.msra.gmra.mrb[156].mxu1 %v4836_v48 }
 0x860   :  { %7124 = vmatprep.mubr.bf16.mxu1 %v4837_v62 }
 0x867   :  { %7125 = vmatmul.mubr.bf16.gmra.mrb[160].mxu1 %v4838_v5 }
 0x868   :  { %7182 = vmatprep.mubr.msk.f32.mxu1 %vm7457_vm14, %v10937_v36  ;;  %v5972_v36 = vld [vmem:[%s11237_s19 + $0x38] sm:$0xff] }
 0x8f0   :  { %v6759_v14 = vpop.f32.mrb[124].mxu1 }
 0x8f1   :  { %v6760_v19 = vpop.f32.mrb[125].mxu1 }
 0x8f2   :  { %v6799_v63 = vpop.f32.mrb[148].mxu0  ;;  %v6761_v61 = vadd.f32 %v6760_v19, %v6759_v14  ;;  %v6762_v2 = vpop.f32.mrb[126].mxu1 }
 0x8f3   :  { %v6800_v15 = vpop.f32.mrb[149].mxu0  ;;  %v6763_v20 = vpop.f32.mrb[127].mxu1 }
 0x8f4   :  { %v6801_v31 = vadd.f32 %v6800_v15, %v6799_v63  ;;  %v6802_v28 = vpop.f32.mrb[150].mxu0  ;;  %v6764_v47 = vadd.f32 %v6763_v20, %v6762_v2 }
 0x8f5   :  { %v6803_v11 = vpop.f32.mrb[151].mxu0 }
 0x8f6   :  { %v5555_v53 = vadd.f32 %v6801_v31, %v6761_v61  ;;  %v6804_v3 = vadd.f32 %v6803_v11, %v6802_v28 }
 0x8f8   :  { %v5558_v12 = vadd.f32 %v6804_v3, %v6764_v47  ;;  %v6765_v33 = vpop.f32.mrb[128].mxu1 }
 0x8f9   :  { %v6766_v44 = vpop.f32.mrb[129].mxu1 }
 0x8fa   :  { %v6805_v22 = vpop.f32.mrb[152].mxu0  ;;  %v6767_v55 = vadd.f32 %v6766_v44, %v6765_v33  ;;  %v6768_v34 = vpop.f32.mrb[130].mxu1 }
 0x8fb   :  { %v6806_v23 = vpop.f32.mrb[153].mxu0  ;;  %v6769_v39 = vpop.f32.mrb[131].mxu1 }
 0x8fc   :  { %v6807_v25 = vadd.f32 %v6806_v23, %v6805_v22  ;;  %v6808_v0 = vpop.f32.mrb[154].mxu0  ;;  %v6770_v27 = vadd.f32 %v6769_v39, %v6768_v34 }
 0x8fd   :  { %v6809_v10 = vpop.f32.mrb[155].mxu0 }
 0x8fe   :  { %v5563_v43 = vadd.f32 %v6807_v25, %v6767_v55  ;;  %v6810_v29 = vadd.f32 %v6809_v10, %v6808_v0 }
 0x900   :  { %v5566_v35 = vadd.f32 %v6810_v29, %v6770_v27  ;;  %v6771_v58 = vpop.f32.mrb[132].mxu1 }
 0x901   :  { %v6772_v13 = vpop.f32.mrb[133].mxu1 }
 0x902   :  { %v6811_v21 = vpop.f32.mrb[156].mxu0  ;;  %v6773_v54 = vadd.f32 %v6772_v13, %v6771_v58  ;;  %v6774_v56 = vpop.f32.mrb[134].mxu1 }
 0x903   :  { %v6812_v50 = vpop.f32.mrb[157].mxu0  ;;  %v6775_v51 = vpop.f32.mrb[135].mxu1 }
 0x904   :  { %v6813_v30 = vadd.f32 %v6812_v50, %v6811_v21  ;;  %v6814_v46 = vpop.f32.mrb[158].mxu0  ;;  %v6776_v4 = vadd.f32 %v6775_v51, %v6774_v56 }
 0x905   :  { %v6815_v6 = vpop.f32.mrb[159].mxu0 }
 0x906   :  { %v5571_v49 = vadd.f32 %v6813_v30, %v6773_v54  ;;  %v6816_v16 = vadd.f32 %v6815_v6, %v6814_v46 }
 0x908   :  { %v5574_v17 = vadd.f32 %v6816_v16, %v6776_v4  ;;  %v6777_v1 = vpop.f32.mrb[136].mxu1 }
 0x909   :  { %v6778_v26 = vpop.f32.mrb[137].mxu1 }
 0x90a   :  { %v6817_v38 = vpop.f32.mrb[160].mxu0  ;;  %v6779_v24 = vadd.f32 %v6778_v26, %v6777_v1  ;;  %v6780_v8 = vpop.f32.mrb[138].mxu1 }
 0x90b   :  { %v6818_v45 = vpop.f32.mrb[161].mxu0  ;;  %v6781_v57 = vpop.f32.mrb[139].mxu1 }
 0x90c   :  { %v6819_v42 = vadd.f32 %v6818_v45, %v6817_v38  ;;  %v6820_v18 = vpop.f32.mrb[162].mxu0  ;;  %v6782_v60 = vadd.f32 %v6781_v57, %v6780_v8 }
 0x90d   :  { %v6821_v9 = vpop.f32.mrb[163].mxu0 }
 0x90e   :  { %v5579_v37 = vadd.f32 %v6819_v42, %v6779_v24  ;;  %v6822_v41 = vadd.f32 %v6821_v9, %v6820_v18 }
 0x910   :  { %v5582_v52 = vadd.f32 %v6822_v41, %v6782_v60 }
 0x911   :  { %v6839_v48 = vpop.f32.mrb[140].mxu1 }
 0x912   :  { %v6879_v62 = vpop.f32.mrb[164].mxu0  ;;  %v6840_v40 = vpop.f32.mrb[141].mxu1 }
 0x913   :  { %v6841_v5 = vadd.f32 %v6840_v40, %v6839_v48  ;;  %v6880_v32 = vpop.f32.mrb[165].mxu0  ;;  %v6842_v14 = vpop.f32.mrb[142].mxu1 }
 0x914   :  { %v6881_v63 = vadd.f32 %v6880_v32, %v6879_v62  ;;  %v6882_v19 = vpop.f32.mrb[166].mxu0  ;;  %v6843_v61 = vpop.f32.mrb[143].mxu1 }
 0x915   :  { %v5620_v15 = vadd.f32 %v6841_v5, %v5555_v53  ;;  %v6844_v2 = vadd.f32 %v6843_v61, %v6842_v14  ;;  %v6883_v31 = vpop.f32.mrb[167].mxu0 }
 0x916   :  { %v6884_v28 = vadd.f32 %v6883_v31, %v6882_v19 }
 0x917   :  { %v5623_v20 = vadd.f32 %v6844_v2, %v5558_v12  ;;  %v5685_v47 = vadd.f32 %v6881_v63, %v5620_v15 }
 0x919   :  { %v6845_v11 = vpop.f32.mrb[144].mxu1  ;;  %v5688_v3 = vadd.f32 %v6884_v28, %v5623_v20 }
 0x91a   :  { %v6885_v33 = vpop.f32.mrb[168].mxu0  ;;  %v6846_v22 = vpop.f32.mrb[145].mxu1 }
 0x91b   :  { %v6847_v44 = vadd.f32 %v6846_v22, %v6845_v11  ;;  %v6886_v55 = vpop.f32.mrb[169].mxu0  ;;  %v6848_v23 = vpop.f32.mrb[146].mxu1 }
 0x91c   :  { %v6887_v34 = vadd.f32 %v6886_v55, %v6885_v33  ;;  %v6888_v25 = vpop.f32.mrb[170].mxu0  ;;  %v6849_v0 = vpop.f32.mrb[147].mxu1 }
 0x91d   :  { %v5628_v39 = vadd.f32 %v6847_v44, %v5563_v43  ;;  %v6850_v27 = vadd.f32 %v6849_v0, %v6848_v23  ;;  %v6889_v10 = vpop.f32.mrb[171].mxu0  ;;  %v6321_v0 = vunpack.c.h.bf16 %v11130_v59  ;;  %v5967_v59 = vld [vmem:[%s11237_s19 + $0x10] sm:$0xff] }
 0x91e   :  { %v6890_v29 = vadd.f32 %v6889_v10, %v6888_v25  ;;  %v5965_v10 = vld [vmem:[%s11237_s19] sm:$0xff] }
 0x91f   :  { %v5631_v53 = vadd.f32 %v6850_v27, %v5566_v35  ;;  %v5693_v58 = vadd.f32 %v6887_v34, %v5628_v39 }
 0x921   :  { %v6851_v21 = vpop.f32.mrb[148].mxu1  ;;  %v5696_v13 = vadd.f32 %v6890_v29, %v5631_v53  ;;  %v5966_v29 = vld [vmem:[%s11237_s19 + $0x8] sm:$0xff]  ;;  %v7456_v53 = vmov 0.0|0.0  }
 0x922   :  { %v6891_v12 = vpop.f32.mrb[172].mxu0  ;;  %v6852_v54 = vpop.f32.mrb[149].mxu1  ;;  %7239 = vmatprep.subr.bf16.mxu1 %v7456_v53 }
 0x923   :  { %v6853_v50 = vadd.f32 %v6852_v54, %v6851_v21  ;;  %v6892_v56 = vpop.f32.mrb[173].mxu0  ;;  %v6854_v30 = vpop.f32.mrb[150].mxu1  ;;  %v5968_v21 = vld [vmem:[%s11237_s19 + $0x18] sm:$0xff]  ;;  %v5970_v54 = vld [vmem:[%s11237_s19 + $0x28] sm:$0xff] }
 0x924   :  { %v6893_v46 = vadd.f32 %v6892_v56, %v6891_v12  ;;  %v6894_v51 = vpop.f32.mrb[174].mxu0  ;;  %v6855_v4 = vpop.f32.mrb[151].mxu1  ;;  %v5969_v12 = vld [vmem:[%s11237_s19 + $0x20] sm:$0xff]  ;;  %v5971_v56 = vld [vmem:[%s11237_s19 + $0x30] sm:$0xff] }
 0x925   :  { %v5636_v6 = vadd.f32 %v6853_v50, %v5571_v49  ;;  %v6856_v16 = vadd.f32 %v6855_v4, %v6854_v30  ;;  %v6895_v1 = vpop.f32.mrb[175].mxu0  ;;  %v7246_v50 = vpack.c.bf16 %v5970_v54, %v5969_v12  ;;  %v7249_v30 = vpack.c.bf16 %v5972_v36, %v5971_v56  ;;  %v6316_v54 = vld [vmem:[%s11234_s16] ss:$0 sm:$0xff] }
 0x926   :  { %v6896_v38 = vadd.f32 %v6895_v1, %v6894_v51  ;;  %v5974_v51 = vld [vmem:[%s11237_s19 + $0x48] sm:$0xff] }
 0x927   :  { %v5639_v43 = vadd.f32 %v6856_v16, %v5574_v17  ;;  %v5701_v26 = vadd.f32 %v6893_v46, %v5636_v6  ;;  %v5973_v46 = vld [vmem:[%s11237_s19 + $0x40] sm:$0xff]  ;;  %v5975_v6 = vld [vmem:[%s11237_s19 + $0x50] sm:$0xff]  ;;  %v5976_v16 = vld [vmem:[%s11237_s19 + $0x58] sm:$0xff] }
 0x928   :  { %v7252_v4 = vpack.c.bf16 %v5974_v51, %v5973_v46  ;;  %v7255_v1 = vpack.c.bf16 %v5976_v16, %v5975_v6 }
 0x929   :  { %v6857_v24 = vpop.f32.mrb[152].mxu1  ;;  %v5704_v45 = vadd.f32 %v6896_v38, %v5639_v43  ;;  %v5977_v38 = vld [vmem:[%s11237_s19 + $0x60] sm:$0xff]  ;;  %v5978_v43 = vld [vmem:[%s11237_s19 + $0x68] sm:$0xff] }
 0x92a   :  { %v6897_v35 = vpop.f32.mrb[176].mxu0  ;;  %v6858_v8 = vpop.f32.mrb[153].mxu1 }
 0x92b   :  { %v6859_v42 = vadd.f32 %v6858_v8, %v6857_v24  ;;  %v6898_v18 = vpop.f32.mrb[177].mxu0  ;;  %v6860_v57 = vpop.f32.mrb[154].mxu1  ;;  %v5979_v24 = vld [vmem:[%s11237_s19 + $0x70] sm:$0xff]  ;;  %v6311_v8 = vld [vmem:[%s11232_s14] ss:$0 sm:$0xff] }
 0x92c   :  { %v6899_v60 = vadd.f32 %v6898_v18, %v6897_v35  ;;  %v6900_v9 = vpop.f32.mrb[178].mxu0  ;;  %v6861_v41 = vpop.f32.mrb[155].mxu1 }
 0x92d   :  { %v5644_v48 = vadd.f32 %v6859_v42, %v5579_v37  ;;  %v6862_v62 = vadd.f32 %v6861_v41, %v6860_v57  ;;  %v6901_v40 = vpop.f32.mrb[179].mxu0 }
 0x92e   :  { %v6902_v5 = vadd.f32 %v6901_v40, %v6900_v9 }
 0x92f   :  { %v5647_v49 = vadd.f32 %v6862_v62, %v5582_v52  ;;  %v5709_v32 = vadd.f32 %v6899_v60, %v5644_v48 }
 0x931   :  { %v5712_v14 = vadd.f32 %v6902_v5, %v5647_v49 }
 0x932   :  { %v7122_v63 = vpop.f32.mrb[156].mxu1 }
 0x933   :  { %v5758_v17 = vadd.f32 %v7122_v63, %v5693_v58  ;;  %v5749_v19 = vpop.f32.mrb[157].mxu1  ;;  %v7240_v58 = vpack.c.bf16 %v5966_v29, %v5965_v10 }
 0x934   :  { %v5750_v61 = vadd.f32 %v5749_v19, %v5685_v47  ;;  %v7123_v15 = vpop.f32.mrb[158].mxu1 }
 0x935   :  { %v5761_v2 = vadd.f32 %v7123_v15, %v5696_v13  ;;  %v5752_v31 = vpop.f32.mrb[159].mxu1  ;;  %7241 = vmatpush3.bf16.msra.mxu1 %v7240_v58  ;;  %v7243_v13 = vpack.c.bf16 %v5968_v21, %v5967_v59  ;;  %v5892_v58 = vld [vmem:[%s11233_s15] sm:$0x1] }
 0x936   :  { %v5753_v28 = vadd.f32 %v5752_v31, %v5688_v3  ;;  %v6326_v3 = vld [vmem:[%s11236_s18 + $0x8] sm:$0xff]   ;;  %7242 = vmatprep.subr.bf16.mxu1 %v7456_v53 }
 0x937   :  { %v7227_v20 = vpack.c.bf16 %v5761_v2, %v5758_v17  ;;  %v6324_v39 = vunpack.c.l.bf16 %v6326_v3  ;;  %v6325_v27 = vunpack.c.h.bf16 %v6326_v3 }
 0x938   :  { %v7223_v11 = vpack.c.bf16 %v5753_v28, %v5750_v61 }
 0x939   :  { %7244 = vmatpush3.bf16.msra.mxu1 %v7243_v13 }
 0x93a   :  { %v7126_v33 = vpop.f32.mrb[160].mxu1  ;;  %7224 = vmatprep.subr.bf16.mxu0 %v7223_v11  ;;  %7245 = vmatprep.subr.bf16.mxu1 %v7456_v53 }
 0x93b   :  { %v5774_v22 = vadd.f32 %v7126_v33, %v5709_v32  ;;  %v5765_v37 = vpop.f32.mrb[161].mxu1  ;;  %7226 = vmatpush3.bf16.msra.mxu0 %v7223_v11 }
 0x93c   :  { %v5766_v44 = vadd.f32 %v5765_v37, %v5701_v26  ;;  %v7127_v55 = vpop.f32.mrb[162].mxu1  ;;  %7228 = vmatprep.subr.bf16.mxu0 %v7227_v20  ;;  %v7258_v26 = vpack.c.bf16 %v5978_v43, %v5977_v38 }
 0x93d   :  { %v5777_v52 = vadd.f32 %v7127_v55, %v5712_v14  ;;  %v5768_v23 = vpop.f32.mrb[163].mxu1  ;;  %7247 = vmatpush3.bf16.msra.mxu1 %v7246_v50 }
 0x93e   :  { %v5769_v34 = vadd.f32 %v5768_v23, %v5704_v45  ;;  %7248 = vmatprep.subr.bf16.mxu1 %v7456_v53  ;;  %v5980_v45 = vld [vmem:[%s11237_s19 + $0x78] sm:$0xff] }
 0x93f   :  { %v7235_v25 = vpack.c.bf16 %v5777_v52, %v5774_v22  ;;  %7230 = vmatpush3.bf16.msra.mxu0 %v7227_v20  ;;  %v7261_v35 = vpack.c.bf16 %v5980_v45, %v5979_v24 }
 0x940   :  { %v7231_v47 = vpack.c.bf16 %v5769_v34, %v5766_v44 }
 0x941   :  { %7250 = vmatpush3.bf16.msra.mxu1 %v7249_v30 }
 0x942   :  { %7232 = vmatprep.subr.bf16.mxu0 %v7231_v47  ;;  %7251 = vmatprep.subr.bf16.mxu1 %v7456_v53 }
 0x943   :  { %7234 = vmatpush3.bf16.msra.mxu0 %v7231_v47 }
 0x944   :  { %7236 = vmatprep.subr.bf16.mxu0 %v7235_v25 }
 0x945   :  { %7253 = vmatpush3.bf16.msra.mxu1 %v7252_v4 }
 0x946   :  { %7254 = vmatprep.subr.bf16.mxu1 %v7456_v53 }
 0x947   :  { %7238 = vmatpush3.bf16.msra.mxu0 %v7235_v25 }
 0x949   :  { %7256 = vmatpush3.bf16.msra.mxu1 %v7255_v1 }
 0x94a   :  { %7145 = vmatmul.mubr.msk.f32.vlgmr.msra.gmra.mrb[180].mxu0 %vm3218_vm10, %v6321_v0  ;;  %7257 = vmatprep.subr.bf16.mxu1 %v7456_v53 }
 0x94b   :  { %7147 = vmatprep.mubr.msk.f32.mxu0 %vm3218_vm10, %v6324_v39 }
 0x94d   :  { %7259 = vmatpush3.bf16.msra.mxu1 %v7258_v26 }
 0x94e   :  { %7148 = vmatmul.mubr.msk.f32.gmra.mrb[182].mxu0 %vm3218_vm10, %v6325_v27  ;;  %7260 = vmatprep.subr.bf16.mxu1 %v7456_v53 }
 0x951   :  { %7262 = vmatpush3.bf16.msra.mxu1 %v7261_v35 }
 0xa1d   :  { %v7146_v42 = vpop.f32.mrb[180].mxu0 }
 0xa1e   :  { %v5879_v18 = vadd.f32 %v7146_v42, %v6311_v8  ;;  %v5873_v57 = vpop.f32.mrb[181].mxu0 }
 0xa1f   :  { %v5874_v60 = vadd.f32 %v6311_v8, %v5873_v57 }
 0xa20   :  { %v5895_v9 = vmax.f32 %v5879_v18, 0.0 }
 0xa21   :  { %v5894_v41 = vmax.f32 %v5874_v60, 0.0  ;;  %v7149_v48 = vpop.f32.mrb[182].mxu0 }
 0xa22   :  { %v5883_v62 = vpop.f32.mrb[183].mxu0  ;;  %v5889_v5 = vadd.f32 %v7149_v48, %v6311_v8 }
 0xa23   :  { %v5898_v40 = vadd.f32 %v5895_v9, %v5894_v41  ;;  %v5884_v49 = vadd.f32 %v6311_v8, %v5883_v62  ;;  %v6317_v62 = vld [vmem:[%s11238_s20] ss:$0 sm:$0xff]  ;;  %s7427_s20 = scalar_lea.vmem %s6083_s3, 32 }
 0xa24   :  { %v5897_v14 = vmax.f32 %v5889_v5, 0.0  ;;  %p7428_p0 = scmp.ne.s32.totalorder %s6083_s3, %s7427_s20  ;;  %p7433_p2 = scmp.lt.s32.totalorder %s7427_s20, %s7427_s20 }
 0xa25   :  { %v5896_v32 = vmax.f32 %v5884_v49, 0.0 }
 0xa26   :  { %p7434_p3 = por %p7433_p2, %p7432_p1 }
 0xa27   :  { %v5899_v63 = vadd.f32 %v5898_v40, %v5896_v32 }
 0xa28   :  { %p7435_p4 = pnand %p7434_p3, %p7428_p0 }
 0xa29   :  { %v5900_v17 = vadd.f32 %v5899_v63, %v5897_v14 }
 0xa2b   :  { %v5901_v19 = vrot.slane %v5900_v17, 4 }
 0xa2d   :  { %v5902_v61 = vadd.f32 %v5901_v19, %v5900_v17 }
 0xa2f   :  { %v5903_v15 = vrot.slane %v5902_v61, 2 }
 0xa31   :  { %v5904_v2 = vadd.f32 %v5903_v15, %v5902_v61 }
 0xa33   :  { %v5905_v31 = vrot.slane %v5904_v2, 1 }
 0xa35   :  { %v5906_v28 = vadd.f32 %v5905_v31, %v5904_v2 }
 0xa37   :  { %v5908_v20 = vmul.f32 0.03125, %v5906_v28 }
 0xa39   :  { %v5909_v11 = vsub.f32 %v5894_v41, %v5908_v20  ;;  %v5910_v33 = vsub.f32 %v5895_v9, %v5908_v20  ;;  %v5911_v22 = vsub.f32 %v5896_v32, %v5908_v20  ;;  %v5912_v37 = vsub.f32 %v5897_v14, %v5908_v20 }
 0xa3b   :  { %v5913_v44 = vmul.f32 %v5909_v11, %v5909_v11  ;;  %v5914_v55 = vmul.f32 %v5910_v33, %v5910_v33  ;;  %v5915_v52 = vmul.f32 %v5911_v22, %v5911_v22  ;;  %v5916_v34 = vmul.f32 %v5912_v37, %v5912_v37 }
 0xa3d   :  { %v5917_v23 = vadd.f32 %v5914_v55, %v5913_v44 }
 0xa3f   :  { %v5918_v25 = vadd.f32 %v5917_v23, %v5915_v52 }
 0xa41   :  { %v5919_v47 = vadd.f32 %v5918_v25, %v5916_v34 }
 0xa43   :  { %v5920_v3 = vrot.slane %v5919_v47, 4 }
 0xa45   :  { %v5921_v0 = vadd.f32 %v5920_v3, %v5919_v47 }
 0xa47   :  { %v5922_v39 = vrot.slane %v5921_v0, 2 }
 0xa49   :  { %v5923_v27 = vadd.f32 %v5922_v39, %v5921_v0 }
 0xa4b   :  { %v5924_v10 = vrot.slane %v5923_v27, 1 }
 0xa4d   :  { %v5925_v29 = vadd.f32 %v5924_v10, %v5923_v27 }
 0xa4f   :  { %v5926_v59 = vmul.f32 0.03125, %v5925_v29 }
 0xa51   :  { %v5927_v53 = vadd.f32 1e-05, %v5926_v59 }
 0xa53   :  { %7419 = vrsqrt.f32 %v5927_v53 }
 0xa5d   :  { %v7420_v21 = vpop.eup %7419 }
 0xa5e   :  { %v5929_v13 = vmul.f32 %v7420_v21, %v5892_v58 }
 0xa60   :  { %v5933_v12 = vrot.slane %v5929_v13, %v11511_v7 }
 0xa62   :  { %v5934_v50 = vmul.f32 %v5933_v12, %v5909_v11  ;;  %v5935_v56 = vmul.f32 %v5933_v12, %v5910_v33  ;;  %v5936_v36 = vmul.f32 %v5933_v12, %v5911_v22  ;;  %v5937_v30 = vmul.f32 %v5933_v12, %v5912_v37 }
 0xa64   :  { %v5944_v46 = vadd.f32 %v6316_v54, %v5934_v50  ;;  %v5945_v51 = vadd.f32 %v6316_v54, %v5935_v56  ;;  %v5946_v4 = vadd.f32 %v6316_v54, %v5936_v36  ;;  %v5947_v6 = vadd.f32 %v6316_v54, %v5937_v30 }
 0xa66   :  { %v5955_v16 = vadd.f32 %v5947_v6, %v5946_v4  ;;  %v5948_v1 = vadd.f32 %v5945_v51, %v5944_v46 }
 0xa68   :  { %v5956_v38 = vrot.slane %v5955_v16, 4  ;;  %v5949_v43 = vrot.slane %v5948_v1, 4 }
 0xa6a   :  { %v5957_v26 = vadd.f32 %v5956_v38, %v5955_v16  ;;  %v5950_v24 = vadd.f32 %v5949_v43, %v5948_v1 }
 0xa6c   :  { %v5958_v45 = vrot.slane %v5957_v26, 2  ;;  %v5951_v7 = vrot.slane %v5950_v24, 2 }
 0xa6e   :  { %v5952_v35 = vadd.f32 %v5951_v7, %v5950_v24  ;;  %v5959_v8 = vadd.f32 %v5958_v45, %v5957_v26 }
 0xa70   :  { %v5953_v42 = vrot.slane %v5952_v35, 1  ;;  %v5960_v18 = vrot.slane %v5959_v8, 1 }
 0xa72   :  { %v5954_v57 = vadd.f32 %v5953_v42, %v5952_v35  ;;  %v5961_v60 = vadd.f32 %v5960_v18, %v5959_v8 }
 0xa74   :  { %v5963_v9 = vmul.f32 0.0625, %v5954_v57  ;;  %v5964_v41 = vmul.f32 0.0625, %v5961_v60 }
 0xa76   :  { %v5991_v48 = vsel %vm5990_vm15, %v5964_v41, %v5963_v9 }
 0xa77   :  { %7183 = vmatmul.mubr.f32.vlgmr.msra.gmra.mrb[164].mxu1 %v5991_v48 }
 0xb4a   :  { %v6059_v40 = vpop.f32.mrb[164].mxu1 }
 0xb4b   :  { %v6060_v5 = vadd.f32 %v6317_v62, %v6059_v40  ;;  %v7184_v49 = vpop.f32.mrb[165].mxu1 }
 0xb4d   :  { %v6064_v32 = vsel %vm6063_vm0, %v6060_v5, -inf }
 0xb4e   :  { %6065 = vmax.xlane.f32.xlu0 %v6064_v32 }
 0xbdb   :  { %v6066_v14 = vpop.xlane.xlu0 %6065 }
 0xbdc   :  { %v6067_v63 = vsub.f32 %v6060_v5, %v6066_v14 }
 0xbde   :  { %v6068_v17 = vmul.f32 1.442695, %v6067_v63 }
 0xbe0   :  { %7421 = vpow2.f32 %v6068_v17 }
 0xbea   :  { %v7422_v19 = vpop.eup %7421 }
 0xbeb   :  { %v6070_v61 = vsel %vm6063_vm0, %v7422_v19, 0.0 }
 0xbec   :  { %6071 = vadd.xlane.f32.xlu1 %v6070_v61 }
 0xc79   :  { %v6072_v15 = vpop.xlane.xlu1 %6071 }
 0xc7a   :  { %7423 = vrcp.f32 %v6072_v15 }
 0xc84   :  { %v7424_v2 = vpop.eup %7423 }
 0xc85   :  { %v6074_v31 = vmul.f32 %v7424_v2, %v7422_v19 }
 0xc87   :  { %6075 = vst.msk [vmem:[#allocation8] sm:$0x3] %vm6063_vm0, %v6074_v31 }
 0xc88   :  { %7438 = shalt.err (!%p7435_p4)
}
 0xc89   :  { %s7439_s12 = scalar_lea.hbm %s11239_s21, 32 }
 0xc8a   :  { %p7440_p5 = scmp.ne.s32.totalorder %s11239_s21, %s7439_s12  ;;  %p7443_p6 = scmp.lt.u32.totalorder %s7439_s12, %s11239_s21 }
 0xc8c   :  { %p7445_p7 = pnand %p7443_p6, %p7440_p5 }
 0xc8e   :  { %7448 = shalt.err (!%p7445_p7)
}
 0xc8f   :  { %6085 = dma.vmem_to_hbm [thread:$0]  %s6083_s3, 32, %s11239_s21, [#allocation9]  }
 0xc90   :  { %7449 = dma.done.wait [#allocation9], 32  }
 0xc91   :  { %7450 = vsyncadd [#allocation9], 4294967264 }
 0xc92   :  { %6089 = vsyncpa [#allocation9], 1 }

</bundles_post_ra>
